<compile_context>
chip_gen: v6e
topology: v6e:2x2x1
jax: 0.10.0
libtpu: 0.0.40
codegen_flags: <defaults>
</compile_context>

<pallas_src>
import functools

import jax
import jax.numpy as jnp
from jax.experimental import pallas as pl
from jax.experimental.pallas import tpu as pltpu


# Layer dimensions of the autoencoder (encoder then decoder).
DIMS = [784, 1000, 500, 250, 2, 250, 500, 1000, 784]
N_LAYERS = len(DIMS) - 1


def _round_up(x, m):
    return (x + m - 1) // m * m


# Lane-aligned (multiple-of-128) padded feature dims:
# [896, 1024, 512, 256, 128, 256, 512, 1024, 896]
PADDED_DIMS = [_round_up(d, 128) for d in DIMS]


def _elementwise_dtype():
    """bf16 elementwise math on chips with a bf16 VPU/EUP (v6e, v7x);
    f32 elementwise on older generations (v2-v5) that lack it."""
    try:
        kind = jax.devices()[0].device_kind.lower()
    except Exception:
        kind = ""
    if any(g in kind for g in ("v2", "v3", "v4", "v5")):
        return jnp.float32
    return jnp.bfloat16


ACT_DTYPE = _elementwise_dtype()


def _autoencoder_kernel(x_ref, *refs, act_dtype):
    """Fused 8-layer forward pass over one batch tile.

    refs = (w1, b1, w2, b2, ..., w8, b8, out_ref)
      wi : (in_pad_i, out_pad_i) bf16 in VMEM (zero-padded, weight-stationary)
      bi : (1, out_pad_i)        act_dtype in VMEM (zero-padded)
    Zero padding is numerically exact: padded weight rows/cols and bias
    entries are zero, and tanh(0) = 0 keeps padded lanes inert.
    """
    out_ref = refs[-1]
    param_refs = refs[:-1]

    h = x_ref[...]                                    # (TILE_B, 896) bf16

    for li in range(N_LAYERS):
        w = param_refs[2 * li][...]                   # bf16
        b = param_refs[2 * li + 1][...]               # act_dtype
        # bf16 MXU matmul with f32 accumulation.
        y = jnp.dot(h, w, preferred_element_type=jnp.float32)
        # Single cast of the MXU result to the elementwise dtype, then the
        # bias add + activation run entirely in that dtype.
        y = y.astype(act_dtype) + b
        if li == 3:
            h = y                                     # enc_lin4: latent code, no activation
        elif li == N_LAYERS - 1:
            # dec_lin4: sigmoid via the numerically robust tanh identity
            # (no exp overflow; routes to the EUP tanh path).
            h = 0.5 * (jnp.tanh(0.5 * y) + 1.0)
        else:
            h = jnp.tanh(y)
        h = h.astype(jnp.bfloat16)                    # MXU operand for the next layer

    out_ref[...] = h.astype(out_ref.dtype)            # bf16 lane-dense store


def _choose_batch_tiling(batch, tile_b):
    """Pick (padded_batch, tile) such that:
       * tiny batches (<= 8 rows) run as a single tile,
       * otherwise the grid has >= 2 steps (both v7x TensorCores get work),
       * batch-padding waste is bounded by one sublane-aligned tile."""
    padded = _round_up(batch, 8)
    if padded <= 8:
        return padded, padded
    n_tiles = max(2, pl.cdiv(padded, tile_b))
    tb = _round_up(pl.cdiv(padded, n_tiles), 8)
    return n_tiles * tb, tb


@functools.partial(jax.jit, static_argnames=("tile_b",))
def autoencoder_forward(x, padded_params, *, tile_b=512):
    """x: (B, 784) float; padded_params: flat list [w1, b1, ..., w8, b8]
    with zero-padded, lane-aligned shapes (weights bf16, biases ACT_DTYPE).
    Returns (B, 784) f32."""
    batch = x.shape[0]
    in_pad = PADDED_DIMS[0]
    out_pad = PADDED_DIMS[-1]

    padded_batch, tb = _choose_batch_tiling(batch, tile_b)

    # bf16 padded input: halves the per-tile x DMA; the kernel consumes x in
    # bf16 anyway so there is no extra precision loss.  Extra rows / feature
    # lanes are zeros.
    xp = jnp.zeros((padded_batch, in_pad), jnp.bfloat16)
    xp = xp.at[:batch, : DIMS[0]].set(x.astype(jnp.bfloat16))

    grid = (padded_batch // tb,)

    in_specs = [pl.BlockSpec((tb, in_pad), lambda b: (b, 0))]
    for li in range(N_LAYERS):
        w_shape = (PADDED_DIMS[li], PADDED_DIMS[li + 1])
        b_shape = (1, PADDED_DIMS[li + 1])
        # Weight-stationary: constant index map -> same block every grid
        # step, DMA'd once and kept VMEM-resident.
        in_specs.append(pl.BlockSpec(w_shape, lambda b: (0, 0)))
        in_specs.append(pl.BlockSpec(b_shape, lambda b: (0, 0)))
    out_spec = pl.BlockSpec((tb, out_pad), lambda b: (b, 0))

    kernel = functools.partial(_autoencoder_kernel, act_dtype=ACT_DTYPE)

    out_padded = pl.pallas_call(
        kernel,
        out_shape=jax.ShapeDtypeStruct((padded_batch, out_pad), jnp.bfloat16),
        grid=grid,
        in_specs=in_specs,
        out_specs=out_spec,
        compiler_params=pltpu.CompilerParams(
            dimension_semantics=("parallel",),   # megacore sharding on v7x
            vmem_limit_bytes=48 << 20,           # < 64 MiB physical (v7x-safe)
        ),
    )(xp, *padded_params)

    # Slice off batch padding and padded output lanes; return f32.
    return out_padded[:batch, : DIMS[-1]].astype(jnp.float32)


def init_params(key):
    """Deterministic init mimicking torch.nn.Linear default
    (U[-1/sqrt(fan_in), +1/sqrt(fan_in)]).  Unpadded, f32, weights stored
    transposed as (in_features, out_features)."""
    params = []
    for i in range(N_LAYERS):
        fan_in, fan_out = DIMS[i], DIMS[i + 1]
        key, kw, kb = jax.random.split(key, 3)
        bound = 1.0 / jnp.sqrt(jnp.float32(fan_in))
        w = jax.random.uniform(kw, (fan_in, fan_out), jnp.float32, -bound, bound)
        b = jax.random.uniform(kb, (1, fan_out), jnp.float32, -bound, bound)
        params += [w, b]
    return params


def pad_params(params, act_dtype=ACT_DTYPE):
    """Zero-pad params to lane-aligned shapes; weights -> bf16,
    biases -> the elementwise dtype used inside the kernel."""
    padded = []
    for li in range(N_LAYERS):
        w = params[2 * li]
        b = params[2 * li + 1]
        in_p, out_p = PADDED_DIMS[li], PADDED_DIMS[li + 1]
        wp = jnp.zeros((in_p, out_p), jnp.float32).at[: w.shape[0], : w.shape[1]].set(w)
        bp = jnp.zeros((1, out_p), jnp.float32).at[:, : b.shape[1]].set(b)
        padded += [wp.astype(jnp.bfloat16), bp.astype(act_dtype)]
    return padded


def reference_forward(x, params):
    """Plain-JAX f32 reference matching the PyTorch module semantics."""
    h = x
    for li in range(N_LAYERS):
        w = params[2 * li]
        b = params[2 * li + 1]
        y = h @ w + b
        if li == 3:
            h = y
        elif li == N_LAYERS - 1:
            h = jax.nn.sigmoid(y)
        else:
            h = jnp.tanh(y)
    return h


if __name__ == "__main__":
    key = jax.random.PRNGKey(0)
    key, kx = jax.random.split(key)

    batch = 8
    x = jax.random.normal(kx, (batch, 784), jnp.float32)

    params = init_params(key)
    padded_params = pad_params(params)

    out = autoencoder_forward(x, padded_params)
    out = jax.block_until_ready(out)

    ref = reference_forward(x, params)
    assert out.shape == (batch, 784), out.shape
    assert jnp.all(jnp.isfinite(out)), "non-finite output"
    # bf16 weights + bf16 activation carry vs f32 reference -> loosened tolerance.
    max_err = float(jnp.max(jnp.abs(out - ref)))
    assert max_err < 3e-2, max_err

    print("KERNEL_OK")
</pallas_src>

<mosaic_0001>
module attributes {stable_mosaic.version = 11 : i64} {
  func.func @_autoencoder_kernel(%arg0: i32, %arg1: memref<8x896xbf16, #tpu.memory_space<vmem>>, %arg2: memref<896x1024xbf16, #tpu.memory_space<vmem>>, %arg3: memref<1x1024xbf16, #tpu.memory_space<vmem>>, %arg4: memref<1024x512xbf16, #tpu.memory_space<vmem>>, %arg5: memref<1x512xbf16, #tpu.memory_space<vmem>>, %arg6: memref<512x256xbf16, #tpu.memory_space<vmem>>, %arg7: memref<1x256xbf16, #tpu.memory_space<vmem>>, %arg8: memref<256x128xbf16, #tpu.memory_space<vmem>>, %arg9: memref<1x128xbf16, #tpu.memory_space<vmem>>, %arg10: memref<128x256xbf16, #tpu.memory_space<vmem>>, %arg11: memref<1x256xbf16, #tpu.memory_space<vmem>>, %arg12: memref<256x512xbf16, #tpu.memory_space<vmem>>, %arg13: memref<1x512xbf16, #tpu.memory_space<vmem>>, %arg14: memref<512x1024xbf16, #tpu.memory_space<vmem>>, %arg15: memref<1x1024xbf16, #tpu.memory_space<vmem>>, %arg16: memref<1024x896xbf16, #tpu.memory_space<vmem>>, %arg17: memref<1x896xbf16, #tpu.memory_space<vmem>>, %arg18: memref<8x896xbf16, #tpu.memory_space<vmem>>) attributes {dimension_semantics = [#tpu.dimension_semantics<parallel>], iteration_bounds = array<i64: 1>, scalar_prefetch = 0 : i64, scratch_operands = 0 : i64, tpu.core_type = #tpu.core_type<tc>, window_params = [{transform_indices = @transform_0, window_bounds = array<i64: 8, 896>}, {pipeline_mode = #tpu.pipeline_mode<synchronous>, transform_indices = @transform_1, window_bounds = array<i64: 896, 1024>}, {pipeline_mode = #tpu.pipeline_mode<synchronous>, transform_indices = @transform_2, window_bounds = array<i64: 1, 1024>}, {pipeline_mode = #tpu.pipeline_mode<synchronous>, transform_indices = @transform_3, window_bounds = array<i64: 1024, 512>}, {pipeline_mode = #tpu.pipeline_mode<synchronous>, transform_indices = @transform_4, window_bounds = array<i64: 1, 512>}, {pipeline_mode = #tpu.pipeline_mode<synchronous>, transform_indices = @transform_5, window_bounds = array<i64: 512, 256>}, {pipeline_mode = #tpu.pipeline_mode<synchronous>, transform_indices = @transform_6, window_bounds = array<i64: 1, 256>}, {pipeline_mode = #tpu.pipeline_mode<synchronous>, transform_indices = @transform_7, window_bounds = array<i64: 256, 128>}, {pipeline_mode = #tpu.pipeline_mode<synchronous>, transform_indices = @transform_8, window_bounds = array<i64: 1, 128>}, {pipeline_mode = #tpu.pipeline_mode<synchronous>, transform_indices = @transform_9, window_bounds = array<i64: 128, 256>}, {pipeline_mode = #tpu.pipeline_mode<synchronous>, transform_indices = @transform_10, window_bounds = array<i64: 1, 256>}, {pipeline_mode = #tpu.pipeline_mode<synchronous>, transform_indices = @transform_11, window_bounds = array<i64: 256, 512>}, {pipeline_mode = #tpu.pipeline_mode<synchronous>, transform_indices = @transform_12, window_bounds = array<i64: 1, 512>}, {pipeline_mode = #tpu.pipeline_mode<synchronous>, transform_indices = @transform_13, window_bounds = array<i64: 512, 1024>}, {pipeline_mode = #tpu.pipeline_mode<synchronous>, transform_indices = @transform_14, window_bounds = array<i64: 1, 1024>}, {pipeline_mode = #tpu.pipeline_mode<synchronous>, transform_indices = @transform_15, window_bounds = array<i64: 1024, 896>}, {pipeline_mode = #tpu.pipeline_mode<synchronous>, transform_indices = @transform_16, window_bounds = array<i64: 1, 896>}, {transform_indices = @transform_17, window_bounds = array<i64: 8, 896>}]} {
    %c0 = arith.constant 0 : index
    %c0_0 = arith.constant 0 : index
    %0 = vector.load %arg1[%c0, %c0_0] : memref<8x896xbf16, #tpu.memory_space<vmem>>, vector<8x896xbf16>
    %c0_1 = arith.constant 0 : index
    %c0_2 = arith.constant 0 : index
    %1 = vector.load %arg2[%c0_1, %c0_2] : memref<896x1024xbf16, #tpu.memory_space<vmem>>, vector<896x1024xbf16>
    %c0_3 = arith.constant 0 : index
    %c0_4 = arith.constant 0 : index
    %2 = vector.load %arg3[%c0_3, %c0_4] : memref<1x1024xbf16, #tpu.memory_space<vmem>>, vector<1x1024xbf16>
    %cst = arith.constant dense<0.000000e+00> : vector<8x1024xf32>
    %3 = tpu.matmul %0, %1, %cst {dimension_numbers = #tpu.dot_dimension_numbers<[1], [0], [0], [1], [0, 0, 1, 1], [], []>} : vector<8x896xbf16>, vector<896x1024xbf16>, vector<8x1024xf32> -> vector<8x1024xf32>
    %4 = arith.truncf %3 : vector<8x1024xf32> to vector<8x1024xbf16>
    %5 = vector.broadcast %2 : vector<1x1024xbf16> to vector<8x1024xbf16>
    %6 = arith.addf %4, %5 : vector<8x1024xbf16>
    %7 = math.tanh %6 : vector<8x1024xbf16>
    %c0_5 = arith.constant 0 : index
    %c0_6 = arith.constant 0 : index
    %8 = vector.load %arg4[%c0_5, %c0_6] : memref<1024x512xbf16, #tpu.memory_space<vmem>>, vector<1024x512xbf16>
    %c0_7 = arith.constant 0 : index
    %c0_8 = arith.constant 0 : index
    %9 = vector.load %arg5[%c0_7, %c0_8] : memref<1x512xbf16, #tpu.memory_space<vmem>>, vector<1x512xbf16>
    %cst_9 = arith.constant dense<0.000000e+00> : vector<8x512xf32>
    %10 = tpu.matmul %7, %8, %cst_9 {dimension_numbers = #tpu.dot_dimension_numbers<[1], [0], [0], [1], [0, 0, 1, 1], [], []>} : vector<8x1024xbf16>, vector<1024x512xbf16>, vector<8x512xf32> -> vector<8x512xf32>
    %11 = arith.truncf %10 : vector<8x512xf32> to vector<8x512xbf16>
    %12 = vector.broadcast %9 : vector<1x512xbf16> to vector<8x512xbf16>
    %13 = arith.addf %11, %12 : vector<8x512xbf16>
    %14 = math.tanh %13 : vector<8x512xbf16>
    %c0_10 = arith.constant 0 : index
    %c0_11 = arith.constant 0 : index
    %15 = vector.load %arg6[%c0_10, %c0_11] : memref<512x256xbf16, #tpu.memory_space<vmem>>, vector<512x256xbf16>
    %c0_12 = arith.constant 0 : index
    %c0_13 = arith.constant 0 : index
    %16 = vector.load %arg7[%c0_12, %c0_13] : memref<1x256xbf16, #tpu.memory_space<vmem>>, vector<1x256xbf16>
    %cst_14 = arith.constant dense<0.000000e+00> : vector<8x256xf32>
    %17 = tpu.matmul %14, %15, %cst_14 {dimension_numbers = #tpu.dot_dimension_numbers<[1], [0], [0], [1], [0, 0, 1, 1], [], []>} : vector<8x512xbf16>, vector<512x256xbf16>, vector<8x256xf32> -> vector<8x256xf32>
    %18 = arith.truncf %17 : vector<8x256xf32> to vector<8x256xbf16>
    %19 = vector.broadcast %16 : vector<1x256xbf16> to vector<8x256xbf16>
    %20 = arith.addf %18, %19 : vector<8x256xbf16>
    %21 = math.tanh %20 : vector<8x256xbf16>
    %c0_15 = arith.constant 0 : index
    %c0_16 = arith.constant 0 : index
    %22 = vector.load %arg8[%c0_15, %c0_16] : memref<256x128xbf16, #tpu.memory_space<vmem>>, vector<256x128xbf16>
    %c0_17 = arith.constant 0 : index
    %c0_18 = arith.constant 0 : index
    %23 = vector.load %arg9[%c0_17, %c0_18] : memref<1x128xbf16, #tpu.memory_space<vmem>>, vector<1x128xbf16>
    %cst_19 = arith.constant dense<0.000000e+00> : vector<8x128xf32>
    %24 = tpu.matmul %21, %22, %cst_19 {dimension_numbers = #tpu.dot_dimension_numbers<[1], [0], [0], [1], [0, 0, 1, 1], [], []>} : vector<8x256xbf16>, vector<256x128xbf16>, vector<8x128xf32> -> vector<8x128xf32>
    %25 = arith.truncf %24 : vector<8x128xf32> to vector<8x128xbf16>
    %26 = vector.broadcast %23 : vector<1x128xbf16> to vector<8x128xbf16>
    %27 = arith.addf %25, %26 : vector<8x128xbf16>
    %c0_20 = arith.constant 0 : index
    %c0_21 = arith.constant 0 : index
    %28 = vector.load %arg10[%c0_20, %c0_21] : memref<128x256xbf16, #tpu.memory_space<vmem>>, vector<128x256xbf16>
    %c0_22 = arith.constant 0 : index
    %c0_23 = arith.constant 0 : index
    %29 = vector.load %arg11[%c0_22, %c0_23] : memref<1x256xbf16, #tpu.memory_space<vmem>>, vector<1x256xbf16>
    %cst_24 = arith.constant dense<0.000000e+00> : vector<8x256xf32>
    %30 = tpu.matmul %27, %28, %cst_24 {dimension_numbers = #tpu.dot_dimension_numbers<[1], [0], [0], [1], [0, 0, 1, 1], [], []>} : vector<8x128xbf16>, vector<128x256xbf16>, vector<8x256xf32> -> vector<8x256xf32>
    %31 = arith.truncf %30 : vector<8x256xf32> to vector<8x256xbf16>
    %32 = vector.broadcast %29 : vector<1x256xbf16> to vector<8x256xbf16>
    %33 = arith.addf %31, %32 : vector<8x256xbf16>
    %34 = math.tanh %33 : vector<8x256xbf16>
    %c0_25 = arith.constant 0 : index
    %c0_26 = arith.constant 0 : index
    %35 = vector.load %arg12[%c0_25, %c0_26] : memref<256x512xbf16, #tpu.memory_space<vmem>>, vector<256x512xbf16>
    %c0_27 = arith.constant 0 : index
    %c0_28 = arith.constant 0 : index
    %36 = vector.load %arg13[%c0_27, %c0_28] : memref<1x512xbf16, #tpu.memory_space<vmem>>, vector<1x512xbf16>
    %cst_29 = arith.constant dense<0.000000e+00> : vector<8x512xf32>
    %37 = tpu.matmul %34, %35, %cst_29 {dimension_numbers = #tpu.dot_dimension_numbers<[1], [0], [0], [1], [0, 0, 1, 1], [], []>} : vector<8x256xbf16>, vector<256x512xbf16>, vector<8x512xf32> -> vector<8x512xf32>
    %38 = arith.truncf %37 : vector<8x512xf32> to vector<8x512xbf16>
    %39 = vector.broadcast %36 : vector<1x512xbf16> to vector<8x512xbf16>
    %40 = arith.addf %38, %39 : vector<8x512xbf16>
    %41 = math.tanh %40 : vector<8x512xbf16>
    %c0_30 = arith.constant 0 : index
    %c0_31 = arith.constant 0 : index
    %42 = vector.load %arg14[%c0_30, %c0_31] : memref<512x1024xbf16, #tpu.memory_space<vmem>>, vector<512x1024xbf16>
    %c0_32 = arith.constant 0 : index
    %c0_33 = arith.constant 0 : index
    %43 = vector.load %arg15[%c0_32, %c0_33] : memref<1x1024xbf16, #tpu.memory_space<vmem>>, vector<1x1024xbf16>
    %cst_34 = arith.constant dense<0.000000e+00> : vector<8x1024xf32>
    %44 = tpu.matmul %41, %42, %cst_34 {dimension_numbers = #tpu.dot_dimension_numbers<[1], [0], [0], [1], [0, 0, 1, 1], [], []>} : vector<8x512xbf16>, vector<512x1024xbf16>, vector<8x1024xf32> -> vector<8x1024xf32>
    %45 = arith.truncf %44 : vector<8x1024xf32> to vector<8x1024xbf16>
    %46 = vector.broadcast %43 : vector<1x1024xbf16> to vector<8x1024xbf16>
    %47 = arith.addf %45, %46 : vector<8x1024xbf16>
    %48 = math.tanh %47 : vector<8x1024xbf16>
    %c0_35 = arith.constant 0 : index
    %c0_36 = arith.constant 0 : index
    %49 = vector.load %arg16[%c0_35, %c0_36] : memref<1024x896xbf16, #tpu.memory_space<vmem>>, vector<1024x896xbf16>
    %c0_37 = arith.constant 0 : index
    %c0_38 = arith.constant 0 : index
    %50 = vector.load %arg17[%c0_37, %c0_38] : memref<1x896xbf16, #tpu.memory_space<vmem>>, vector<1x896xbf16>
    %cst_39 = arith.constant dense<0.000000e+00> : vector<8x896xf32>
    %51 = tpu.matmul %48, %49, %cst_39 {dimension_numbers = #tpu.dot_dimension_numbers<[1], [0], [0], [1], [0, 0, 1, 1], [], []>} : vector<8x1024xbf16>, vector<1024x896xbf16>, vector<8x896xf32> -> vector<8x896xf32>
    %52 = arith.truncf %51 : vector<8x896xf32> to vector<8x896xbf16>
    %53 = vector.broadcast %50 : vector<1x896xbf16> to vector<8x896xbf16>
    %54 = arith.addf %52, %53 : vector<8x896xbf16>
    %cst_40 = arith.constant 5.000000e-01 : bf16
    %55 = vector.broadcast %cst_40 : bf16 to vector<8x896xbf16>
    %56 = arith.mulf %55, %54 : vector<8x896xbf16>
    %57 = math.tanh %56 : vector<8x896xbf16>
    %cst_41 = arith.constant 1.000000e+00 : bf16
    %58 = vector.broadcast %cst_41 : bf16 to vector<8x896xbf16>
    %59 = arith.addf %57, %58 : vector<8x896xbf16>
    %cst_42 = arith.constant 5.000000e-01 : bf16
    %60 = vector.broadcast %cst_42 : bf16 to vector<8x896xbf16>
    %61 = arith.mulf %60, %59 : vector<8x896xbf16>
    %c0_43 = arith.constant 0 : index
    %c0_44 = arith.constant 0 : index
    %62 = vector.load %arg18[%c0_43, %c0_44] : memref<8x896xbf16, #tpu.memory_space<vmem>>, vector<8x896xbf16>
    tpu.vector_store %arg18[%c0_43, %c0_44], %61 {strides = array<i32>} : memref<8x896xbf16, #tpu.memory_space<vmem>>, vector<8x896xbf16>,
    return
  }
  func.func @transform_0(%arg0: i32) -> (i32, i32) {
    %c0_i32 = arith.constant 0 : i32
    %c0_i32_0 = arith.constant 0 : i32
    return %arg0, %c0_i32 : i32, i32
  }
  func.func @transform_1(%arg0: i32) -> (i32, i32) {
    %c0_i32 = arith.constant 0 : i32
    %c0_i32_0 = arith.constant 0 : i32
    %c0_i32_1 = arith.constant 0 : i32
    return %c0_i32, %c0_i32_0 : i32, i32
  }
  func.func @transform_2(%arg0: i32) -> (i32, i32) {
    %c0_i32 = arith.constant 0 : i32
    %c0_i32_0 = arith.constant 0 : i32
    %c0_i32_1 = arith.constant 0 : i32
    return %c0_i32, %c0_i32_0 : i32, i32
  }
  func.func @transform_3(%arg0: i32) -> (i32, i32) {
    %c0_i32 = arith.constant 0 : i32
    %c0_i32_0 = arith.constant 0 : i32
    %c0_i32_1 = arith.constant 0 : i32
    return %c0_i32, %c0_i32_0 : i32, i32
  }
  func.func @transform_4(%arg0: i32) -> (i32, i32) {
    %c0_i32 = arith.constant 0 : i32
    %c0_i32_0 = arith.constant 0 : i32
    %c0_i32_1 = arith.constant 0 : i32
    return %c0_i32, %c0_i32_0 : i32, i32
  }
  func.func @transform_5(%arg0: i32) -> (i32, i32) {
    %c0_i32 = arith.constant 0 : i32
    %c0_i32_0 = arith.constant 0 : i32
    %c0_i32_1 = arith.constant 0 : i32
    return %c0_i32, %c0_i32_0 : i32, i32
  }
  func.func @transform_6(%arg0: i32) -> (i32, i32) {
    %c0_i32 = arith.constant 0 : i32
    %c0_i32_0 = arith.constant 0 : i32
    %c0_i32_1 = arith.constant 0 : i32
    return %c0_i32, %c0_i32_0 : i32, i32
  }
  func.func @transform_7(%arg0: i32) -> (i32, i32) {
    %c0_i32 = arith.constant 0 : i32
    %c0_i32_0 = arith.constant 0 : i32
    %c0_i32_1 = arith.constant 0 : i32
    return %c0_i32, %c0_i32_0 : i32, i32
  }
  func.func @transform_8(%arg0: i32) -> (i32, i32) {
    %c0_i32 = arith.constant 0 : i32
    %c0_i32_0 = arith.constant 0 : i32
    %c0_i32_1 = arith.constant 0 : i32
    return %c0_i32, %c0_i32_0 : i32, i32
  }
  func.func @transform_9(%arg0: i32) -> (i32, i32) {
    %c0_i32 = arith.constant 0 : i32
    %c0_i32_0 = arith.constant 0 : i32
    %c0_i32_1 = arith.constant 0 : i32
    return %c0_i32, %c0_i32_0 : i32, i32
  }
  func.func @transform_10(%arg0: i32) -> (i32, i32) {
    %c0_i32 = arith.constant 0 : i32
    %c0_i32_0 = arith.constant 0 : i32
    %c0_i32_1 = arith.constant 0 : i32
    return %c0_i32, %c0_i32_0 : i32, i32
  }
  func.func @transform_11(%arg0: i32) -> (i32, i32) {
    %c0_i32 = arith.constant 0 : i32
    %c0_i32_0 = arith.constant 0 : i32
    %c0_i32_1 = arith.constant 0 : i32
    return %c0_i32, %c0_i32_0 : i32, i32
  }
  func.func @transform_12(%arg0: i32) -> (i32, i32) {
    %c0_i32 = arith.constant 0 : i32
    %c0_i32_0 = arith.constant 0 : i32
    %c0_i32_1 = arith.constant 0 : i32
    return %c0_i32, %c0_i32_0 : i32, i32
  }
  func.func @transform_13(%arg0: i32) -> (i32, i32) {
    %c0_i32 = arith.constant 0 : i32
    %c0_i32_0 = arith.constant 0 : i32
    %c0_i32_1 = arith.constant 0 : i32
    return %c0_i32, %c0_i32_0 : i32, i32
  }
  func.func @transform_14(%arg0: i32) -> (i32, i32) {
    %c0_i32 = arith.constant 0 : i32
    %c0_i32_0 = arith.constant 0 : i32
    %c0_i32_1 = arith.constant 0 : i32
    return %c0_i32, %c0_i32_0 : i32, i32
  }
  func.func @transform_15(%arg0: i32) -> (i32, i32) {
    %c0_i32 = arith.constant 0 : i32
    %c0_i32_0 = arith.constant 0 : i32
    %c0_i32_1 = arith.constant 0 : i32
    return %c0_i32, %c0_i32_0 : i32, i32
  }
  func.func @transform_16(%arg0: i32) -> (i32, i32) {
    %c0_i32 = arith.constant 0 : i32
    %c0_i32_0 = arith.constant 0 : i32
    %c0_i32_1 = arith.constant 0 : i32
    return %c0_i32, %c0_i32_0 : i32, i32
  }
  func.func @transform_17(%arg0: i32) -> (i32, i32) {
    %c0_i32 = arith.constant 0 : i32
    %c0_i32_0 = arith.constant 0 : i32
    return %arg0, %c0_i32 : i32, i32
  }
}

</mosaic_0001>

<bundles_post_ra>
// kernel: autoencoder_forward.1
= control target key start
LH: loop header
LB: loop body
LE: loop exit
PB: predicated region body
PF: predicated region fallthrough
CT: control target
= control target key end

     0   :  { %s16774_s0 = inlined_call_operand.vmem [shape: bf16[8,896], index: 0, kind: input, shape index: {}]   ;;  %s16775_s1 = inlined_call_operand.hbm [shape: bf16[896,1024], index: 1, kind: input, shape index: {}]   ;;  %s16776_s2 = inlined_call_operand.hbm [shape: bf16[1,1024], index: 2, kind: input, shape index: {}]   ;;  %s16777_s3 = inlined_call_operand.hbm [shape: bf16[1024,512], index: 3, kind: input, shape index: {}]   ;;  %s16778_s4 = inlined_call_operand.hbm [shape: bf16[1,512], index: 4, kind: input, shape index: {}]   ;;  %s16779_s5 = inlined_call_operand.hbm [shape: bf16[512,256], index: 5, kind: input, shape index: {}]   ;;  %s16780_s6 = inlined_call_operand.hbm [shape: bf16[1,256], index: 6, kind: input, shape index: {}]   ;;  %s16781_s7 = inlined_call_operand.hbm [shape: bf16[256,128], index: 7, kind: input, shape index: {}]   ;;  %s16782_s8 = inlined_call_operand.hbm [shape: bf16[1,128], index: 8, kind: input, shape index: {}]   ;;  %s16783_s9 = inlined_call_operand.hbm [shape: bf16[128,256], index: 9, kind: input, shape index: {}]   ;;  %s16784_s10 = inlined_call_operand.hbm [shape: bf16[1,256], index: 10, kind: input, shape index: {}]   ;;  %s16785_s11 = inlined_call_operand.hbm [shape: bf16[256,512], index: 11, kind: input, shape index: {}]   ;;  %s16786_s12 = inlined_call_operand.hbm [shape: bf16[1,512], index: 12, kind: input, shape index: {}]   ;;  %s16787_s13 = inlined_call_operand.hbm [shape: bf16[512,1024], index: 13, kind: input, shape index: {}]   ;;  %s16788_s14 = inlined_call_operand.hbm [shape: bf16[1,1024], index: 14, kind: input, shape index: {}]   ;;  %s16789_s15 = inlined_call_operand.hbm [shape: bf16[1024,896], index: 15, kind: input, shape index: {}]   ;;  %s16790_s16 = inlined_call_operand.hbm [shape: bf16[1,896], index: 16, kind: input, shape index: {}]   ;;  %s16791_s17 = inlined_call_operand.vmem [shape: bf16[8,896], index: 17, kind: output, shape index: {}]  }
   0x1   :  { %16793 = sst [smem:[#allocation36_spill]] %s16774_s0 }
   0x2   :  { %16794 = sst [smem:[#allocation37_spill]] %s16775_s1 }
   0x3   :  { %22 = vsyncpa [#allocation3], 0 }
   0x4   :  { %23 = vsyncpa [#allocation5], 0 }
   0x5   :  { %24 = vsyncpa [#allocation8], 0 }
   0x6   :  { %25 = vsyncpa [#allocation11], 0 }
   0x7   :  { %26 = vsyncpa [#allocation14], 0 }
   0x8   :  { %27 = vsyncpa [#allocation17], 0 }
   0x9   :  { %28 = vsyncpa [#allocation20], 0 }
   0xa   :  { %29 = vsyncpa [#allocation23], 0 }
   0xb   :  { %30 = vsyncpa [#allocation26], 0  ;;  %s16138_s24 = smov [#allocation4]   ;;  %s16139_s26 = smov [#allocation7]  }
   0xc   :  { %s51_s25 = sshll.u32 %s16138_s24, 4  ;;  %s73_s27 = sshll.u32 %s16139_s26, 4  ;;  %s52_s25 = int_to_ptr.vmem [resolvable:$true] %s51_s25  ;;  %s74_s27 = int_to_ptr.vmem [resolvable:$true] %s73_s27 }
   0xd   :  { %s15808_s28 = scalar_lea.vmem %s52_s25, 128  ;;  %p15813_p1 = scmp.lt.s32.totalorder %s52_s25, %s52_s25 }
   0xe   :  { %p15809_p0 = scmp.ne.s32.totalorder %s52_s25, %s15808_s28  ;;  %p15814_p2 = scmp.lt.s32.totalorder %s15808_s28, %s15808_s28 }
  0x10   :  { %p15815_p3 = por %p15814_p2, %p15813_p1 }
  0x12   :  { %p15816_p4 = pnand %p15815_p3, %p15809_p0 }
  0x14   :  { %15819 = shalt.err (!%p15816_p4)
}
  0x15   :  { %54 = dma.hbm_to_vmem [thread:$0]  %s16776_s2, 128, %s52_s25, [#allocation5]  }
  0x16   :  { %s15828_s30 = scalar_lea.vmem %s74_s27, 64  ;;  %p15833_p6 = scmp.lt.s32.totalorder %s74_s27, %s74_s27 }
  0x17   :  { %p15829_p5 = scmp.ne.s32.totalorder %s74_s27, %s15828_s30  ;;  %p15834_p7 = scmp.lt.s32.totalorder %s15828_s30, %s15828_s30 }
  0x19   :  { %p15835_p8 = por %p15834_p7, %p15833_p6 }
  0x1b   :  { %p15836_p9 = pnand %p15835_p8, %p15829_p5 }
  0x1d   :  { %15839 = shalt.err (!%p15836_p9)
}
  0x1e   :  { %76 = dma.hbm_to_vmem [thread:$0]  %s16778_s4, 64, %s74_s27, [#allocation8]  }
  0x1f   :  { %s16140_s1 = smov [#allocation10]   ;;  %s16141_s21 = smov [#allocation13]  }
  0x20   :  { %s95_s20 = sshll.u32 %s16140_s1, 4  ;;  %s117_s22 = sshll.u32 %s16141_s21, 4  ;;  %s96_s20 = int_to_ptr.vmem [resolvable:$true] %s95_s20  ;;  %s118_s22 = int_to_ptr.vmem [resolvable:$true] %s117_s22 }
  0x21   :  { %s15848_s23 = scalar_lea.vmem %s96_s20, 32  ;;  %p15853_p11 = scmp.lt.s32.totalorder %s96_s20, %s96_s20 }
  0x22   :  { %p15849_p10 = scmp.ne.s32.totalorder %s96_s20, %s15848_s23  ;;  %p15854_p12 = scmp.lt.s32.totalorder %s15848_s23, %s15848_s23 }
  0x24   :  { %p15855_p13 = por %p15854_p12, %p15853_p11 }
  0x26   :  { %p15856_p0 = pnand %p15855_p13, %p15849_p10 }
  0x28   :  { %15859 = shalt.err (!%p15856_p0)
}
  0x29   :  { %98 = dma.hbm_to_vmem [thread:$0]  %s16780_s6, 32, %s96_s20, [#allocation11]  }
  0x2a   :  { %s15868_s25 = scalar_lea.vmem %s118_s22, 16  ;;  %s15872_s4 = scalar_lea.vmem %s118_s22, 32 }
  0x2b   :  { %p15869_p1 = scmp.ne.s32.totalorder %s118_s22, %s15868_s25  ;;  %p15873_p2 = scmp.lt.s32.totalorder %s118_s22, %s118_s22 }
  0x2c   :  { %p15874_p3 = scmp.lt.s32.totalorder %s15872_s4, %s15868_s25 }
  0x2e   :  { %p15875_p4 = por %p15874_p3, %p15873_p2 }
  0x30   :  { %p15876_p5 = pnand %p15875_p4, %p15869_p1 }
  0x32   :  { %15879 = shalt.err (!%p15876_p5)
}
  0x33   :  { %120 = dma.hbm_to_vmem [thread:$0]  %s16782_s8, 16, %s118_s22, [#allocation14]  }
  0x34   :  { %s16142_s28 = smov [#allocation16]   ;;  %s16143_s0 = smov [#allocation19]  }
  0x35   :  { %s139_s29 = sshll.u32 %s16142_s28, 4  ;;  %s161_s30 = sshll.u32 %s16143_s0, 4  ;;  %s140_s29 = int_to_ptr.vmem [resolvable:$true] %s139_s29  ;;  %s162_s30 = int_to_ptr.vmem [resolvable:$true] %s161_s30 }
  0x36   :  { %s15888_s18 = scalar_lea.vmem %s140_s29, 32  ;;  %p15893_p7 = scmp.lt.s32.totalorder %s140_s29, %s140_s29 }
  0x37   :  { %p15889_p6 = scmp.ne.s32.totalorder %s140_s29, %s15888_s18  ;;  %p15894_p8 = scmp.lt.s32.totalorder %s15888_s18, %s15888_s18 }
  0x39   :  { %p15895_p9 = por %p15894_p8, %p15893_p7 }
  0x3b   :  { %p15896_p10 = pnand %p15895_p9, %p15889_p6 }
  0x3d   :  { %15899 = shalt.err (!%p15896_p10)
}
  0x3e   :  { %142 = dma.hbm_to_vmem [thread:$0]  %s16784_s10, 32, %s140_s29, [#allocation17]  }
  0x3f   :  { %s15908_s1 = scalar_lea.vmem %s162_s30, 64  ;;  %p15913_p12 = scmp.lt.s32.totalorder %s162_s30, %s162_s30 }
  0x40   :  { %p15909_p11 = scmp.ne.s32.totalorder %s162_s30, %s15908_s1  ;;  %p15914_p13 = scmp.lt.s32.totalorder %s15908_s1, %s15908_s1 }
  0x42   :  { %p15915_p0 = por %p15914_p13, %p15913_p12 }
  0x44   :  { %p15916_p1 = pnand %p15915_p0, %p15909_p11 }
  0x46   :  { %15919 = shalt.err (!%p15916_p1)
}
  0x47   :  { %164 = dma.hbm_to_vmem [thread:$0]  %s16786_s12, 64, %s162_s30, [#allocation20]  }
  0x48   :  { %s16144_s21 = smov [#allocation22]   ;;  %s16145_s23 = smov [#allocation2]  }
  0x49   :  { %s183_s22 = sshll.u32 %s16144_s21, 4  ;;  %s38_s2 = sshll.u32 %s16145_s23, 4  ;;  %s184_s22 = int_to_ptr.vmem [resolvable:$true] %s183_s22  ;;  %s39_s2 = int_to_ptr.vmem [resolvable:$true] %s38_s2 }
  0x4a   :  { %s15928_s24 = scalar_lea.vmem %s184_s22, 128  ;;  %p15933_p3 = scmp.lt.s32.totalorder %s184_s22, %s184_s22 }
  0x4b   :  { %p15929_p2 = scmp.ne.s32.totalorder %s184_s22, %s15928_s24  ;;  %p15934_p4 = scmp.lt.s32.totalorder %s15928_s24, %s15928_s24 }
  0x4d   :  { %p15935_p5 = por %p15934_p4, %p15933_p3 }
  0x4f   :  { %p15936_p6 = pnand %p15935_p5, %p15929_p2 }
  0x51   :  { %15939 = shalt.err (!%p15936_p6)
}
  0x52   :  { %186 = dma.hbm_to_vmem [thread:$0]  %s16788_s14, 128, %s184_s22, [#allocation23]  }
  0x53   :  { %s15948_s4 = scalar_lea.vmem %s39_s2, 57344  ;;  %p15953_p8 = scmp.lt.s32.totalorder %s39_s2, %s39_s2 }
  0x54   :  { %p15949_p7 = scmp.ne.s32.totalorder %s39_s2, %s15948_s4  ;;  %p15954_p9 = scmp.lt.s32.totalorder %s15948_s4, %s15948_s4 }
  0x56   :  { %p15955_p10 = por %p15954_p9, %p15953_p8 }
  0x58   :  { %p15956_p11 = pnand %p15955_p10, %p15949_p7 }
  0x5a   :  { %15959 = shalt.err (!%p15956_p11)
}
  0x5b   :  { %s16146_s12 = smov 512   ;;  %s16147_s26 = smov 32  }
  0x5c   :  { %s16795_s29 = sld [smem:[#allocation37_spill]]  ;;  %s16148_s0 = smov [#allocation6]  }
  0x5d   :  { %s60_s30 = sshll.u32 %s16148_s0, 4  ;;  %s61_s30 = int_to_ptr.vmem [resolvable:$true] %s60_s30 }
  0x5e   :  { %s15968_s14 = scalar_lea.vmem %s61_s30, 32768  ;;  %p15973_p13 = scmp.lt.s32.totalorder %s61_s30, %s61_s30 }
  0x5f   :  { %p15969_p12 = scmp.ne.s32.totalorder %s61_s30, %s15968_s14  ;;  %p15974_p0 = scmp.lt.s32.totalorder %s15968_s14, %s15968_s14 }
  0x61   :  { %p15975_p1 = por %p15974_p0, %p15973_p13 }
  0x62   :  { %44 = dma.hbm_to_vmem [thread:$0]  %s16795_s29, 57344, %s39_s2, [#allocation3], %s16146_s12, %s16146_s12, %s16147_s26  }
  0x63   :  { %p15976_p2 = pnand %p15975_p1, %p15969_p12 }
  0x65   :  { %15979 = shalt.err (!%p15976_p2)
}
  0x66   :  { %s16149_s18 = smov 256   ;;  %s16150_s6 = smov 16  }
  0x67   :  { %66 = dma.hbm_to_vmem [thread:$0]  %s16777_s3, 32768, %s61_s30, [#allocation5], %s16149_s18, %s16149_s18, %s16150_s6  }
  0x68   :  { %s16151_s8 = smov [#allocation9]  }
  0x69   :  { %s82_s20 = sshll.u32 %s16151_s8, 4  ;;  %s83_s20 = int_to_ptr.vmem [resolvable:$true] %s82_s20 }
  0x6a   :  { %s15988_s21 = scalar_lea.vmem %s83_s20, 8192  ;;  %p15993_p4 = scmp.lt.s32.totalorder %s83_s20, %s83_s20 }
  0x6b   :  { %p15989_p3 = scmp.ne.s32.totalorder %s83_s20, %s15988_s21  ;;  %p15994_p5 = scmp.lt.s32.totalorder %s15988_s21, %s15988_s21 }
  0x6d   :  { %p15995_p6 = por %p15994_p5, %p15993_p4 }
  0x6f   :  { %p15996_p7 = pnand %p15995_p6, %p15989_p3 }
  0x71   :  { %15999 = shalt.err (!%p15996_p7)
}
  0x72   :  { %s16152_s22 = smov 128   ;;  %s16153_s23 = smov 8  }
  0x73   :  { %88 = dma.hbm_to_vmem [thread:$0]  %s16779_s5, 8192, %s83_s20, [#allocation8], %s16152_s22, %s16152_s22, %s16153_s23  }
  0x74   :  { %s16154_s3 = smov [#allocation12]  }
  0x75   :  { %s104_s10 = sshll.u32 %s16154_s3, 4  ;;  %s105_s10 = int_to_ptr.vmem [resolvable:$true] %s104_s10 }
  0x76   :  { %s16008_s25 = scalar_lea.vmem %s105_s10, 2048  ;;  %p16013_p9 = scmp.lt.s32.totalorder %s105_s10, %s105_s10 }
  0x77   :  { %p16009_p8 = scmp.ne.s32.totalorder %s105_s10, %s16008_s25  ;;  %p16014_p10 = scmp.lt.s32.totalorder %s16008_s25, %s16008_s25 }
  0x79   :  { %p16015_p11 = por %p16014_p10, %p16013_p9 }
  0x7b   :  { %p16016_p12 = pnand %p16015_p11, %p16009_p8 }
  0x7d   :  { %16019 = shalt.err (!%p16016_p12)
}
  0x7e   :  { %s16155_s4 = smov 64   ;;  %s16156_s27 = smov 4  }
  0x7f   :  { %110 = dma.hbm_to_vmem [thread:$0]  %s16781_s7, 2048, %s105_s10, [#allocation11], %s16155_s4, %s16155_s4, %s16156_s27  }
  0x80   :  { %s16157_s0 = smov [#allocation15]   ;;  %s16158_s5 = smov [#allocation18]  }
  0x81   :  { %s126_s30 = sshll.u32 %s16157_s0, 4  ;;  %s148_s14 = sshll.u32 %s16158_s5, 4  ;;  %s127_s30 = int_to_ptr.vmem [resolvable:$true] %s126_s30  ;;  %s149_s14 = int_to_ptr.vmem [resolvable:$true] %s148_s14 }
  0x82   :  { %s16028_s19 = scalar_lea.vmem %s127_s30, 2048  ;;  %p16033_p0 = scmp.lt.s32.totalorder %s127_s30, %s127_s30 }
  0x83   :  { %p16029_p13 = scmp.ne.s32.totalorder %s127_s30, %s16028_s19  ;;  %p16034_p1 = scmp.lt.s32.totalorder %s16028_s19, %s16028_s19 }
  0x85   :  { %p16035_p2 = por %p16034_p1, %p16033_p0 }
  0x87   :  { %p16036_p3 = pnand %p16035_p2, %p16029_p13 }
  0x89   :  { %16039 = shalt.err (!%p16036_p3)
}
  0x8a   :  { %132 = dma.hbm_to_vmem [thread:$0]  %s16783_s9, 2048, %s127_s30, [#allocation14], %s16152_s22, %s16152_s22, %s16153_s23  }
  0x8b   :  { %s16048_s7 = scalar_lea.vmem %s149_s14, 8192  ;;  %p16053_p5 = scmp.lt.s32.totalorder %s149_s14, %s149_s14 }
  0x8c   :  { %p16049_p4 = scmp.ne.s32.totalorder %s149_s14, %s16048_s7  ;;  %p16054_p6 = scmp.lt.s32.totalorder %s16048_s7, %s16048_s7 }
  0x8e   :  { %p16055_p7 = por %p16054_p6, %p16053_p5 }
  0x90   :  { %p16056_p8 = pnand %p16055_p7, %p16049_p4 }
  0x92   :  { %16059 = shalt.err (!%p16056_p8)
}
  0x93   :  { %154 = dma.hbm_to_vmem [thread:$0]  %s16785_s11, 8192, %s149_s14, [#allocation17], %s16149_s18, %s16149_s18, %s16150_s6  }
  0x94   :  { %s16159_s2 = smov [#allocation21]   ;;  %s16160_s3 = smov [#allocation24]  }
  0x95   :  { %s170_s24 = sshll.u32 %s16159_s2, 4  ;;  %s192_s9 = sshll.u32 %s16160_s3, 4  ;;  %s171_s24 = int_to_ptr.vmem [resolvable:$true] %s170_s24  ;;  %s193_s9 = int_to_ptr.vmem [resolvable:$true] %s192_s9 }
  0x96   :  { %s16068_s22 = scalar_lea.vmem %s171_s24, 32768  ;;  %p16073_p10 = scmp.lt.s32.totalorder %s171_s24, %s171_s24 }
  0x97   :  { %p16069_p9 = scmp.ne.s32.totalorder %s171_s24, %s16068_s22  ;;  %p16074_p11 = scmp.lt.s32.totalorder %s16068_s22, %s16068_s22 }
  0x99   :  { %p16075_p12 = por %p16074_p11, %p16073_p10 }
  0x9b   :  { %p16076_p13 = pnand %p16075_p12, %p16069_p9 }
  0x9d   :  { %16079 = shalt.err (!%p16076_p13)
}
  0x9e   :  { %176 = dma.hbm_to_vmem [thread:$0]  %s16787_s13, 32768, %s171_s24, [#allocation20], %s16146_s12, %s16146_s12, %s16147_s26  }
  0x9f   :  { %s16088_s11 = scalar_lea.vmem %s193_s9, 57344  ;;  %p16093_p1 = scmp.lt.s32.totalorder %s193_s9, %s193_s9 }
  0xa0   :  { %p16089_p0 = scmp.ne.s32.totalorder %s193_s9, %s16088_s11  ;;  %p16094_p2 = scmp.lt.s32.totalorder %s16088_s11, %s16088_s11 }
  0xa2   :  { %p16095_p3 = por %p16094_p2, %p16093_p1 }
  0xa4   :  { %p16096_p4 = pnand %p16095_p3, %p16089_p0 }
  0xa6   :  { %16099 = shalt.err (!%p16096_p4)
}
  0xa7   :  { %s16161_s18 = smov 448   ;;  %s16162_s6 = smov 28  }
  0xa8   :  { %198 = dma.hbm_to_vmem [thread:$0]  %s16789_s15, 57344, %s193_s9, [#allocation23], %s16161_s18, %s16161_s18, %s16162_s6  }
  0xa9   :  { %s16163_s27 = smov [#allocation25]  }
  0xaa   :  { %s205_s28 = sshll.u32 %s16163_s27, 4  ;;  %s206_s28 = int_to_ptr.vmem [resolvable:$true] %s205_s28 }
  0xab   :  { %s16108_s29 = scalar_lea.vmem %s206_s28, 112  ;;  %s16112_s13 = scalar_lea.vmem %s206_s28, 128 }
  0xac   :  { %p16109_p5 = scmp.ne.s32.totalorder %s206_s28, %s16108_s29  ;;  %p16113_p6 = scmp.lt.s32.totalorder %s206_s28, %s206_s28 }
  0xad   :  { %p16114_p7 = scmp.lt.s32.totalorder %s16112_s13, %s16108_s29 }
  0xaf   :  { %p16115_p8 = por %p16114_p7, %p16113_p6 }
  0xb1   :  { %p16116_p9 = pnand %p16115_p8, %p16109_p5 }
  0xb3   :  { %16119 = shalt.err (!%p16116_p9)
}
  0xb4   :  { %208 = dma.hbm_to_vmem [thread:$0]  %s16790_s16, 112, %s206_s28, [#allocation26]  }
  0xb5   :  { %16120 = dma.done.wait [#allocation3], 57344  }
  0xb6   :  { %16121 = vsyncadd [#allocation3], 4294909952 }
  0xb7   :  { %16122 = dma.done.wait [#allocation5], 32896  }
  0xb8   :  { %16123 = vsyncadd [#allocation5], 4294934400 }
  0xb9   :  { %16124 = dma.done.wait [#allocation8], 8256  }
  0xba   :  { %16125 = vsyncadd [#allocation8], 4294959040 }
  0xbb   :  { %16126 = dma.done.wait [#allocation11], 2080  }
  0xbc   :  { %16127 = vsyncadd [#allocation11], 4294965216 }
  0xbd   :  { %16128 = dma.done.wait [#allocation14], 2064  }
  0xbe   :  { %16129 = vsyncadd [#allocation14], 4294965232 }
  0xbf   :  { %16130 = dma.done.wait [#allocation17], 8224  }
  0xc0   :  { %16131 = vsyncadd [#allocation17], 4294959072 }
  0xc1   :  { %16132 = dma.done.wait [#allocation20], 32832  }
  0xc2   :  { %16133 = vsyncadd [#allocation20], 4294934464 }
  0xc3   :  { %16134 = dma.done.wait [#allocation23], 57472  }
  0xc4   :  { %16135 = vsyncadd [#allocation23], 4294909824 }
  0xc5   :  { %16136 = dma.done.wait [#allocation26], 112  }
  0xc6   :  { %16137 = vsyncadd [#allocation26], 4294967184  ;;  %v320_v0 = vld [vmem:[#allocation2 + $0x1c0] sm:$0xff]  ;;  %s16796_s0 = sld [smem:[#allocation36_spill]] }
  0xc7   :  { %v324_v1 = vld [vmem:[#allocation2 + $0x1e0] sm:$0xff] }
  0xc8   :  { %v448_v2 = vld [vmem:[#allocation2 + $0x5c0] sm:$0xff]  ;;  %v12802_v3 = vcombine.high %v320_v0, %v324_v1  ;;  %v12801_v5 = vcombine.low %v320_v0, %v324_v1 }
  0xc9   :  { %v452_v4 = vld [vmem:[#allocation2 + $0x5e0] sm:$0xff] }
  0xca   :  { %v312_v6 = vld [vmem:[#allocation2 + $0x180] sm:$0xff]  ;;  %v12930_v8 = vcombine.high %v448_v2, %v452_v4  ;;  %v12929_v9 = vcombine.low %v448_v2, %v452_v4  ;;  %2978 = vmatprep.subr.bf16.mxu0 %v12802_v3 }
  0xcb   :  { %v316_v7 = vld [vmem:[#allocation2 + $0x1a0] sm:$0xff]  ;;  %2979 = vmatpush1.bf16.msra.mxu0 %v12801_v5 }
  0xcc   :  { %v12794_v10 = vcombine.high %v312_v6, %v316_v7  ;;  %v440_v11 = vld [vmem:[#allocation2 + $0x580] sm:$0xff]  ;;  %3019 = vmatprep.subr.bf16.mxu1 %v12930_v8  ;;  %v12793_v18 = vcombine.low %v312_v6, %v316_v7  ;;  %v16330_v54 = vld [vmem:[%s16796_s0 + $0x8] sm:$0xff] }
  0xcd   :  { %v444_v12 = vld [vmem:[#allocation2 + $0x5a0] sm:$0xff]  ;;  %3020 = vmatpush1.bf16.msra.mxu1 %v12929_v9  ;;  %v16338_v59 = vcombine.high %v16330_v54, %v16330_v54 }
  0xce   :  { %v304_v13 = vld [vmem:[#allocation2 + $0x140] sm:$0xff]  ;;  %v12922_v14 = vcombine.high %v440_v11, %v444_v12  ;;  %2980 = vmatprep.subr.bf16.mxu0 %v12794_v10  ;;  %v12921_v19 = vcombine.low %v440_v11, %v444_v12 }
  0xcf   :  { %v308_v15 = vld [vmem:[#allocation2 + $0x160] sm:$0xff]  ;;  %2981 = vmatpush1.bf16.msra.mxu0 %v12793_v18  ;;  %3051 = vmatprep.mubr.bf16.mxu1 %v16338_v59 }
  0xd0   :  { %v432_v16 = vld [vmem:[#allocation2 + $0x540] sm:$0xff]  ;;  %v12786_v20 = vcombine.high %v304_v13, %v308_v15  ;;  %3021 = vmatprep.subr.bf16.mxu1 %v12922_v14  ;;  %v12785_v26 = vcombine.low %v304_v13, %v308_v15 }
  0xd1   :  { %v436_v17 = vld [vmem:[#allocation2 + $0x560] sm:$0xff]  ;;  %3022 = vmatpush1.bf16.msra.mxu1 %v12921_v19 }
  0xd2   :  { %v12914_v21 = vcombine.high %v432_v16, %v436_v17  ;;  %v296_v22 = vld [vmem:[#allocation2 + $0x100] sm:$0xff]  ;;  %2982 = vmatprep.subr.bf16.mxu0 %v12786_v20  ;;  %v12913_v27 = vcombine.low %v432_v16, %v436_v17 }
  0xd3   :  { %v300_v23 = vld [vmem:[#allocation2 + $0x120] sm:$0xff]  ;;  %2983 = vmatpush1.bf16.msra.mxu0 %v12785_v26 }
  0xd4   :  { %v424_v24 = vld [vmem:[#allocation2 + $0x500] sm:$0xff]  ;;  %v12778_v28 = vcombine.high %v296_v22, %v300_v23  ;;  %3023 = vmatprep.subr.bf16.mxu1 %v12914_v21  ;;  %v12777_v34 = vcombine.low %v296_v22, %v300_v23 }
  0xd5   :  { %v428_v25 = vld [vmem:[#allocation2 + $0x520] sm:$0xff]  ;;  %3024 = vmatpush1.bf16.msra.mxu1 %v12913_v27 }
  0xd6   :  { %v12906_v29 = vcombine.high %v424_v24, %v428_v25  ;;  %v288_v30 = vld [vmem:[#allocation2 + $0xc0] sm:$0xff]  ;;  %2984 = vmatprep.subr.bf16.mxu0 %v12778_v28  ;;  %v12905_v35 = vcombine.low %v424_v24, %v428_v25 }
  0xd7   :  { %v292_v31 = vld [vmem:[#allocation2 + $0xe0] sm:$0xff]  ;;  %2985 = vmatpush1.bf16.msra.mxu0 %v12777_v34 }
  0xd8   :  { %v416_v32 = vld [vmem:[#allocation2 + $0x4c0] sm:$0xff]  ;;  %v12770_v36 = vcombine.high %v288_v30, %v292_v31  ;;  %3025 = vmatprep.subr.bf16.mxu1 %v12906_v29  ;;  %v12769_v42 = vcombine.low %v288_v30, %v292_v31 }
  0xd9   :  { %v420_v33 = vld [vmem:[#allocation2 + $0x4e0] sm:$0xff]  ;;  %3026 = vmatpush1.bf16.msra.mxu1 %v12905_v35 }
  0xda   :  { %v12898_v37 = vcombine.high %v416_v32, %v420_v33  ;;  %v280_v38 = vld [vmem:[#allocation2 + $0x80] sm:$0xff]  ;;  %2986 = vmatprep.subr.bf16.mxu0 %v12770_v36  ;;  %v12897_v43 = vcombine.low %v416_v32, %v420_v33 }
  0xdb   :  { %v284_v39 = vld [vmem:[#allocation2 + $0xa0] sm:$0xff]  ;;  %2987 = vmatpush1.bf16.msra.mxu0 %v12769_v42 }
  0xdc   :  { %v408_v40 = vld [vmem:[#allocation2 + $0x480] sm:$0xff]  ;;  %v12762_v44 = vcombine.high %v280_v38, %v284_v39  ;;  %3027 = vmatprep.subr.bf16.mxu1 %v12898_v37  ;;  %v12761_v50 = vcombine.low %v280_v38, %v284_v39 }
  0xdd   :  { %v412_v41 = vld [vmem:[#allocation2 + $0x4a0] sm:$0xff]  ;;  %3028 = vmatpush1.bf16.msra.mxu1 %v12897_v43 }
  0xde   :  { %v12890_v45 = vcombine.high %v408_v40, %v412_v41  ;;  %v272_v46 = vld [vmem:[#allocation2 + $0x40] sm:$0xff]  ;;  %2988 = vmatprep.subr.bf16.mxu0 %v12762_v44  ;;  %v12889_v51 = vcombine.low %v408_v40, %v412_v41 }
  0xdf   :  { %v276_v47 = vld [vmem:[#allocation2 + $0x60] sm:$0xff]  ;;  %2989 = vmatpush1.bf16.msra.mxu0 %v12761_v50 }
  0xe0   :  { %v400_v48 = vld [vmem:[#allocation2 + $0x440] sm:$0xff]  ;;  %v12754_v52 = vcombine.high %v272_v46, %v276_v47  ;;  %3029 = vmatprep.subr.bf16.mxu1 %v12890_v45  ;;  %v12753_v62 = vcombine.low %v272_v46, %v276_v47 }
  0xe1   :  { %v404_v49 = vld [vmem:[#allocation2 + $0x460] sm:$0xff]  ;;  %3030 = vmatpush1.bf16.msra.mxu1 %v12889_v51 }
  0xe2   :  { %v16325_v53 = vld [vmem:[%s16796_s0] sm:$0xff]  ;;  %v12882_v55 = vcombine.high %v400_v48, %v404_v49  ;;  %2990 = vmatprep.subr.bf16.mxu0 %v12754_v52  ;;  %v12881_v63 = vcombine.low %v400_v48, %v404_v49 }
  0xe3   :  { %v264_v56 = vld [vmem:[#allocation2] sm:$0xff]  ;;  %v16334_v58 = vcombine.high %v16325_v53, %v16325_v53  ;;  %2991 = vmatpush1.bf16.msra.mxu0 %v12753_v62 }
  0xe4   :  { %v268_v57 = vld [vmem:[#allocation2 + $0x20] sm:$0xff]  ;;  %3031 = vmatprep.subr.bf16.mxu1 %v12882_v55 }
  0xe5   :  { %v392_v60 = vld [vmem:[#allocation2 + $0x400] sm:$0xff]  ;;  %3010 = vmatprep.mubr.bf16.mxu0 %v16334_v58  ;;  %v12746_v0 = vcombine.high %v264_v56, %v268_v57  ;;  %v12745_v6 = vcombine.low %v264_v56, %v268_v57  ;;  %3032 = vmatpush1.bf16.msra.mxu1 %v12881_v63 }
  0xe6   :  { %v396_v61 = vld [vmem:[#allocation2 + $0x420] sm:$0xff] }
  0xe7   :  { %v12874_v1 = vcombine.high %v392_v60, %v396_v61  ;;  %v384_v2 = vld [vmem:[#allocation2 + $0x3c0] sm:$0xff]  ;;  %2992 = vmatprep.subr.bf16.mxu0 %v12746_v0  ;;  %v12873_v7 = vcombine.low %v392_v60, %v396_v61 }
  0xe8   :  { %v388_v3 = vld [vmem:[#allocation2 + $0x3e0] sm:$0xff]  ;;  %2993 = vmatpush1.bf16.msra.mxu0 %v12745_v6 }
  0xe9   :  { %v512_v4 = vld [vmem:[#allocation2 + $0x7c0] sm:$0xff]  ;;  %v12866_v8 = vcombine.high %v384_v2, %v388_v3  ;;  %3033 = vmatprep.subr.bf16.mxu1 %v12874_v1  ;;  %v12865_v14 = vcombine.low %v384_v2, %v388_v3 }
  0xea   :  { %v516_v5 = vld [vmem:[#allocation2 + $0x7e0] sm:$0xff]  ;;  %3034 = vmatpush1.bf16.msra.mxu1 %v12873_v7 }
  0xeb   :  { %v12994_v9 = vcombine.high %v512_v4, %v516_v5  ;;  %v376_v10 = vld [vmem:[#allocation2 + $0x380] sm:$0xff]  ;;  %2994 = vmatprep.subr.bf16.mxu0 %v12866_v8  ;;  %v12993_v15 = vcombine.low %v512_v4, %v516_v5 }
  0xec   :  { %v380_v11 = vld [vmem:[#allocation2 + $0x3a0] sm:$0xff]  ;;  %2995 = vmatpush2.bf16.msra.mxu0 %v12865_v14 }
  0xed   :  { %v504_v12 = vld [vmem:[#allocation2 + $0x780] sm:$0xff]  ;;  %v12858_v16 = vcombine.high %v376_v10, %v380_v11  ;;  %3035 = vmatprep.subr.bf16.mxu1 %v12994_v9  ;;  %v12857_v22 = vcombine.low %v376_v10, %v380_v11 }
  0xee   :  { %v508_v13 = vld [vmem:[#allocation2 + $0x7a0] sm:$0xff]  ;;  %3036 = vmatpush2.bf16.msra.mxu1 %v12993_v15 }
  0xef   :  { %v12986_v17 = vcombine.high %v504_v12, %v508_v13  ;;  %v368_v18 = vld [vmem:[#allocation2 + $0x340] sm:$0xff]  ;;  %2996 = vmatprep.subr.bf16.mxu0 %v12858_v16  ;;  %v12985_v23 = vcombine.low %v504_v12, %v508_v13  ;;  %v16344_v16 = vcombine.low %v16325_v53, %v16325_v53 }
  0xf0   :  { %v372_v19 = vld [vmem:[#allocation2 + $0x360] sm:$0xff]  ;;  %2997 = vmatpush2.bf16.msra.mxu0 %v12857_v22 }
  0xf1   :  { %v496_v20 = vld [vmem:[#allocation2 + $0x740] sm:$0xff]  ;;  %v12850_v24 = vcombine.high %v368_v18, %v372_v19  ;;  %3037 = vmatprep.subr.bf16.mxu1 %v12986_v17  ;;  %v12849_v30 = vcombine.low %v368_v18, %v372_v19  ;;  %v16348_v19 = vcombine.low %v16330_v54, %v16330_v54 }
  0xf2   :  { %v500_v21 = vld [vmem:[#allocation2 + $0x760] sm:$0xff]  ;;  %3038 = vmatpush2.bf16.msra.mxu1 %v12985_v23 }
  0xf3   :  { %v12978_v25 = vcombine.high %v496_v20, %v500_v21  ;;  %v360_v26 = vld [vmem:[#allocation2 + $0x300] sm:$0xff]  ;;  %2998 = vmatprep.subr.bf16.mxu0 %v12850_v24  ;;  %v12977_v31 = vcombine.low %v496_v20, %v500_v21  ;;  %v16353_v21 = vld [vmem:[%s16796_s0 + $0x10] sm:$0xff] }
  0xf4   :  { %v364_v27 = vld [vmem:[#allocation2 + $0x320] sm:$0xff]  ;;  %2999 = vmatpush2.bf16.msra.mxu0 %v12849_v30  ;;  %v16358_v54 = vcombine.high %v16353_v21, %v16353_v21 }
  0xf5   :  { %v488_v28 = vld [vmem:[#allocation2 + $0x700] sm:$0xff]  ;;  %v12842_v32 = vcombine.high %v360_v26, %v364_v27  ;;  %3039 = vmatprep.subr.bf16.mxu1 %v12978_v25  ;;  %v12841_v38 = vcombine.low %v360_v26, %v364_v27 }
  0xf6   :  { %v492_v29 = vld [vmem:[#allocation2 + $0x720] sm:$0xff]  ;;  %3040 = vmatpush2.bf16.msra.mxu1 %v12977_v31 }
  0xf7   :  { %v12970_v33 = vcombine.high %v488_v28, %v492_v29  ;;  %v352_v34 = vld [vmem:[#allocation2 + $0x2c0] sm:$0xff]  ;;  %3000 = vmatprep.subr.bf16.mxu0 %v12842_v32  ;;  %v12969_v39 = vcombine.low %v488_v28, %v492_v29 }
  0xf8   :  { %v356_v35 = vld [vmem:[#allocation2 + $0x2e0] sm:$0xff]  ;;  %3001 = vmatpush2.bf16.msra.mxu0 %v12841_v38 }
  0xf9   :  { %v480_v36 = vld [vmem:[#allocation2 + $0x6c0] sm:$0xff]  ;;  %v12834_v40 = vcombine.high %v352_v34, %v356_v35  ;;  %3041 = vmatprep.subr.bf16.mxu1 %v12970_v33  ;;  %v12833_v46 = vcombine.low %v352_v34, %v356_v35 }
  0xfa   :  { %v484_v37 = vld [vmem:[#allocation2 + $0x6e0] sm:$0xff]  ;;  %3042 = vmatpush2.bf16.msra.mxu1 %v12969_v39 }
  0xfb   :  { %v12962_v41 = vcombine.high %v480_v36, %v484_v37  ;;  %v344_v42 = vld [vmem:[#allocation2 + $0x280] sm:$0xff]  ;;  %3002 = vmatprep.subr.bf16.mxu0 %v12834_v40  ;;  %v12961_v47 = vcombine.low %v480_v36, %v484_v37  ;;  %v16164_v36 = vmov 0  }
  0xfc   :  { %v348_v43 = vld [vmem:[#allocation2 + $0x2a0] sm:$0xff]  ;;  %3003 = vmatpush2.bf16.msra.mxu0 %v12833_v46 }
  0xfd   :  { %v472_v44 = vld [vmem:[#allocation2 + $0x680] sm:$0xff]  ;;  %v12826_v48 = vcombine.high %v344_v42, %v348_v43  ;;  %3043 = vmatprep.subr.bf16.mxu1 %v12962_v41  ;;  %v12825_v56 = vcombine.low %v344_v42, %v348_v43 }
  0xfe   :  { %v476_v45 = vld [vmem:[#allocation2 + $0x6a0] sm:$0xff]  ;;  %3044 = vmatpush2.bf16.msra.mxu1 %v12961_v47 }
  0xff   :  { %v12954_v49 = vcombine.high %v472_v44, %v476_v45  ;;  %v336_v50 = vld [vmem:[#allocation2 + $0x240] sm:$0xff]  ;;  %3004 = vmatprep.subr.bf16.mxu0 %v12826_v48  ;;  %v12953_v57 = vcombine.low %v472_v44, %v476_v45 }
 0x100   :  { %v340_v51 = vld [vmem:[#allocation2 + $0x260] sm:$0xff]  ;;  %3005 = vmatpush2.bf16.msra.mxu0 %v12825_v56 }
 0x101   :  { %v464_v52 = vld [vmem:[#allocation2 + $0x640] sm:$0xff]  ;;  %v12818_v60 = vcombine.high %v336_v50, %v340_v51  ;;  %3045 = vmatprep.subr.bf16.mxu1 %v12954_v49  ;;  %v12817_v2 = vcombine.low %v336_v50, %v340_v51 }
 0x102   :  { %v468_v55 = vld [vmem:[#allocation2 + $0x660] sm:$0xff]  ;;  %3046 = vmatpush2.bf16.msra.mxu1 %v12953_v57 }
 0x103   :  { %v12946_v61 = vcombine.high %v464_v52, %v468_v55  ;;  %v328_v62 = vld [vmem:[#allocation2 + $0x200] sm:$0xff]  ;;  %3006 = vmatprep.subr.bf16.mxu0 %v12818_v60  ;;  %v12945_v3 = vcombine.low %v464_v52, %v468_v55 }
 0x104   :  { %v332_v63 = vld [vmem:[#allocation2 + $0x220] sm:$0xff]  ;;  %3007 = vmatpush2.bf16.msra.mxu0 %v12817_v2 }
 0x105   :  { %v456_v0 = vld [vmem:[#allocation2 + $0x600] sm:$0xff]  ;;  %v12810_v4 = vcombine.high %v328_v62, %v332_v63  ;;  %3047 = vmatprep.subr.bf16.mxu1 %v12946_v61  ;;  %v12809_v10 = vcombine.low %v328_v62, %v332_v63 }
 0x106   :  { %v460_v1 = vld [vmem:[#allocation2 + $0x620] sm:$0xff]  ;;  %3048 = vmatpush2.bf16.msra.mxu1 %v12945_v3 }
 0x107   :  { %v12938_v5 = vcombine.high %v456_v0, %v460_v1  ;;  %v576_v6 = vld [vmem:[#allocation2 + $0x9c0] sm:$0xff]  ;;  %3008 = vmatprep.subr.bf16.mxu0 %v12810_v4  ;;  %v12937_v11 = vcombine.low %v456_v0, %v460_v1 }
 0x108   :  { %v580_v7 = vld [vmem:[#allocation2 + $0x9e0] sm:$0xff]  ;;  %3009 = vmatpush2.bf16.msra.mxu0 %v12809_v10 }
 0x109   :  { %v704_v8 = vld [vmem:[#allocation2 + $0xdc0] sm:$0xff]  ;;  %v13058_v12 = vcombine.high %v576_v6, %v580_v7  ;;  %3049 = vmatprep.subr.bf16.mxu1 %v12938_v5  ;;  %v13057_v20 = vcombine.low %v576_v6, %v580_v7 }
 0x10a   :  { %v708_v9 = vld [vmem:[#allocation2 + $0xde0] sm:$0xff]  ;;  %3050 = vmatpush2.bf16.msra.mxu1 %v12937_v11 }
 0x10b   :  { %v13186_v13 = vcombine.high %v704_v8, %v708_v9  ;;  %v568_v14 = vld [vmem:[#allocation2 + $0x980] sm:$0xff]  ;;  %3060 = vmatprep.subr.bf16.mxu0 %v13058_v12  ;;  %v13185_v22 = vcombine.low %v704_v8, %v708_v9  ;;  %3011 = vmatmul.mubr.bf16.vlgmr.msra.gmra.mxu0 %v16344_v16 }
 0x10c   :  { %v572_v15 = vld [vmem:[#allocation2 + $0x9a0] sm:$0xff]  ;;  %3061 = vmatpush1.bf16.msra.mxu0 %v13057_v20  ;;  %3092 = vmatprep.mubr.bf16.mxu0 %v16358_v54 }
 0x10d   :  { %v696_v17 = vld [vmem:[#allocation2 + $0xd80] sm:$0xff]  ;;  %v13050_v23 = vcombine.high %v568_v14, %v572_v15  ;;  %3101 = vmatprep.subr.bf16.mxu1 %v13186_v13  ;;  %3052 = vmatmul.mubr.bf16.vlgmr.msra.gmra.mxu1 %v16348_v19  ;;  %v13049_v28 = vcombine.low %v568_v14, %v572_v15  ;;  %v321_v14 = vld [vmem:[#allocation2 + $0x1c8] sm:$0xff] }
 0x10e   :  { %v700_v18 = vld [vmem:[#allocation2 + $0xda0] sm:$0xff]  ;;  %3102 = vmatpush1.bf16.msra.mxu1 %v13185_v22  ;;  %3133 = vmatprep.mubr.bf16.mxu1 %v16164_v36 }
 0x10f   :  { %v560_v24 = vld [vmem:[#allocation2 + $0x940] sm:$0xff]  ;;  %v13178_v53 = vcombine.high %v696_v17, %v700_v18  ;;  %3062 = vmatprep.subr.bf16.mxu0 %v13050_v23  ;;  %v13177_v29 = vcombine.low %v696_v17, %v700_v18  ;;  %v325_v17 = vld [vmem:[#allocation2 + $0x1e8] sm:$0xff] }
 0x110   :  { %v564_v25 = vld [vmem:[#allocation2 + $0x960] sm:$0xff]  ;;  %3063 = vmatpush1.bf16.msra.mxu0 %v13049_v28 }
 0x111   :  { %v688_v26 = vld [vmem:[#allocation2 + $0xd40] sm:$0xff]  ;;  %v13042_v30 = vcombine.high %v560_v24, %v564_v25  ;;  %3103 = vmatprep.subr.bf16.mxu1 %v13178_v53  ;;  %v13041_v37 = vcombine.low %v560_v24, %v564_v25  ;;  %v313_v53 = vld [vmem:[#allocation2 + $0x188] sm:$0xff]  ;;  %v14463_v25 = vld [vmem:[%s16796_s0 + $0x18] ss:$0 sps:$4 sm:$0xff]  }
 0x112   :  { %v692_v27 = vld [vmem:[#allocation2 + $0xd60] sm:$0xff]  ;;  %3104 = vmatpush1.bf16.msra.mxu1 %v13177_v29  ;;  %v12803_v29 = vcombine.low %v321_v14, %v325_v17 }
 0x113   :  { %v552_v31 = vld [vmem:[#allocation2 + $0x900] sm:$0xff]  ;;  %v13170_v34 = vcombine.high %v688_v26, %v692_v27  ;;  %3064 = vmatprep.subr.bf16.mxu0 %v13042_v30  ;;  %v13169_v38 = vcombine.low %v688_v26, %v692_v27  ;;  %v12804_v26 = vcombine.high %v321_v14, %v325_v17  ;;  %v317_v27 = vld [vmem:[#allocation2 + $0x1a8] sm:$0xff] }
 0x114   :  { %v556_v32 = vld [vmem:[#allocation2 + $0x920] sm:$0xff]  ;;  %3065 = vmatpush1.bf16.msra.mxu0 %v13041_v37  ;;  %v265_v14 = vld [vmem:[#allocation2 + $0x8] sm:$0xff] }
 0x115   :  { %v680_v33 = vld [vmem:[#allocation2 + $0xd00] sm:$0xff]  ;;  %v13034_v39 = vcombine.high %v552_v31, %v556_v32  ;;  %3105 = vmatprep.subr.bf16.mxu1 %v13170_v34  ;;  %v13033_v45 = vcombine.low %v552_v31, %v556_v32  ;;  %v12796_v34 = vcombine.high %v313_v53, %v317_v27  ;;  %v269_v17 = vld [vmem:[#allocation2 + $0x28] sm:$0xff] }
 0x116   :  { %v684_v35 = vld [vmem:[#allocation2 + $0xd20] sm:$0xff]  ;;  %3106 = vmatpush1.bf16.msra.mxu1 %v13169_v38  ;;  %v12795_v38 = vcombine.low %v313_v53, %v317_v27  ;;  %v449_v53 = vld [vmem:[#allocation2 + $0x5c8] sm:$0xff] }
 0x117   :  { %v544_v40 = vld [vmem:[#allocation2 + $0x8c0] sm:$0xff]  ;;  %v13162_v43 = vcombine.high %v680_v33, %v684_v35  ;;  %3066 = vmatprep.subr.bf16.mxu0 %v13034_v39  ;;  %v13161_v46 = vcombine.low %v680_v33, %v684_v35  ;;  %v305_v33 = vld [vmem:[#allocation2 + $0x148] sm:$0xff] }
 0x118   :  { %v548_v41 = vld [vmem:[#allocation2 + $0x8e0] sm:$0xff]  ;;  %3067 = vmatpush1.bf16.msra.mxu0 %v13033_v45  ;;  %v309_v35 = vld [vmem:[#allocation2 + $0x168] sm:$0xff] }
 0x119   :  { %v672_v42 = vld [vmem:[#allocation2 + $0xcc0] sm:$0xff]  ;;  %v13026_v47 = vcombine.high %v544_v40, %v548_v41  ;;  %3107 = vmatprep.subr.bf16.mxu1 %v13162_v43  ;;  %v13025_v55 = vcombine.low %v544_v40, %v548_v41  ;;  %v12788_v43 = vcombine.high %v305_v33, %v309_v35 }
 0x11a   :  { %v676_v44 = vld [vmem:[#allocation2 + $0xce0] sm:$0xff]  ;;  %3108 = vmatpush1.bf16.msra.mxu1 %v13161_v46  ;;  %v12787_v46 = vcombine.low %v305_v33, %v309_v35  ;;  %v16369_v35 = vcombine.low %v16353_v21, %v16353_v21 }
 0x11b   :  { %v536_v48 = vld [vmem:[#allocation2 + $0x880] sm:$0xff]  ;;  %v13154_v51 = vcombine.high %v672_v42, %v676_v44  ;;  %3068 = vmatprep.subr.bf16.mxu0 %v13026_v47  ;;  %v13153_v56 = vcombine.low %v672_v42, %v676_v44  ;;  %v297_v42 = vld [vmem:[#allocation2 + $0x108] sm:$0xff] }
 0x11c   :  { %v540_v49 = vld [vmem:[#allocation2 + $0x8a0] sm:$0xff]  ;;  %3069 = vmatpush1.bf16.msra.mxu0 %v13025_v55  ;;  %v301_v44 = vld [vmem:[#allocation2 + $0x128] sm:$0xff] }
 0x11d   :  { %v664_v50 = vld [vmem:[#allocation2 + $0xc80] sm:$0xff]  ;;  %v13018_v57 = vcombine.high %v536_v48, %v540_v49  ;;  %3109 = vmatprep.subr.bf16.mxu1 %v13154_v51  ;;  %v13017_v1 = vcombine.low %v536_v48, %v540_v49  ;;  %v12780_v51 = vcombine.high %v297_v42, %v301_v44 }
 0x11e   :  { %v668_v52 = vld [vmem:[#allocation2 + $0xca0] sm:$0xff]  ;;  %3110 = vmatpush1.bf16.msra.mxu1 %v13153_v56  ;;  %v12779_v56 = vcombine.low %v297_v42, %v301_v44  ;;  %v433_v42 = vld [vmem:[#allocation2 + $0x548] sm:$0xff] }
 0x11f   :  { %v528_v60 = vld [vmem:[#allocation2 + $0x840] sm:$0xff]  ;;  %v13146_v63 = vcombine.high %v664_v50, %v668_v52  ;;  %3070 = vmatprep.subr.bf16.mxu0 %v13018_v57  ;;  %v13145_v2 = vcombine.low %v664_v50, %v668_v52  ;;  %v289_v50 = vld [vmem:[#allocation2 + $0xc8] sm:$0xff] }
 0x120   :  { %v532_v61 = vld [vmem:[#allocation2 + $0x860] sm:$0xff]  ;;  %3071 = vmatpush1.bf16.msra.mxu0 %v13017_v1  ;;  %v293_v52 = vld [vmem:[#allocation2 + $0xe8] sm:$0xff] }
 0x121   :  { %v656_v62 = vld [vmem:[#allocation2 + $0xc40] sm:$0xff]  ;;  %v13010_v3 = vcombine.high %v528_v60, %v532_v61  ;;  %3111 = vmatprep.subr.bf16.mxu1 %v13146_v63  ;;  %v13009_v9 = vcombine.low %v528_v60, %v532_v61  ;;  %v12772_v63 = vcombine.high %v289_v50, %v293_v52  ;;  %v437_v44 = vld [vmem:[#allocation2 + $0x568] sm:$0xff] }
 0x122   :  { %v660_v0 = vld [vmem:[#allocation2 + $0xc60] sm:$0xff]  ;;  %3112 = vmatpush1.bf16.msra.mxu1 %v13145_v2  ;;  %v12771_v2 = vcombine.low %v289_v50, %v293_v52  ;;  %v12915_v52 = vcombine.low %v433_v42, %v437_v44 }
 0x123   :  { %v520_v4 = vld [vmem:[#allocation2 + $0x800] sm:$0xff]  ;;  %v13138_v7 = vcombine.high %v656_v62, %v660_v0  ;;  %3072 = vmatprep.subr.bf16.mxu0 %v13010_v3  ;;  %v13137_v10 = vcombine.low %v656_v62, %v660_v0  ;;  %v281_v62 = vld [vmem:[#allocation2 + $0x88] sm:$0xff] }
 0x124   :  { %v524_v5 = vld [vmem:[#allocation2 + $0x820] sm:$0xff]  ;;  %3073 = vmatpush1.bf16.msra.mxu0 %v13009_v9  ;;  %v285_v0 = vld [vmem:[#allocation2 + $0xa8] sm:$0xff] }
 0x125   :  { %v648_v6 = vld [vmem:[#allocation2 + $0xc00] sm:$0xff]  ;;  %v13002_v11 = vcombine.high %v520_v4, %v524_v5  ;;  %3113 = vmatprep.subr.bf16.mxu1 %v13138_v7  ;;  %v13001_v18 = vcombine.low %v520_v4, %v524_v5  ;;  %v12764_v7 = vcombine.high %v281_v62, %v285_v0 }
 0x126   :  { %v652_v8 = vld [vmem:[#allocation2 + $0xc20] sm:$0xff]  ;;  %3114 = vmatpush1.bf16.msra.mxu1 %v13137_v10  ;;  %v12763_v10 = vcombine.low %v281_v62, %v285_v0 }
 0x127   :  { %v640_v12 = vld [vmem:[#allocation2 + $0xbc0] sm:$0xff]  ;;  %v13130_v15 = vcombine.high %v648_v6, %v652_v8  ;;  %3074 = vmatprep.subr.bf16.mxu0 %v13002_v11  ;;  %v13129_v20 = vcombine.low %v648_v6, %v652_v8  ;;  %v273_v6 = vld [vmem:[#allocation2 + $0x48] sm:$0xff] }
 0x128   :  { %v644_v13 = vld [vmem:[#allocation2 + $0xbe0] sm:$0xff]  ;;  %3075 = vmatpush1.bf16.msra.mxu0 %v13001_v18  ;;  %v277_v8 = vld [vmem:[#allocation2 + $0x68] sm:$0xff] }
 0x129   :  { %v13122_v22 = vcombine.high %v640_v12, %v644_v13  ;;  %v632_v23 = vld [vmem:[#allocation2 + $0xb80] sm:$0xff]  ;;  %3115 = vmatprep.subr.bf16.mxu1 %v13130_v15  ;;  %v13121_v28 = vcombine.low %v640_v12, %v644_v13  ;;  %v12756_v15 = vcombine.high %v273_v6, %v277_v8 }
 0x12a   :  { %v636_v24 = vld [vmem:[#allocation2 + $0xba0] sm:$0xff]  ;;  %3116 = vmatpush1.bf16.msra.mxu1 %v13129_v20  ;;  %v12755_v20 = vcombine.low %v273_v6, %v277_v8 }
 0x12b   :  { %3076 = vmatprep.subr.bf16.mxu0 %v13122_v22  ;;  %v13114_v30 = vcombine.high %v632_v23, %v636_v24  ;;  %v624_v31 = vld [vmem:[#allocation2 + $0xb40] sm:$0xff]  ;;  %3142 = vmatprep.subr.bf16.mxu1 %v12804_v26  ;;  %v13113_v37 = vcombine.low %v632_v23, %v636_v24  ;;  %v385_v23 = vld [vmem:[#allocation2 + $0x3c8] sm:$0xff] }
 0x12c   :  { %v628_v32 = vld [vmem:[#allocation2 + $0xb60] sm:$0xff]  ;;  %3077 = vmatpush2.bf16.msra.mxu0 %v13121_v28  ;;  %v389_v24 = vld [vmem:[#allocation2 + $0x3e8] sm:$0xff]  ;;  %v12747_v28 = vcombine.low %v265_v14, %v269_v17 }
 0x12d   :  { %3134 = vmatmul.mubr.bf16.vlgmr.msra.gmra.mxu1 %v14463_v25  ;;  %3078 = vmatprep.subr.bf16.mxu0 %v13114_v30  ;;  %v13106_v39 = vcombine.high %v624_v31, %v628_v32  ;;  %v616_v40 = vld [vmem:[#allocation2 + $0xb00] sm:$0xff]  ;;  %v13105_v45 = vcombine.low %v624_v31, %v628_v32  ;;  %v12748_v25 = vcombine.high %v265_v14, %v269_v17  ;;  %v453_v26 = vld [vmem:[#allocation2 + $0x5e8] sm:$0xff] }
 0x12e   :  { %3143 = vmatpush1.bf16.msra.mxu1 %v12803_v29  ;;  %v620_v41 = vld [vmem:[#allocation2 + $0xb20] sm:$0xff]  ;;  %3174 = vmatprep.mubr.bf16.mxu1 %v16334_v58  ;;  %v12932_v29 = vcombine.high %v449_v53, %v453_v26  ;;  %v377_v30 = vld [vmem:[#allocation2 + $0x388] sm:$0xff]  ;;  %v12868_v33 = vcombine.high %v385_v23, %v389_v24 }
 0x12f   :  { %3144 = vmatprep.subr.bf16.mxu1 %v12796_v34  ;;  %v13098_v47 = vcombine.high %v616_v40, %v620_v41  ;;  %v608_v48 = vld [vmem:[#allocation2 + $0xac0] sm:$0xff]  ;;  %v13097_v55 = vcombine.low %v616_v40, %v620_v41  ;;  %v381_v31 = vld [vmem:[#allocation2 + $0x3a8] sm:$0xff] }
 0x130   :  { %3079 = vmatpush2.bf16.msra.mxu0 %v13113_v37  ;;  %v612_v49 = vld [vmem:[#allocation2 + $0xae0] sm:$0xff]  ;;  %v441_v32 = vld [vmem:[#allocation2 + $0x588] sm:$0xff]  ;;  %v12931_v37 = vcombine.low %v449_v53, %v453_v26  ;;  %v12859_v21 = vcombine.low %v377_v30, %v381_v31 }
 0x131   :  { %3080 = vmatprep.subr.bf16.mxu0 %v13106_v39  ;;  %v13090_v57 = vcombine.high %v608_v48, %v612_v49  ;;  %v600_v60 = vld [vmem:[#allocation2 + $0xa80] sm:$0xff]  ;;  %v13089_v1 = vcombine.low %v608_v48, %v612_v49  ;;  %v445_v34 = vld [vmem:[#allocation2 + $0x5a8] sm:$0xff] }
 0x132   :  { %3145 = vmatpush1.bf16.msra.mxu1 %v12795_v38  ;;  %v604_v61 = vld [vmem:[#allocation2 + $0xaa0] sm:$0xff]  ;;  %v12867_v38 = vcombine.low %v385_v23, %v389_v24  ;;  %v12924_v39 = vcombine.high %v441_v32, %v445_v34  ;;  %v369_v40 = vld [vmem:[#allocation2 + $0x348] sm:$0xff] }
 0x133   :  { %3146 = vmatprep.subr.bf16.mxu1 %v12788_v43  ;;  %v13082_v3 = vcombine.high %v600_v60, %v604_v61  ;;  %v592_v4 = vld [vmem:[#allocation2 + $0xa40] sm:$0xff]  ;;  %v13081_v9 = vcombine.low %v600_v60, %v604_v61  ;;  %v373_v41 = vld [vmem:[#allocation2 + $0x368] sm:$0xff]  ;;  %v12860_v43 = vcombine.high %v377_v30, %v381_v31 }
 0x134   :  { %3081 = vmatpush2.bf16.msra.mxu0 %v13105_v45  ;;  %v596_v5 = vld [vmem:[#allocation2 + $0xa60] sm:$0xff]  ;;  %v12923_v45 = vcombine.low %v441_v32, %v445_v34  ;;  %v365_v48 = vld [vmem:[#allocation2 + $0x328] sm:$0xff]  ;;  %v12852_v50 = vcombine.high %v369_v40, %v373_v41 }
 0x135   :  { %3082 = vmatprep.subr.bf16.mxu0 %v13098_v47  ;;  %v13074_v11 = vcombine.high %v592_v4, %v596_v5  ;;  %v584_v12 = vld [vmem:[#allocation2 + $0xa00] sm:$0xff]  ;;  %v13073_v18 = vcombine.low %v592_v4, %v596_v5  ;;  %v361_v47 = vld [vmem:[#allocation2 + $0x308] sm:$0xff] }
 0x136   :  { %3147 = vmatpush1.bf16.msra.mxu1 %v12787_v46  ;;  %v588_v13 = vld [vmem:[#allocation2 + $0xa20] sm:$0xff]  ;;  %v12916_v46 = vcombine.high %v433_v42, %v437_v44  ;;  %v425_v49 = vld [vmem:[#allocation2 + $0x508] sm:$0xff]  ;;  %v12844_v62 = vcombine.high %v361_v47, %v365_v48 }
 0x137   :  { %3148 = vmatprep.subr.bf16.mxu1 %v12780_v51  ;;  %v13066_v22 = vcombine.high %v584_v12, %v588_v13  ;;  %v13065_v27 = vcombine.low %v584_v12, %v588_v13  ;;  %v429_v51 = vld [vmem:[#allocation2 + $0x528] sm:$0xff] }
 0x138   :  { %3083 = vmatpush2.bf16.msra.mxu0 %v13097_v55  ;;  %v12851_v55 = vcombine.low %v369_v40, %v373_v41  ;;  %v357_v60 = vld [vmem:[#allocation2 + $0x2e8] sm:$0xff]  ;;  %v12907_v0 = vcombine.low %v425_v49, %v429_v51 }
 0x139   :  { %3084 = vmatprep.subr.bf16.mxu0 %v13090_v57  ;;  %v353_v57 = vld [vmem:[#allocation2 + $0x2c8] sm:$0xff] }
 0x13a   :  { %3149 = vmatpush1.bf16.msra.mxu1 %v12779_v56  ;;  %v12908_v56 = vcombine.high %v425_v49, %v429_v51  ;;  %v417_v61 = vld [vmem:[#allocation2 + $0x4c8] sm:$0xff]  ;;  %v12836_v6 = vcombine.high %v353_v57, %v357_v60 }
 0x13b   :  { %3150 = vmatprep.subr.bf16.mxu1 %v12772_v63  ;;  %v421_v63 = vld [vmem:[#allocation2 + $0x4e8] sm:$0xff] }
 0x13c   :  { %3085 = vmatpush2.bf16.msra.mxu0 %v13089_v1  ;;  %v12843_v1 = vcombine.low %v361_v47, %v365_v48  ;;  %v349_v4 = vld [vmem:[#allocation2 + $0x2a8] sm:$0xff]  ;;  %v12899_v8 = vcombine.low %v417_v61, %v421_v63 }
 0x13d   :  { %3086 = vmatprep.subr.bf16.mxu0 %v13082_v3  ;;  %v345_v3 = vld [vmem:[#allocation2 + $0x288] sm:$0xff] }
 0x13e   :  { %3151 = vmatpush1.bf16.msra.mxu1 %v12771_v2  ;;  %v12900_v2 = vcombine.high %v417_v61, %v421_v63  ;;  %v409_v5 = vld [vmem:[#allocation2 + $0x488] sm:$0xff]  ;;  %v12828_v14 = vcombine.high %v345_v3, %v349_v4 }
 0x13f   :  { %3152 = vmatprep.subr.bf16.mxu1 %v12764_v7  ;;  %v413_v7 = vld [vmem:[#allocation2 + $0x4a8] sm:$0xff] }
 0x140   :  { %3087 = vmatpush2.bf16.msra.mxu0 %v13081_v9  ;;  %v12835_v9 = vcombine.low %v353_v57, %v357_v60  ;;  %v341_v12 = vld [vmem:[#allocation2 + $0x268] sm:$0xff]  ;;  %v12891_v17 = vcombine.low %v409_v5, %v413_v7 }
 0x141   :  { %3088 = vmatprep.subr.bf16.mxu0 %v13074_v11  ;;  %v337_v11 = vld [vmem:[#allocation2 + $0x248] sm:$0xff] }
 0x142   :  { %3153 = vmatpush1.bf16.msra.mxu1 %v12763_v10  ;;  %v12892_v10 = vcombine.high %v409_v5, %v413_v7  ;;  %v401_v13 = vld [vmem:[#allocation2 + $0x448] sm:$0xff]  ;;  %v12820_v53 = vcombine.high %v337_v11, %v341_v12 }
 0x143   :  { %3154 = vmatprep.subr.bf16.mxu1 %v12756_v15  ;;  %v405_v15 = vld [vmem:[#allocation2 + $0x468] sm:$0xff] }
 0x144   :  { %3089 = vmatpush2.bf16.msra.mxu0 %v13073_v18  ;;  %v12827_v18 = vcombine.low %v345_v3, %v349_v4  ;;  %v333_v23 = vld [vmem:[#allocation2 + $0x228] sm:$0xff]  ;;  %v12883_v26 = vcombine.low %v401_v13, %v405_v15 }
 0x145   :  { %3090 = vmatprep.subr.bf16.mxu0 %v13066_v22  ;;  %v329_v22 = vld [vmem:[#allocation2 + $0x208] sm:$0xff] }
 0x146   :  { %3155 = vmatpush1.bf16.msra.mxu1 %v12755_v20  ;;  %v12884_v20 = vcombine.high %v401_v13, %v405_v15  ;;  %v393_v24 = vld [vmem:[#allocation2 + $0x408] sm:$0xff]  ;;  %v12812_v32 = vcombine.high %v329_v22, %v333_v23 }
 0x147   :  { %3156 = vmatprep.subr.bf16.mxu1 %v12748_v25  ;;  %v397_v25 = vld [vmem:[#allocation2 + $0x428] sm:$0xff] }
 0x148   :  { %3091 = vmatpush2.bf16.msra.mxu0 %v13065_v27  ;;  %v12819_v27 = vcombine.low %v337_v11, %v341_v12  ;;  %v517_v30 = vld [vmem:[#allocation2 + $0x7e8] sm:$0xff]  ;;  %v12875_v34 = vcombine.low %v393_v24, %v397_v25 }
 0x149   :  { %3183 = vmatprep.subr.bf16.mxu0 %v12932_v29  ;;  %v513_v29 = vld [vmem:[#allocation2 + $0x7c8] sm:$0xff] }
 0x14a   :  { %3157 = vmatpush1.bf16.msra.mxu1 %v12747_v28  ;;  %v12876_v28 = vcombine.high %v393_v24, %v397_v25  ;;  %v577_v31 = vld [vmem:[#allocation2 + $0x9c8] sm:$0xff]  ;;  %v12995_v44 = vcombine.low %v513_v29, %v517_v30 }
 0x14b   :  { %3158 = vmatprep.subr.bf16.mxu1 %v12868_v33  ;;  %3093 = vmatmul.mubr.bf16.vlgmr.msra.gmra.mxu0 %v16369_v35  ;;  %v581_v33 = vld [vmem:[#allocation2 + $0x9e8] sm:$0xff] }
 0x14c   :  { %3184 = vmatpush1.bf16.msra.mxu0 %v12931_v37  ;;  %3215 = vmatprep.mubr.bf16.mxu0 %v16338_v59  ;;  %v12811_v37 = vcombine.low %v329_v22, %v333_v23  ;;  %v509_v40 = vld [vmem:[#allocation2 + $0x7a8] sm:$0xff]  ;;  %v13060_v42 = vcombine.high %v577_v31, %v581_v33 }
 0x14d   :  { %3185 = vmatprep.subr.bf16.mxu0 %v12924_v39  ;;  %v505_v39 = vld [vmem:[#allocation2 + $0x788] sm:$0xff] }
 0x14e   :  { %3159 = vmatpush2.bf16.msra.mxu1 %v12867_v38  ;;  %v12996_v38 = vcombine.high %v513_v29, %v517_v30  ;;  %v569_v41 = vld [vmem:[#allocation2 + $0x988] sm:$0xff]  ;;  %v12987_v51 = vcombine.low %v505_v39, %v509_v40 }
 0x14f   :  { %3160 = vmatprep.subr.bf16.mxu1 %v12860_v43  ;;  %v573_v43 = vld [vmem:[#allocation2 + $0x9a8] sm:$0xff] }
 0x150   :  { %3186 = vmatpush1.bf16.msra.mxu0 %v12923_v45  ;;  %v13059_v45 = vcombine.low %v577_v31, %v581_v33  ;;  %v501_v47 = vld [vmem:[#allocation2 + $0x768] sm:$0xff]  ;;  %v13052_v49 = vcombine.high %v569_v41, %v573_v43 }
 0x151   :  { %3187 = vmatprep.subr.bf16.mxu0 %v12916_v46  ;;  %v497_v46 = vld [vmem:[#allocation2 + $0x748] sm:$0xff] }
 0x152   :  { %3161 = vmatpush2.bf16.msra.mxu1 %v12859_v21  ;;  %v12988_v21 = vcombine.high %v505_v39, %v509_v40  ;;  %v561_v48 = vld [vmem:[#allocation2 + $0x948] sm:$0xff]  ;;  %v12979_v63 = vcombine.low %v497_v46, %v501_v47 }
 0x153   :  { %3162 = vmatprep.subr.bf16.mxu1 %v12852_v50  ;;  %v565_v50 = vld [vmem:[#allocation2 + $0x968] sm:$0xff] }
 0x154   :  { %3188 = vmatpush1.bf16.msra.mxu0 %v12915_v52  ;;  %v13051_v52 = vcombine.low %v569_v41, %v573_v43  ;;  %v493_v57 = vld [vmem:[#allocation2 + $0x728] sm:$0xff]  ;;  %v13044_v61 = vcombine.high %v561_v48, %v565_v50 }
 0x155   :  { %3189 = vmatprep.subr.bf16.mxu0 %v12908_v56  ;;  %v489_v56 = vld [vmem:[#allocation2 + $0x708] sm:$0xff] }
 0x156   :  { %3163 = vmatpush2.bf16.msra.mxu1 %v12851_v55  ;;  %v12980_v55 = vcombine.high %v497_v46, %v501_v47  ;;  %v553_v60 = vld [vmem:[#allocation2 + $0x908] sm:$0xff]  ;;  %v12971_v7 = vcombine.low %v489_v56, %v493_v57 }
 0x157   :  { %3164 = vmatprep.subr.bf16.mxu1 %v12844_v62  ;;  %v557_v62 = vld [vmem:[#allocation2 + $0x928] sm:$0xff] }
 0x158   :  { %3190 = vmatpush1.bf16.msra.mxu0 %v12907_v0  ;;  %v13043_v0 = vcombine.low %v561_v48, %v565_v50  ;;  %v485_v3 = vld [vmem:[#allocation2 + $0x6e8] sm:$0xff]  ;;  %v13036_v5 = vcombine.high %v553_v60, %v557_v62 }
 0x159   :  { %3191 = vmatprep.subr.bf16.mxu0 %v12900_v2  ;;  %v481_v2 = vld [vmem:[#allocation2 + $0x6c8] sm:$0xff] }
 0x15a   :  { %3165 = vmatpush2.bf16.msra.mxu1 %v12843_v1  ;;  %v12972_v1 = vcombine.high %v489_v56, %v493_v57  ;;  %v545_v4 = vld [vmem:[#allocation2 + $0x8c8] sm:$0xff]  ;;  %v12963_v15 = vcombine.low %v481_v2, %v485_v3 }
 0x15b   :  { %3166 = vmatprep.subr.bf16.mxu1 %v12836_v6  ;;  %v549_v6 = vld [vmem:[#allocation2 + $0x8e8] sm:$0xff] }
 0x15c   :  { %3192 = vmatpush1.bf16.msra.mxu0 %v12899_v8  ;;  %v13035_v8 = vcombine.low %v553_v60, %v557_v62  ;;  %v477_v11 = vld [vmem:[#allocation2 + $0x6a8] sm:$0xff]  ;;  %v13028_v13 = vcombine.high %v545_v4, %v549_v6 }
 0x15d   :  { %3193 = vmatprep.subr.bf16.mxu0 %v12892_v10  ;;  %v473_v10 = vld [vmem:[#allocation2 + $0x688] sm:$0xff] }
 0x15e   :  { %3167 = vmatpush2.bf16.msra.mxu1 %v12835_v9  ;;  %v12964_v9 = vcombine.high %v481_v2, %v485_v3  ;;  %v537_v12 = vld [vmem:[#allocation2 + $0x888] sm:$0xff]  ;;  %v12955_v25 = vcombine.low %v473_v10, %v477_v11 }
 0x15f   :  { %3168 = vmatprep.subr.bf16.mxu1 %v12828_v14  ;;  %v541_v14 = vld [vmem:[#allocation2 + $0x8a8] sm:$0xff] }
 0x160   :  { %3194 = vmatpush1.bf16.msra.mxu0 %v12891_v17  ;;  %v13027_v17 = vcombine.low %v545_v4, %v549_v6  ;;  %v469_v22 = vld [vmem:[#allocation2 + $0x668] sm:$0xff]  ;;  %v13020_v24 = vcombine.high %v537_v12, %v541_v14 }
 0x161   :  { %3195 = vmatprep.subr.bf16.mxu0 %v12884_v20  ;;  %v465_v20 = vld [vmem:[#allocation2 + $0x648] sm:$0xff] }
 0x162   :  { %3169 = vmatpush2.bf16.msra.mxu1 %v12827_v18  ;;  %v12956_v18 = vcombine.high %v473_v10, %v477_v11  ;;  %v529_v23 = vld [vmem:[#allocation2 + $0x848] sm:$0xff]  ;;  %v12947_v33 = vcombine.low %v465_v20, %v469_v22 }
 0x163   :  { %3170 = vmatprep.subr.bf16.mxu1 %v12820_v53  ;;  %v533_v53 = vld [vmem:[#allocation2 + $0x868] sm:$0xff] }
 0x164   :  { %3196 = vmatpush1.bf16.msra.mxu0 %v12883_v26  ;;  %v13019_v26 = vcombine.low %v537_v12, %v541_v14  ;;  %v461_v29 = vld [vmem:[#allocation2 + $0x628] sm:$0xff]  ;;  %v13012_v31 = vcombine.high %v529_v23, %v533_v53 }
 0x165   :  { %3197 = vmatprep.subr.bf16.mxu0 %v12876_v28  ;;  %v457_v28 = vld [vmem:[#allocation2 + $0x608] sm:$0xff] }
 0x166   :  { %3171 = vmatpush2.bf16.msra.mxu1 %v12819_v27  ;;  %v12948_v27 = vcombine.high %v465_v20, %v469_v22  ;;  %v521_v30 = vld [vmem:[#allocation2 + $0x808] sm:$0xff]  ;;  %v12939_v43 = vcombine.low %v457_v28, %v461_v29 }
 0x167   :  { %3172 = vmatprep.subr.bf16.mxu1 %v12812_v32  ;;  %v525_v32 = vld [vmem:[#allocation2 + $0x828] sm:$0xff] }
 0x168   :  { %3198 = vmatpush1.bf16.msra.mxu0 %v12875_v34  ;;  %v13011_v34 = vcombine.low %v529_v23, %v533_v53  ;;  %v645_v39 = vld [vmem:[#allocation2 + $0xbe8] sm:$0xff]  ;;  %v13004_v41 = vcombine.high %v521_v30, %v525_v32 }
 0x169   :  { %3199 = vmatprep.subr.bf16.mxu0 %v12996_v38  ;;  %v641_v38 = vld [vmem:[#allocation2 + $0xbc8] sm:$0xff] }
 0x16a   :  { %3173 = vmatpush2.bf16.msra.mxu1 %v12811_v37  ;;  %v12940_v37 = vcombine.high %v457_v28, %v461_v29  ;;  %v705_v40 = vld [vmem:[#allocation2 + $0xdc8] sm:$0xff]  ;;  %v13124_v48 = vcombine.high %v641_v38, %v645_v39 }
 0x16b   :  { %3224 = vmatprep.subr.bf16.mxu1 %v13060_v42  ;;  %v709_v42 = vld [vmem:[#allocation2 + $0xde8] sm:$0xff] }
 0x16c   :  { %3200 = vmatpush2.bf16.msra.mxu0 %v12995_v44  ;;  %v13003_v44 = vcombine.low %v521_v30, %v525_v32  ;;  %v637_v46 = vld [vmem:[#allocation2 + $0xba8] sm:$0xff]  ;;  %v13187_v50 = vcombine.low %v705_v40, %v709_v42 }
 0x16d   :  { %3175 = vmatmul.mubr.bf16.vlgmr.msra.gmra.mxu1 %v16344_v16  ;;  %3201 = vmatprep.subr.bf16.mxu0 %v12988_v21  ;;  %v633_v21 = vld [vmem:[#allocation2 + $0xb88] sm:$0xff] }
 0x16e   :  { %3225 = vmatpush1.bf16.msra.mxu1 %v13059_v45  ;;  %3256 = vmatprep.mubr.bf16.mxu1 %v16358_v54  ;;  %v13188_v45 = vcombine.high %v705_v40, %v709_v42  ;;  %v697_v47 = vld [vmem:[#allocation2 + $0xd88] sm:$0xff]  ;;  %v13116_v57 = vcombine.high %v633_v21, %v637_v46 }
 0x16f   :  { %3226 = vmatprep.subr.bf16.mxu1 %v13052_v49  ;;  %v701_v49 = vld [vmem:[#allocation2 + $0xda8] sm:$0xff] }
 0x170   :  { %3202 = vmatpush2.bf16.msra.mxu0 %v12987_v51  ;;  %v13123_v51 = vcombine.low %v641_v38, %v645_v39  ;;  %v629_v56 = vld [vmem:[#allocation2 + $0xb68] sm:$0xff]  ;;  %v13179_v62 = vcombine.low %v697_v47, %v701_v49 }
 0x171   :  { %3203 = vmatprep.subr.bf16.mxu0 %v12980_v55  ;;  %v625_v55 = vld [vmem:[#allocation2 + $0xb48] sm:$0xff] }
 0x172   :  { %3227 = vmatpush1.bf16.msra.mxu1 %v13051_v52  ;;  %v13180_v52 = vcombine.high %v697_v47, %v701_v49  ;;  %v689_v60 = vld [vmem:[#allocation2 + $0xd48] sm:$0xff]  ;;  %v13108_v4 = vcombine.high %v625_v55, %v629_v56 }
 0x173   :  { %3228 = vmatprep.subr.bf16.mxu1 %v13044_v61  ;;  %v693_v61 = vld [vmem:[#allocation2 + $0xd68] sm:$0xff] }
 0x174   :  { %3204 = vmatpush2.bf16.msra.mxu0 %v12979_v63  ;;  %v13115_v63 = vcombine.low %v633_v21, %v637_v46  ;;  %v621_v2 = vld [vmem:[#allocation2 + $0xb28] sm:$0xff]  ;;  %v13171_v6 = vcombine.low %v689_v60, %v693_v61  ;;  %v326_v21 = vld [vmem:[#allocation2 + $0x1f0] sm:$0xff] }
 0x175   :  { %3205 = vmatprep.subr.bf16.mxu0 %v12972_v1  ;;  %v617_v1 = vld [vmem:[#allocation2 + $0xb08] sm:$0xff]  ;;  %v450_v46 = vld [vmem:[#allocation2 + $0x5d0] sm:$0xff] }
 0x176   :  { %3229 = vmatpush1.bf16.msra.mxu1 %v13043_v0  ;;  %v13172_v0 = vcombine.high %v689_v60, %v693_v61  ;;  %v681_v3 = vld [vmem:[#allocation2 + $0xd08] sm:$0xff]  ;;  %v13100_v12 = vcombine.high %v617_v1, %v621_v2  ;;  %v446_v60 = vld [vmem:[#allocation2 + $0x5b0] sm:$0xff] }
 0x177   :  { %3230 = vmatprep.subr.bf16.mxu1 %v13036_v5  ;;  %v685_v5 = vld [vmem:[#allocation2 + $0xd28] sm:$0xff] }
 0x178   :  { %3206 = vmatpush2.bf16.msra.mxu0 %v12971_v7  ;;  %v13107_v7 = vcombine.low %v625_v55, %v629_v56  ;;  %v613_v10 = vld [vmem:[#allocation2 + $0xae8] sm:$0xff]  ;;  %v13163_v14 = vcombine.low %v681_v3, %v685_v5  ;;  %v318_v55 = vld [vmem:[#allocation2 + $0x1b0] sm:$0xff] }
 0x179   :  { %3207 = vmatprep.subr.bf16.mxu0 %v12964_v9  ;;  %v609_v9 = vld [vmem:[#allocation2 + $0xac8] sm:$0xff]  ;;  %v442_v56 = vld [vmem:[#allocation2 + $0x590] sm:$0xff] }
 0x17a   :  { %3231 = vmatpush1.bf16.msra.mxu1 %v13035_v8  ;;  %v13164_v8 = vcombine.high %v681_v3, %v685_v5  ;;  %v673_v11 = vld [vmem:[#allocation2 + $0xcc8] sm:$0xff]  ;;  %v13092_v23 = vcombine.high %v609_v9, %v613_v10  ;;  %v12926_v3 = vcombine.high %v442_v56, %v446_v60  ;;  %v15795_v5 = vld [vmem:[%s16796_s0 + $0x18] ss:$0 sps:$4 sm:$0xff]  }
 0x17b   :  { %3232 = vmatprep.subr.bf16.mxu1 %v13028_v13  ;;  %v677_v13 = vld [vmem:[#allocation2 + $0xce8] sm:$0xff] }
 0x17c   :  { %3208 = vmatpush2.bf16.msra.mxu0 %v12963_v15  ;;  %v13099_v15 = vcombine.low %v617_v1, %v621_v2  ;;  %v605_v20 = vld [vmem:[#allocation2 + $0xaa8] sm:$0xff]  ;;  %v13155_v53 = vcombine.low %v673_v11, %v677_v13  ;;  %v310_v1 = vld [vmem:[#allocation2 + $0x170] sm:$0xff] }
 0x17d   :  { %3209 = vmatprep.subr.bf16.mxu0 %v12956_v18  ;;  %v601_v18 = vld [vmem:[#allocation2 + $0xa88] sm:$0xff]  ;;  %v434_v2 = vld [vmem:[#allocation2 + $0x550] sm:$0xff] }
 0x17e   :  { %3233 = vmatpush1.bf16.msra.mxu1 %v13027_v17  ;;  %v13156_v17 = vcombine.high %v673_v11, %v677_v13  ;;  %v665_v22 = vld [vmem:[#allocation2 + $0xc88] sm:$0xff]  ;;  %v13084_v30 = vcombine.high %v601_v18, %v605_v20  ;;  %v426_v11 = vld [vmem:[#allocation2 + $0x510] sm:$0xff] }
 0x17f   :  { %3234 = vmatprep.subr.bf16.mxu1 %v13020_v24  ;;  %v669_v24 = vld [vmem:[#allocation2 + $0xca8] sm:$0xff]  ;;  %v430_v13 = vld [vmem:[#allocation2 + $0x530] sm:$0xff] }
 0x180   :  { %3210 = vmatpush2.bf16.msra.mxu0 %v12955_v25  ;;  %v13091_v25 = vcombine.low %v609_v9, %v613_v10  ;;  %v597_v28 = vld [vmem:[#allocation2 + $0xa68] sm:$0xff]  ;;  %v13147_v32 = vcombine.low %v665_v22, %v669_v24  ;;  %v298_v9 = vld [vmem:[#allocation2 + $0x110] sm:$0xff] }
 0x181   :  { %3211 = vmatprep.subr.bf16.mxu0 %v12948_v27  ;;  %v593_v27 = vld [vmem:[#allocation2 + $0xa48] sm:$0xff]  ;;  %v302_v10 = vld [vmem:[#allocation2 + $0x130] sm:$0xff] }
 0x182   :  { %3235 = vmatpush1.bf16.msra.mxu1 %v13019_v26  ;;  %v13148_v26 = vcombine.high %v665_v22, %v669_v24  ;;  %v657_v29 = vld [vmem:[#allocation2 + $0xc48] sm:$0xff]  ;;  %v13076_v40 = vcombine.high %v593_v27, %v597_v28  ;;  %v418_v22 = vld [vmem:[#allocation2 + $0x4d0] sm:$0xff] }
 0x183   :  { %3236 = vmatprep.subr.bf16.mxu1 %v13012_v31  ;;  %v661_v31 = vld [vmem:[#allocation2 + $0xc68] sm:$0xff]  ;;  %v422_v24 = vld [vmem:[#allocation2 + $0x4f0] sm:$0xff] }
 0x184   :  { %3212 = vmatpush2.bf16.msra.mxu0 %v12947_v33  ;;  %v13083_v33 = vcombine.low %v601_v18, %v605_v20  ;;  %v589_v38 = vld [vmem:[#allocation2 + $0xa28] sm:$0xff]  ;;  %v13139_v42 = vcombine.low %v657_v29, %v661_v31  ;;  %v290_v18 = vld [vmem:[#allocation2 + $0xd0] sm:$0xff] }
 0x185   :  { %3213 = vmatprep.subr.bf16.mxu0 %v12940_v37  ;;  %v585_v37 = vld [vmem:[#allocation2 + $0xa08] sm:$0xff]  ;;  %v294_v20 = vld [vmem:[#allocation2 + $0xf0] sm:$0xff] }
 0x186   :  { %3237 = vmatpush1.bf16.msra.mxu1 %v13011_v34  ;;  %v13140_v34 = vcombine.high %v657_v29, %v661_v31  ;;  %v649_v39 = vld [vmem:[#allocation2 + $0xc08] sm:$0xff]  ;;  %v13068_v47 = vcombine.high %v585_v37, %v589_v38  ;;  %v410_v29 = vld [vmem:[#allocation2 + $0x490] sm:$0xff] }
 0x187   :  { %3238 = vmatprep.subr.bf16.mxu1 %v13004_v41  ;;  %v653_v41 = vld [vmem:[#allocation2 + $0xc28] sm:$0xff]  ;;  %v414_v31 = vld [vmem:[#allocation2 + $0x4b0] sm:$0xff] }
 0x188   :  { %3214 = vmatpush2.bf16.msra.mxu0 %v12939_v43  ;;  %v13075_v43 = vcombine.low %v593_v27, %v597_v28  ;;  %v13131_v49 = vcombine.low %v649_v39, %v653_v41  ;;  %v282_v27 = vld [vmem:[#allocation2 + $0x90] sm:$0xff] }
 0x189   :  { %3265 = vmatprep.subr.bf16.mxu0 %v13188_v45  ;;  %v322_v45 = vld [vmem:[#allocation2 + $0x1d0] sm:$0xff] }
 0x18a   :  { %3239 = vmatpush1.bf16.msra.mxu1 %v13003_v44  ;;  %v13132_v44 = vcombine.high %v649_v39, %v653_v41  ;;  %v12805_v61 = vcombine.low %v322_v45, %v326_v21  ;;  %v286_v28 = vld [vmem:[#allocation2 + $0xb0] sm:$0xff] }
 0x18b   :  { %3240 = vmatprep.subr.bf16.mxu1 %v13124_v48  ;;  %3216 = vmatmul.mubr.bf16.vlgmr.msra.gmra.mxu0 %v16348_v19  ;;  %v454_v48 = vld [vmem:[#allocation2 + $0x5f0] sm:$0xff] }
 0x18c   :  { %3266 = vmatpush1.bf16.msra.mxu0 %v13187_v50  ;;  %3297 = vmatprep.mubr.bf16.mxu0 %v16164_v36  ;;  %v13067_v50 = vcombine.low %v585_v37, %v589_v38  ;;  %v274_v37 = vld [vmem:[#allocation2 + $0x50] sm:$0xff] }
 0x18d   :  { %3267 = vmatprep.subr.bf16.mxu0 %v13180_v52  ;;  %v314_v52 = vld [vmem:[#allocation2 + $0x190] sm:$0xff] }
 0x18e   :  { %3241 = vmatpush2.bf16.msra.mxu1 %v13123_v51  ;;  %v12806_v51 = vcombine.high %v322_v45, %v326_v21  ;;  %v278_v38 = vld [vmem:[#allocation2 + $0x70] sm:$0xff] }
 0x18f   :  { %3242 = vmatprep.subr.bf16.mxu1 %v13116_v57  ;;  %v12934_v57 = vcombine.high %v450_v46, %v454_v48  ;;  %v402_v39 = vld [vmem:[#allocation2 + $0x450] sm:$0xff] }
 0x190   :  { %3268 = vmatpush1.bf16.msra.mxu0 %v13179_v62  ;;  %v12933_v62 = vcombine.low %v450_v46, %v454_v48  ;;  %v406_v41 = vld [vmem:[#allocation2 + $0x470] sm:$0xff] }
 0x191   :  { %3269 = vmatprep.subr.bf16.mxu0 %v13172_v0  ;;  %v306_v0 = vld [vmem:[#allocation2 + $0x150] sm:$0xff] }
 0x192   :  { %3243 = vmatpush2.bf16.msra.mxu1 %v13115_v63  ;;  %v12798_v63 = vcombine.high %v314_v52, %v318_v55  ;;  %v266_v45 = vld [vmem:[#allocation2 + $0x10] sm:$0xff] }
 0x193   :  { %3244 = vmatprep.subr.bf16.mxu1 %v13108_v4  ;;  %v438_v4 = vld [vmem:[#allocation2 + $0x570] sm:$0xff] }
 0x194   :  { %3270 = vmatpush1.bf16.msra.mxu0 %v13171_v6  ;;  %v12797_v6 = vcombine.low %v314_v52, %v318_v55  ;;  %v270_v21 = vld [vmem:[#allocation2 + $0x30] sm:$0xff] }
 0x195   :  { %3271 = vmatprep.subr.bf16.mxu0 %v13164_v8  ;;  %v12790_v8 = vcombine.high %v306_v0, %v310_v1  ;;  %v394_v46 = vld [vmem:[#allocation2 + $0x410] sm:$0xff] }
 0x196   :  { %3245 = vmatpush2.bf16.msra.mxu1 %v13107_v7  ;;  %v12925_v7 = vcombine.low %v442_v56, %v446_v60  ;;  %v398_v48 = vld [vmem:[#allocation2 + $0x430] sm:$0xff] }
 0x197   :  { %3246 = vmatprep.subr.bf16.mxu1 %v13100_v12  ;;  %v12918_v12 = vcombine.high %v434_v2, %v438_v4  ;;  %v386_v52 = vld [vmem:[#allocation2 + $0x3d0] sm:$0xff] }
 0x198   :  { %3272 = vmatpush1.bf16.msra.mxu0 %v13163_v14  ;;  %v12789_v14 = vcombine.low %v306_v0, %v310_v1  ;;  %v390_v55 = vld [vmem:[#allocation2 + $0x3f0] sm:$0xff] }
 0x199   :  { %3273 = vmatprep.subr.bf16.mxu0 %v13156_v17  ;;  %v12782_v17 = vcombine.high %v298_v9, %v302_v10  ;;  %v514_v56 = vld [vmem:[#allocation2 + $0x7d0] sm:$0xff] }
 0x19a   :  { %3247 = vmatpush2.bf16.msra.mxu1 %v13099_v15  ;;  %v12917_v15 = vcombine.low %v434_v2, %v438_v4  ;;  %v518_v60 = vld [vmem:[#allocation2 + $0x7f0] sm:$0xff] }
 0x19b   :  { %3248 = vmatprep.subr.bf16.mxu1 %v13092_v23  ;;  %v12910_v23 = vcombine.high %v426_v11, %v430_v13  ;;  %v378_v0 = vld [vmem:[#allocation2 + $0x390] sm:$0xff] }
 0x19c   :  { %3274 = vmatpush1.bf16.msra.mxu0 %v13155_v53  ;;  %v12781_v53 = vcombine.low %v298_v9, %v302_v10  ;;  %v382_v1 = vld [vmem:[#allocation2 + $0x3b0] sm:$0xff] }
 0x19d   :  { %3275 = vmatprep.subr.bf16.mxu0 %v13148_v26  ;;  %v12774_v26 = vcombine.high %v290_v18, %v294_v20  ;;  %v506_v2 = vld [vmem:[#allocation2 + $0x790] sm:$0xff] }
 0x19e   :  { %3249 = vmatpush2.bf16.msra.mxu1 %v13091_v25  ;;  %v12909_v25 = vcombine.low %v426_v11, %v430_v13  ;;  %v510_v4 = vld [vmem:[#allocation2 + $0x7b0] sm:$0xff] }
 0x19f   :  { %3250 = vmatprep.subr.bf16.mxu1 %v13084_v30  ;;  %v12902_v30 = vcombine.high %v418_v22, %v422_v24  ;;  %v374_v9 = vld [vmem:[#allocation2 + $0x370] sm:$0xff]  ;;  %v12990_v11 = vcombine.high %v506_v2, %v510_v4 }
 0x1a0   :  { %3276 = vmatpush1.bf16.msra.mxu0 %v13147_v32  ;;  %v12773_v32 = vcombine.low %v290_v18, %v294_v20  ;;  %v498_v10 = vld [vmem:[#allocation2 + $0x750] sm:$0xff]  ;;  %v12989_v20 = vcombine.low %v506_v2, %v510_v4 }
 0x1a1   :  { %3277 = vmatprep.subr.bf16.mxu0 %v13140_v34  ;;  %v12766_v34 = vcombine.high %v282_v27, %v286_v28  ;;  %v334_v2 = vld [vmem:[#allocation2 + $0x230] sm:$0xff] }
 0x1a2   :  { %3251 = vmatpush2.bf16.msra.mxu1 %v13083_v33  ;;  %v12901_v33 = vcombine.low %v418_v22, %v422_v24  ;;  %v366_v24 = vld [vmem:[#allocation2 + $0x330] sm:$0xff] }
 0x1a3   :  { %3252 = vmatprep.subr.bf16.mxu1 %v13076_v40  ;;  %v12894_v40 = vcombine.high %v410_v29, %v414_v31 }
 0x1a4   :  { %3278 = vmatpush1.bf16.msra.mxu0 %v13139_v42  ;;  %v12765_v42 = vcombine.low %v282_v27, %v286_v28  ;;  %v494_v27 = vld [vmem:[#allocation2 + $0x730] sm:$0xff] }
 0x1a5   :  { %3279 = vmatprep.subr.bf16.mxu0 %v13132_v44  ;;  %v12758_v44 = vcombine.high %v274_v37, %v278_v38 }
 0x1a6   :  { %3253 = vmatpush2.bf16.msra.mxu1 %v13075_v43  ;;  %v12893_v43 = vcombine.low %v410_v29, %v414_v31 }
 0x1a7   :  { %3254 = vmatprep.subr.bf16.mxu1 %v13068_v47  ;;  %v12886_v47 = vcombine.high %v402_v39, %v406_v41 }
 0x1a8   :  { %3280 = vmatpush1.bf16.msra.mxu0 %v13131_v49  ;;  %v12757_v49 = vcombine.low %v274_v37, %v278_v38  ;;  %v354_v37 = vld [vmem:[#allocation2 + $0x2d0] sm:$0xff] }
 0x1a9   :  { %3306 = vmatprep.subr.bf16.mxu0 %v12806_v51  ;;  %v12750_v51 = vcombine.high %v266_v45, %v270_v21  ;;  %v358_v38 = vld [vmem:[#allocation2 + $0x2f0] sm:$0xff] }
 0x1aa   :  { %3255 = vmatpush2.bf16.msra.mxu1 %v13067_v50  ;;  %v12885_v50 = vcombine.low %v402_v39, %v406_v41  ;;  %v482_v39 = vld [vmem:[#allocation2 + $0x6d0] sm:$0xff] }
 0x1ab   :  { %3347 = vmatprep.subr.bf16.mxu1 %v12934_v57  ;;  %3298 = vmatmul.mubr.bf16.vlgmr.msra.gmra.mxu0 %v15795_v5  ;;  %v12878_v57 = vcombine.high %v394_v46, %v398_v48  ;;  %v12869_v5 = vcombine.low %v386_v52, %v390_v55 }
 0x1ac   :  { %3307 = vmatpush1.bf16.msra.mxu0 %v12805_v61  ;;  %3338 = vmatprep.mubr.bf16.mxu0 %v16334_v58  ;;  %v12749_v61 = vcombine.low %v266_v45, %v270_v21  ;;  %v12838_v45 = vcombine.high %v354_v37, %v358_v38  ;;  %v346_v21 = vld [vmem:[#allocation2 + $0x290] sm:$0xff] }
 0x1ad   :  { %3257 = vmatmul.mubr.bf16.vlgmr.msra.gmra.mxu1 %v16369_v35  ;;  %3308 = vmatprep.subr.bf16.mxu0 %v12798_v63  ;;  %v12870_v63 = vcombine.high %v386_v52, %v390_v55  ;;  %v338_v55 = vld [vmem:[#allocation2 + $0x250] sm:$0xff] }
 0x1ae   :  { %3348 = vmatpush1.bf16.msra.mxu1 %v12933_v62  ;;  %3379 = vmatprep.mubr.bf16.mxu1 %v16338_v59  ;;  %v12877_v62 = vcombine.low %v394_v46, %v398_v48  ;;  %v350_v46 = vld [vmem:[#allocation2 + $0x2b0] sm:$0xff] }
 0x1af   :  { %3349 = vmatprep.subr.bf16.mxu1 %v12926_v3  ;;  %v12998_v3 = vcombine.high %v514_v56, %v518_v60  ;;  %v12830_v52 = vcombine.high %v346_v21, %v350_v46 }
 0x1b0   :  { %3309 = vmatpush1.bf16.msra.mxu0 %v12797_v6  ;;  %v12997_v6 = vcombine.low %v514_v56, %v518_v60  ;;  %v342_v56 = vld [vmem:[#allocation2 + $0x270] sm:$0xff] }
 0x1b1   :  { %3310 = vmatprep.subr.bf16.mxu0 %v12790_v8  ;;  %v370_v8 = vld [vmem:[#allocation2 + $0x350] sm:$0xff] }
 0x1b2   :  { %3350 = vmatpush1.bf16.msra.mxu1 %v12925_v7  ;;  %v12862_v7 = vcombine.high %v378_v0, %v382_v1  ;;  %v12854_v22 = vcombine.high %v370_v8, %v374_v9  ;;  %v12853_v31 = vcombine.low %v370_v8, %v374_v9  ;;  %v578_v9 = vld [vmem:[#allocation2 + $0x9d0] sm:$0xff] }
 0x1b3   :  { %3351 = vmatprep.subr.bf16.mxu1 %v12918_v12  ;;  %v502_v12 = vld [vmem:[#allocation2 + $0x770] sm:$0xff] }
 0x1b4   :  { %3311 = vmatpush1.bf16.msra.mxu0 %v12789_v14 }
 0x1b5   :  { %3312 = vmatprep.subr.bf16.mxu0 %v12782_v17 }
 0x1b6   :  { %3352 = vmatpush1.bf16.msra.mxu1 %v12917_v15  ;;  %v12861_v15 = vcombine.low %v378_v0, %v382_v1  ;;  %v12822_v0 = vcombine.high %v338_v55, %v342_v56  ;;  %v330_v1 = vld [vmem:[#allocation2 + $0x210] sm:$0xff] }
 0x1b7   :  { %3353 = vmatprep.subr.bf16.mxu1 %v12910_v23  ;;  %v362_v23 = vld [vmem:[#allocation2 + $0x310] sm:$0xff]  ;;  %v12814_v8 = vcombine.high %v330_v1, %v334_v2 }
 0x1b8   :  { %3313 = vmatpush1.bf16.msra.mxu0 %v12781_v53  ;;  %v490_v53 = vld [vmem:[#allocation2 + $0x710] sm:$0xff] }
 0x1b9   :  { %3314 = vmatprep.subr.bf16.mxu0 %v12774_v26  ;;  %v12982_v26 = vcombine.high %v498_v10, %v502_v12  ;;  %v12974_v41 = vcombine.high %v490_v53, %v494_v27 }
 0x1ba   :  { %3354 = vmatpush1.bf16.msra.mxu1 %v12909_v25 }
 0x1bb   :  { %3355 = vmatprep.subr.bf16.mxu1 %v12902_v30 }
 0x1bc   :  { %3315 = vmatpush1.bf16.msra.mxu0 %v12773_v32 }
 0x1bd   :  { %3316 = vmatprep.subr.bf16.mxu0 %v12766_v34  ;;  %v12846_v34 = vcombine.high %v362_v23, %v366_v24 }
 0x1be   :  { %3356 = vmatpush1.bf16.msra.mxu1 %v12901_v33  ;;  %v12981_v33 = vcombine.low %v498_v10, %v502_v12  ;;  %v582_v10 = vld [vmem:[#allocation2 + $0x9f0] sm:$0xff] }
 0x1bf   :  { %3357 = vmatprep.subr.bf16.mxu1 %v12894_v40 }
 0x1c0   :  { %3317 = vmatpush1.bf16.msra.mxu0 %v12765_v42  ;;  %v486_v42 = vld [vmem:[#allocation2 + $0x6f0] sm:$0xff] }
 0x1c1   :  { %3318 = vmatprep.subr.bf16.mxu0 %v12758_v44  ;;  %v12973_v44 = vcombine.low %v490_v53, %v494_v27  ;;  %v12966_v48 = vcombine.high %v482_v39, %v486_v42  ;;  %v702_v53 = vld [vmem:[#allocation2 + $0xdb0] sm:$0xff] }
 0x1c2   :  { %3358 = vmatpush1.bf16.msra.mxu1 %v12893_v43  ;;  %v12845_v43 = vcombine.low %v362_v23, %v366_v24  ;;  %v698_v23 = vld [vmem:[#allocation2 + $0xd90] sm:$0xff] }
 0x1c3   :  { %3359 = vmatprep.subr.bf16.mxu1 %v12886_v47  ;;  %v474_v47 = vld [vmem:[#allocation2 + $0x690] sm:$0xff] }
 0x1c4   :  { %3319 = vmatpush1.bf16.msra.mxu0 %v12757_v49  ;;  %v478_v49 = vld [vmem:[#allocation2 + $0x6b0] sm:$0xff] }
 0x1c5   :  { %3320 = vmatprep.subr.bf16.mxu0 %v12750_v51  ;;  %v12965_v51 = vcombine.low %v482_v39, %v486_v42  ;;  %v12958_v60 = vcombine.high %v474_v47, %v478_v49  ;;  %v682_v42 = vld [vmem:[#allocation2 + $0xd10] sm:$0xff] }
 0x1c6   :  { %3360 = vmatpush1.bf16.msra.mxu1 %v12885_v50  ;;  %v12837_v50 = vcombine.low %v354_v37, %v358_v38  ;;  %v13181_v38 = vcombine.low %v698_v23, %v702_v53 }
 0x1c7   :  { %3361 = vmatprep.subr.bf16.mxu1 %v12878_v57  ;;  %v466_v57 = vld [vmem:[#allocation2 + $0x650] sm:$0xff] }
 0x1c8   :  { %3321 = vmatpush1.bf16.msra.mxu0 %v12749_v61  ;;  %v470_v61 = vld [vmem:[#allocation2 + $0x670] sm:$0xff] }
 0x1c9   :  { %3322 = vmatprep.subr.bf16.mxu0 %v12870_v63  ;;  %v12957_v63 = vcombine.low %v474_v47, %v478_v49  ;;  %v12950_v4 = vcombine.high %v466_v57, %v470_v61  ;;  %v546_v49 = vld [vmem:[#allocation2 + $0x8d0] sm:$0xff] }
 0x1ca   :  { %3362 = vmatpush1.bf16.msra.mxu1 %v12877_v62  ;;  %v12829_v62 = vcombine.low %v346_v21, %v350_v46 }
 0x1cb   :  { %3363 = vmatprep.subr.bf16.mxu1 %v12998_v3  ;;  %v3012_v13 = vpop.f32.mrf.mxu0  ;;  %v458_v3 = vld [vmem:[#allocation2 + $0x610] sm:$0xff] }
 0x1cc   :  { %3323 = vmatpush2.bf16.msra.mxu0 %v12869_v5  ;;  %v462_v5 = vld [vmem:[#allocation2 + $0x630] sm:$0xff] }
 0x1cd   :  { %v3053_v14 = vpop.f32.mrf.mxu1  ;;  %v3014_v18 = vpop.f32.mrf.mxu0  ;;  %3324 = vmatprep.subr.bf16.mxu0 %v12862_v7  ;;  %v12949_v7 = vcombine.low %v466_v57, %v470_v61  ;;  %v12942_v12 = vcombine.high %v458_v3, %v462_v5 }
 0x1ce   :  { %v16383_v17 = vadd.f32 %v3053_v14, %v3012_v13  ;;  %3364 = vmatpush2.bf16.msra.mxu1 %v12997_v6  ;;  %v12821_v6 = vcombine.low %v338_v55, %v342_v56  ;;  %v710_v13 = vld [vmem:[#allocation2 + $0xdf0] sm:$0xff]  ;;  %v12813_v14 = vcombine.low %v330_v1, %v334_v2  ;;  %v16165_v1 = vmov 1966171168  }
 0x1cf   :  { %v3055_v25 = vpop.f32.mrf.mxu1  ;;  %3365 = vmatprep.subr.bf16.mxu1 %v12990_v11  ;;  %v3016_v29 = vpop.f32.mrf.mxu0  ;;  %v706_v11 = vld [vmem:[#allocation2 + $0xdd0] sm:$0xff]  ;;  %v3645_v2 = vunpack.c.l.s4 %v16165_v1 }
 0x1d0   :  { %v16385_v28 = vadd.f32 %v3055_v25, %v3014_v18  ;;  %3325 = vmatpush2.bf16.msra.mxu0 %v12861_v15  ;;  %v12941_v15 = vcombine.low %v458_v3, %v462_v5  ;;  %v13062_v18 = vcombine.high %v578_v9, %v582_v10  ;;  %v13190_v24 = vcombine.high %v706_v11, %v710_v13  ;;  %v562_v29 = vld [vmem:[#allocation2 + $0x950] sm:$0xff] }
 0x1d1   :  { %v3057_v30 = vpop.f32.mrf.mxu1  ;;  %v3017_v32 = vpop.f32.mrf.mxu0  ;;  %3326 = vmatprep.subr.bf16.mxu0 %v12854_v22  ;;  %v574_v22 = vld [vmem:[#allocation2 + $0x9b0] sm:$0xff]  ;;  %v13061_v25 = vcombine.low %v578_v9, %v582_v10  ;;  %v3647_v3 = vlaneseq }
 0x1d2   :  { %3366 = vmatpush2.bf16.msra.mxu1 %v12989_v20  ;;  %v570_v20 = vld [vmem:[#allocation2 + $0x990] sm:$0xff]  ;;  %v13182_v32 = vcombine.high %v698_v23, %v702_v53 }
 0x1d3   :  { %v3058_v40 = vpop.f32.mrf.mxu1  ;;  %3367 = vmatprep.subr.bf16.mxu1 %v12982_v26  ;;  %v13189_v26 = vcombine.low %v706_v11, %v710_v13  ;;  %v13054_v27 = vcombine.high %v570_v20, %v574_v22  ;;  %v566_v30 = vld [vmem:[#allocation2 + $0x970] sm:$0xff]  ;;  %v13053_v37 = vcombine.low %v570_v20, %v574_v22  ;;  %v3648_v13 = vshrl.u32 %v3647_v3, 7 }
 0x1d4   :  { %3327 = vmatpush2.bf16.msra.mxu0 %v12853_v31  ;;  %v690_v31 = vld [vmem:[#allocation2 + $0xd50] sm:$0xff]  ;;  %v13046_v39 = vcombine.high %v562_v29, %v566_v30  ;;  %v13045_v46 = vcombine.low %v562_v29, %v566_v30  ;;  %v16397_v29 = vld.sshfl [vmem:[#allocation4] sm:$0xff pattern:$0x75316420] }
 0x1d5   :  { %3328 = vmatprep.subr.bf16.mxu0 %v12846_v34  ;;  %v554_v40 = vld [vmem:[#allocation2 + $0x910] sm:$0xff] }
 0x1d6   :  { %3368 = vmatpush2.bf16.msra.mxu1 %v12981_v33  ;;  %v694_v33 = vld [vmem:[#allocation2 + $0xd70] sm:$0xff] }
 0x1d7   :  { %3369 = vmatprep.subr.bf16.mxu1 %v12974_v41  ;;  %v558_v41 = vld [vmem:[#allocation2 + $0x930] sm:$0xff]  ;;  %v13173_v47 = vcombine.low %v690_v31, %v694_v33 }
 0x1d8   :  { %3329 = vmatpush2.bf16.msra.mxu0 %v12845_v43  ;;  %v678_v56 = vld [vmem:[#allocation2 + $0xcf0] sm:$0xff]  ;;  %v13037_v57 = vcombine.low %v554_v40, %v558_v41 }
 0x1d9   :  { %3330 = vmatprep.subr.bf16.mxu0 %v12838_v45  ;;  %v686_v45 = vld [vmem:[#allocation2 + $0xd30] sm:$0xff] }
 0x1da   :  { %3370 = vmatpush2.bf16.msra.mxu1 %v12973_v44  ;;  %v13174_v44 = vcombine.high %v690_v31, %v694_v33  ;;  %v13166_v55 = vcombine.high %v682_v42, %v686_v45  ;;  %v670_v5 = vld [vmem:[#allocation2 + $0xcb0] sm:$0xff] }
 0x1db   :  { %3371 = vmatprep.subr.bf16.mxu1 %v12966_v48  ;;  %v13038_v48 = vcombine.high %v554_v40, %v558_v41  ;;  %v530_v9 = vld [vmem:[#allocation2 + $0x850] sm:$0xff]  ;;  %v327_v40 = vld [vmem:[#allocation2 + $0x1f8] sm:$0xff] }
 0x1dc   :  { %3331 = vmatpush2.bf16.msra.mxu0 %v12837_v50  ;;  %v550_v50 = vld [vmem:[#allocation2 + $0x8f0] sm:$0xff] }
 0x1dd   :  { %3332 = vmatprep.subr.bf16.mxu0 %v12830_v52  ;;  %v13030_v61 = vcombine.high %v546_v49, %v550_v50  ;;  %v534_v10 = vld [vmem:[#allocation2 + $0x870] sm:$0xff] }
 0x1de   :  { %3372 = vmatpush2.bf16.msra.mxu1 %v12965_v51  ;;  %v674_v51 = vld [vmem:[#allocation2 + $0xcd0] sm:$0xff]  ;;  %v13014_v23 = vcombine.high %v530_v9, %v534_v10  ;;  %v13013_v30 = vcombine.low %v530_v9, %v534_v10 }
 0x1df   :  { %3373 = vmatprep.subr.bf16.mxu1 %v12958_v60  ;;  %v13165_v60 = vcombine.low %v682_v42, %v686_v45  ;;  %v658_v11 = vld [vmem:[#allocation2 + $0xc50] sm:$0xff] }
 0x1e0   :  { %3333 = vmatpush2.bf16.msra.mxu0 %v12829_v62  ;;  %v538_v62 = vld [vmem:[#allocation2 + $0x890] sm:$0xff] }
 0x1e1   :  { %3334 = vmatprep.subr.bf16.mxu0 %v12822_v0  ;;  %v666_v0 = vld [vmem:[#allocation2 + $0xc90] sm:$0xff] }
 0x1e2   :  { %3374 = vmatpush2.bf16.msra.mxu1 %v12957_v63  ;;  %v542_v63 = vld [vmem:[#allocation2 + $0x8b0] sm:$0xff]  ;;  %v13149_v22 = vcombine.low %v666_v0, %v670_v5 }
 0x1e3   :  { %3375 = vmatprep.subr.bf16.mxu1 %v12950_v4  ;;  %v13158_v4 = vcombine.high %v674_v51, %v678_v56  ;;  %v522_v20 = vld [vmem:[#allocation2 + $0x810] sm:$0xff] }
 0x1e4   :  { %3335 = vmatpush2.bf16.msra.mxu0 %v12821_v6  ;;  %v13029_v6 = vcombine.low %v546_v49, %v550_v50  ;;  %v650_v53 = vld [vmem:[#allocation2 + $0xc10] sm:$0xff]  ;;  %v319_v49 = vld [vmem:[#allocation2 + $0x1b8] sm:$0xff] }
 0x1e5   :  { %3336 = vmatprep.subr.bf16.mxu0 %v12814_v8  ;;  %v13022_v8 = vcombine.high %v538_v62, %v542_v63  ;;  %v642_v33 = vld [vmem:[#allocation2 + $0xbd0] sm:$0xff] }
 0x1e6   :  { %3376 = vmatpush2.bf16.msra.mxu1 %v12949_v7  ;;  %v13157_v7 = vcombine.low %v674_v51, %v678_v56  ;;  %v618_v10 = vld [vmem:[#allocation2 + $0xb10] sm:$0xff] }
 0x1e7   :  { %3377 = vmatprep.subr.bf16.mxu1 %v12942_v12  ;;  %v3646_v12 = vunpack.c.0.s8 %v3645_v2  ;;  %v15796_v2 = vld [vmem:[%s16796_s0 + $0x18] ss:$0 sps:$4 sm:$0xff]  }
 0x1e8   :  { %3337 = vmatpush2.bf16.msra.mxu0 %v12813_v14  ;;  %v13150_v14 = vcombine.high %v666_v0, %v670_v5  ;;  %v311_v0 = vld [vmem:[#allocation2 + $0x178] sm:$0xff] }
 0x1e9   :  { %3388 = vmatprep.subr.bf16.mxu0 %v13062_v18  ;;  %v13021_v18 = vcombine.low %v538_v62, %v542_v63  ;;  %v307_v63 = vld [vmem:[#allocation2 + $0x158] sm:$0xff] }
 0x1ea   :  { %3378 = vmatpush2.bf16.msra.mxu1 %v12941_v15  ;;  %v662_v15 = vld [vmem:[#allocation2 + $0xc70] sm:$0xff] }
 0x1eb   :  { %3429 = vmatprep.subr.bf16.mxu1 %v13190_v24  ;;  %3339 = vmatmul.mubr.bf16.vlgmr.msra.gmra.mxu0 %v16344_v16  ;;  %v526_v24 = vld [vmem:[#allocation2 + $0x830] sm:$0xff]  ;;  %v13141_v31 = vcombine.low %v658_v11, %v662_v15 }
 0x1ec   :  { %3389 = vmatpush1.bf16.msra.mxu0 %v13061_v25  ;;  %3420 = vmatprep.mubr.bf16.mxu0 %v16358_v54  ;;  %v654_v25 = vld [vmem:[#allocation2 + $0xc30] sm:$0xff]  ;;  %v13005_v41 = vcombine.low %v522_v20, %v526_v24 }
 0x1ed   :  { %v16388_v34 = vpop.f32.mrf.mxu1  ;;  %3380 = vmatmul.mubr.bf16.vlgmr.msra.gmra.mxu1 %v16348_v19  ;;  %3390 = vmatprep.subr.bf16.mxu0 %v13054_v27  ;;  %v13142_v27 = vcombine.high %v658_v11, %v662_v15  ;;  %v13133_v42 = vcombine.low %v650_v53, %v654_v25  ;;  %v622_v11 = vld [vmem:[#allocation2 + $0xb30] sm:$0xff] }
 0x1ee   :  { %3430 = vmatpush1.bf16.msra.mxu1 %v13189_v26  ;;  %3461 = vmatprep.mubr.bf16.mxu1 %v16164_v36  ;;  %v16395_v26 = vsub.s32 %v3646_v12, %v3648_v13  ;;  %v299_v12 = vld [vmem:[#allocation2 + $0x118] sm:$0xff] }
 0x1ef   :  { %v16391_v43 = vpop.f32.mrf.mxu1  ;;  %3431 = vmatprep.subr.bf16.mxu1 %v13182_v32  ;;  %v13006_v32 = vcombine.high %v522_v20, %v526_v24  ;;  %v614_v24 = vld [vmem:[#allocation2 + $0xaf0] sm:$0xff] }
 0x1f0   :  { %3391 = vmatpush1.bf16.msra.mxu0 %v13053_v37  ;;  %v646_v37 = vld [vmem:[#allocation2 + $0xbf0] sm:$0xff] }
 0x1f1   :  { %v3139_v21 = vpop.f32.mrf.mxu1  ;;  %3392 = vmatprep.subr.bf16.mxu0 %v13046_v39  ;;  %v13134_v39 = vcombine.high %v650_v53, %v654_v25  ;;  %v13126_v45 = vcombine.high %v642_v33, %v646_v37  ;;  %v13125_v50 = vcombine.low %v642_v33, %v646_v37  ;;  %v291_v53 = vld [vmem:[#allocation2 + $0xd8] sm:$0xff]  ;;  %v606_v33 = vld [vmem:[#allocation2 + $0xab0] sm:$0xff] }
 0x1f2   :  { %3432 = vmatpush1.bf16.msra.mxu1 %v13181_v38  ;;  %v323_v38 = vld [vmem:[#allocation2 + $0x1d8] sm:$0xff]  ;;  %v634_v21 = vld [vmem:[#allocation2 + $0xb90] sm:$0xff] }
 0x1f3   :  { %v3140_v52 = vpop.f32.mrf.mxu1  ;;  %3433 = vmatprep.subr.bf16.mxu1 %v13174_v44  ;;  %v16401_v44 = vrot.slane %v16397_v29, %v16395_v26  ;;  %v283_v37 = vld [vmem:[#allocation2 + $0x98] sm:$0xff] }
 0x1f4   :  { %3393 = vmatpush1.bf16.msra.mxu0 %v13045_v46  ;;  %v638_v46 = vld [vmem:[#allocation2 + $0xbb0] sm:$0xff]  ;;  %v16405_v52 = vsub.s32 0, %v3648_v13 }
 0x1f5   :  { %3394 = vmatprep.subr.bf16.mxu0 %v13038_v48  ;;  %v12808_v48 = vcombine.high %v323_v38, %v327_v40  ;;  %v3693_v51 = vpack.i.b16 %v16401_v44, %v16401_v44  ;;  %v13118_v56 = vcombine.high %v634_v21, %v638_v46  ;;  %v13117_v3 = vcombine.low %v634_v21, %v638_v46  ;;  %v598_v21 = vld [vmem:[#allocation2 + $0xa70] sm:$0xff]  ;;  %v275_v46 = vld [vmem:[#allocation2 + $0x58] sm:$0xff] }
 0x1f6   :  { %3434 = vmatpush1.bf16.msra.mxu1 %v13173_v47  ;;  %v315_v47 = vld [vmem:[#allocation2 + $0x198] sm:$0xff] }
 0x1f7   :  { %3435 = vmatprep.subr.bf16.mxu1 %v13166_v55  ;;  %v12807_v55 = vcombine.low %v323_v38, %v327_v40 }
 0x1f8   :  { %3395 = vmatpush1.bf16.msra.mxu0 %v13037_v57  ;;  %v12800_v57 = vcombine.high %v315_v47, %v319_v49 }
 0x1f9   :  { %3396 = vmatprep.subr.bf16.mxu0 %v13030_v61  ;;  %v630_v61 = vld [vmem:[#allocation2 + $0xb70] sm:$0xff] }
 0x1fa   :  { %3436 = vmatpush1.bf16.msra.mxu1 %v13165_v60  ;;  %v626_v60 = vld [vmem:[#allocation2 + $0xb50] sm:$0xff] }
 0x1fb   :  { %3437 = vmatprep.subr.bf16.mxu1 %v13158_v4  ;;  %v3698_v4 = vrot.slane %v3693_v51, %v16405_v52  ;;  %v13109_v20 = vcombine.low %v626_v60, %v630_v61 }
 0x1fc   :  { %3397 = vmatpush1.bf16.msra.mxu0 %v13029_v6  ;;  %v12799_v6 = vcombine.low %v315_v47, %v319_v49 }
 0x1fd   :  { %3398 = vmatprep.subr.bf16.mxu0 %v13022_v8 }
 0x1fe   :  { %3438 = vmatpush1.bf16.msra.mxu1 %v13157_v7  ;;  %v13110_v7 = vcombine.high %v626_v60, %v630_v61  ;;  %v271_v61 = vld [vmem:[#allocation2 + $0x38] sm:$0xff] }
 0x1ff   :  { %3439 = vmatprep.subr.bf16.mxu1 %v13150_v14  ;;  %v303_v14 = vld [vmem:[#allocation2 + $0x138] sm:$0xff] }
 0x200   :  { %3399 = vmatpush1.bf16.msra.mxu0 %v13021_v18 }
 0x201   :  { %3400 = vmatprep.subr.bf16.mxu0 %v13014_v23  ;;  %v610_v23 = vld [vmem:[#allocation2 + $0xad0] sm:$0xff] }
 0x202   :  { %3440 = vmatpush1.bf16.msra.mxu1 %v13149_v22  ;;  %v13093_v40 = vcombine.low %v610_v23, %v614_v24 }
 0x203   :  { %3441 = vmatprep.subr.bf16.mxu1 %v13142_v27  ;;  %v295_v27 = vld [vmem:[#allocation2 + $0xf8] sm:$0xff] }
 0x204   :  { %3401 = vmatpush1.bf16.msra.mxu0 %v13013_v30  ;;  %v13101_v30 = vcombine.low %v618_v10, %v622_v11  ;;  %v12776_v38 = vcombine.high %v291_v53, %v295_v27 }
 0x205   :  { %3402 = vmatprep.subr.bf16.mxu0 %v13006_v32  ;;  %v602_v32 = vld [vmem:[#allocation2 + $0xa90] sm:$0xff] }
 0x206   :  { %3442 = vmatpush1.bf16.msra.mxu1 %v13141_v31  ;;  %v13094_v31 = vcombine.high %v610_v23, %v614_v24  ;;  %v13085_v49 = vcombine.low %v602_v32, %v606_v33  ;;  %v375_v23 = vld [vmem:[#allocation2 + $0x378] sm:$0xff] }
 0x207   :  { %3443 = vmatprep.subr.bf16.mxu1 %v13134_v39  ;;  %v287_v39 = vld [vmem:[#allocation2 + $0xb8] sm:$0xff] }
 0x208   :  { %3403 = vmatpush1.bf16.msra.mxu0 %v13005_v41  ;;  %v12775_v41 = vcombine.low %v291_v53, %v295_v27  ;;  %v12768_v47 = vcombine.high %v283_v37, %v287_v39  ;;  %v431_v27 = vld [vmem:[#allocation2 + $0x538] sm:$0xff] }
 0x209   :  { %3404 = vmatprep.subr.bf16.mxu0 %v13126_v45  ;;  %v594_v45 = vld [vmem:[#allocation2 + $0xa50] sm:$0xff] }
 0x20a   :  { %3444 = vmatpush1.bf16.msra.mxu1 %v13133_v42  ;;  %v13086_v42 = vcombine.high %v602_v32, %v606_v33  ;;  %v13078_v51 = vcombine.high %v594_v45, %v598_v21  ;;  %v363_v33 = vld [vmem:[#allocation2 + $0x318] sm:$0xff] }
 0x20b   :  { %3470 = vmatprep.subr.bf16.mxu1 %v12808_v48  ;;  %v3094_v62 = vpop.f32.mrf.mxu0  ;;  %v279_v48 = vld [vmem:[#allocation2 + $0x78] sm:$0xff] }
 0x20c   :  { %v3095_v1 = vadd.f32 %v3094_v62, %v16383_v17  ;;  %3405 = vmatpush2.bf16.msra.mxu0 %v13125_v50  ;;  %v12792_v17 = vcombine.high %v307_v63, %v311_v0  ;;  %v12767_v50 = vcombine.low %v283_v37, %v287_v39  ;;  %v12760_v60 = vcombine.high %v275_v46, %v279_v48  ;;  %v367_v37 = vld [vmem:[#allocation2 + $0x338] sm:$0xff] }
 0x20d   :  { %3462 = vmatmul.mubr.bf16.vlgmr.msra.gmra.mxu1 %v15796_v2  ;;  %v3096_v5 = vpop.f32.mrf.mxu0  ;;  %3406 = vmatprep.subr.bf16.mxu0 %v13118_v56  ;;  %v590_v56 = vld [vmem:[#allocation2 + $0xa30] sm:$0xff]  ;;  %v13077_v62 = vcombine.low %v594_v45, %v598_v21  ;;  %v391_v2 = vld [vmem:[#allocation2 + $0x3f8] sm:$0xff] }
 0x20e   :  { %3471 = vmatpush1.bf16.msra.mxu1 %v12807_v55  ;;  %v3136_v8 = vadd.f32 %v16388_v34, %v3095_v1  ;;  %v3097_v9 = vadd.f32 %v3096_v5, %v16385_v28  ;;  %3502 = vmatprep.mubr.bf16.mxu1 %v16334_v58  ;;  %v12791_v34 = vcombine.low %v307_v63, %v311_v0  ;;  %v586_v55 = vld [vmem:[#allocation2 + $0xa10] sm:$0xff]  ;;  %v387_v1 = vld [vmem:[#allocation2 + $0x3d8] sm:$0xff] }
 0x20f   :  { %3472 = vmatprep.subr.bf16.mxu1 %v12800_v57  ;;  %v3098_v13 = vpop.f32.mrf.mxu0  ;;  %v13102_v28 = vcombine.high %v618_v10, %v622_v11  ;;  %v12784_v58 = vcombine.high %v299_v12, %v303_v14  ;;  %v267_v57 = vld [vmem:[#allocation2 + $0x18] sm:$0xff]  ;;  %v12759_v63 = vcombine.low %v275_v46, %v279_v48  ;;  %v13070_v0 = vcombine.high %v586_v55, %v590_v56 }
 0x210   :  { %v3634_v15 = vpack.c.bf16 %v3136_v8, %v3136_v8  ;;  %v16416_v18 = vadd.f32 %v16391_v43, %v3097_v9  ;;  %3407 = vmatpush2.bf16.msra.mxu0 %v13117_v3  ;;  %v12783_v43 = vcombine.low %v299_v12, %v303_v14  ;;  %v451_v3 = vld [vmem:[#allocation2 + $0x5d8] sm:$0xff]  ;;  %v12872_v11 = vcombine.high %v387_v1, %v391_v2 }
 0x211   :  { %v3099_v22 = vpop.f32.mrf.mxu0  ;;  %3408 = vmatprep.subr.bf16.mxu0 %v13110_v7  ;;  %v455_v5 = vld [vmem:[#allocation2 + $0x5f8] sm:$0xff]  ;;  %v12751_v7 = vcombine.low %v267_v57, %v271_v61 }
 0x212   :  { %3473 = vmatpush1.bf16.msra.mxu1 %v12799_v6  ;;  %v16418_v25 = vadd.bf16 %v3698_v4, %v3634_v15  ;;  %v12752_v4 = vcombine.high %v267_v57, %v271_v61  ;;  %v13069_v6 = vcombine.low %v586_v55, %v590_v56  ;;  %v12936_v8 = vcombine.high %v451_v3, %v455_v5  ;;  %v379_v9 = vld [vmem:[#allocation2 + $0x398] sm:$0xff] }
 0x213   :  { %3474 = vmatprep.subr.bf16.mxu1 %v12792_v17  ;;  %v383_v17 = vld [vmem:[#allocation2 + $0x3b8] sm:$0xff]  ;;  %v12935_v13 = vcombine.low %v451_v3, %v455_v5 }
 0x214   :  { %3409 = vmatpush2.bf16.msra.mxu0 %v13109_v20  ;;  %v443_v10 = vld [vmem:[#allocation2 + $0x598] sm:$0xff]  ;;  %v12871_v20 = vcombine.low %v387_v1, %v391_v2 }
 0x215   :  { %3410 = vmatprep.subr.bf16.mxu0 %v13102_v28  ;;  %v447_v12 = vld [vmem:[#allocation2 + $0x5b8] sm:$0xff] }
 0x216   :  { %3475 = vmatpush1.bf16.msra.mxu1 %v12791_v34  ;;  %v435_v14 = vld [vmem:[#allocation2 + $0x558] sm:$0xff]  ;;  %v12928_v22 = vcombine.high %v443_v10, %v447_v12  ;;  %v12864_v34 = vcombine.high %v379_v9, %v383_v17  ;;  %v12927_v53 = vcombine.low %v443_v10, %v447_v12 }
 0x217   :  { %3476 = vmatprep.subr.bf16.mxu1 %v12784_v58  ;;  %v439_v15 = vld [vmem:[#allocation2 + $0x578] sm:$0xff] }
 0x218   :  { %3411 = vmatpush2.bf16.msra.mxu0 %v13101_v30  ;;  %v371_v28 = vld [vmem:[#allocation2 + $0x358] sm:$0xff]  ;;  %v12863_v30 = vcombine.low %v379_v9, %v383_v17  ;;  %v12919_v39 = vcombine.low %v435_v14, %v439_v15 }
 0x219   :  { %3412 = vmatprep.subr.bf16.mxu0 %v13094_v31  ;;  %v427_v58 = vld [vmem:[#allocation2 + $0x518] sm:$0xff]  ;;  %v12856_v32 = vcombine.high %v371_v28, %v375_v23 }
 0x21a   :  { %3477 = vmatpush1.bf16.msra.mxu1 %v12783_v43  ;;  %v12920_v43 = vcombine.high %v435_v14, %v439_v15  ;;  %v355_v45 = vld [vmem:[#allocation2 + $0x2d8] sm:$0xff]  ;;  %v12911_v48 = vcombine.low %v427_v58, %v431_v27 }
 0x21b   :  { %3478 = vmatprep.subr.bf16.mxu1 %v12776_v38  ;;  %v419_v21 = vld [vmem:[#allocation2 + $0x4d8] sm:$0xff] }
 0x21c   :  { %3413 = vmatpush2.bf16.msra.mxu0 %v13093_v40  ;;  %v12855_v40 = vcombine.low %v371_v28, %v375_v23  ;;  %v423_v46 = vld [vmem:[#allocation2 + $0x4f8] sm:$0xff] }
 0x21d   :  { %3414 = vmatprep.subr.bf16.mxu0 %v13086_v42  ;;  %v351_v55 = vld [vmem:[#allocation2 + $0x2b8] sm:$0xff]  ;;  %v12903_v61 = vcombine.low %v419_v21, %v423_v46 }
 0x21e   :  { %3479 = vmatpush1.bf16.msra.mxu1 %v12775_v41  ;;  %v12912_v41 = vcombine.high %v427_v58, %v431_v27  ;;  %v411_v56 = vld [vmem:[#allocation2 + $0x498] sm:$0xff] }
 0x21f   :  { %3480 = vmatprep.subr.bf16.mxu1 %v12768_v47  ;;  %v359_v47 = vld [vmem:[#allocation2 + $0x2f8] sm:$0xff] }
 0x220   :  { %3415 = vmatpush2.bf16.msra.mxu0 %v13085_v49  ;;  %v12847_v49 = vcombine.low %v363_v33, %v367_v37  ;;  %v12840_v57 = vcombine.high %v355_v45, %v359_v47  ;;  %v343_v1 = vld [vmem:[#allocation2 + $0x278] sm:$0xff] }
 0x221   :  { %3416 = vmatprep.subr.bf16.mxu0 %v13078_v51  ;;  %v347_v51 = vld [vmem:[#allocation2 + $0x298] sm:$0xff] }
 0x222   :  { %3481 = vmatpush1.bf16.msra.mxu1 %v12767_v50  ;;  %v12904_v50 = vcombine.high %v419_v21, %v423_v46  ;;  %v403_v2 = vld [vmem:[#allocation2 + $0x458] sm:$0xff]  ;;  %v12832_v3 = vcombine.high %v347_v51, %v351_v55 }
 0x223   :  { %3482 = vmatprep.subr.bf16.mxu1 %v12760_v60  ;;  %v415_v60 = vld [vmem:[#allocation2 + $0x4b8] sm:$0xff] }
 0x224   :  { %3417 = vmatpush2.bf16.msra.mxu0 %v13077_v62  ;;  %v12839_v62 = vcombine.low %v355_v45, %v359_v47  ;;  %v12895_v5 = vcombine.low %v411_v56, %v415_v60  ;;  %v335_v9 = vld [vmem:[#allocation2 + $0x238] sm:$0xff] }
 0x225   :  { %3418 = vmatprep.subr.bf16.mxu0 %v13070_v0  ;;  %v339_v0 = vld [vmem:[#allocation2 + $0x258] sm:$0xff] }
 0x226   :  { %3483 = vmatpush1.bf16.msra.mxu1 %v12759_v63  ;;  %v12896_v63 = vcombine.high %v411_v56, %v415_v60  ;;  %v395_v17 = vld [vmem:[#allocation2 + $0x418] sm:$0xff]  ;;  %v12824_v10 = vcombine.high %v339_v0, %v343_v1 }
 0x227   :  { %3484 = vmatprep.subr.bf16.mxu1 %v12752_v4  ;;  %v407_v4 = vld [vmem:[#allocation2 + $0x478] sm:$0xff] }
 0x228   :  { %3419 = vmatpush2.bf16.msra.mxu0 %v13069_v6  ;;  %v12831_v6 = vcombine.low %v347_v51, %v351_v55  ;;  %v12887_v12 = vcombine.low %v403_v2, %v407_v4  ;;  %v515_v15 = vld [vmem:[#allocation2 + $0x7d8] sm:$0xff] }
 0x229   :  { %3511 = vmatprep.subr.bf16.mxu0 %v12936_v8  ;;  %v331_v8 = vld [vmem:[#allocation2 + $0x218] sm:$0xff] }
 0x22a   :  { %3485 = vmatpush1.bf16.msra.mxu1 %v12751_v7  ;;  %v12888_v7 = vcombine.high %v403_v2, %v407_v4  ;;  %v583_v28 = vld [vmem:[#allocation2 + $0x9f8] sm:$0xff] }
 0x22b   :  { %3486 = vmatprep.subr.bf16.mxu1 %v12872_v11  ;;  %3421 = vmatmul.mubr.bf16.vlgmr.msra.gmra.mxu0 %v16369_v35  ;;  %v399_v11 = vld [vmem:[#allocation2 + $0x438] sm:$0xff] }
 0x22c   :  { %3512 = vmatpush1.bf16.msra.mxu0 %v12935_v13  ;;  %3543 = vmatprep.mubr.bf16.mxu0 %v16338_v59  ;;  %v12848_v59 = vcombine.high %v363_v33, %v367_v37  ;;  %v12823_v13 = vcombine.low %v339_v0, %v343_v1  ;;  %v12880_v14 = vcombine.high %v395_v17, %v399_v11  ;;  %v507_v27 = vld [vmem:[#allocation2 + $0x798] sm:$0xff] }
 0x22d   :  { %v16421_v24 = vpop.f32.mrf.mxu1  ;;  %3513 = vmatprep.subr.bf16.mxu0 %v12928_v22  ;;  %v579_v22 = vld [vmem:[#allocation2 + $0x9d8] sm:$0xff]  ;;  %v12879_v23 = vcombine.low %v395_v17, %v399_v11 }
 0x22e   :  { %3487 = vmatpush2.bf16.msra.mxu1 %v12871_v20  ;;  %v519_v20 = vld [vmem:[#allocation2 + $0x7f8] sm:$0xff] }
 0x22f   :  { %v16424_v31 = vpop.f32.mrf.mxu1  ;;  %3488 = vmatprep.subr.bf16.mxu1 %v12864_v34  ;;  %v12816_v34 = vcombine.high %v331_v8, %v335_v9  ;;  %v13000_v58 = vcombine.high %v515_v15, %v519_v20  ;;  %v575_v33 = vld [vmem:[#allocation2 + $0x9b8] sm:$0xff]  ;;  %v12999_v37 = vcombine.low %v515_v15, %v519_v20 }
 0x230   :  { %3514 = vmatpush1.bf16.msra.mxu0 %v12927_v53  ;;  %v12815_v53 = vcombine.low %v331_v8, %v335_v9  ;;  %v567_v21 = vld [vmem:[#allocation2 + $0x978] sm:$0xff] }
 0x231   :  { %v3180_v38 = vpop.f32.mrf.mxu1  ;;  %3515 = vmatprep.subr.bf16.mxu0 %v12920_v43  ;;  %v571_v43 = vld [vmem:[#allocation2 + $0x998] sm:$0xff] }
 0x232   :  { %3489 = vmatpush2.bf16.msra.mxu1 %v12863_v30  ;;  %v511_v30 = vld [vmem:[#allocation2 + $0x7b8] sm:$0xff]  ;;  %v13055_v51 = vcombine.low %v571_v43, %v575_v33 }
 0x233   :  { %v3181_v42 = vpop.f32.mrf.mxu1  ;;  %3490 = vmatprep.subr.bf16.mxu1 %v12856_v32  ;;  %v13064_v32 = vcombine.high %v579_v22, %v583_v28  ;;  %v499_v38 = vld [vmem:[#allocation2 + $0x758] sm:$0xff]  ;;  %v12991_v47 = vcombine.low %v507_v27, %v511_v30 }
 0x234   :  { %3516 = vmatpush1.bf16.msra.mxu0 %v12919_v39  ;;  %v503_v39 = vld [vmem:[#allocation2 + $0x778] sm:$0xff] }
 0x235   :  { %3517 = vmatprep.subr.bf16.mxu0 %v12912_v41  ;;  %v12992_v41 = vcombine.high %v507_v27, %v511_v30  ;;  %v563_v42 = vld [vmem:[#allocation2 + $0x958] sm:$0xff]  ;;  %v12984_v55 = vcombine.high %v499_v38, %v503_v39 }
 0x236   :  { %3491 = vmatpush2.bf16.msra.mxu1 %v12855_v40  ;;  %v13063_v40 = vcombine.low %v579_v22, %v583_v28  ;;  %v555_v56 = vld [vmem:[#allocation2 + $0x918] sm:$0xff]  ;;  %v13047_v0 = vcombine.low %v563_v42, %v567_v21 }
 0x237   :  { %3492 = vmatprep.subr.bf16.mxu1 %v12848_v59  ;;  %v13056_v59 = vcombine.high %v571_v43, %v575_v33  ;;  %v551_v4 = vld [vmem:[#allocation2 + $0x8f8] sm:$0xff] }
 0x238   :  { %3518 = vmatpush1.bf16.msra.mxu0 %v12911_v48  ;;  %v491_v48 = vld [vmem:[#allocation2 + $0x718] sm:$0xff] }
 0x239   :  { %3519 = vmatprep.subr.bf16.mxu0 %v12904_v50  ;;  %v539_v9 = vld [vmem:[#allocation2 + $0x898] sm:$0xff] }
 0x23a   :  { %3493 = vmatpush2.bf16.msra.mxu1 %v12847_v49  ;;  %v495_v49 = vld [vmem:[#allocation2 + $0x738] sm:$0xff] }
 0x23b   :  { %3494 = vmatprep.subr.bf16.mxu1 %v12840_v57  ;;  %v13048_v57 = vcombine.high %v563_v42, %v567_v21  ;;  %v12976_v1 = vcombine.high %v491_v48, %v495_v49  ;;  %v543_v17 = vld [vmem:[#allocation2 + $0x8b8] sm:$0xff] }
 0x23c   :  { %3520 = vmatpush1.bf16.msra.mxu0 %v12903_v61  ;;  %v12983_v61 = vcombine.low %v499_v38, %v503_v39  ;;  %v531_v20 = vld [vmem:[#allocation2 + $0x858] sm:$0xff] }
 0x23d   :  { %3521 = vmatprep.subr.bf16.mxu0 %v12896_v63  ;;  %v535_v22 = vld [vmem:[#allocation2 + $0x878] sm:$0xff] }
 0x23e   :  { %3495 = vmatpush2.bf16.msra.mxu1 %v12839_v62  ;;  %v487_v62 = vld [vmem:[#allocation2 + $0x6f8] sm:$0xff]  ;;  %v13015_v39 = vcombine.low %v531_v20, %v535_v22 }
 0x23f   :  { %3496 = vmatprep.subr.bf16.mxu1 %v12832_v3  ;;  %v547_v3 = vld [vmem:[#allocation2 + $0x8d8] sm:$0xff] }
 0x240   :  { %3522 = vmatpush1.bf16.msra.mxu0 %v12895_v5  ;;  %v12975_v5 = vcombine.low %v491_v48, %v495_v49  ;;  %v523_v30 = vld [vmem:[#allocation2 + $0x818] sm:$0xff] }
 0x241   :  { %3523 = vmatprep.subr.bf16.mxu0 %v12888_v7  ;;  %v479_v7 = vld [vmem:[#allocation2 + $0x6b8] sm:$0xff] }
 0x242   :  { %3497 = vmatpush2.bf16.msra.mxu1 %v12831_v6  ;;  %v475_v6 = vld [vmem:[#allocation2 + $0x698] sm:$0xff] }
 0x243   :  { %3498 = vmatprep.subr.bf16.mxu1 %v12824_v10  ;;  %v13032_v10 = vcombine.high %v547_v3, %v551_v4  ;;  %v12960_v15 = vcombine.high %v475_v6, %v479_v7  ;;  %v12959_v28 = vcombine.low %v475_v6, %v479_v7  ;;  %v527_v43 = vld [vmem:[#allocation2 + $0x838] sm:$0xff] }
 0x244   :  { %3524 = vmatpush1.bf16.msra.mxu0 %v12887_v12  ;;  %v467_v12 = vld [vmem:[#allocation2 + $0x658] sm:$0xff]  ;;  %v13007_v48 = vcombine.low %v523_v30, %v527_v43 }
 0x245   :  { %3525 = vmatprep.subr.bf16.mxu0 %v12880_v14  ;;  %v13031_v14 = vcombine.low %v547_v3, %v551_v4  ;;  %v711_v38 = vld [vmem:[#allocation2 + $0xdf8] sm:$0xff] }
 0x246   :  { %3499 = vmatpush2.bf16.msra.mxu1 %v12823_v13  ;;  %v471_v13 = vld [vmem:[#allocation2 + $0x678] sm:$0xff] }
 0x247   :  { %3500 = vmatprep.subr.bf16.mxu1 %v12816_v34  ;;  %v13024_v34 = vcombine.high %v539_v9, %v543_v17  ;;  %v12952_v27 = vcombine.high %v467_v12, %v471_v13  ;;  %v12951_v33 = vcombine.low %v467_v12, %v471_v13  ;;  %v647_v42 = vld [vmem:[#allocation2 + $0xbf8] sm:$0xff] }
 0x248   :  { %3526 = vmatpush1.bf16.msra.mxu0 %v12879_v23  ;;  %v459_v23 = vld [vmem:[#allocation2 + $0x618] sm:$0xff] }
 0x249   :  { %3527 = vmatprep.subr.bf16.mxu0 %v13000_v58  ;;  %v13023_v58 = vcombine.low %v539_v9, %v543_v17  ;;  %v699_v21 = vld [vmem:[#allocation2 + $0xd98] sm:$0xff] }
 0x24a   :  { %3501 = vmatpush2.bf16.msra.mxu1 %v12815_v53  ;;  %v463_v53 = vld [vmem:[#allocation2 + $0x638] sm:$0xff] }
 0x24b   :  { %3552 = vmatprep.subr.bf16.mxu1 %v13064_v32  ;;  %v3217_v45 = vpop.f32.mrf.mxu0  ;;  %v13016_v32 = vcombine.high %v531_v20, %v535_v22  ;;  %v631_v4 = vld [vmem:[#allocation2 + $0xb78] sm:$0xff] }
 0x24c   :  { %v16427_v46 = vadd.f32 %v3217_v45, %v16421_v24  ;;  %3528 = vmatpush2.bf16.msra.mxu0 %v12999_v37  ;;  %v559_v24 = vld [vmem:[#allocation2 + $0x938] sm:$0xff]  ;;  %v12943_v45 = vcombine.low %v459_v23, %v463_v53 }
 0x24d   :  { %3503 = vmatmul.mubr.bf16.vlgmr.msra.gmra.mxu1 %v16344_v16  ;;  %v16430_v50 = vpop.f32.mrf.mxu0  ;;  %3529 = vmatprep.subr.bf16.mxu0 %v12992_v41  ;;  %v483_v16 = vld [vmem:[#allocation2 + $0x6d8] sm:$0xff]  ;;  %v13040_v2 = vcombine.high %v555_v56, %v559_v24 }
 0x24e   :  { %3553 = vmatpush1.bf16.msra.mxu1 %v13063_v40  ;;  %3584 = vmatprep.mubr.bf16.mxu1 %v16358_v54  ;;  %v13039_v54 = vcombine.low %v555_v56, %v559_v24  ;;  %v12968_v8 = vcombine.high %v483_v16, %v487_v62  ;;  %v12967_v11 = vcombine.low %v483_v16, %v487_v62  ;;  %v707_v37 = vld [vmem:[#allocation2 + $0xdd8] sm:$0xff] }
 0x24f   :  { %3554 = vmatprep.subr.bf16.mxu1 %v13056_v59  ;;  %v3221_v60 = vpop.f32.mrf.mxu0  ;;  %v12944_v40 = vcombine.high %v459_v23, %v463_v53  ;;  %v643_v41 = vld [vmem:[#allocation2 + $0xbd8] sm:$0xff]  ;;  %v13008_v59 = vcombine.high %v523_v30, %v527_v43  ;;  %v13192_v49 = vcombine.high %v707_v37, %v711_v38  ;;  %v13191_v24 = vcombine.low %v707_v37, %v711_v38 }
 0x250   :  { %3530 = vmatpush2.bf16.msra.mxu0 %v12991_v47  ;;  %v703_v47 = vld [vmem:[#allocation2 + $0xdb8] sm:$0xff]  ;;  %v13128_v56 = vcombine.high %v643_v41, %v647_v42  ;;  %v3658_v60 = vcombine.high %v16397_v29, %v16397_v29  ;;  %v13127_v62 = vcombine.low %v643_v41, %v647_v42 }
 0x251   :  { %v3222_v63 = vpop.f32.mrf.mxu0  ;;  %3531 = vmatprep.subr.bf16.mxu0 %v12984_v55  ;;  %v639_v55 = vld [vmem:[#allocation2 + $0xbb8] sm:$0xff]  ;;  %v13183_v6 = vcombine.low %v699_v21, %v703_v47 }
 0x252   :  { %3555 = vmatpush1.bf16.msra.mxu1 %v13055_v51  ;;  %v635_v51 = vld [vmem:[#allocation2 + $0xb98] sm:$0xff]  ;;  %v13184_v63 = vcombine.high %v699_v21, %v703_v47  ;;  %v3635_v47 = vpack.c.bf16 %v16416_v18, %v16416_v18 }
 0x253   :  { %3556 = vmatprep.subr.bf16.mxu1 %v13048_v57  ;;  %v3688_v57 = vcombine.high %v16401_v44, %v16401_v44  ;;  %v695_v16 = vld [vmem:[#allocation2 + $0xd78] sm:$0xff]  ;;  %v3680_v44 = vrot.slane %v3658_v60, %v16395_v26  ;;  %v13119_v29 = vcombine.low %v635_v51, %v639_v55 }
 0x254   :  { %3532 = vmatpush2.bf16.msra.mxu0 %v12983_v61  ;;  %v691_v61 = vld [vmem:[#allocation2 + $0xd58] sm:$0xff] }
 0x255   :  { %3533 = vmatprep.subr.bf16.mxu0 %v12976_v1  ;;  %v13120_v1 = vcombine.high %v635_v51, %v639_v55  ;;  %v3707_v3 = vpack.i.b16 %v3688_v57, %v3688_v57  ;;  %v683_v7 = vld [vmem:[#allocation2 + $0xd18] sm:$0xff]  ;;  %v3690_v20 = vcombine.high %v3680_v44, %v3680_v44  ;;  %v3700_v43 = vpack.i.b16 %v3680_v44, %v3680_v44 }
 0x256   :  { %3557 = vmatpush1.bf16.msra.mxu1 %v13047_v0  ;;  %v627_v0 = vld [vmem:[#allocation2 + $0xb58] sm:$0xff] }
 0x257   :  { %3558 = vmatprep.subr.bf16.mxu1 %v13040_v2  ;;  %v13112_v12 = vcombine.high %v627_v0, %v631_v4  ;;  %v611_v30 = vld [vmem:[#allocation2 + $0xad8] sm:$0xff] }
 0x258   :  { %3534 = vmatpush2.bf16.msra.mxu0 %v12975_v5  ;;  %v607_v21 = vld [vmem:[#allocation2 + $0xab8] sm:$0xff] }
 0x259   :  { %3535 = vmatprep.subr.bf16.mxu0 %v12968_v8  ;;  %v3220_v8 = vadd.f32 %v16430_v50, %v16424_v31  ;;  %v13175_v31 = vcombine.low %v691_v61, %v695_v16  ;;  %v675_v50 = vld [vmem:[#allocation2 + $0xcd8] sm:$0xff] }
 0x25a   :  { %3559 = vmatpush1.bf16.msra.mxu1 %v13039_v54  ;;  %v687_v54 = vld [vmem:[#allocation2 + $0xd38] sm:$0xff] }
 0x25b   :  { %3560 = vmatprep.subr.bf16.mxu1 %v13032_v10  ;;  %v619_v10 = vld [vmem:[#allocation2 + $0xb18] sm:$0xff]  ;;  %v13167_v41 = vcombine.low %v683_v7, %v687_v54 }
 0x25c   :  { %3536 = vmatpush2.bf16.msra.mxu0 %v12967_v11  ;;  %v667_v51 = vld [vmem:[#allocation2 + $0xc98] sm:$0xff] }
 0x25d   :  { %3537 = vmatprep.subr.bf16.mxu0 %v12960_v15  ;;  %v671_v55 = vld [vmem:[#allocation2 + $0xcb8] sm:$0xff] }
 0x25e   :  { %3561 = vmatpush1.bf16.msra.mxu1 %v13031_v14  ;;  %v3712_v14 = vrot.slane %v3707_v3, %v16405_v52  ;;  %v13151_v3 = vcombine.low %v667_v51, %v671_v55  ;;  %v655_v44 = vld [vmem:[#allocation2 + $0xc38] sm:$0xff] }
 0x25f   :  { %3562 = vmatprep.subr.bf16.mxu1 %v13024_v34  ;;  %v623_v34 = vld [vmem:[#allocation2 + $0xb38] sm:$0xff] }
 0x260   :  { %3538 = vmatpush2.bf16.msra.mxu0 %v12959_v28  ;;  %v13103_v42 = vcombine.low %v619_v10, %v623_v34 }
 0x261   :  { %3539 = vmatprep.subr.bf16.mxu0 %v12952_v27  ;;  %v13168_v27 = vcombine.high %v683_v7, %v687_v54  ;;  %v591_v7 = vld [vmem:[#allocation2 + $0xa38] sm:$0xff] }
 0x262   :  { %3563 = vmatpush1.bf16.msra.mxu1 %v13023_v58  ;;  %v13111_v58 = vcombine.low %v627_v0, %v631_v4  ;;  %v599_v0 = vld [vmem:[#allocation2 + $0xa78] sm:$0xff] }
 0x263   :  { %3564 = vmatprep.subr.bf16.mxu1 %v13016_v32  ;;  %v651_v4 = vld [vmem:[#allocation2 + $0xc18] sm:$0xff] }
 0x264   :  { %3540 = vmatpush2.bf16.msra.mxu0 %v12951_v33  ;;  %v13104_v33 = vcombine.high %v619_v10, %v623_v34  ;;  %v13135_v10 = vcombine.low %v651_v4, %v655_v44  ;;  %v14472_v34 = vld [vmem:[#allocation6 + $0xc0] ss:$16 sps:$4 sm:$0xff]  }
 0x265   :  { %3541 = vmatprep.subr.bf16.mxu0 %v12944_v40  ;;  %v615_v40 = vld [vmem:[#allocation2 + $0xaf8] sm:$0xff] }
 0x266   :  { %3565 = vmatpush1.bf16.msra.mxu1 %v13015_v39  ;;  %v3714_v39 = vpack.i.b16 %v3690_v20, %v3690_v20  ;;  %v14474_v20 = vld [vmem:[#allocation6 + $0xc4] ss:$16 sps:$4 sm:$0xff]  }
 0x267   :  { %3566 = vmatprep.subr.bf16.mxu1 %v13008_v59 }
 0x268   :  { %3542 = vmatpush2.bf16.msra.mxu0 %v12943_v45  ;;  %v603_v45 = vld [vmem:[#allocation2 + $0xa98] sm:$0xff]  ;;  %v3719_v57 = vrot.slane %v3714_v39, %v16405_v52 }
 0x269   :  { %3593 = vmatprep.subr.bf16.mxu0 %v13192_v49  ;;  %v13096_v49 = vcombine.high %v611_v30, %v615_v40  ;;  %v14490_v39 = vld [vmem:[#allocation6 + $0x60] ss:$16 sps:$4 sm:$0xff]  }
 0x26a   :  { %3567 = vmatpush1.bf16.msra.mxu1 %v13007_v48  ;;  %v3705_v48 = vrot.slane %v3700_v43, %v16405_v52  ;;  %v14484_v43 = vld [vmem:[#allocation6 + $0x80] ss:$16 sps:$4 sm:$0xff]  }
 0x26b   :  { %3568 = vmatprep.subr.bf16.mxu1 %v13128_v56  ;;  %v3299_v2 = vpop.f32.mrf.mxu0  ;;  %3544 = vmatmul.mubr.bf16.vlgmr.msra.gmra.mxu0 %v16348_v19  ;;  %v13176_v19 = vcombine.high %v691_v61, %v695_v16  ;;  %v663_v61 = vld [vmem:[#allocation2 + $0xc78] sm:$0xff]  ;;  %v13095_v16 = vcombine.low %v611_v30, %v615_v40 }
 0x26c   :  { %3594 = vmatpush1.bf16.msra.mxu0 %v13191_v24  ;;  %3625 = vmatprep.mubr.bf16.mxu0 %v16164_v36  ;;  %v659_v24 = vld [vmem:[#allocation2 + $0xc58] sm:$0xff]  ;;  %v3749_v18 = vadd.bf16 %v3705_v48, %v3635_v47 }
 0x26d   :  { %v3258_v5 = vpop.f32.mrf.mxu1  ;;  %v3301_v17 = vpop.f32.mrf.mxu0  ;;  %3595 = vmatprep.subr.bf16.mxu0 %v13184_v63  ;;  %v595_v63 = vld [vmem:[#allocation2 + $0xa58] sm:$0xff] }
 0x26e   :  { %v3259_v9 = vadd.f32 %v3258_v5, %v16427_v46  ;;  %3569 = vmatpush2.bf16.msra.mxu1 %v13127_v62  ;;  %v679_v46 = vld [vmem:[#allocation2 + $0xcf8] sm:$0xff]  ;;  %v13152_v62 = vcombine.high %v667_v51, %v671_v55  ;;  %v13087_v5 = vcombine.low %v603_v45, %v607_v21  ;;  %15725 = vtanh.bf16 %v3749_v18 }
 0x26f   :  { %v3260_v11 = vpop.f32.mrf.mxu1  ;;  %3570 = vmatprep.subr.bf16.mxu1 %v13120_v1  ;;  %v3303_v22 = vpop.f32.mrf.mxu0  ;;  %v13160_v59 = vcombine.high %v675_v50, %v679_v46  ;;  %v13159_v60 = vcombine.low %v675_v50, %v679_v46  ;;  %v13088_v1 = vcombine.high %v603_v45, %v607_v21  ;;  %v13080_v54 = vcombine.high %v595_v63, %v599_v0  ;;  %v14480_v50 = vld [vmem:[#allocation6 + $0xa4] ss:$16 sps:$4 sm:$0xff]   ;;  %v14493_v40 = vld [vmem:[#allocation6 + $0x260] ss:$16 sps:$4 sm:$0xff]  }
 0x270   :  { %v3300_v13 = vadd.f32 %v3299_v2, %v3259_v9  ;;  %v3261_v15 = vadd.f32 %v3260_v11, %v3220_v8  ;;  %3596 = vmatpush1.bf16.msra.mxu0 %v13183_v6  ;;  %v587_v6 = vld [vmem:[#allocation2 + $0xa18] sm:$0xff]  ;;  %v13143_v8 = vcombine.low %v659_v24, %v663_v61  ;;  %v13079_v9 = vcombine.low %v595_v63, %v599_v0 }
 0x271   :  { %v3262_v28 = vpop.f32.mrf.mxu1  ;;  %v3304_v53 = vpop.f32.mrf.mxu0  ;;  %3597 = vmatprep.subr.bf16.mxu0 %v13176_v19  ;;  %v13072_v19 = vcombine.high %v587_v6, %v591_v7  ;;  %v13071_v11 = vcombine.low %v587_v6, %v591_v7  ;;  %v14477_v22 = vld [vmem:[#allocation6 + $0x2c4] ss:$16 sps:$4 sm:$0xff]   ;;  %v14499_v45 = vld [vmem:[#allocation6 + $0x240] ss:$16 sps:$4 sm:$0xff]  }
 0x272   :  { %v3636_v23 = vpack.c.bf16 %v3300_v13, %v3300_v13  ;;  %3571 = vmatpush2.bf16.msra.mxu1 %v13119_v29  ;;  %v3302_v38 = vadd.f32 %v3301_v17, %v3261_v15  ;;  %v13144_v29 = vcombine.high %v659_v24, %v663_v61  ;;  %v13136_v17 = vcombine.high %v651_v4, %v655_v44  ;;  %v14471_v13 = vld [vmem:[#allocation6 + $0x2e4] ss:$16 sps:$4 sm:$0xff]   ;;  %v14469_v15 = vld [vmem:[#allocation6 + $0x2e0] ss:$16 sps:$4 sm:$0xff]  }
 0x273   :  { %v3263_v32 = vpop.f32.mrf.mxu1  ;;  %3572 = vmatprep.subr.bf16.mxu1 %v13112_v12  ;;  %v14468_v12 = vld [vmem:[#allocation6 + $0xe4] ss:$16 sps:$4 sm:$0xff]   ;;  %v15797_v28 = vld [vmem:[%s16796_s0 + $0x18] ss:$0 sps:$4 sm:$0xff]  }
 0x274   :  { %v16444_v37 = vadd.bf16 %v3712_v14, %v3636_v23  ;;  %3598 = vmatpush1.bf16.msra.mxu0 %v13175_v31  ;;  %v3637_v56 = vpack.c.bf16 %v3302_v38, %v3302_v38  ;;  %v14466_v14 = vld [vmem:[#allocation6 + $0xe0] ss:$16 sps:$4 sm:$0xff]   ;;  %v14483_v23 = vld [vmem:[#allocation6 + $0x2a4] ss:$16 sps:$4 sm:$0xff]  }
 0x275   :  { %3599 = vmatprep.subr.bf16.mxu0 %v13168_v27  ;;  %v14475_v31 = vld [vmem:[#allocation6 + $0x2c0] ss:$16 sps:$4 sm:$0xff]   ;;  %v14486_v30 = vld [vmem:[#allocation6 + $0x84] ss:$16 sps:$4 sm:$0xff]  }
 0x276   :  { %3573 = vmatpush2.bf16.msra.mxu1 %v13111_v58  ;;  %v3751_v2 = vadd.bf16 %v3719_v57, %v3637_v56  ;;  %v14478_v58 = vld [vmem:[#allocation6 + $0xa0] ss:$16 sps:$4 sm:$0xff]   ;;  %v14495_v38 = vld [vmem:[#allocation6 + $0x264] ss:$16 sps:$4 sm:$0xff]  }
 0x277   :  { %3574 = vmatprep.subr.bf16.mxu1 %v13104_v33  ;;  %v14481_v27 = vld [vmem:[#allocation6 + $0x2a0] ss:$16 sps:$4 sm:$0xff]   ;;  %v14492_v33 = vld [vmem:[#allocation6 + $0x64] ss:$16 sps:$4 sm:$0xff]  }
 0x278   :  { %3600 = vmatpush1.bf16.msra.mxu0 %v13167_v41  ;;  %15727 = vtanh.bf16 %v3751_v2  ;;  %v14487_v32 = vld [vmem:[#allocation6 + $0x280] ss:$16 sps:$4 sm:$0xff]   ;;  %v14498_v41 = vld [vmem:[#allocation6 + $0x44] ss:$16 sps:$4 sm:$0xff]  }
 0x279   :  { %3601 = vmatprep.subr.bf16.mxu0 %v13160_v59  ;;  %v14496_v59 = vld [vmem:[#allocation6 + $0x40] ss:$16 sps:$4 sm:$0xff]   ;;  %v14504_v21 = vld [vmem:[#allocation6 + $0x24] ss:$16 sps:$4 sm:$0xff]   ;;  %15729 = vtanh.bf16 %v16418_v25 }
 0x27a   :  { %3575 = vmatpush2.bf16.msra.mxu1 %v13103_v42  ;;  %v14501_v42 = vld [vmem:[#allocation6 + $0x244] ss:$16 sps:$4 sm:$0xff]   ;;  %v14502_v48 = vld [vmem:[#allocation6 + $0x20] ss:$16 sps:$4 sm:$0xff]   ;;  %15731 = vtanh.bf16 %v16444_v37 }
 0x27b   :  { %3576 = vmatprep.subr.bf16.mxu1 %v13096_v49  ;;  %v14507_v47 = vld [vmem:[#allocation6 + $0x224] ss:$16 sps:$4 sm:$0xff]   ;;  %v14505_v49 = vld [vmem:[#allocation6 + $0x220] ss:$16 sps:$4 sm:$0xff]  }
 0x27c   :  { %3602 = vmatpush1.bf16.msra.mxu0 %v13159_v60  ;;  %v16453_v46 = vpop.eup %15725  ;;  %v14510_v51 = vld [vmem:[#allocation6 + $0x4] ss:$16 sps:$4 sm:$0xff]   ;;  %v14508_v56 = vld [vmem:[#allocation6] ss:$16 sps:$4 sm:$0xff]  }
 0x27d   :  { %3603 = vmatprep.subr.bf16.mxu0 %v13152_v62  ;;  %v14513_v55 = vld [vmem:[#allocation6 + $0x204] ss:$16 sps:$4 sm:$0xff]   ;;  %v14511_v57 = vld [vmem:[#allocation6 + $0x200] ss:$16 sps:$4 sm:$0xff]  }
 0x27e   :  { %3577 = vmatpush2.bf16.msra.mxu1 %v13095_v16  ;;  %v14516_v60 = vld [vmem:[#allocation6 + $0x1e4] ss:$16 sps:$4 sm:$0xff]   ;;  %v14514_v61 = vld [vmem:[#allocation6 + $0x1e0] ss:$16 sps:$4 sm:$0xff]  }
 0x27f   :  { %3578 = vmatprep.subr.bf16.mxu1 %v13088_v1  ;;  %v14519_v24 = vld [vmem:[#allocation6 + $0x3e4] ss:$16 sps:$4 sm:$0xff]   ;;  %v14517_v16 = vld [vmem:[#allocation6 + $0x3e0] ss:$16 sps:$4 sm:$0xff]  }
 0x280   :  { %3604 = vmatpush1.bf16.msra.mxu0 %v13151_v3  ;;  %v14522_v62 = vld [vmem:[#allocation6 + $0x1c4] ss:$16 sps:$4 sm:$0xff]   ;;  %v14520_v18 = vld [vmem:[#allocation6 + $0x1c0] ss:$16 sps:$4 sm:$0xff]  }
 0x281   :  { %3605 = vmatprep.subr.bf16.mxu0 %v13144_v29  ;;  %v14525_v63 = vld [vmem:[#allocation6 + $0x3c4] ss:$16 sps:$4 sm:$0xff]   ;;  %v14523_v2 = vld [vmem:[#allocation6 + $0x3c0] ss:$16 sps:$4 sm:$0xff]  }
 0x282   :  { %3579 = vmatpush2.bf16.msra.mxu1 %v13087_v5  ;;  %v14528_v44 = vld [vmem:[#allocation6 + $0x1a4] ss:$16 sps:$4 sm:$0xff]   ;;  %v14526_v7 = vld [vmem:[#allocation6 + $0x1a0] ss:$16 sps:$4 sm:$0xff]  }
 0x283   :  { %3580 = vmatprep.subr.bf16.mxu1 %v13080_v54  ;;  %v14531_v29 = vld [vmem:[#allocation6 + $0x3a4] ss:$16 sps:$4 sm:$0xff]   ;;  %v14556_v25 = vld [vmem:[#allocation6 + $0x100] ss:$16 sps:$4 sm:$0xff]  }
 0x284   :  { %3606 = vmatpush1.bf16.msra.mxu0 %v13143_v8  ;;  %v14562_v37 = vld [vmem:[#allocation6 + $0x4e0] ss:$16 sps:$4 sm:$0xff]  }
 0x285   :  { %3607 = vmatprep.subr.bf16.mxu0 %v13136_v17  ;;  %v14534_v17 = vld [vmem:[#allocation6 + $0x184] ss:$16 sps:$4 sm:$0xff]  }
 0x286   :  { %3581 = vmatpush2.bf16.msra.mxu1 %v13079_v9  ;;  %v16456_v53 = vpop.eup %15727  ;;  %v14529_v9 = vld [vmem:[#allocation6 + $0x3a0] ss:$16 sps:$4 sm:$0xff]  }
 0x287   :  { %3582 = vmatprep.subr.bf16.mxu1 %v13072_v19 }
 0x288   :  { %3608 = vmatpush1.bf16.msra.mxu0 %v13135_v10  ;;  %v14537_v10 = vld [vmem:[#allocation6 + $0x384] ss:$16 sps:$4 sm:$0xff]  }
 0x289   :  { %5301 = vmatprep.subr.bf16.mxu0 %v14468_v12  ;;  %v14535_v12 = vld [vmem:[#allocation6 + $0x380] ss:$16 sps:$4 sm:$0xff]  }
 0x28a   :  { %3583 = vmatpush2.bf16.msra.mxu1 %v13071_v11  ;;  %v14532_v11 = vld [vmem:[#allocation6 + $0x180] ss:$16 sps:$4 sm:$0xff]  }
 0x28b   :  { %5342 = vmatprep.subr.bf16.mxu1 %v14471_v13  ;;  %3626 = vmatmul.mubr.bf16.vlgmr.msra.gmra.mxu0 %v15797_v28  ;;  %v14540_v13 = vld [vmem:[#allocation6 + $0x164] ss:$16 sps:$4 sm:$0xff]   ;;  %v14544_v28 = vld [vmem:[#allocation6 + $0x140] ss:$16 sps:$4 sm:$0xff]  }
 0x28c   :  { %5302 = vmatpush1.bf16.msra.mxu0 %v14466_v14  ;;  %5333 = vmatprep.mubr.bf16.mxu0 %v16453_v46  ;;  %v14543_v14 = vld [vmem:[#allocation6 + $0x364] ss:$16 sps:$4 sm:$0xff]  }
 0x28d   :  { %3585 = vmatmul.mubr.bf16.vlgmr.msra.gmra.mxu1 %v16369_v35  ;;  %5303 = vmatprep.subr.bf16.mxu0 %v14474_v20  ;;  %v14489_v35 = vld [vmem:[#allocation6 + $0x284] ss:$16 sps:$4 sm:$0xff]   ;;  %v14541_v20 = vld [vmem:[#allocation6 + $0x360] ss:$16 sps:$4 sm:$0xff]  }
 0x28e   :  { %5343 = vmatpush1.bf16.msra.mxu1 %v14469_v15  ;;  %5374 = vmatprep.mubr.bf16.mxu1 %v16456_v53  ;;  %v14538_v15 = vld [vmem:[#allocation6 + $0x160] ss:$16 sps:$4 sm:$0xff]  }
 0x28f   :  { %5344 = vmatprep.subr.bf16.mxu1 %v14477_v22  ;;  %v14546_v22 = vld [vmem:[#allocation6 + $0x144] ss:$16 sps:$4 sm:$0xff]  }
 0x290   :  { %5304 = vmatpush1.bf16.msra.mxu0 %v14472_v34  ;;  %v14549_v34 = vld [vmem:[#allocation6 + $0x344] ss:$16 sps:$4 sm:$0xff]  }
 0x291   :  { %5305 = vmatprep.subr.bf16.mxu0 %v14480_v50  ;;  %v14552_v50 = vld [vmem:[#allocation6 + $0x124] ss:$16 sps:$4 sm:$0xff]  }
 0x292   :  { %5345 = vmatpush1.bf16.msra.mxu1 %v14475_v31  ;;  %v14547_v31 = vld [vmem:[#allocation6 + $0x340] ss:$16 sps:$4 sm:$0xff]  }
 0x293   :  { %5346 = vmatprep.subr.bf16.mxu1 %v14483_v23  ;;  %v14555_v23 = vld [vmem:[#allocation6 + $0x324] ss:$16 sps:$4 sm:$0xff]  }
 0x294   :  { %5306 = vmatpush1.bf16.msra.mxu0 %v14478_v58  ;;  %v14550_v58 = vld [vmem:[#allocation6 + $0x120] ss:$16 sps:$4 sm:$0xff]  }
 0x295   :  { %5307 = vmatprep.subr.bf16.mxu0 %v14486_v30  ;;  %v14558_v30 = vld [vmem:[#allocation6 + $0x104] ss:$16 sps:$4 sm:$0xff]  }
 0x296   :  { %5347 = vmatpush1.bf16.msra.mxu1 %v14481_v27  ;;  %v14553_v27 = vld [vmem:[#allocation6 + $0x320] ss:$16 sps:$4 sm:$0xff]  }
 0x297   :  { %5348 = vmatprep.subr.bf16.mxu1 %v14489_v35  ;;  %v14559_v35 = vld [vmem:[#allocation6 + $0x300] ss:$16 sps:$4 sm:$0xff]  }
 0x298   :  { %5308 = vmatpush1.bf16.msra.mxu0 %v14484_v43  ;;  %v14561_v43 = vld [vmem:[#allocation6 + $0x304] ss:$16 sps:$4 sm:$0xff]  }
 0x299   :  { %5309 = vmatprep.subr.bf16.mxu0 %v14492_v33  ;;  %v14634_v33 = vld [vmem:[#allocation6 + $0x6e4] ss:$16 sps:$4 sm:$0xff]  }
 0x29a   :  { %5349 = vmatpush1.bf16.msra.mxu1 %v14487_v32  ;;  %v14564_v32 = vld [vmem:[#allocation6 + $0x4e4] ss:$16 sps:$4 sm:$0xff]  }
 0x29b   :  { %5350 = vmatprep.subr.bf16.mxu1 %v14495_v38  ;;  %v14567_v38 = vld [vmem:[#allocation6 + $0x4c4] ss:$16 sps:$4 sm:$0xff]  }
 0x29c   :  { %5310 = vmatpush1.bf16.msra.mxu0 %v14490_v39  ;;  %v14632_v39 = vld [vmem:[#allocation6 + $0x6e0] ss:$16 sps:$4 sm:$0xff]  }
 0x29d   :  { %5311 = vmatprep.subr.bf16.mxu0 %v14498_v41  ;;  %v16468_v41 = vpop.eup %15729 }
 0x29e   :  { %5351 = vmatpush1.bf16.msra.mxu1 %v14493_v40  ;;  %v14640_v40 = vld [vmem:[#allocation6 + $0x6c4] ss:$16 sps:$4 sm:$0xff]  }
 0x29f   :  { %5352 = vmatprep.subr.bf16.mxu1 %v14501_v42  ;;  %v16470_v42 = vpop.eup %15731 }
 0x2a0   :  { %5312 = vmatpush1.bf16.msra.mxu0 %v14496_v59 }
 0x2a1   :  { %5313 = vmatprep.subr.bf16.mxu0 %v14504_v21  ;;  %v14570_v21 = vld [vmem:[#allocation6 + $0x4a4] ss:$16 sps:$4 sm:$0xff]  }
 0x2a2   :  { %5353 = vmatpush1.bf16.msra.mxu1 %v14499_v45  ;;  %v14565_v45 = vld [vmem:[#allocation6 + $0x4c0] ss:$16 sps:$4 sm:$0xff]  }
 0x2a3   :  { %5354 = vmatprep.subr.bf16.mxu1 %v14507_v47  ;;  %v14638_v47 = vld [vmem:[#allocation6 + $0x6c0] ss:$16 sps:$4 sm:$0xff]  }
 0x2a4   :  { %5314 = vmatpush1.bf16.msra.mxu0 %v14502_v48 }
 0x2a5   :  { %5315 = vmatprep.subr.bf16.mxu0 %v14510_v51 }
 0x2a6   :  { %5355 = vmatpush1.bf16.msra.mxu1 %v14505_v49  ;;  %v14646_v49 = vld [vmem:[#allocation6 + $0x6a4] ss:$16 sps:$4 sm:$0xff]  }
 0x2a7   :  { %5356 = vmatprep.subr.bf16.mxu1 %v14513_v55  ;;  %v14568_v55 = vld [vmem:[#allocation6 + $0x4a0] ss:$16 sps:$4 sm:$0xff]  }
 0x2a8   :  { %5316 = vmatpush1.bf16.msra.mxu0 %v14508_v56  ;;  %v14573_v56 = vld [vmem:[#allocation6 + $0x484] ss:$16 sps:$4 sm:$0xff]  }
 0x2a9   :  { %5317 = vmatprep.subr.bf16.mxu0 %v14516_v60 }
 0x2aa   :  { %5357 = vmatpush1.bf16.msra.mxu1 %v14511_v57  ;;  %v14644_v57 = vld [vmem:[#allocation6 + $0x6a0] ss:$16 sps:$4 sm:$0xff]  }
 0x2ab   :  { %5358 = vmatprep.subr.bf16.mxu1 %v14519_v24  ;;  %v3340_v0 = vpop.f32.mrf.mxu0  ;;  %v14652_v24 = vld [vmem:[#allocation6 + $0x684] ss:$16 sps:$4 sm:$0xff]  }
 0x2ac   :  { %5318 = vmatpush2.bf16.msra.mxu0 %v14514_v61  ;;  %v14571_v61 = vld [vmem:[#allocation6 + $0x480] ss:$16 sps:$4 sm:$0xff]  }
 0x2ad   :  { %v3381_v1 = vpop.f32.mrf.mxu1  ;;  %v16462_v4 = vpop.f32.mrf.mxu0  ;;  %5319 = vmatprep.subr.bf16.mxu0 %v14522_v62  ;;  %v14650_v62 = vld [vmem:[#allocation6 + $0x680] ss:$16 sps:$4 sm:$0xff]  }
 0x2ae   :  { %v16460_v3 = vadd.f32 %v3381_v1, %v3340_v0  ;;  %5359 = vmatpush2.bf16.msra.mxu1 %v14517_v16  ;;  %v14576_v16 = vld [vmem:[#allocation6 + $0x464] ss:$16 sps:$4 sm:$0xff]   ;;  %v14574_v0 = vld [vmem:[#allocation6 + $0x460] ss:$16 sps:$4 sm:$0xff]  }
 0x2af   :  { %v16464_v5 = vpop.f32.mrf.mxu1  ;;  %5360 = vmatprep.subr.bf16.mxu1 %v14525_v63  ;;  %v3344_v6 = vpop.f32.mrf.mxu0  ;;  %v14658_v63 = vld [vmem:[#allocation6 + $0x664] ss:$16 sps:$4 sm:$0xff]   ;;  %v14656_v1 = vld [vmem:[#allocation6 + $0x660] ss:$16 sps:$4 sm:$0xff]  }
 0x2b0   :  { %5320 = vmatpush2.bf16.msra.mxu0 %v14520_v18  ;;  %v14579_v18 = vld [vmem:[#allocation6 + $0x444] ss:$16 sps:$4 sm:$0xff]  }
 0x2b1   :  { %v3385_v54 = vpop.f32.mrf.mxu1  ;;  %v3345_v8 = vpop.f32.mrf.mxu0  ;;  %5321 = vmatprep.subr.bf16.mxu0 %v14528_v44  ;;  %v14577_v44 = vld [vmem:[#allocation6 + $0x440] ss:$16 sps:$4 sm:$0xff]  }
 0x2b2   :  { %5361 = vmatpush2.bf16.msra.mxu1 %v14523_v2  ;;  %v14664_v2 = vld [vmem:[#allocation6 + $0x644] ss:$16 sps:$4 sm:$0xff]   ;;  %v14662_v54 = vld [vmem:[#allocation6 + $0x640] ss:$16 sps:$4 sm:$0xff]  }
 0x2b3   :  { %v3386_v19 = vpop.f32.mrf.mxu1  ;;  %5362 = vmatprep.subr.bf16.mxu1 %v14531_v29  ;;  %v15798_v29 = vld [vmem:[#allocation4] sm:$0xff]  ;;  %v14670_v8 = vld [vmem:[#allocation6 + $0x624] ss:$16 sps:$4 sm:$0xff]  }
 0x2b4   :  { %5322 = vmatpush2.bf16.msra.mxu0 %v14526_v7  ;;  %v3643_v6 = vcombine.high %v15798_v29, %v15798_v29  ;;  %v14582_v7 = vld [vmem:[#allocation6 + $0x424] ss:$16 sps:$4 sm:$0xff]  }
 0x2b5   :  { %5323 = vmatprep.subr.bf16.mxu0 %v14534_v17  ;;  %v14585_v19 = vld [vmem:[#allocation6 + $0x404] ss:$16 sps:$4 sm:$0xff]  }
 0x2b6   :  { %5363 = vmatpush2.bf16.msra.mxu1 %v14529_v9  ;;  %v14580_v9 = vld [vmem:[#allocation6 + $0x420] ss:$16 sps:$4 sm:$0xff]   ;;  %v3657_v17 = vrot.slane %v3643_v6, %v16395_v26  ;;  %v14718_v29 = vld [vmem:[#allocation6 + $0x724] ss:$16 sps:$4 sm:$0xff]  }
 0x2b7   :  { %5364 = vmatprep.subr.bf16.mxu1 %v14537_v10  ;;  %v14668_v10 = vld [vmem:[#allocation6 + $0x620] ss:$16 sps:$4 sm:$0xff]  }
 0x2b8   :  { %5324 = vmatpush2.bf16.msra.mxu0 %v14532_v11  ;;  %v14676_v11 = vld [vmem:[#allocation6 + $0x604] ss:$16 sps:$4 sm:$0xff]   ;;  %v14605_v6 = vld [vmem:[#allocation6 + $0x520] ss:$16 sps:$4 sm:$0xff]  }
 0x2b9   :  { %5325 = vmatprep.subr.bf16.mxu0 %v14540_v13  ;;  %v3659_v13 = vcombine.high %v3657_v17, %v3657_v17 }
 0x2ba   :  { %5365 = vmatpush2.bf16.msra.mxu1 %v14535_v12  ;;  %v14583_v12 = vld [vmem:[#allocation6 + $0x400] ss:$16 sps:$4 sm:$0xff]  }
 0x2bb   :  { %5366 = vmatprep.subr.bf16.mxu1 %v14543_v14  ;;  %v14589_v14 = vld [vmem:[#allocation6 + $0x5e4] ss:$16 sps:$4 sm:$0xff]  }
 0x2bc   :  { %5326 = vmatpush2.bf16.msra.mxu0 %v14538_v15  ;;  %v14674_v15 = vld [vmem:[#allocation6 + $0x600] ss:$16 sps:$4 sm:$0xff]  }
 0x2bd   :  { %5327 = vmatprep.subr.bf16.mxu0 %v14546_v22  ;;  %v14587_v22 = vld [vmem:[#allocation6 + $0x5e0] ss:$16 sps:$4 sm:$0xff]  }
 0x2be   :  { %5367 = vmatpush2.bf16.msra.mxu1 %v14541_v20  ;;  %v14682_v20 = vld [vmem:[#allocation6 + $0x7e4] ss:$16 sps:$4 sm:$0xff]  }
 0x2bf   :  { %5368 = vmatprep.subr.bf16.mxu1 %v14549_v34  ;;  %v16480_v34 = vrot.slane %v3659_v13, %v16395_v26  ;;  %v14616_v13 = vld [vmem:[#allocation6 + $0xcc] ss:$16 sps:$4 sm:$0xff]  }
 0x2c0   :  { %5328 = vmatpush2.bf16.msra.mxu0 %v14544_v28  ;;  %v14592_v28 = vld [vmem:[#allocation6 + $0x5c4] ss:$16 sps:$4 sm:$0xff]  }
 0x2c1   :  { %5329 = vmatprep.subr.bf16.mxu0 %v14552_v50  ;;  %v14688_v50 = vld [vmem:[#allocation6 + $0x7c4] ss:$16 sps:$4 sm:$0xff]  }
 0x2c2   :  { %5369 = vmatpush2.bf16.msra.mxu1 %v14547_v31  ;;  %v14680_v31 = vld [vmem:[#allocation6 + $0x7e0] ss:$16 sps:$4 sm:$0xff]  }
 0x2c3   :  { %5370 = vmatprep.subr.bf16.mxu1 %v14555_v23 }
 0x2c4   :  { %5330 = vmatpush2.bf16.msra.mxu0 %v14550_v58  ;;  %v3384_v58 = vadd.f32 %v16464_v5, %v16462_v4 }
 0x2c5   :  { %5331 = vmatprep.subr.bf16.mxu0 %v14558_v30  ;;  %v16486_v30 = vrot.slane %v3657_v17, %v16395_v26  ;;  %v14608_v17 = vld [vmem:[#allocation6 + $0x500] ss:$16 sps:$4 sm:$0xff]  }
 0x2c6   :  { %5371 = vmatpush2.bf16.msra.mxu1 %v14553_v27 }
 0x2c7   :  { %5372 = vmatprep.subr.bf16.mxu1 %v14561_v43  ;;  %v3728_v43 = vpack.i.b16 %v16480_v34, %v16480_v34 }
 0x2c8   :  { %5332 = vmatpush2.bf16.msra.mxu0 %v14556_v25  ;;  %v14590_v25 = vld [vmem:[#allocation6 + $0x5c0] ss:$16 sps:$4 sm:$0xff]  }
 0x2c9   :  { %5383 = vmatprep.subr.bf16.mxu0 %v14564_v32  ;;  %v14595_v32 = vld [vmem:[#allocation6 + $0x5a4] ss:$16 sps:$4 sm:$0xff]  }
 0x2ca   :  { %5373 = vmatpush2.bf16.msra.mxu1 %v14559_v35 }
 0x2cb   :  { %5424 = vmatprep.subr.bf16.mxu1 %v14634_v33  ;;  %5334 = vmatmul.mubr.bf16.vlgmr.msra.gmra.mxu0 %v16468_v41  ;;  %v14686_v33 = vld [vmem:[#allocation6 + $0x7c0] ss:$16 sps:$4 sm:$0xff]  }
 0x2cc   :  { %5384 = vmatpush1.bf16.msra.mxu0 %v14562_v37 }
 0x2cd   :  { %v16473_v59 = vpop.f32.mrf.mxu1  ;;  %5375 = vmatmul.mubr.bf16.vlgmr.msra.gmra.mxu1 %v16470_v42  ;;  %5385 = vmatprep.subr.bf16.mxu0 %v14567_v38  ;;  %v14694_v38 = vld [vmem:[#allocation6 + $0x7a4] ss:$16 sps:$4 sm:$0xff]  }
 0x2ce   :  { %5425 = vmatpush1.bf16.msra.mxu1 %v14632_v39 }
 0x2cf   :  { %v16476_v48 = vpop.f32.mrf.mxu1  ;;  %5426 = vmatprep.subr.bf16.mxu1 %v14640_v40  ;;  %v3733_v40 = vrot.slane %v3728_v43, %v16405_v52  ;;  %v14625_v43 = vld [vmem:[#allocation6 + $0x6c] ss:$16 sps:$4 sm:$0xff]  }
 0x2d0   :  { %5386 = vmatpush1.bf16.msra.mxu0 %v14565_v45  ;;  %v14593_v45 = vld [vmem:[#allocation6 + $0x5a0] ss:$16 sps:$4 sm:$0xff]  }
 0x2d1   :  { %v3467_v51 = vpop.f32.mrf.mxu1  ;;  %5387 = vmatprep.subr.bf16.mxu0 %v14570_v21 }
 0x2d2   :  { %5427 = vmatpush1.bf16.msra.mxu1 %v14638_v47  ;;  %v14598_v47 = vld [vmem:[#allocation6 + $0x584] ss:$16 sps:$4 sm:$0xff]  }
 0x2d3   :  { %v3468_v60 = vpop.f32.mrf.mxu1  ;;  %5428 = vmatprep.subr.bf16.mxu1 %v14646_v49  ;;  %v14692_v49 = vld [vmem:[#allocation6 + $0x7a0] ss:$16 sps:$4 sm:$0xff]  }
 0x2d4   :  { %5388 = vmatpush1.bf16.msra.mxu0 %v14568_v55  ;;  %v14700_v55 = vld [vmem:[#allocation6 + $0x784] ss:$16 sps:$4 sm:$0xff]   ;;  %v14596_v60 = vld [vmem:[#allocation6 + $0x580] ss:$16 sps:$4 sm:$0xff]  }
 0x2d5   :  { %5389 = vmatprep.subr.bf16.mxu0 %v14573_v56 }
 0x2d6   :  { %5429 = vmatpush1.bf16.msra.mxu1 %v14644_v57 }
 0x2d7   :  { %5430 = vmatprep.subr.bf16.mxu1 %v14652_v24  ;;  %v14698_v24 = vld [vmem:[#allocation6 + $0x780] ss:$16 sps:$4 sm:$0xff]  }
 0x2d8   :  { %5390 = vmatpush1.bf16.msra.mxu0 %v14571_v61  ;;  %v14706_v61 = vld [vmem:[#allocation6 + $0x764] ss:$16 sps:$4 sm:$0xff]  }
 0x2d9   :  { %5391 = vmatprep.subr.bf16.mxu0 %v14576_v16 }
 0x2da   :  { %5431 = vmatpush1.bf16.msra.mxu1 %v14650_v62  ;;  %v14599_v62 = vld [vmem:[#allocation6 + $0x560] ss:$16 sps:$4 sm:$0xff]  }
 0x2db   :  { %5432 = vmatprep.subr.bf16.mxu1 %v14658_v63  ;;  %v14604_v63 = vld [vmem:[#allocation6 + $0x544] ss:$16 sps:$4 sm:$0xff]  }
 0x2dc   :  { %5392 = vmatpush1.bf16.msra.mxu0 %v14574_v0  ;;  %v14704_v0 = vld [vmem:[#allocation6 + $0x760] ss:$16 sps:$4 sm:$0xff]  }
 0x2dd   :  { %5393 = vmatprep.subr.bf16.mxu0 %v14579_v18  ;;  %v14712_v18 = vld [vmem:[#allocation6 + $0x744] ss:$16 sps:$4 sm:$0xff]  }
 0x2de   :  { %5433 = vmatpush1.bf16.msra.mxu1 %v14656_v1  ;;  %v14602_v1 = vld [vmem:[#allocation6 + $0x540] ss:$16 sps:$4 sm:$0xff]  }
 0x2df   :  { %5434 = vmatprep.subr.bf16.mxu1 %v14664_v2  ;;  %v14607_v2 = vld [vmem:[#allocation6 + $0x524] ss:$16 sps:$4 sm:$0xff]  }
 0x2e0   :  { %5394 = vmatpush1.bf16.msra.mxu0 %v14577_v44  ;;  %v14710_v44 = vld [vmem:[#allocation6 + $0x740] ss:$16 sps:$4 sm:$0xff]  }
 0x2e1   :  { %5395 = vmatprep.subr.bf16.mxu0 %v14582_v7  ;;  %v14610_v7 = vld [vmem:[#allocation6 + $0x504] ss:$16 sps:$4 sm:$0xff]  }
 0x2e2   :  { %5435 = vmatpush1.bf16.msra.mxu1 %v14662_v54  ;;  %v14716_v54 = vld [vmem:[#allocation6 + $0x720] ss:$16 sps:$4 sm:$0xff]  }
 0x2e3   :  { %5436 = vmatprep.subr.bf16.mxu1 %v14670_v8  ;;  %v14724_v8 = vld [vmem:[#allocation6 + $0x704] ss:$16 sps:$4 sm:$0xff]  }
 0x2e4   :  { %5396 = vmatpush1.bf16.msra.mxu0 %v14580_v9 }
 0x2e5   :  { %5397 = vmatprep.subr.bf16.mxu0 %v14585_v19  ;;  %v14613_v19 = vld [vmem:[#allocation6 + $0xec] ss:$16 sps:$4 sm:$0xff]  }
 0x2e6   :  { %5437 = vmatpush1.bf16.msra.mxu1 %v14668_v10  ;;  %v14722_v10 = vld [vmem:[#allocation6 + $0x700] ss:$16 sps:$4 sm:$0xff]  }
 0x2e7   :  { %5438 = vmatprep.subr.bf16.mxu1 %v14676_v11  ;;  %v14730_v11 = vld [vmem:[#allocation6 + $0x2ec] ss:$16 sps:$4 sm:$0xff]  }
 0x2e8   :  { %5398 = vmatpush1.bf16.msra.mxu0 %v14583_v12  ;;  %v14611_v12 = vld [vmem:[#allocation6 + $0xe8] ss:$16 sps:$4 sm:$0xff]  }
 0x2e9   :  { %5399 = vmatprep.subr.bf16.mxu0 %v14589_v14 }
 0x2ea   :  { %5439 = vmatpush1.bf16.msra.mxu1 %v14674_v15 }
 0x2eb   :  { %5440 = vmatprep.subr.bf16.mxu1 %v14682_v20  ;;  %v3422_v23 = vpop.f32.mrf.mxu0  ;;  %v14614_v20 = vld [vmem:[#allocation6 + $0xc8] ss:$16 sps:$4 sm:$0xff]  }
 0x2ec   :  { %v3423_v27 = vadd.f32 %v3422_v23, %v16460_v3  ;;  %5400 = vmatpush2.bf16.msra.mxu0 %v14587_v22  ;;  %v3721_v3 = vpack.i.b16 %v16486_v30, %v16486_v30  ;;  %v14619_v22 = vld [vmem:[#allocation6 + $0xac] ss:$16 sps:$4 sm:$0xff]  }
 0x2ed   :  { %v3424_v35 = vpop.f32.mrf.mxu0  ;;  %5401 = vmatprep.subr.bf16.mxu0 %v14592_v28  ;;  %v14622_v23 = vld [vmem:[#allocation6 + $0x8c] ss:$16 sps:$4 sm:$0xff]  }
 0x2ee   :  { %5441 = vmatpush2.bf16.msra.mxu1 %v14680_v31  ;;  %v3425_v37 = vadd.f32 %v3424_v35, %v3384_v58  ;;  %v3464_v4 = vadd.f32 %v16473_v59, %v3423_v27  ;;  %v3726_v59 = vrot.slane %v3721_v3, %v16405_v52  ;;  %v14620_v27 = vld [vmem:[#allocation6 + $0x88] ss:$16 sps:$4 sm:$0xff]   ;;  %v14628_v35 = vld [vmem:[#allocation6 + $0x4c] ss:$16 sps:$4 sm:$0xff]  }
 0x2ef   :  { %5442 = vmatprep.subr.bf16.mxu1 %v14688_v50  ;;  %v3426_v39 = vpop.f32.mrf.mxu0  ;;  %v14617_v50 = vld [vmem:[#allocation6 + $0xa8] ss:$16 sps:$4 sm:$0xff]   ;;  %v14649_v3 = vld [vmem:[#allocation6 + $0x1cc] ss:$16 sps:$4 sm:$0xff]  }
 0x2f0   :  { %v3466_v5 = vadd.f32 %v16476_v48, %v3425_v37  ;;  %5402 = vmatpush2.bf16.msra.mxu0 %v14590_v25  ;;  %v3638_v56 = vpack.c.bf16 %v3464_v4, %v3464_v4  ;;  %v14601_v48 = vld [vmem:[#allocation6 + $0x564] ss:$16 sps:$4 sm:$0xff]   ;;  %v14623_v25 = vld [vmem:[#allocation6 + $0x68] ss:$16 sps:$4 sm:$0xff]   ;;  %v14637_v37 = vld [vmem:[#allocation6 + $0xc] ss:$16 sps:$4 sm:$0xff]  }
 0x2f1   :  { %v3427_v21 = vpop.f32.mrf.mxu0  ;;  %5403 = vmatprep.subr.bf16.mxu0 %v14595_v32  ;;  %v14631_v32 = vld [vmem:[#allocation6 + $0x2c] ss:$16 sps:$4 sm:$0xff]   ;;  %v14641_v4 = vld [vmem:[#allocation6 + $0x1e8] ss:$16 sps:$4 sm:$0xff]  }
 0x2f2   :  { %5443 = vmatpush2.bf16.msra.mxu1 %v14686_v33  ;;  %v3639_v51 = vpack.c.bf16 %v3466_v5, %v3466_v5  ;;  %v3752_v16 = vadd.bf16 %v3726_v59, %v3638_v56  ;;  %v14629_v33 = vld [vmem:[#allocation6 + $0x28] ss:$16 sps:$4 sm:$0xff]   ;;  %v14643_v39 = vld [vmem:[#allocation6 + $0x1ec] ss:$16 sps:$4 sm:$0xff]  }
 0x2f3   :  { %5444 = vmatprep.subr.bf16.mxu1 %v14694_v38  ;;  %v14635_v38 = vld [vmem:[#allocation6 + $0x8] ss:$16 sps:$4 sm:$0xff]   ;;  %v14655_v21 = vld [vmem:[#allocation6 + $0x1ac] ss:$16 sps:$4 sm:$0xff]  }
 0x2f4   :  { %v3753_v57 = vadd.bf16 %v3733_v40, %v3639_v51  ;;  %5404 = vmatpush2.bf16.msra.mxu0 %v14593_v45  ;;  %v14647_v40 = vld [vmem:[#allocation6 + $0x1c8] ss:$16 sps:$4 sm:$0xff]   ;;  %v14667_v59 = vld [vmem:[#allocation6 + $0x16c] ss:$16 sps:$4 sm:$0xff]  }
 0x2f5   :  { %5405 = vmatprep.subr.bf16.mxu0 %v14598_v47  ;;  %v14659_v56 = vld [vmem:[#allocation6 + $0x188] ss:$16 sps:$4 sm:$0xff]  }
 0x2f6   :  { %5445 = vmatpush2.bf16.msra.mxu1 %v14692_v49  ;;  %15733 = vtanh.bf16 %v3753_v57  ;;  %v14653_v49 = vld [vmem:[#allocation6 + $0x1a8] ss:$16 sps:$4 sm:$0xff]  }
 0x2f7   :  { %5446 = vmatprep.subr.bf16.mxu1 %v14700_v55  ;;  %15735 = vtanh.bf16 %v3752_v16  ;;  %v14661_v55 = vld [vmem:[#allocation6 + $0x18c] ss:$16 sps:$4 sm:$0xff]   ;;  %v14665_v57 = vld [vmem:[#allocation6 + $0x168] ss:$16 sps:$4 sm:$0xff]  }
 0x2f8   :  { %5406 = vmatpush2.bf16.msra.mxu0 %v14596_v60  ;;  %v14673_v60 = vld [vmem:[#allocation6 + $0x14c] ss:$16 sps:$4 sm:$0xff]  }
 0x2f9   :  { %5407 = vmatprep.subr.bf16.mxu0 %v14601_v48  ;;  %v14671_v48 = vld [vmem:[#allocation6 + $0x148] ss:$16 sps:$4 sm:$0xff]   ;;  %v14685_v16 = vld [vmem:[#allocation6 + $0x10c] ss:$16 sps:$4 sm:$0xff]  }
 0x2fa   :  { %5447 = vmatpush2.bf16.msra.mxu1 %v14698_v24  ;;  %v14679_v24 = vld [vmem:[#allocation6 + $0x12c] ss:$16 sps:$4 sm:$0xff]  }
 0x2fb   :  { %5448 = vmatprep.subr.bf16.mxu1 %v14706_v61  ;;  %v14677_v61 = vld [vmem:[#allocation6 + $0x128] ss:$16 sps:$4 sm:$0xff]  }
 0x2fc   :  { %5408 = vmatpush2.bf16.msra.mxu0 %v14599_v62  ;;  %v14683_v62 = vld [vmem:[#allocation6 + $0x108] ss:$16 sps:$4 sm:$0xff]  }
 0x2fd   :  { %5409 = vmatprep.subr.bf16.mxu0 %v14604_v63  ;;  %v14691_v63 = vld [vmem:[#allocation6 + $0x4ec] ss:$16 sps:$4 sm:$0xff]  }
 0x2fe   :  { %5449 = vmatpush2.bf16.msra.mxu1 %v14704_v0  ;;  %v3689_v0 = vcombine.high %v16486_v30, %v16486_v30 }
 0x2ff   :  { %5450 = vmatprep.subr.bf16.mxu1 %v14712_v18  ;;  %v14689_v18 = vld [vmem:[#allocation6 + $0x4e8] ss:$16 sps:$4 sm:$0xff]  }
 0x300   :  { %5410 = vmatpush2.bf16.msra.mxu0 %v14602_v1  ;;  %v3691_v1 = vcombine.high %v16480_v34, %v16480_v34 }
 0x301   :  { %5411 = vmatprep.subr.bf16.mxu0 %v14607_v2  ;;  %v14697_v2 = vld [vmem:[#allocation6 + $0x4cc] ss:$16 sps:$4 sm:$0xff]  }
 0x302   :  { %5451 = vmatpush2.bf16.msra.mxu1 %v14710_v44 }
 0x303   :  { %5452 = vmatprep.subr.bf16.mxu1 %v14718_v29 }
 0x304   :  { %v16496_v9 = vpop.eup %15733  ;;  %5412 = vmatpush2.bf16.msra.mxu0 %v14605_v6 }
 0x305   :  { %5415 = vmatprep.mubr.bf16.mxu0 %v16496_v9  ;;  %5413 = vmatprep.subr.bf16.mxu0 %v14610_v7  ;;  %v16499_v14 = vpop.eup %15735  ;;  %v3735_v7 = vpack.i.b16 %v3689_v0, %v3689_v0  ;;  %v14763_v0 = vld [vmem:[#allocation6 + $0x56c] ss:$16 sps:$4 sm:$0xff]  }
 0x306   :  { %5453 = vmatpush2.bf16.msra.mxu1 %v14716_v54  ;;  %v14695_v54 = vld [vmem:[#allocation6 + $0x4c8] ss:$16 sps:$4 sm:$0xff]  }
 0x307   :  { %5454 = vmatprep.subr.bf16.mxu1 %v14724_v8 }
 0x308   :  { %5414 = vmatpush2.bf16.msra.mxu0 %v14608_v17 }
 0x309   :  { %5465 = vmatprep.subr.bf16.mxu0 %v14613_v19  ;;  %v3742_v19 = vpack.i.b16 %v3691_v1, %v3691_v1  ;;  %v14761_v1 = vld [vmem:[#allocation6 + $0x568] ss:$16 sps:$4 sm:$0xff]  }
 0x30a   :  { %5455 = vmatpush2.bf16.msra.mxu1 %v14722_v10  ;;  %v14703_v10 = vld [vmem:[#allocation6 + $0x4ac] ss:$16 sps:$4 sm:$0xff]  }
 0x30b   :  { %5416 = vmatmul.mubr.bf16.vlgmr.msra.gmra.mxu0 %v16499_v14  ;;  %5506 = vmatprep.subr.bf16.mxu1 %v14730_v11 }
 0x30c   :  { %5466 = vmatpush1.bf16.msra.mxu0 %v14611_v12  ;;  %5497 = vmatprep.mubr.bf16.mxu0 %v16453_v46  ;;  %v14626_v46 = vld [vmem:[#allocation6 + $0x48] ss:$16 sps:$4 sm:$0xff]  }
 0x30d   :  { %v16502_v15 = vpop.f32.mrf.mxu1  ;;  %5467 = vmatprep.subr.bf16.mxu0 %v14616_v13 }
 0x30f   :  { %v16505_v28 = vpop.f32.mrf.mxu1 }
 0x310   :  { %5468 = vmatpush1.bf16.msra.mxu0 %v14614_v20  ;;  %v14701_v20 = vld [vmem:[#allocation6 + $0x4a8] ss:$16 sps:$4 sm:$0xff]  }
 0x311   :  { %v3508_v31 = vpop.f32.mrf.mxu1  ;;  %5469 = vmatprep.subr.bf16.mxu0 %v14619_v22 }
 0x313   :  { %v3509_v58 = vpop.f32.mrf.mxu1 }
 0x314   :  { %5470 = vmatpush1.bf16.msra.mxu0 %v14617_v50 }
 0x315   :  { %5471 = vmatprep.subr.bf16.mxu0 %v14622_v23 }
 0x318   :  { %5472 = vmatpush1.bf16.msra.mxu0 %v14620_v27 }
 0x319   :  { %5473 = vmatprep.subr.bf16.mxu0 %v14625_v43  ;;  %v14707_v43 = vld [vmem:[#allocation6 + $0x488] ss:$16 sps:$4 sm:$0xff]  }
 0x31c   :  { %5474 = vmatpush1.bf16.msra.mxu0 %v14623_v25 }
 0x31d   :  { %5475 = vmatprep.subr.bf16.mxu0 %v14628_v35  ;;  %v14715_v35 = vld [vmem:[#allocation6 + $0x46c] ss:$16 sps:$4 sm:$0xff]  }
 0x320   :  { %5476 = vmatpush1.bf16.msra.mxu0 %v14626_v46  ;;  %v14713_v46 = vld [vmem:[#allocation6 + $0x468] ss:$16 sps:$4 sm:$0xff]  }
 0x321   :  { %5477 = vmatprep.subr.bf16.mxu0 %v14631_v32  ;;  %v14721_v32 = vld [vmem:[#allocation6 + $0x44c] ss:$16 sps:$4 sm:$0xff]  }
 0x324   :  { %5478 = vmatpush1.bf16.msra.mxu0 %v14629_v33  ;;  %v14719_v33 = vld [vmem:[#allocation6 + $0x448] ss:$16 sps:$4 sm:$0xff]  }
 0x325   :  { %5479 = vmatprep.subr.bf16.mxu0 %v14637_v37  ;;  %v14727_v37 = vld [vmem:[#allocation6 + $0x42c] ss:$16 sps:$4 sm:$0xff]  }
 0x328   :  { %5480 = vmatpush1.bf16.msra.mxu0 %v14635_v38  ;;  %v14725_v38 = vld [vmem:[#allocation6 + $0x428] ss:$16 sps:$4 sm:$0xff]  }
 0x329   :  { %5481 = vmatprep.subr.bf16.mxu0 %v14643_v39  ;;  %v14733_v39 = vld [vmem:[#allocation6 + $0x40c] ss:$16 sps:$4 sm:$0xff]  }
 0x32b   :  { %v3545_v5 = vpop.f32.mrf.mxu0 }
 0x32c   :  { %5482 = vmatpush2.bf16.msra.mxu0 %v14641_v4  ;;  %v3546_v44 = vadd.f32 %v3545_v5, %v16502_v15  ;;  %v3740_v15 = vrot.slane %v3735_v7, %v16405_v52  ;;  %v14728_v4 = vld [vmem:[#allocation6 + $0x2e8] ss:$16 sps:$4 sm:$0xff]   ;;  %v14772_v7 = vld [vmem:[#allocation6 + $0x20c] ss:$16 sps:$4 sm:$0xff]  }
 0x32d   :  { %v3547_v45 = vpop.f32.mrf.mxu0  ;;  %5483 = vmatprep.subr.bf16.mxu0 %v14649_v3  ;;  %v14731_v5 = vld [vmem:[#allocation6 + $0x408] ss:$16 sps:$4 sm:$0xff]  }
 0x32e   :  { %v3548_v8 = vadd.f32 %v3547_v45, %v16505_v28  ;;  %v14709_v28 = vld [vmem:[#allocation6 + $0x48c] ss:$16 sps:$4 sm:$0xff]  }
 0x32f   :  { %v3549_v47 = vpop.f32.mrf.mxu0 }
 0x330   :  { %5484 = vmatpush2.bf16.msra.mxu0 %v14647_v40  ;;  %v14736_v40 = vld [vmem:[#allocation6 + $0x2cc] ss:$16 sps:$4 sm:$0xff]   ;;  %v14734_v47 = vld [vmem:[#allocation6 + $0x2c8] ss:$16 sps:$4 sm:$0xff]  }
 0x331   :  { %v3550_v51 = vpop.f32.mrf.mxu0  ;;  %5485 = vmatprep.subr.bf16.mxu0 %v14655_v21  ;;  %v14739_v21 = vld [vmem:[#allocation6 + $0x5ec] ss:$16 sps:$4 sm:$0xff]  }
 0x332   :  { %v14742_v51 = vld [vmem:[#allocation6 + $0x2ac] ss:$16 sps:$4 sm:$0xff]  }
 0x334   :  { %5486 = vmatpush2.bf16.msra.mxu0 %v14653_v49  ;;  %v14737_v49 = vld [vmem:[#allocation6 + $0x5e8] ss:$16 sps:$4 sm:$0xff]  }
 0x335   :  { %5487 = vmatprep.subr.bf16.mxu0 %v14661_v55  ;;  %v14745_v55 = vld [vmem:[#allocation6 + $0x5cc] ss:$16 sps:$4 sm:$0xff]  }
 0x338   :  { %5488 = vmatpush2.bf16.msra.mxu0 %v14659_v56  ;;  %v14740_v56 = vld [vmem:[#allocation6 + $0x2a8] ss:$16 sps:$4 sm:$0xff]  }
 0x339   :  { %5489 = vmatprep.subr.bf16.mxu0 %v14667_v59  ;;  %v14743_v59 = vld [vmem:[#allocation6 + $0x5c8] ss:$16 sps:$4 sm:$0xff]  }
 0x33c   :  { %5490 = vmatpush2.bf16.msra.mxu0 %v14665_v57  ;;  %v14748_v57 = vld [vmem:[#allocation6 + $0x28c] ss:$16 sps:$4 sm:$0xff]  }
 0x33d   :  { %5491 = vmatprep.subr.bf16.mxu0 %v14673_v60  ;;  %v14751_v60 = vld [vmem:[#allocation6 + $0x5ac] ss:$16 sps:$4 sm:$0xff]  }
 0x340   :  { %5492 = vmatpush2.bf16.msra.mxu0 %v14671_v48  ;;  %v14746_v48 = vld [vmem:[#allocation6 + $0x288] ss:$16 sps:$4 sm:$0xff]  }
 0x341   :  { %5493 = vmatprep.subr.bf16.mxu0 %v14679_v24  ;;  %v14754_v24 = vld [vmem:[#allocation6 + $0x26c] ss:$16 sps:$4 sm:$0xff]  }
 0x344   :  { %5494 = vmatpush2.bf16.msra.mxu0 %v14677_v61  ;;  %v14757_v61 = vld [vmem:[#allocation6 + $0x58c] ss:$16 sps:$4 sm:$0xff]  }
 0x345   :  { %5495 = vmatprep.subr.bf16.mxu0 %v14685_v16  ;;  %v14752_v16 = vld [vmem:[#allocation6 + $0x268] ss:$16 sps:$4 sm:$0xff]  }
 0x348   :  { %5496 = vmatpush2.bf16.msra.mxu0 %v14683_v62  ;;  %v14755_v62 = vld [vmem:[#allocation6 + $0x588] ss:$16 sps:$4 sm:$0xff]  }
 0x349   :  { %5547 = vmatprep.subr.bf16.mxu0 %v14691_v63  ;;  %v14760_v63 = vld [vmem:[#allocation6 + $0x24c] ss:$16 sps:$4 sm:$0xff]  }
 0x34b   :  { %v3627_v29 = vpop.f32.mrf.mxu0  ;;  %5498 = vmatmul.mubr.bf16.vlgmr.msra.gmra.mxu0 %v16468_v41 }
 0x34c   :  { %5548 = vmatpush1.bf16.msra.mxu0 %v14689_v18  ;;  %5579 = vmatprep.mubr.bf16.mxu0 %v16496_v9  ;;  %v3747_v9 = vrot.slane %v3742_v19, %v16405_v52  ;;  %v14758_v18 = vld [vmem:[#allocation6 + $0x248] ss:$16 sps:$4 sm:$0xff]   ;;  %v14781_v19 = vld [vmem:[#allocation6 + $0x50c] ss:$16 sps:$4 sm:$0xff]  }
 0x34d   :  { %v3586_v6 = vpop.f32.mrf.mxu1  ;;  %v3629_v17 = vpop.f32.mrf.mxu0  ;;  %5549 = vmatprep.subr.bf16.mxu0 %v14697_v2  ;;  %v14766_v2 = vld [vmem:[#allocation6 + $0x22c] ss:$16 sps:$4 sm:$0xff]  }
 0x34e   :  { %v3587_v30 = vadd.f32 %v3586_v6, %v3546_v44  ;;  %v14769_v44 = vld [vmem:[#allocation6 + $0x54c] ss:$16 sps:$4 sm:$0xff]   ;;  %v14767_v6 = vld [vmem:[#allocation6 + $0x548] ss:$16 sps:$4 sm:$0xff]  }
 0x34f   :  { %v3588_v34 = vpop.f32.mrf.mxu1  ;;  %v3631_v13 = vpop.f32.mrf.mxu0 }
 0x350   :  { %v3628_v11 = vadd.f32 %v3627_v29, %v3587_v30  ;;  %v3589_v12 = vadd.f32 %v3588_v34, %v3548_v8  ;;  %5550 = vmatpush1.bf16.msra.mxu0 %v14695_v54  ;;  %v14764_v29 = vld [vmem:[#allocation6 + $0x228] ss:$16 sps:$4 sm:$0xff]   ;;  %v14775_v54 = vld [vmem:[#allocation6 + $0x52c] ss:$16 sps:$4 sm:$0xff]  }
 0x351   :  { %v3590_v41 = vpop.f32.mrf.mxu1  ;;  %v3632_v50 = vpop.f32.mrf.mxu0  ;;  %5551 = vmatprep.subr.bf16.mxu0 %v14703_v10  ;;  %v14770_v8 = vld [vmem:[#allocation6 + $0x208] ss:$16 sps:$4 sm:$0xff]  }
 0x352   :  { %v3640_v22 = vpack.c.bf16 %v3628_v11, %v3628_v11  ;;  %v3630_v31 = vadd.f32 %v3629_v17, %v3589_v12  ;;  %v14773_v30 = vld [vmem:[#allocation6 + $0x528] ss:$16 sps:$4 sm:$0xff]   ;;  %v14778_v17 = vld [vmem:[#allocation6 + $0x3ec] ss:$16 sps:$4 sm:$0xff]  }
 0x353   :  { %v3591_v23 = vpop.f32.mrf.mxu1  ;;  %v14776_v10 = vld [vmem:[#allocation6 + $0x3e8] ss:$16 sps:$4 sm:$0xff]   ;;  %v14784_v11 = vld [vmem:[#allocation6 + $0x3cc] ss:$16 sps:$4 sm:$0xff]  }
 0x354   :  { %v3641_v58 = vpack.c.bf16 %v3630_v31, %v3630_v31  ;;  %v3754_v27 = vadd.bf16 %v3740_v15, %v3640_v22  ;;  %5552 = vmatpush1.bf16.msra.mxu0 %v14701_v20  ;;  %v14779_v34 = vld [vmem:[#allocation6 + $0x508] ss:$16 sps:$4 sm:$0xff]   ;;  %v14787_v15 = vld [vmem:[#allocation6 + $0x3ac] ss:$16 sps:$4 sm:$0xff]  }
 0x355   :  { %5553 = vmatprep.subr.bf16.mxu0 %v14709_v28  ;;  %v14853_v12 = vld [vmem:[#allocation9 + $0x74] ss:$8 sps:$4 sm:$0xff]   ;;  %v14851_v41 = vld [vmem:[#allocation9 + $0x70] ss:$8 sps:$4 sm:$0xff]   ;;  %v14856_v20 = vld [vmem:[#allocation9 + $0x64] ss:$8 sps:$4 sm:$0xff]  }
 0x356   :  { %v3755_v25 = vadd.bf16 %v3747_v9, %v3641_v58  ;;  %v14782_v13 = vld [vmem:[#allocation6 + $0x3c8] ss:$16 sps:$4 sm:$0xff]   ;;  %v14790_v23 = vld [vmem:[#allocation6 + $0x38c] ss:$16 sps:$4 sm:$0xff]  }
 0x357   :  { %v14785_v9 = vld [vmem:[#allocation6 + $0x3a8] ss:$16 sps:$4 sm:$0xff]   ;;  %v14854_v58 = vld [vmem:[#allocation9 + $0x60] ss:$8 sps:$4 sm:$0xff]  }
 0x358   :  { %15737 = vtanh.bf16 %v3755_v25  ;;  %5554 = vmatpush1.bf16.msra.mxu0 %v14707_v43  ;;  %v14859_v43 = vld [vmem:[#allocation9 + $0x54] ss:$8 sps:$4 sm:$0xff]  }
 0x359   :  { %15739 = vtanh.bf16 %v3754_v27  ;;  %5555 = vmatprep.subr.bf16.mxu0 %v14715_v35 }
 0x35c   :  { %5556 = vmatpush1.bf16.msra.mxu0 %v14713_v46 }
 0x35d   :  { %5557 = vmatprep.subr.bf16.mxu0 %v14721_v32  ;;  %v14788_v32 = vld [vmem:[#allocation6 + $0x388] ss:$16 sps:$4 sm:$0xff]  }
 0x360   :  { %5558 = vmatpush1.bf16.msra.mxu0 %v14719_v33 }
 0x361   :  { %5559 = vmatprep.subr.bf16.mxu0 %v14727_v37  ;;  %v14857_v37 = vld [vmem:[#allocation9 + $0x50] ss:$8 sps:$4 sm:$0xff]  }
 0x364   :  { %5560 = vmatpush1.bf16.msra.mxu0 %v14725_v38 }
 0x365   :  { %5561 = vmatprep.subr.bf16.mxu0 %v14733_v39  ;;  %v14862_v39 = vld [vmem:[#allocation9 + $0x44] ss:$8 sps:$4 sm:$0xff]  }
 0x366   :  { %v16517_v3 = vpop.eup %15737 }
 0x367   :  { %v16519_v45 = vpop.eup %15739  ;;  %5456 = vmatprep.mubr.bf16.mxu1 %v16517_v3 }
 0x368   :  { %5457 = vmatmul.mubr.bf16.vlgmr.msra.gmra.mxu1 %v16519_v45  ;;  %5562 = vmatpush1.bf16.msra.mxu0 %v14731_v5  ;;  %v14796_v5 = vld [vmem:[#allocation6 + $0x34c] ss:$16 sps:$4 sm:$0xff]  }
 0x369   :  { %5507 = vmatpush1.bf16.msra.mxu1 %v14728_v4  ;;  %5538 = vmatprep.mubr.bf16.mxu1 %v16456_v53  ;;  %v14749_v53 = vld [vmem:[#allocation6 + $0x5a8] ss:$16 sps:$4 sm:$0xff]  }
 0x36a   :  { %5508 = vmatprep.subr.bf16.mxu1 %v14736_v40  ;;  %5563 = vmatprep.subr.bf16.mxu0 %v14739_v21  ;;  %v14791_v4 = vld [vmem:[#allocation6 + $0x368] ss:$16 sps:$4 sm:$0xff]   ;;  %v14860_v40 = vld [vmem:[#allocation9 + $0x40] ss:$8 sps:$4 sm:$0xff]  }
 0x36b   :  { %v14865_v21 = vld [vmem:[#allocation9 + $0x34] ss:$8 sps:$4 sm:$0xff]  }
 0x36c   :  { %5564 = vmatpush2.bf16.msra.mxu0 %v14737_v49  ;;  %v14799_v49 = vld [vmem:[#allocation6 + $0x32c] ss:$16 sps:$4 sm:$0xff]  }
 0x36d   :  { %5509 = vmatpush1.bf16.msra.mxu1 %v14734_v47  ;;  %5565 = vmatprep.subr.bf16.mxu0 %v14745_v55  ;;  %v14794_v47 = vld [vmem:[#allocation6 + $0x348] ss:$16 sps:$4 sm:$0xff]  }
 0x36e   :  { %5510 = vmatprep.subr.bf16.mxu1 %v14742_v51  ;;  %v14863_v51 = vld [vmem:[#allocation9 + $0x30] ss:$8 sps:$4 sm:$0xff]   ;;  %v14868_v55 = vld [vmem:[#allocation9 + $0x24] ss:$8 sps:$4 sm:$0xff]  }
 0x370   :  { %5566 = vmatpush2.bf16.msra.mxu0 %v14743_v59  ;;  %v14802_v59 = vld [vmem:[#allocation6 + $0x30c] ss:$16 sps:$4 sm:$0xff]  }
 0x371   :  { %5511 = vmatpush1.bf16.msra.mxu1 %v14740_v56  ;;  %5567 = vmatprep.subr.bf16.mxu0 %v14751_v60  ;;  %v14797_v56 = vld [vmem:[#allocation6 + $0x328] ss:$16 sps:$4 sm:$0xff]  }
 0x372   :  { %5512 = vmatprep.subr.bf16.mxu1 %v14748_v57  ;;  %v14866_v57 = vld [vmem:[#allocation9 + $0x20] ss:$8 sps:$4 sm:$0xff]   ;;  %v14871_v60 = vld [vmem:[#allocation9 + $0x14] ss:$8 sps:$4 sm:$0xff]  }
 0x374   :  { %5568 = vmatpush2.bf16.msra.mxu0 %v14749_v53  ;;  %v14805_v53 = vld [vmem:[#allocation6 + $0x6ec] ss:$16 sps:$4 sm:$0xff]  }
 0x375   :  { %5513 = vmatpush1.bf16.msra.mxu1 %v14746_v48  ;;  %5569 = vmatprep.subr.bf16.mxu0 %v14757_v61  ;;  %v14800_v48 = vld [vmem:[#allocation6 + $0x308] ss:$16 sps:$4 sm:$0xff]  }
 0x376   :  { %5514 = vmatprep.subr.bf16.mxu1 %v14754_v24  ;;  %v14869_v24 = vld [vmem:[#allocation9 + $0x10] ss:$8 sps:$4 sm:$0xff]   ;;  %v14874_v61 = vld [vmem:[#allocation9 + $0x4] ss:$8 sps:$4 sm:$0xff]  }
 0x378   :  { %5570 = vmatpush2.bf16.msra.mxu0 %v14755_v62  ;;  %v14808_v62 = vld [vmem:[#allocation6 + $0x6cc] ss:$16 sps:$4 sm:$0xff]  }
 0x379   :  { %5515 = vmatpush1.bf16.msra.mxu1 %v14752_v16  ;;  %5571 = vmatprep.subr.bf16.mxu0 %v14763_v0  ;;  %v14803_v16 = vld [vmem:[#allocation6 + $0x6e8] ss:$16 sps:$4 sm:$0xff]  }
 0x37a   :  { %5516 = vmatprep.subr.bf16.mxu1 %v14760_v63  ;;  %v14872_v63 = vld [vmem:[#allocation9] ss:$8 sps:$4 sm:$0xff]   ;;  %v14877_v0 = vld [vmem:[#allocation9 + $0xf4] ss:$8 sps:$4 sm:$0xff]  }
 0x37c   :  { %5572 = vmatpush2.bf16.msra.mxu0 %v14761_v1  ;;  %v14811_v1 = vld [vmem:[#allocation6 + $0x6ac] ss:$16 sps:$4 sm:$0xff]  }
 0x37d   :  { %5517 = vmatpush1.bf16.msra.mxu1 %v14758_v18  ;;  %5573 = vmatprep.subr.bf16.mxu0 %v14769_v44  ;;  %v14806_v18 = vld [vmem:[#allocation6 + $0x6c8] ss:$16 sps:$4 sm:$0xff]  }
 0x37e   :  { %5518 = vmatprep.subr.bf16.mxu1 %v14766_v2  ;;  %v14875_v2 = vld [vmem:[#allocation9 + $0xf0] ss:$8 sps:$4 sm:$0xff]   ;;  %v14880_v44 = vld [vmem:[#allocation9 + $0xe4] ss:$8 sps:$4 sm:$0xff]  }
 0x380   :  { %5574 = vmatpush2.bf16.msra.mxu0 %v14767_v6  ;;  %v14814_v6 = vld [vmem:[#allocation6 + $0x68c] ss:$16 sps:$4 sm:$0xff]  }
 0x381   :  { %5519 = vmatpush1.bf16.msra.mxu1 %v14764_v29  ;;  %5575 = vmatprep.subr.bf16.mxu0 %v14775_v54  ;;  %v14809_v29 = vld [vmem:[#allocation6 + $0x6a8] ss:$16 sps:$4 sm:$0xff]  }
 0x382   :  { %5520 = vmatprep.subr.bf16.mxu1 %v14772_v7  ;;  %v14878_v7 = vld [vmem:[#allocation9 + $0xe0] ss:$8 sps:$4 sm:$0xff]   ;;  %v14883_v54 = vld [vmem:[#allocation9 + $0xd4] ss:$8 sps:$4 sm:$0xff]  }
 0x384   :  { %5576 = vmatpush2.bf16.msra.mxu0 %v14773_v30  ;;  %v14886_v30 = vld [vmem:[#allocation9 + $0xc4] ss:$8 sps:$4 sm:$0xff]  }
 0x385   :  { %5521 = vmatpush1.bf16.msra.mxu1 %v14770_v8  ;;  %5577 = vmatprep.subr.bf16.mxu0 %v14781_v19  ;;  %v14817_v8 = vld [vmem:[#allocation6 + $0x66c] ss:$16 sps:$4 sm:$0xff]  }
 0x386   :  { %5522 = vmatprep.subr.bf16.mxu1 %v14778_v17  ;;  %v14815_v17 = vld [vmem:[#allocation6 + $0x668] ss:$16 sps:$4 sm:$0xff]   ;;  %v14820_v19 = vld [vmem:[#allocation6 + $0x64c] ss:$16 sps:$4 sm:$0xff]  }
 0x388   :  { %5578 = vmatpush2.bf16.msra.mxu0 %v14779_v34  ;;  %v14889_v34 = vld [vmem:[#allocation9 + $0xb4] ss:$8 sps:$4 sm:$0xff]  }
 0x389   :  { %5523 = vmatpush2.bf16.msra.mxu1 %v14776_v10  ;;  %6079 = vmatprep.subr.bf16.mxu0 %v14853_v12  ;;  %v14884_v10 = vld [vmem:[#allocation9 + $0xc0] ss:$8 sps:$4 sm:$0xff]  }
 0x38a   :  { %5524 = vmatprep.subr.bf16.mxu1 %v14784_v11  ;;  %v14818_v11 = vld [vmem:[#allocation6 + $0x648] ss:$16 sps:$4 sm:$0xff]   ;;  %v14823_v12 = vld [vmem:[#allocation6 + $0x62c] ss:$16 sps:$4 sm:$0xff]  }
 0x38b   :  { %v5335_v22 = vpop.f32.mrf.mxu0  ;;  %5580 = vmatmul.mubr.bf16.vlgmr.msra.gmra.mxu0 %v16499_v14  ;;  %v14793_v14 = vld [vmem:[#allocation6 + $0x36c] ss:$16 sps:$4 sm:$0xff]  }
 0x38c   :  { %6080 = vmatpush1.bf16.msra.mxu0 %v14851_v41  ;;  %v14821_v41 = vld [vmem:[#allocation6 + $0x628] ss:$16 sps:$4 sm:$0xff]  }
 0x38d   :  { %5525 = vmatpush2.bf16.msra.mxu1 %v14782_v13  ;;  %v5376_v31 = vpop.f32.mrf.mxu1  ;;  %v5337_v28 = vpop.f32.mrf.mxu0  ;;  %6081 = vmatprep.subr.bf16.mxu0 %v14856_v20  ;;  %v14887_v13 = vld [vmem:[#allocation9 + $0xb0] ss:$8 sps:$4 sm:$0xff]  }
 0x38e   :  { %v16525_v50 = vadd.f32 %v5376_v31, %v5335_v22  ;;  %5526 = vmatprep.subr.bf16.mxu1 %v14787_v15  ;;  %v14892_v15 = vld [vmem:[#allocation9 + $0xa4] ss:$8 sps:$4 sm:$0xff]   ;;  %v14826_v20 = vld [vmem:[#allocation6 + $0x60c] ss:$16 sps:$4 sm:$0xff]   ;;  %v14895_v31 = vld [vmem:[#allocation9 + $0x94] ss:$8 sps:$4 sm:$0xff]  }
 0x38f   :  { %v5378_v27 = vpop.f32.mrf.mxu1  ;;  %v5339_v35 = vpop.f32.mrf.mxu0  ;;  %v14890_v22 = vld [vmem:[#allocation9 + $0xa0] ss:$8 sps:$4 sm:$0xff]  }
 0x390   :  { %v16527_v25 = vadd.f32 %v5378_v27, %v5337_v28  ;;  %6082 = vmatpush1.bf16.msra.mxu0 %v14854_v58  ;;  %v14829_v28 = vld [vmem:[#allocation6 + $0x7ec] ss:$16 sps:$4 sm:$0xff]   ;;  %v14898_v58 = vld [vmem:[#allocation9 + $0x84] ss:$8 sps:$4 sm:$0xff]  }
 0x391   :  { %5527 = vmatpush2.bf16.msra.mxu1 %v14785_v9  ;;  %v5380_v46 = vpop.f32.mrf.mxu1  ;;  %v5340_v33 = vpop.f32.mrf.mxu0  ;;  %6083 = vmatprep.subr.bf16.mxu0 %v14859_v43  ;;  %v14824_v9 = vld [vmem:[#allocation6 + $0x608] ss:$16 sps:$4 sm:$0xff]   ;;  %v14832_v43 = vld [vmem:[#allocation6 + $0x7cc] ss:$16 sps:$4 sm:$0xff]  }
 0x392   :  { %5528 = vmatprep.subr.bf16.mxu1 %v14790_v23  ;;  %v14893_v23 = vld [vmem:[#allocation9 + $0x90] ss:$8 sps:$4 sm:$0xff]   ;;  %v14827_v27 = vld [vmem:[#allocation6 + $0x7e8] ss:$16 sps:$4 sm:$0xff]   ;;  %v14896_v35 = vld [vmem:[#allocation9 + $0x80] ss:$8 sps:$4 sm:$0xff]  }
 0x393   :  { %v5381_v38 = vpop.f32.mrf.mxu1  ;;  %v14830_v46 = vld [vmem:[#allocation6 + $0x7c8] ss:$16 sps:$4 sm:$0xff]  }
 0x394   :  { %6084 = vmatpush1.bf16.msra.mxu0 %v14857_v37  ;;  %v14833_v37 = vld [vmem:[#allocation6 + $0x7a8] ss:$16 sps:$4 sm:$0xff]  }
 0x395   :  { %5529 = vmatpush2.bf16.msra.mxu1 %v14788_v32  ;;  %6085 = vmatprep.subr.bf16.mxu0 %v14862_v39  ;;  %v14835_v32 = vld [vmem:[#allocation6 + $0x7ac] ss:$16 sps:$4 sm:$0xff]  }
 0x396   :  { %5530 = vmatprep.subr.bf16.mxu1 %v14793_v14  ;;  %v14838_v39 = vld [vmem:[#allocation6 + $0x78c] ss:$16 sps:$4 sm:$0xff]  }
 0x398   :  { %6086 = vmatpush1.bf16.msra.mxu0 %v14860_v40  ;;  %v14836_v40 = vld [vmem:[#allocation6 + $0x788] ss:$16 sps:$4 sm:$0xff]  }
 0x399   :  { %5531 = vmatpush2.bf16.msra.mxu1 %v14791_v4  ;;  %6087 = vmatprep.subr.bf16.mxu0 %v14865_v21 }
 0x39a   :  { %5532 = vmatprep.subr.bf16.mxu1 %v14796_v5 }
 0x39c   :  { %6088 = vmatpush1.bf16.msra.mxu0 %v14863_v51  ;;  %v14844_v51 = vld [vmem:[#allocation6 + $0x74c] ss:$16 sps:$4 sm:$0xff]  }
 0x39d   :  { %5533 = vmatpush2.bf16.msra.mxu1 %v14794_v47  ;;  %6089 = vmatprep.subr.bf16.mxu0 %v14868_v55  ;;  %v14841_v47 = vld [vmem:[#allocation6 + $0x76c] ss:$16 sps:$4 sm:$0xff]  }
 0x39e   :  { %5534 = vmatprep.subr.bf16.mxu1 %v14799_v49  ;;  %v14839_v49 = vld [vmem:[#allocation6 + $0x768] ss:$16 sps:$4 sm:$0xff]   ;;  %v14847_v55 = vld [vmem:[#allocation6 + $0x72c] ss:$16 sps:$4 sm:$0xff]  }
 0x3a0   :  { %6090 = vmatpush1.bf16.msra.mxu0 %v14866_v57  ;;  %v14899_v57 = vld [vmem:[#allocation9 + $0x170] ss:$8 sps:$4 sm:$0xff]  }
 0x3a1   :  { %5535 = vmatpush2.bf16.msra.mxu1 %v14797_v56  ;;  %6091 = vmatprep.subr.bf16.mxu0 %v14871_v60  ;;  %v14845_v56 = vld [vmem:[#allocation6 + $0x728] ss:$16 sps:$4 sm:$0xff]  }
 0x3a2   :  { %5536 = vmatprep.subr.bf16.mxu1 %v14802_v59  ;;  %v14850_v59 = vld [vmem:[#allocation6 + $0x70c] ss:$16 sps:$4 sm:$0xff]   ;;  %v14901_v60 = vld [vmem:[#allocation9 + $0x174] ss:$8 sps:$4 sm:$0xff]  }
 0x3a4   :  { %6092 = vmatpush1.bf16.msra.mxu0 %v14869_v24  ;;  %v14907_v24 = vld [vmem:[#allocation9 + $0x154] ss:$8 sps:$4 sm:$0xff]  }
 0x3a5   :  { %5537 = vmatpush2.bf16.msra.mxu1 %v14800_v48  ;;  %6093 = vmatprep.subr.bf16.mxu0 %v14874_v61  ;;  %v14904_v48 = vld [vmem:[#allocation9 + $0x164] ss:$8 sps:$4 sm:$0xff]   ;;  %v14905_v61 = vld [vmem:[#allocation9 + $0x150] ss:$8 sps:$4 sm:$0xff]  }
 0x3a6   :  { %5588 = vmatprep.subr.bf16.mxu1 %v14805_v53  ;;  %v14902_v53 = vld [vmem:[#allocation9 + $0x160] ss:$8 sps:$4 sm:$0xff]  }
 0x3a8   :  { %5539 = vmatmul.mubr.bf16.vlgmr.msra.gmra.mxu1 %v16470_v42  ;;  %6094 = vmatpush1.bf16.msra.mxu0 %v14872_v63  ;;  %v14812_v42 = vld [vmem:[#allocation6 + $0x688] ss:$16 sps:$4 sm:$0xff]  }
 0x3a9   :  { %5589 = vmatpush1.bf16.msra.mxu1 %v14803_v16  ;;  %5620 = vmatprep.mubr.bf16.mxu1 %v16517_v3  ;;  %v14881_v3 = vld [vmem:[#allocation9 + $0xd0] ss:$8 sps:$4 sm:$0xff]   ;;  %v14910_v16 = vld [vmem:[#allocation9 + $0x144] ss:$8 sps:$4 sm:$0xff]   ;;  %v14913_v63 = vld [vmem:[#allocation9 + $0x134] ss:$8 sps:$4 sm:$0xff]  }
 0x3aa   :  { %5590 = vmatprep.subr.bf16.mxu1 %v14808_v62  ;;  %6095 = vmatprep.subr.bf16.mxu0 %v14877_v0  ;;  %v14908_v62 = vld [vmem:[#allocation9 + $0x140] ss:$8 sps:$4 sm:$0xff]   ;;  %v14911_v0 = vld [vmem:[#allocation9 + $0x130] ss:$8 sps:$4 sm:$0xff]  }
 0x3ac   :  { %6096 = vmatpush2.bf16.msra.mxu0 %v14875_v2  ;;  %v14917_v2 = vld [vmem:[#allocation9 + $0x110] ss:$8 sps:$4 sm:$0xff]  }
 0x3ad   :  { %5591 = vmatpush1.bf16.msra.mxu1 %v14806_v18  ;;  %6097 = vmatprep.subr.bf16.mxu0 %v14880_v44  ;;  %v14914_v18 = vld [vmem:[#allocation9 + $0x120] ss:$8 sps:$4 sm:$0xff]   ;;  %v14922_v44 = vld [vmem:[#allocation9 + $0x104] ss:$8 sps:$4 sm:$0xff]  }
 0x3ae   :  { %5592 = vmatprep.subr.bf16.mxu1 %v14811_v1  ;;  %v14919_v1 = vld [vmem:[#allocation9 + $0x114] ss:$8 sps:$4 sm:$0xff]  }
 0x3b0   :  { %6098 = vmatpush2.bf16.msra.mxu0 %v14878_v7 }
 0x3b1   :  { %5593 = vmatpush1.bf16.msra.mxu1 %v14809_v29  ;;  %6099 = vmatprep.subr.bf16.mxu0 %v14883_v54  ;;  %v14920_v29 = vld [vmem:[#allocation9 + $0x100] ss:$8 sps:$4 sm:$0xff]   ;;  %v14923_v54 = vld [vmem:[#allocation9 + $0x1f0] ss:$8 sps:$4 sm:$0xff]  }
 0x3b2   :  { %5594 = vmatprep.subr.bf16.mxu1 %v14814_v6  ;;  %v14925_v6 = vld [vmem:[#allocation9 + $0x1f4] ss:$8 sps:$4 sm:$0xff]  }
 0x3b4   :  { %6100 = vmatpush2.bf16.msra.mxu0 %v14881_v3 }
 0x3b5   :  { %5595 = vmatpush1.bf16.msra.mxu1 %v14812_v42  ;;  %6101 = vmatprep.subr.bf16.mxu0 %v14886_v30  ;;  %v14926_v30 = vld [vmem:[#allocation9 + $0x1e0] ss:$8 sps:$4 sm:$0xff]  }
 0x3b6   :  { %5596 = vmatprep.subr.bf16.mxu1 %v14817_v8  ;;  %v14928_v8 = vld [vmem:[#allocation9 + $0x1e4] ss:$8 sps:$4 sm:$0xff]  }
 0x3b8   :  { %6102 = vmatpush2.bf16.msra.mxu0 %v14884_v10 }
 0x3b9   :  { %5597 = vmatpush1.bf16.msra.mxu1 %v14815_v17  ;;  %6103 = vmatprep.subr.bf16.mxu0 %v14889_v34 }
 0x3ba   :  { %5598 = vmatprep.subr.bf16.mxu1 %v14820_v19  ;;  %v13449_v19 = vld.sshfl [vmem:[#allocation7] sm:$0x33 pattern:$0x75316420] }
 0x3bb   :  { %v5641_v10 = vcombine.high %v13449_v19, %v13449_v19  ;;  %v5648_v34 = vrot.slane %v13449_v19, %v16395_v26 }
 0x3bc   :  { %6104 = vmatpush2.bf16.msra.mxu0 %v14887_v13 }
 0x3bd   :  { %5599 = vmatpush1.bf16.msra.mxu1 %v14818_v11  ;;  %6105 = vmatprep.subr.bf16.mxu0 %v14892_v15  ;;  %v16544_v11 = vrot.slane %v5641_v10, %v16395_v26  ;;  %v14931_v15 = vld [vmem:[#allocation9 + $0x1d4] ss:$8 sps:$4 sm:$0xff]  }
 0x3be   :  { %5600 = vmatprep.subr.bf16.mxu1 %v14823_v12  ;;  %v5659_v12 = vpack.i.b16 %v5648_v34, %v5648_v34 }
 0x3bf   :  { %v5666_v13 = vpack.i.b16 %v16544_v11, %v16544_v11 }
 0x3c0   :  { %6106 = vmatpush2.bf16.msra.mxu0 %v14890_v22 }
 0x3c1   :  { %5601 = vmatpush1.bf16.msra.mxu1 %v14821_v41  ;;  %6107 = vmatprep.subr.bf16.mxu0 %v14895_v31  ;;  %v5664_v31 = vrot.slane %v5659_v12, %v16405_v52 }
 0x3c2   :  { %5602 = vmatprep.subr.bf16.mxu1 %v14826_v20  ;;  %v14929_v20 = vld [vmem:[#allocation9 + $0x1d0] ss:$8 sps:$4 sm:$0xff]  }
 0x3c4   :  { %6108 = vmatpush2.bf16.msra.mxu0 %v14893_v23 }
 0x3c5   :  { %5603 = vmatpush1.bf16.msra.mxu1 %v14824_v9  ;;  %6109 = vmatprep.subr.bf16.mxu0 %v14898_v58  ;;  %v5671_v58 = vrot.slane %v5666_v13, %v16405_v52  ;;  %v14951_v13 = vld [vmem:[#allocation12 + $0x68] sm:$0xff]  }
 0x3c6   :  { %5604 = vmatprep.subr.bf16.mxu1 %v14829_v28 }
 0x3c8   :  { %6110 = vmatpush2.bf16.msra.mxu0 %v14896_v35  ;;  %v14932_v35 = vld [vmem:[#allocation9 + $0x1c0] ss:$8 sps:$4 sm:$0xff]  }
 0x3c9   :  { %5605 = vmatpush2.bf16.msra.mxu1 %v14827_v27  ;;  %v14934_v27 = vld [vmem:[#allocation9 + $0x1c4] ss:$8 sps:$4 sm:$0xff]  }
 0x3ca   :  { %5606 = vmatprep.subr.bf16.mxu1 %v14832_v43 }
 0x3cb   :  { %v5417_v33 = vpop.f32.mrf.mxu0 }
 0x3cc   :  { %v16532_v14 = vadd.f32 %v5417_v33, %v16525_v50  ;;  %v14842_v50 = vld [vmem:[#allocation6 + $0x748] ss:$16 sps:$4 sm:$0xff]  }
 0x3cd   :  { %5607 = vmatpush2.bf16.msra.mxu1 %v14830_v46  ;;  %v5419_v38 = vpop.f32.mrf.mxu0 }
 0x3ce   :  { %5608 = vmatprep.subr.bf16.mxu1 %v14835_v32  ;;  %v16535_v4 = vadd.f32 %v5419_v38, %v16527_v25  ;;  %v14848_v25 = vld [vmem:[#allocation6 + $0x708] ss:$16 sps:$4 sm:$0xff]   ;;  %v14935_v38 = vld [vmem:[#allocation9 + $0x1b0] ss:$8 sps:$4 sm:$0xff]  }
 0x3cf   :  { %v5421_v5 = vpop.f32.mrf.mxu0 }
 0x3d0   :  { %v14938_v5 = vld [vmem:[#allocation9 + $0x1a0] ss:$8 sps:$4 sm:$0xff]  }
 0x3d1   :  { %5609 = vmatpush2.bf16.msra.mxu1 %v14833_v37  ;;  %v5422_v21 = vpop.f32.mrf.mxu0 }
 0x3d2   :  { %5610 = vmatprep.subr.bf16.mxu1 %v14838_v39  ;;  %v14940_v39 = vld [vmem:[#allocation9 + $0x1a4] ss:$8 sps:$4 sm:$0xff]  }
 0x3d3   :  { %v14946_v21 = vld [vmem:[#allocation9 + $0x184] ss:$8 sps:$4 sm:$0xff]  }
 0x3d5   :  { %5611 = vmatpush2.bf16.msra.mxu1 %v14836_v40  ;;  %v14941_v40 = vld [vmem:[#allocation9 + $0x190] ss:$8 sps:$4 sm:$0xff]  }
 0x3d6   :  { %5612 = vmatprep.subr.bf16.mxu1 %v14841_v47  ;;  %v14944_v47 = vld [vmem:[#allocation9 + $0x180] ss:$8 sps:$4 sm:$0xff]  }
 0x3d9   :  { %5613 = vmatpush2.bf16.msra.mxu1 %v14839_v49 }
 0x3da   :  { %5614 = vmatprep.subr.bf16.mxu1 %v14844_v51 }
 0x3dd   :  { %5615 = vmatpush2.bf16.msra.mxu1 %v14842_v50 }
 0x3de   :  { %5616 = vmatprep.subr.bf16.mxu1 %v14847_v55 }
 0x3e1   :  { %5617 = vmatpush2.bf16.msra.mxu1 %v14845_v56 }
 0x3e2   :  { %5618 = vmatprep.subr.bf16.mxu1 %v14850_v59 }
 0x3e5   :  { %5619 = vmatpush2.bf16.msra.mxu1 %v14848_v25 }
 0x3e6   :  { %6120 = vmatprep.subr.bf16.mxu1 %v14901_v60 }
 0x3e8   :  { %5621 = vmatmul.mubr.bf16.vlgmr.msra.gmra.mxu1 %v16519_v45  ;;  %v14916_v45 = vld [vmem:[#allocation9 + $0x124] ss:$8 sps:$4 sm:$0xff]  }
 0x3e9   :  { %6121 = vmatpush1.bf16.msra.mxu1 %v14899_v57 }
 0x3ea   :  { %6122 = vmatprep.subr.bf16.mxu1 %v14904_v48 }
 0x3ed   :  { %6123 = vmatpush1.bf16.msra.mxu1 %v14902_v53  ;;  %v14947_v53 = vld [vmem:[#allocation12 + $0x78] sm:$0xff]  }
 0x3ee   :  { %6124 = vmatprep.subr.bf16.mxu1 %v14907_v24  ;;  %v14948_v24 = vld [vmem:[#allocation12 + $0x38] sm:$0xff]   ;;  %14321 = vmatprep.subr.bf16.mxu0 %v14947_v53 }
 0x3f1   :  { %6125 = vmatpush1.bf16.msra.mxu1 %v14905_v61  ;;  %v14949_v61 = vld [vmem:[#allocation12 + $0x70] sm:$0xff]  }
 0x3f2   :  { %6126 = vmatprep.subr.bf16.mxu1 %v14910_v16  ;;  %v14950_v16 = vld [vmem:[#allocation12 + $0x30] sm:$0xff]  }
 0x3f5   :  { %6127 = vmatpush1.bf16.msra.mxu1 %v14908_v62  ;;  %v5656_v62 = vcombine.high %v5648_v34, %v5648_v34 }
 0x3f6   :  { %6128 = vmatprep.subr.bf16.mxu1 %v14913_v63 }
 0x3f9   :  { %6129 = vmatpush1.bf16.msra.mxu1 %v14911_v0  ;;  %v5657_v0 = vcombine.high %v16544_v11, %v16544_v11 }
 0x3fa   :  { %6130 = vmatprep.subr.bf16.mxu1 %v14916_v45 }
 0x3fd   :  { %6131 = vmatpush1.bf16.msra.mxu1 %v14914_v18  ;;  %v5673_v18 = vpack.i.b16 %v5656_v62, %v5656_v62 }
 0x3fe   :  { %6132 = vmatprep.subr.bf16.mxu1 %v14919_v1 }
 0x401   :  { %6133 = vmatpush1.bf16.msra.mxu1 %v14917_v2  ;;  %v5680_v2 = vpack.i.b16 %v5657_v0, %v5657_v0 }
 0x402   :  { %6134 = vmatprep.subr.bf16.mxu1 %v14922_v44 }
 0x405   :  { %6135 = vmatpush1.bf16.msra.mxu1 %v14920_v29 }
 0x406   :  { %6136 = vmatprep.subr.bf16.mxu1 %v14925_v6 }
 0x409   :  { %6137 = vmatpush2.bf16.msra.mxu1 %v14923_v54  ;;  %v5678_v54 = vrot.slane %v5673_v18, %v16405_v52 }
 0x40a   :  { %6138 = vmatprep.subr.bf16.mxu1 %v14928_v8 }
 0x40b   :  { %v16538_v7 = vpop.f32.mrf.mxu0 }
 0x40d   :  { %v16540_v42 = vpop.f32.mrf.mxu0  ;;  %6139 = vmatpush2.bf16.msra.mxu1 %v14926_v30 }
 0x40e   :  { %6140 = vmatprep.subr.bf16.mxu1 %v14931_v15 }
 0x40f   :  { %v5503_v3 = vpop.f32.mrf.mxu0 }
 0x411   :  { %v5504_v17 = vpop.f32.mrf.mxu0  ;;  %6141 = vmatpush2.bf16.msra.mxu1 %v14929_v20 }
 0x412   :  { %6142 = vmatprep.subr.bf16.mxu1 %v14934_v27  ;;  %v5685_v17 = vrot.slane %v5680_v2, %v16405_v52  ;;  %v14957_v27 = vld [vmem:[#allocation12 + $0x50] sm:$0xff]  }
 0x415   :  { %6143 = vmatpush2.bf16.msra.mxu1 %v14932_v35  ;;  %v14960_v35 = vld [vmem:[#allocation12 + $0x8] sm:$0xff]  }
 0x428   :  { %v5458_v41 = vpop.f32.mrf.mxu1 }
 0x429   :  { %v5459_v22 = vadd.f32 %v5458_v41, %v16532_v14  ;;  %v14937_v14 = vld [vmem:[#allocation9 + $0x1b4] ss:$8 sps:$4 sm:$0xff]   ;;  %v14952_v41 = vld [vmem:[#allocation12 + $0x28] sm:$0xff]  }
 0x42a   :  { %v5460_v9 = vpop.f32.mrf.mxu1  ;;  %6144 = vmatprep.subr.bf16.mxu1 %v14937_v14  ;;  %v14968_v14 = vld [vmem:[#allocation15 + $0x64] ss:$8 sps:$4 sm:$0xff]  }
 0x42b   :  { %v5629_v28 = vpack.c.bf16 %v5459_v22, %v5459_v22  ;;  %v5461_v23 = vadd.f32 %v5460_v9, %v16535_v4  ;;  %6145 = vmatpush2.bf16.msra.mxu1 %v14935_v38  ;;  %v14943_v4 = vld [vmem:[#allocation9 + $0x194] ss:$8 sps:$4 sm:$0xff]   ;;  %v14953_v22 = vld [vmem:[#allocation12 + $0x60] sm:$0xff]  }
 0x42c   :  { %v5462_v43 = vpop.f32.mrf.mxu1  ;;  %6146 = vmatprep.subr.bf16.mxu1 %v14940_v39  ;;  %v14954_v9 = vld [vmem:[#allocation12 + $0x20] sm:$0xff]  }
 0x42d   :  { %v5630_v46 = vpack.c.bf16 %v5461_v23, %v5461_v23  ;;  %v5686_v32 = vadd.bf16 %v5664_v31, %v5629_v28  ;;  %v14955_v23 = vld [vmem:[#allocation12 + $0x58] sm:$0xff]   ;;  %v14958_v43 = vld [vmem:[#allocation12 + $0x10] sm:$0xff]   ;;  %v14966_v38 = vld [vmem:[#allocation15 + $0x60] ss:$8 sps:$4 sm:$0xff]  }
 0x42e   :  { %v5463_v33 = vpop.f32.mrf.mxu1  ;;  %v14971_v39 = vld [vmem:[#allocation15 + $0x54] ss:$8 sps:$4 sm:$0xff]  }
 0x42f   :  { %v5687_v37 = vadd.bf16 %v5671_v58, %v5630_v46  ;;  %6147 = vmatpush2.bf16.msra.mxu1 %v14938_v5  ;;  %v14956_v58 = vld [vmem:[#allocation12 + $0x18] sm:$0xff]   ;;  %v14961_v46 = vld [vmem:[#allocation12 + $0x40] sm:$0xff]  }
 0x430   :  { %6148 = vmatprep.subr.bf16.mxu1 %v14943_v4  ;;  %v14963_v33 = vld [vmem:[#allocation15 + $0x70] ss:$8 sps:$4 sm:$0xff]   ;;  %v14974_v4 = vld [vmem:[#allocation15 + $0x44] ss:$8 sps:$4 sm:$0xff]  }
 0x431   :  { %15741 = vtanh.bf16 %v5687_v37  ;;  %v14965_v37 = vld [vmem:[#allocation15 + $0x74] ss:$8 sps:$4 sm:$0xff]   ;;  %v14969_v5 = vld [vmem:[#allocation15 + $0x50] ss:$8 sps:$4 sm:$0xff]  }
 0x432   :  { %15743 = vtanh.bf16 %v5686_v32  ;;  %v14962_v32 = vld [vmem:[#allocation12] sm:$0xff]  }
 0x433   :  { %6149 = vmatpush2.bf16.msra.mxu1 %v14941_v40  ;;  %v14972_v40 = vld [vmem:[#allocation15 + $0x40] ss:$8 sps:$4 sm:$0xff]  }
 0x434   :  { %6150 = vmatprep.subr.bf16.mxu1 %v14946_v21  ;;  %v14977_v21 = vld [vmem:[#allocation15 + $0x34] ss:$8 sps:$4 sm:$0xff]  }
 0x437   :  { %6151 = vmatpush2.bf16.msra.mxu1 %v14944_v47  ;;  %v14975_v47 = vld [vmem:[#allocation15 + $0x30] ss:$8 sps:$4 sm:$0xff]  }
 0x438   :  { %6479 = vmatprep.subr.bf16.mxu1 %v14965_v37 }
 0x43f   :  { %v15742_v49 = vpop.eup %15741 }
 0x440   :  { %v15744_v51 = vpop.eup %15743  ;;  %6111 = vmatprep.mubr.bf16.mxu0 %v15742_v49  ;;  %v14980_v49 = vld [vmem:[#allocation15 + $0x24] ss:$8 sps:$4 sm:$0xff]  }
 0x441   :  { %6112 = vmatmul.mubr.bf16.vlgmr.msra.gmra.mxu0 %v15744_v51  ;;  %v14978_v51 = vld [vmem:[#allocation15 + $0x20] ss:$8 sps:$4 sm:$0xff]  }
 0x442   :  { %14322 = vmatpush3.bf16.msra.mxu0 %v14948_v24 }
 0x443   :  { %14323 = vmatprep.subr.bf16.mxu0 %v14949_v61 }
 0x446   :  { %14324 = vmatpush3.bf16.msra.mxu0 %v14950_v16 }
 0x447   :  { %14325 = vmatprep.subr.bf16.mxu0 %v14951_v13  ;;  %v15011_v13 = vld [vmem:[#allocation18 + $0x60] ss:$16 sps:$4 sm:$0xff]  }
 0x44a   :  { %14326 = vmatpush3.bf16.msra.mxu0 %v14952_v41  ;;  %v15017_v41 = vld [vmem:[#allocation18 + $0x40] ss:$16 sps:$4 sm:$0xff]  }
 0x44b   :  { %v5581_v50 = vpop.f32.mrf.mxu0  ;;  %14327 = vmatprep.subr.bf16.mxu0 %v14953_v22  ;;  %v15023_v22 = vld [vmem:[#allocation18 + $0x20] ss:$16 sps:$4 sm:$0xff]  }
 0x44d   :  { %v5583_v55 = vpop.f32.mrf.mxu0 }
 0x44e   :  { %14328 = vmatpush3.bf16.msra.mxu0 %v14954_v9  ;;  %v15029_v9 = vld [vmem:[#allocation18] ss:$16 sps:$4 sm:$0xff]  }
 0x44f   :  { %v5585_v56 = vpop.f32.mrf.mxu0  ;;  %14329 = vmatprep.subr.bf16.mxu0 %v14955_v23  ;;  %v15035_v23 = vld [vmem:[#allocation18 + $0x1e0] ss:$16 sps:$4 sm:$0xff]  }
 0x451   :  { %v5586_v59 = vpop.f32.mrf.mxu0 }
 0x452   :  { %14330 = vmatpush3.bf16.msra.mxu0 %v14956_v58  ;;  %v15043_v58 = vld [vmem:[#allocation18 + $0x1c4] ss:$16 sps:$4 sm:$0xff]  }
 0x453   :  { %14331 = vmatprep.subr.bf16.mxu0 %v14957_v27  ;;  %v15041_v27 = vld [vmem:[#allocation18 + $0x1c0] ss:$16 sps:$4 sm:$0xff]  }
 0x456   :  { %14332 = vmatpush3.bf16.msra.mxu0 %v14958_v43  ;;  %v15049_v43 = vld [vmem:[#allocation18 + $0x1a4] ss:$16 sps:$4 sm:$0xff]  }
 0x468   :  { %v5540_v25 = vpop.f32.mrf.mxu1 }
 0x469   :  { %v5541_v63 = vadd.f32 %v5540_v25, %v16538_v7 }
 0x46a   :  { %v5542_v57 = vpop.f32.mrf.mxu1 }
 0x46b   :  { %v5543_v45 = vadd.f32 %v5542_v57, %v16540_v42  ;;  %v5582_v1 = vadd.f32 %v5581_v50, %v5541_v63  ;;  %v13514_v50 = vld.sshfl [vmem:[#allocation10] sm:$0x11 pattern:$0x75316420] }
 0x46c   :  { %v5544_v60 = vpop.f32.mrf.mxu1  ;;  %v6178_v56 = vrot.slane %v13514_v50, %v16395_v26 }
 0x46d   :  { %v5584_v6 = vadd.f32 %v5583_v55, %v5543_v45  ;;  %v6171_v55 = vcombine.high %v13514_v50, %v13514_v50  ;;  %v15010_v50 = vld [vmem:[#allocation18 + $0x8c] ss:$16 sps:$4 sm:$0xff]  }
 0x46e   :  { %v5545_v48 = vpop.f32.mrf.mxu1  ;;  %v6187_v25 = vpack.i.b16 %v6178_v56, %v6178_v56  ;;  %v15016_v56 = vld [vmem:[#allocation18 + $0x6c] ss:$16 sps:$4 sm:$0xff]  }
 0x46f   :  { %v6185_v59 = vrot.slane %v6171_v55, %v16395_v26  ;;  %v15008_v55 = vld [vmem:[#allocation18 + $0x88] ss:$16 sps:$4 sm:$0xff]  }
 0x470   :  { %v6192_v53 = vrot.slane %v6187_v25, %v16405_v52  ;;  %v15022_v25 = vld [vmem:[#allocation18 + $0x4c] ss:$16 sps:$4 sm:$0xff]  }
 0x471   :  { %v6194_v57 = vpack.i.b16 %v6185_v59, %v6185_v59  ;;  %v15014_v59 = vld [vmem:[#allocation18 + $0x68] ss:$16 sps:$4 sm:$0xff]  }
 0x473   :  { %v6199_v62 = vrot.slane %v6194_v57, %v16405_v52  ;;  %v15020_v57 = vld [vmem:[#allocation18 + $0x48] ss:$16 sps:$4 sm:$0xff]  }
 0x4a8   :  { %v5622_v44 = vpop.f32.mrf.mxu1 }
 0x4a9   :  { %v5623_v29 = vadd.f32 %v5622_v44, %v5582_v1 }
 0x4aa   :  { %v5624_v8 = vpop.f32.mrf.mxu1 }
 0x4ab   :  { %v5631_v3 = vpack.c.bf16 %v5623_v29, %v5623_v29  ;;  %v5625_v30 = vadd.f32 %v5624_v8, %v5584_v6  ;;  %v14983_v29 = vld [vmem:[#allocation15 + $0x14] ss:$8 sps:$4 sm:$0xff]   ;;  %v14981_v6 = vld [vmem:[#allocation15 + $0x10] ss:$8 sps:$4 sm:$0xff]   ;;  %v14984_v8 = vld [vmem:[#allocation15] ss:$8 sps:$4 sm:$0xff]  }
 0x4ac   :  { %v5626_v19 = vpop.f32.mrf.mxu1 }
 0x4ad   :  { %v5632_v7 = vpack.c.bf16 %v5625_v30, %v5625_v30  ;;  %v5688_v10 = vadd.bf16 %v5678_v54, %v5631_v3  ;;  %v14986_v54 = vld [vmem:[#allocation15 + $0x4] ss:$8 sps:$4 sm:$0xff]  }
 0x4ae   :  { %v5627_v34 = vpop.f32.mrf.mxu1  ;;  %v14987_v3 = vld [vmem:[#allocation18 + $0xe0] ss:$16 sps:$4 sm:$0xff]   ;;  %v14989_v30 = vld [vmem:[#allocation18 + $0xe4] ss:$16 sps:$4 sm:$0xff]  }
 0x4af   :  { %v5689_v11 = vadd.bf16 %v5685_v17, %v5632_v7  ;;  %v14992_v17 = vld [vmem:[#allocation18 + $0xec] ss:$16 sps:$4 sm:$0xff]   ;;  %v14995_v19 = vld [vmem:[#allocation18 + $0xc4] ss:$16 sps:$4 sm:$0xff]   ;;  %v14993_v7 = vld [vmem:[#allocation18 + $0xc0] ss:$16 sps:$4 sm:$0xff]  }
 0x4b0   :  { %v14999_v34 = vld [vmem:[#allocation18 + $0xa0] ss:$16 sps:$4 sm:$0xff]  }
 0x4b1   :  { %15745 = vtanh.bf16 %v5689_v11  ;;  %v15007_v11 = vld [vmem:[#allocation18 + $0x84] ss:$16 sps:$4 sm:$0xff]  }
 0x4b2   :  { %15747 = vtanh.bf16 %v5688_v10  ;;  %v15001_v10 = vld [vmem:[#allocation18 + $0xa4] ss:$16 sps:$4 sm:$0xff]  }
 0x4bf   :  { %v15746_v42 = vpop.eup %15745 }
 0x4c0   :  { %v15748_v12 = vpop.eup %15747  ;;  %6152 = vmatprep.mubr.bf16.mxu1 %v15746_v42  ;;  %v15005_v42 = vld [vmem:[#allocation18 + $0x80] ss:$16 sps:$4 sm:$0xff]  }
 0x4c1   :  { %6153 = vmatmul.mubr.bf16.vlgmr.msra.gmra.mxu1 %v15748_v12  ;;  %v15013_v12 = vld [vmem:[#allocation18 + $0x64] ss:$16 sps:$4 sm:$0xff]  }
 0x4c2   :  { %6511 = vmatprep.mubr.bf16.mxu1 %v16164_v36  ;;  %v14959_v36 = vld [vmem:[#allocation12 + $0x48] sm:$0xff]   ;;  %6480 = vmatpush1.bf16.msra.mxu1 %v14963_v33 }
 0x4c3   :  { %14333 = vmatprep.subr.bf16.mxu0 %v14959_v36  ;;  %6481 = vmatprep.subr.bf16.mxu1 %v14968_v14  ;;  %v15047_v36 = vld [vmem:[#allocation18 + $0x1a0] ss:$16 sps:$4 sm:$0xff]  }
 0x4c4   :  { %14334 = vmatpush3.bf16.msra.mxu0 %v14960_v35  ;;  %v6236_v35 = vld [vmem:[#allocation13] sm:$0x1] }
 0x4c5   :  { %14335 = vmatprep.subr.bf16.mxu0 %v14961_v46  ;;  %v6375_v46 = vpack.i.b16 %v6236_v35, %v6236_v35 }
 0x4c6   :  { %6482 = vmatpush1.bf16.msra.mxu1 %v14966_v38 }
 0x4c7   :  { %6483 = vmatprep.subr.bf16.mxu1 %v14971_v39  ;;  %v6380_v14 = vrot.slane %v6375_v46, %v16405_v52 }
 0x4c8   :  { %14336 = vmatpush3.bf16.msra.mxu0 %v14962_v32 }
 0x4c9   :  { %6948 = vmatprep.subr.bf16.mxu0 %v14989_v30  ;;  %v15065_v30 = vld [vmem:[#allocation18 + $0x140] ss:$16 sps:$4 sm:$0xff]  }
 0x4ca   :  { %6484 = vmatpush1.bf16.msra.mxu1 %v14969_v5 }
 0x4cb   :  { %6485 = vmatprep.subr.bf16.mxu1 %v14974_v4  ;;  %v14990_v4 = vld [vmem:[#allocation18 + $0xe8] ss:$16 sps:$4 sm:$0xff]  }
 0x4ce   :  { %6486 = vmatpush1.bf16.msra.mxu1 %v14972_v40 }
 0x4cf   :  { %6487 = vmatprep.subr.bf16.mxu1 %v14977_v21  ;;  %v14998_v21 = vld [vmem:[#allocation18 + $0xcc] ss:$16 sps:$4 sm:$0xff]  }
 0x4d2   :  { %6488 = vmatpush1.bf16.msra.mxu1 %v14975_v47  ;;  %v14996_v47 = vld [vmem:[#allocation18 + $0xc8] ss:$16 sps:$4 sm:$0xff]  }
 0x4d3   :  { %6489 = vmatprep.subr.bf16.mxu1 %v14980_v49  ;;  %v15004_v49 = vld [vmem:[#allocation18 + $0xac] ss:$16 sps:$4 sm:$0xff]  }
 0x4d6   :  { %6490 = vmatpush1.bf16.msra.mxu1 %v14978_v51  ;;  %v15002_v51 = vld [vmem:[#allocation18 + $0xa8] ss:$16 sps:$4 sm:$0xff]  }
 0x4d7   :  { %6491 = vmatprep.subr.bf16.mxu1 %v14983_v29  ;;  %v15061_v29 = vld [vmem:[#allocation18 + $0x164] ss:$16 sps:$4 sm:$0xff]  }
 0x4da   :  { %6492 = vmatpush1.bf16.msra.mxu1 %v14981_v6  ;;  %v15064_v6 = vld [vmem:[#allocation18 + $0x16c] ss:$16 sps:$4 sm:$0xff]  }
 0x4db   :  { %6493 = vmatprep.subr.bf16.mxu1 %v14986_v54  ;;  %v15059_v54 = vld [vmem:[#allocation18 + $0x160] ss:$16 sps:$4 sm:$0xff]  }
 0x4de   :  { %6494 = vmatpush1.bf16.msra.mxu1 %v14984_v8  ;;  %v15062_v8 = vld [vmem:[#allocation18 + $0x168] ss:$16 sps:$4 sm:$0xff]  }
 0x4df   :  { %6989 = vmatprep.subr.bf16.mxu1 %v14992_v17  ;;  %v15068_v17 = vld [vmem:[#allocation18 + $0x148] ss:$16 sps:$4 sm:$0xff]  }
 0x501   :  { %v6113_v15 = vpop.f32.mrf.mxu0 }
 0x503   :  { %v6115_v20 = vpop.f32.mrf.mxu0 }
 0x505   :  { %v6117_v31 = vpop.f32.mrf.mxu0 }
 0x506   :  { %v15031_v31 = vld [vmem:[#allocation18 + $0x4] ss:$16 sps:$4 sm:$0xff]  }
 0x507   :  { %v6118_v28 = vpop.f32.mrf.mxu0 }
 0x508   :  { %v15037_v28 = vld [vmem:[#allocation18 + $0x1e4] ss:$16 sps:$4 sm:$0xff]  }
 0x581   :  { %v6154_v60 = vpop.f32.mrf.mxu1 }
 0x582   :  { %v6155_v48 = vadd.f32 %v6154_v60, %v6113_v15  ;;  %v15019_v15 = vld [vmem:[#allocation18 + $0x44] ss:$16 sps:$4 sm:$0xff]   ;;  %v15028_v60 = vld [vmem:[#allocation18 + $0x2c] ss:$16 sps:$4 sm:$0xff]  }
 0x583   :  { %v6156_v24 = vpop.f32.mrf.mxu1 }
 0x584   :  { %v6161_v61 = vpack.c.bf16 %v6155_v48, %v6155_v48  ;;  %v6157_v16 = vadd.f32 %v6156_v24, %v6115_v20  ;;  %v15025_v20 = vld [vmem:[#allocation18 + $0x24] ss:$16 sps:$4 sm:$0xff]   ;;  %v15026_v48 = vld [vmem:[#allocation18 + $0x28] ss:$16 sps:$4 sm:$0xff]  }
 0x585   :  { %v6158_v63 = vpop.f32.mrf.mxu1  ;;  %v15032_v24 = vld [vmem:[#allocation18 + $0x8] ss:$16 sps:$4 sm:$0xff]  }
 0x586   :  { %v6162_v0 = vpack.c.bf16 %v6157_v16, %v6157_v16  ;;  %v6200_v45 = vadd.bf16 %v6192_v53, %v6161_v61  ;;  %v15034_v53 = vld [vmem:[#allocation18 + $0xc] ss:$16 sps:$4 sm:$0xff]   ;;  %v15038_v16 = vld [vmem:[#allocation18 + $0x1e8] ss:$16 sps:$4 sm:$0xff]  }
 0x587   :  { %v6159_v18 = vpop.f32.mrf.mxu1  ;;  %v15040_v61 = vld [vmem:[#allocation18 + $0x1ec] ss:$16 sps:$4 sm:$0xff]   ;;  %v15044_v63 = vld [vmem:[#allocation18 + $0x1c8] ss:$16 sps:$4 sm:$0xff]  }
 0x588   :  { %v6201_v1 = vadd.bf16 %v6199_v62, %v6162_v0  ;;  %v15046_v62 = vld [vmem:[#allocation18 + $0x1cc] ss:$16 sps:$4 sm:$0xff]   ;;  %v15055_v18 = vld [vmem:[#allocation18 + $0x184] ss:$16 sps:$4 sm:$0xff]  }
 0x589   :  { %v15052_v0 = vld [vmem:[#allocation18 + $0x1ac] ss:$16 sps:$4 sm:$0xff]  }
 0x58a   :  { %15749 = vtanh.bf16 %v6201_v1  ;;  %v15058_v1 = vld [vmem:[#allocation18 + $0x18c] ss:$16 sps:$4 sm:$0xff]  }
 0x58b   :  { %15751 = vtanh.bf16 %v6200_v45  ;;  %v15050_v45 = vld [vmem:[#allocation18 + $0x1a8] ss:$16 sps:$4 sm:$0xff]  }
 0x598   :  { %v15750_v2 = vpop.eup %15749 }
 0x599   :  { %v15752_v44 = vpop.eup %15751  ;;  %6365 = vmatprep.mubr.bf16.mxu0 %v15750_v2  ;;  %v15053_v2 = vld [vmem:[#allocation18 + $0x180] ss:$16 sps:$4 sm:$0xff]  }
 0x59a   :  { %6366 = vmatmul.mubr.bf16.vlgmr.msra.gmra.mxu0 %v15752_v44  ;;  %v15056_v44 = vld [vmem:[#allocation18 + $0x188] ss:$16 sps:$4 sm:$0xff]  }
 0x59b   :  { %6949 = vmatpush1.bf16.msra.mxu0 %v14987_v3  ;;  %v15067_v3 = vld [vmem:[#allocation18 + $0x144] ss:$16 sps:$4 sm:$0xff]  }
 0x59c   :  { %6950 = vmatprep.subr.bf16.mxu0 %v14995_v19  ;;  %v15070_v19 = vld [vmem:[#allocation18 + $0x14c] ss:$16 sps:$4 sm:$0xff]  }
 0x59f   :  { %6951 = vmatpush1.bf16.msra.mxu0 %v14993_v7  ;;  %v15073_v7 = vld [vmem:[#allocation18 + $0x124] ss:$16 sps:$4 sm:$0xff]  }
 0x5a0   :  { %6952 = vmatprep.subr.bf16.mxu0 %v15001_v10  ;;  %v15076_v10 = vld [vmem:[#allocation18 + $0x12c] ss:$16 sps:$4 sm:$0xff]  }
 0x5a3   :  { %6953 = vmatpush1.bf16.msra.mxu0 %v14999_v34  ;;  %v15071_v34 = vld [vmem:[#allocation18 + $0x120] ss:$16 sps:$4 sm:$0xff]  }
 0x5a4   :  { %6954 = vmatprep.subr.bf16.mxu0 %v15007_v11  ;;  %v15074_v11 = vld [vmem:[#allocation18 + $0x128] ss:$16 sps:$4 sm:$0xff]  }
 0x5a7   :  { %6955 = vmatpush1.bf16.msra.mxu0 %v15005_v42  ;;  %v15079_v42 = vld [vmem:[#allocation18 + $0x104] ss:$16 sps:$4 sm:$0xff]  }
 0x5a8   :  { %6956 = vmatprep.subr.bf16.mxu0 %v15013_v12  ;;  %v15082_v12 = vld [vmem:[#allocation18 + $0x10c] ss:$16 sps:$4 sm:$0xff]  }
 0x5ab   :  { %6957 = vmatpush1.bf16.msra.mxu0 %v15011_v13  ;;  %v15077_v13 = vld [vmem:[#allocation18 + $0x100] ss:$16 sps:$4 sm:$0xff]  }
 0x5ac   :  { %6958 = vmatprep.subr.bf16.mxu0 %v15019_v15  ;;  %v15080_v15 = vld [vmem:[#allocation18 + $0x108] ss:$16 sps:$4 sm:$0xff]  }
 0x5af   :  { %6959 = vmatpush1.bf16.msra.mxu0 %v15017_v41  ;;  %v7151_v41 = vld [vmem:[#allocation21 + $0x1c0] sm:$0xff] }
 0x5b0   :  { %6960 = vmatprep.subr.bf16.mxu0 %v15025_v20  ;;  %v7155_v20 = vld [vmem:[#allocation21 + $0x1e0] sm:$0xff] }
 0x5b3   :  { %6961 = vmatpush1.bf16.msra.mxu0 %v15023_v22  ;;  %v7279_v22 = vld [vmem:[#allocation21 + $0x5c0] sm:$0xff] }
 0x5b4   :  { %6962 = vmatprep.subr.bf16.mxu0 %v15031_v31  ;;  %v13669_v31 = vcombine.low %v7151_v41, %v7155_v20 }
 0x5b7   :  { %6963 = vmatpush1.bf16.msra.mxu0 %v15029_v9  ;;  %v13670_v9 = vcombine.high %v7151_v41, %v7155_v20 }
 0x5b8   :  { %6964 = vmatprep.subr.bf16.mxu0 %v15037_v28  ;;  %v7283_v28 = vld [vmem:[#allocation21 + $0x5e0] sm:$0xff] }
 0x5bb   :  { %6965 = vmatpush2.bf16.msra.mxu0 %v15035_v23  ;;  %v13797_v23 = vcombine.low %v7279_v22, %v7283_v28 }
 0x5bc   :  { %6966 = vmatprep.subr.bf16.mxu0 %v15043_v58  ;;  %v13798_v58 = vcombine.high %v7279_v22, %v7283_v28  ;;  %v7103_v22 = vld [vmem:[#allocation21 + $0x40] sm:$0xff] }
 0x5bd   :  { %v7235_v28 = vld [vmem:[#allocation21 + $0x460] sm:$0xff] }
 0x5bf   :  { %6967 = vmatpush2.bf16.msra.mxu0 %v15041_v27  ;;  %v13547_v27 = vld.sshfl [vmem:[#allocation16] sm:$0x11 pattern:$0x75316420] }
 0x5c0   :  { %6968 = vmatprep.subr.bf16.mxu0 %v15049_v43  ;;  %v6530_v43 = vcombine.high %v13547_v27, %v13547_v27 }
 0x5c2   :  { %v6544_v35 = vrot.slane %v6530_v43, %v16395_v26 }
 0x5c3   :  { %6969 = vmatpush2.bf16.msra.mxu0 %v15047_v36  ;;  %v6537_v36 = vrot.slane %v13547_v27, %v16395_v26 }
 0x5c4   :  { %6970 = vmatprep.subr.bf16.mxu0 %v15055_v18  ;;  %v7255_v18 = vld [vmem:[#allocation21 + $0x500] sm:$0xff] }
 0x5c5   :  { %v6546_v46 = vpack.i.b16 %v6537_v36, %v6537_v36  ;;  %v7095_v36 = vld [vmem:[#allocation21] sm:$0xff] }
 0x5c7   :  { %6971 = vmatpush2.bf16.msra.mxu0 %v15053_v2 }
 0x5c8   :  { %6972 = vmatprep.subr.bf16.mxu0 %v15061_v29 }
 0x5cb   :  { %6973 = vmatpush2.bf16.msra.mxu0 %v15059_v54  ;;  %v7119_v54 = vld [vmem:[#allocation21 + $0xc0] sm:$0xff] }
 0x5cc   :  { %6974 = vmatprep.subr.bf16.mxu0 %v15067_v3  ;;  %v7247_v3 = vld [vmem:[#allocation21 + $0x4c0] sm:$0xff] }
 0x5cf   :  { %6975 = vmatpush2.bf16.msra.mxu0 %v15065_v30  ;;  %v7251_v30 = vld [vmem:[#allocation21 + $0x4e0] sm:$0xff] }
 0x5d0   :  { %6976 = vmatprep.subr.bf16.mxu0 %v15073_v7 }
 0x5d3   :  { %6977 = vmatpush2.bf16.msra.mxu0 %v15071_v34  ;;  %v7111_v34 = vld [vmem:[#allocation21 + $0x80] sm:$0xff] }
 0x5d4   :  { %6978 = vmatprep.subr.bf16.mxu0 %v15079_v42  ;;  %v7239_v42 = vld [vmem:[#allocation21 + $0x480] sm:$0xff] }
 0x5d7   :  { %6979 = vmatpush2.bf16.msra.mxu0 %v15077_v13 }
 0x5d8   :  { %8632 = vmatprep.subr.bf16.mxu0 %v13670_v9  ;;  %v7231_v9 = vld [vmem:[#allocation21 + $0x440] sm:$0xff] }
 0x5d9   :  { %v13750_v43 = vcombine.high %v7231_v9, %v7235_v28 }
 0x65a   :  { %v14337_v32 = vpop.f32.mrf.mxu0 }
 0x65c   :  { %v14338_v33 = vpop.f32.mrf.mxu0 }
 0x65d   :  { %v14339_v37 = vadd.f32 %v14338_v33, %v14337_v32  ;;  %v6553_v32 = vpack.i.b16 %v6544_v35, %v6544_v35  ;;  %v7099_v35 = vld [vmem:[#allocation21 + $0x20] sm:$0xff] }
 0x65e   :  { %v14340_v38 = vpop.f32.mrf.mxu0 }
 0x65f   :  { %v6373_v39 = vpack.c.bf16 %v14339_v37, %v14339_v37  ;;  %v6551_v37 = vrot.slane %v6546_v46, %v16405_v52  ;;  %v6558_v38 = vrot.slane %v6553_v32, %v16405_v52  ;;  %v7223_v46 = vld [vmem:[#allocation21 + $0x400] sm:$0xff] }
 0x660   :  { %v14341_v5 = vpop.f32.mrf.mxu0  ;;  %v7227_v32 = vld [vmem:[#allocation21 + $0x420] sm:$0xff] }
 0x661   :  { %v6381_v40 = vadd.bf16 %v6380_v14, %v6373_v39 }
 0x663   :  { %6512 = vmatmul.mubr.bf16.vlgmr.msra.gmra.mxu1 %v6381_v40 }
 0x664   :  { %6990 = vmatpush1.bf16.msra.mxu1 %v14990_v4 }
 0x665   :  { %6991 = vmatprep.subr.bf16.mxu1 %v14998_v21 }
 0x668   :  { %6992 = vmatpush1.bf16.msra.mxu1 %v14996_v47 }
 0x669   :  { %6993 = vmatprep.subr.bf16.mxu1 %v15004_v49  ;;  %v7143_v49 = vld [vmem:[#allocation21 + $0x180] sm:$0xff] }
 0x66c   :  { %6994 = vmatpush1.bf16.msra.mxu1 %v15002_v51  ;;  %v7147_v51 = vld [vmem:[#allocation21 + $0x1a0] sm:$0xff] }
 0x66d   :  { %6995 = vmatprep.subr.bf16.mxu1 %v15010_v50  ;;  %v7271_v50 = vld [vmem:[#allocation21 + $0x580] sm:$0xff] }
 0x670   :  { %6996 = vmatpush1.bf16.msra.mxu1 %v15008_v55  ;;  %v7275_v55 = vld [vmem:[#allocation21 + $0x5a0] sm:$0xff] }
 0x671   :  { %6997 = vmatprep.subr.bf16.mxu1 %v15016_v56 }
 0x674   :  { %6998 = vmatpush1.bf16.msra.mxu1 %v15014_v59  ;;  %v13662_v59 = vcombine.high %v7143_v49, %v7147_v51 }
 0x675   :  { %6999 = vmatprep.subr.bf16.mxu1 %v15022_v25  ;;  %v13790_v25 = vcombine.high %v7271_v50, %v7275_v55 }
 0x678   :  { %7000 = vmatpush1.bf16.msra.mxu1 %v15020_v57  ;;  %v7135_v57 = vld [vmem:[#allocation21 + $0x140] sm:$0xff] }
 0x679   :  { %7001 = vmatprep.subr.bf16.mxu1 %v15028_v60 }
 0x67c   :  { %7002 = vmatpush1.bf16.msra.mxu1 %v15026_v48  ;;  %v7139_v48 = vld [vmem:[#allocation21 + $0x160] sm:$0xff] }
 0x67d   :  { %7003 = vmatprep.subr.bf16.mxu1 %v15034_v53  ;;  %v7263_v53 = vld [vmem:[#allocation21 + $0x540] sm:$0xff]  ;;  %v13653_v2 = vcombine.low %v7135_v57, %v7139_v48 }
 0x680   :  { %7004 = vmatpush1.bf16.msra.mxu1 %v15032_v24  ;;  %v7267_v24 = vld [vmem:[#allocation21 + $0x560] sm:$0xff] }
 0x681   :  { %7005 = vmatprep.subr.bf16.mxu1 %v15040_v61  ;;  %v13661_v61 = vcombine.low %v7143_v49, %v7147_v51 }
 0x684   :  { %7006 = vmatpush2.bf16.msra.mxu1 %v15038_v16  ;;  %v13789_v16 = vcombine.low %v7271_v50, %v7275_v55  ;;  %v7207_v50 = vld [vmem:[#allocation21 + $0x380] sm:$0xff] }
 0x685   :  { %7007 = vmatprep.subr.bf16.mxu1 %v15046_v62  ;;  %v13654_v62 = vcombine.high %v7135_v57, %v7139_v48  ;;  %v7211_v55 = vld [vmem:[#allocation21 + $0x3a0] sm:$0xff] }
 0x688   :  { %7008 = vmatpush2.bf16.msra.mxu1 %v15044_v63  ;;  %v13782_v63 = vcombine.high %v7263_v53, %v7267_v24 }
 0x689   :  { %7009 = vmatprep.subr.bf16.mxu1 %v15052_v0  ;;  %v7127_v0 = vld [vmem:[#allocation21 + $0x100] sm:$0xff] }
 0x68c   :  { %7010 = vmatpush2.bf16.msra.mxu1 %v15050_v45  ;;  %v7131_v45 = vld [vmem:[#allocation21 + $0x120] sm:$0xff] }
 0x68d   :  { %7011 = vmatprep.subr.bf16.mxu1 %v15058_v1  ;;  %v7259_v1 = vld [vmem:[#allocation21 + $0x520] sm:$0xff]  ;;  %v13646_v29 = vcombine.high %v7127_v0, %v7131_v45 }
 0x690   :  { %7012 = vmatpush2.bf16.msra.mxu1 %v15056_v44  ;;  %v13781_v44 = vcombine.low %v7263_v53, %v7267_v24  ;;  %v7199_v53 = vld [vmem:[#allocation21 + $0x340] sm:$0xff] }
 0x691   :  { %7013 = vmatprep.subr.bf16.mxu1 %v15064_v6  ;;  %v13774_v6 = vcombine.high %v7255_v18, %v7259_v1  ;;  %v7203_v24 = vld [vmem:[#allocation21 + $0x360] sm:$0xff] }
 0x694   :  { %7014 = vmatpush2.bf16.msra.mxu1 %v15062_v8  ;;  %v7123_v8 = vld [vmem:[#allocation21 + $0xe0] sm:$0xff] }
 0x695   :  { %7015 = vmatprep.subr.bf16.mxu1 %v15070_v19  ;;  %v13773_v19 = vcombine.low %v7255_v18, %v7259_v1  ;;  %v13638_v7 = vcombine.high %v7119_v54, %v7123_v8  ;;  %v13637_v13 = vcombine.low %v7119_v54, %v7123_v8  ;;  %v13717_v18 = vcombine.low %v7199_v53, %v7203_v24  ;;  %v7323_v54 = vld [vmem:[#allocation21 + $0x720] sm:$0xff] }
 0x698   :  { %7016 = vmatpush2.bf16.msra.mxu1 %v15068_v17  ;;  %v13645_v17 = vcombine.low %v7127_v0, %v7131_v45  ;;  %v13718_v0 = vcombine.high %v7199_v53, %v7203_v24 }
 0x699   :  { %7017 = vmatprep.subr.bf16.mxu1 %v15076_v10  ;;  %v13766_v10 = vcombine.high %v7247_v3, %v7251_v30 }
 0x69c   :  { %7018 = vmatpush2.bf16.msra.mxu1 %v15074_v11  ;;  %v7115_v11 = vld [vmem:[#allocation21 + $0xa0] sm:$0xff] }
 0x69d   :  { %7019 = vmatprep.subr.bf16.mxu1 %v15082_v12  ;;  %v7243_v12 = vld [vmem:[#allocation21 + $0x4a0] sm:$0xff]  ;;  %v13630_v41 = vcombine.high %v7111_v34, %v7115_v11 }
 0x69e   :  { %v13758_v20 = vcombine.high %v7239_v42, %v7243_v12 }
 0x6a0   :  { %7020 = vmatpush2.bf16.msra.mxu1 %v15080_v15  ;;  %v13765_v15 = vcombine.low %v7247_v3, %v7251_v30 }
 0x6a1   :  { %8673 = vmatprep.subr.bf16.mxu1 %v13798_v58  ;;  %v13757_v58 = vcombine.low %v7239_v42, %v7243_v12 }
 0x723   :  { %v6513_v33 = vpop.f32.mrf.mxu1 }
 0x724   :  { %v6520_v14 = vpack.c.bf16 %v6513_v33, %v6513_v33 }
 0x725   :  { %v6515_v39 = vpop.f32.mrf.mxu1 }
 0x726   :  { %v6521_v5 = vpack.c.bf16 %v6515_v39, %v6515_v39  ;;  %v6559_v4 = vadd.bf16 %v6551_v37, %v6520_v14  ;;  %v13749_v37 = vcombine.low %v7231_v9, %v7235_v28  ;;  %v13614_v14 = vcombine.high %v7095_v36, %v7099_v35  ;;  %v7215_v39 = vld [vmem:[#allocation21 + $0x3c0] sm:$0xff] }
 0x727   :  { %v6517_v40 = vpop.f32.mrf.mxu1  ;;  %v7167_v9 = vld [vmem:[#allocation21 + $0x240] sm:$0xff] }
 0x728   :  { %v6560_v21 = vadd.bf16 %v6558_v38, %v6521_v5  ;;  %v13742_v38 = vcombine.high %v7223_v46, %v7227_v32  ;;  %v7219_v5 = vld [vmem:[#allocation21 + $0x3e0] sm:$0xff] }
 0x729   :  { %v6518_v47 = vpop.f32.mrf.mxu1  ;;  %v7347_v40 = vld [vmem:[#allocation21 + $0x7e0] sm:$0xff]  ;;  %v13734_v49 = vcombine.high %v7215_v39, %v7219_v5 }
 0x72a   :  { %15753 = vtanh.bf16 %v6560_v21  ;;  %v13613_v21 = vcombine.low %v7095_v36, %v7099_v35  ;;  %v13741_v47 = vcombine.low %v7223_v46, %v7227_v32  ;;  %v7171_v28 = vld [vmem:[#allocation21 + $0x260] sm:$0xff] }
 0x72b   :  { %15755 = vtanh.bf16 %v6559_v4  ;;  %v7343_v4 = vld [vmem:[#allocation21 + $0x7c0] sm:$0xff] }
 0x72c   :  { %v13862_v51 = vcombine.high %v7343_v4, %v7347_v40  ;;  %v13861_v57 = vcombine.low %v7343_v4, %v7347_v40  ;;  %v7299_v36 = vld [vmem:[#allocation21 + $0x660] sm:$0xff] }
 0x72d   :  { %v7159_v35 = vld [vmem:[#allocation21 + $0x200] sm:$0xff] }
 0x72e   :  { %v7163_v32 = vld [vmem:[#allocation21 + $0x220] sm:$0xff] }
 0x72f   :  { %v13677_v4 = vcombine.low %v7159_v35, %v7163_v32 }
 0x738   :  { %v15754_v56 = vpop.eup %15753 }
 0x739   :  { %v15756_v60 = vpop.eup %15755  ;;  %6980 = vmatprep.mubr.bf16.mxu0 %v15754_v56  ;;  %7021 = vmatprep.mubr.bf16.mxu1 %v15754_v56  ;;  %v7335_v56 = vld [vmem:[#allocation21 + $0x780] sm:$0xff] }
 0x73a   :  { %6981 = vmatmul.mubr.bf16.vlgmr.msra.gmra.mxu0 %v15756_v60  ;;  %7022 = vmatmul.mubr.bf16.vlgmr.msra.gmra.mxu1 %v15756_v60  ;;  %v13726_v60 = vcombine.high %v7207_v50, %v7211_v55 }
 0x73b   :  { %8633 = vmatpush1.bf16.msra.mxu0 %v13669_v31  ;;  %8674 = vmatpush1.bf16.msra.mxu1 %v13797_v23  ;;  %v7107_v31 = vld [vmem:[#allocation21 + $0x60] sm:$0xff]  ;;  %v13629_v23 = vcombine.low %v7111_v34, %v7115_v11 }
 0x73c   :  { %8634 = vmatprep.subr.bf16.mxu0 %v13662_v59  ;;  %8675 = vmatprep.subr.bf16.mxu1 %v13790_v25  ;;  %v13622_v27 = vcombine.high %v7103_v22, %v7107_v31  ;;  %v13621_v33 = vcombine.low %v7103_v22, %v7107_v31  ;;  %v7339_v59 = vld [vmem:[#allocation21 + $0x7a0] sm:$0xff]  ;;  %v13733_v25 = vcombine.low %v7215_v39, %v7219_v5 }
 0x73d   :  { %v13854_v48 = vcombine.high %v7335_v56, %v7339_v59  ;;  %v7315_v34 = vld [vmem:[#allocation21 + $0x6e0] sm:$0xff] }
 0x73e   :  { %v7307_v31 = vld [vmem:[#allocation21 + $0x6a0] sm:$0xff] }
 0x73f   :  { %8635 = vmatpush1.bf16.msra.mxu0 %v13661_v61  ;;  %8676 = vmatpush1.bf16.msra.mxu1 %v13789_v16  ;;  %v7327_v61 = vld [vmem:[#allocation21 + $0x740] sm:$0xff] }
 0x740   :  { %8636 = vmatprep.subr.bf16.mxu0 %v13654_v62  ;;  %8677 = vmatprep.subr.bf16.mxu1 %v13782_v63  ;;  %v7331_v16 = vld [vmem:[#allocation21 + $0x760] sm:$0xff]  ;;  %v13725_v62 = vcombine.low %v7207_v50, %v7211_v55  ;;  %v13853_v63 = vcombine.low %v7335_v56, %v7339_v59  ;;  %v7284_v50 = vld [vmem:[#allocation21 + $0x5e8] sm:$0xff] }
 0x741   :  { %v13846_v45 = vcombine.high %v7327_v61, %v7331_v16  ;;  %v13845_v1 = vcombine.low %v7327_v61, %v7331_v16 }
 0x743   :  { %8637 = vmatpush1.bf16.msra.mxu0 %v13653_v2  ;;  %8678 = vmatpush1.bf16.msra.mxu1 %v13781_v44  ;;  %v7191_v2 = vld [vmem:[#allocation21 + $0x300] sm:$0xff] }
 0x744   :  { %8638 = vmatprep.subr.bf16.mxu0 %v13646_v29  ;;  %8679 = vmatprep.subr.bf16.mxu1 %v13774_v6  ;;  %v7195_v44 = vld [vmem:[#allocation21 + $0x320] sm:$0xff] }
 0x745   :  { %v7319_v29 = vld [vmem:[#allocation21 + $0x700] sm:$0xff]  ;;  %v13710_v6 = vcombine.high %v7191_v2, %v7195_v44  ;;  %v13709_v8 = vcombine.low %v7191_v2, %v7195_v44 }
 0x746   :  { %v13837_v3 = vcombine.low %v7319_v29, %v7323_v54  ;;  %v13838_v30 = vcombine.high %v7319_v29, %v7323_v54 }
 0x747   :  { %8639 = vmatpush1.bf16.msra.mxu0 %v13645_v17  ;;  %8680 = vmatpush1.bf16.msra.mxu1 %v13773_v19  ;;  %v7183_v17 = vld [vmem:[#allocation21 + $0x2c0] sm:$0xff] }
 0x748   :  { %8640 = vmatprep.subr.bf16.mxu0 %v13638_v7  ;;  %8681 = vmatprep.subr.bf16.mxu1 %v13766_v10  ;;  %v7187_v19 = vld [vmem:[#allocation21 + $0x2e0] sm:$0xff] }
 0x749   :  { %v7311_v7 = vld [vmem:[#allocation21 + $0x6c0] sm:$0xff]  ;;  %v13702_v10 = vcombine.high %v7183_v17, %v7187_v19  ;;  %v13701_v11 = vcombine.low %v7183_v17, %v7187_v19 }
 0x74a   :  { %v13829_v42 = vcombine.low %v7311_v7, %v7315_v34  ;;  %v13830_v12 = vcombine.high %v7311_v7, %v7315_v34 }
 0x74b   :  { %8641 = vmatpush1.bf16.msra.mxu0 %v13637_v13  ;;  %8682 = vmatpush1.bf16.msra.mxu1 %v13765_v15  ;;  %v7175_v13 = vld [vmem:[#allocation21 + $0x280] sm:$0xff] }
 0x74c   :  { %8642 = vmatprep.subr.bf16.mxu0 %v13630_v41  ;;  %8683 = vmatprep.subr.bf16.mxu1 %v13758_v20  ;;  %v7179_v15 = vld [vmem:[#allocation21 + $0x2a0] sm:$0xff] }
 0x74d   :  { %v7303_v41 = vld [vmem:[#allocation21 + $0x680] sm:$0xff]  ;;  %v13693_v20 = vcombine.low %v7175_v13, %v7179_v15  ;;  %v13694_v22 = vcombine.high %v7175_v13, %v7179_v15  ;;  %v7144_v13 = vld [vmem:[#allocation21 + $0x188] sm:$0xff] }
 0x74e   :  { %v7148_v15 = vld [vmem:[#allocation21 + $0x1a8] sm:$0xff] }
 0x74f   :  { %8643 = vmatpush1.bf16.msra.mxu0 %v13629_v23  ;;  %8684 = vmatpush1.bf16.msra.mxu1 %v13757_v58  ;;  %v13821_v23 = vcombine.low %v7303_v41, %v7307_v31  ;;  %v13822_v58 = vcombine.high %v7303_v41, %v7307_v31 }
 0x750   :  { %8644 = vmatprep.subr.bf16.mxu0 %v13622_v27  ;;  %8685 = vmatprep.subr.bf16.mxu1 %v13750_v43  ;;  %v13686_v27 = vcombine.high %v7167_v9, %v7171_v28  ;;  %v7295_v43 = vld [vmem:[#allocation21 + $0x640] sm:$0xff] }
 0x751   :  { %v13814_v46 = vcombine.high %v7295_v43, %v7299_v36  ;;  %v13813_v39 = vcombine.low %v7295_v43, %v7299_v36  ;;  %v7264_v36 = vld [vmem:[#allocation21 + $0x548] sm:$0xff] }
 0x753   :  { %8645 = vmatpush1.bf16.msra.mxu0 %v13621_v33  ;;  %8686 = vmatpush1.bf16.msra.mxu1 %v13749_v37  ;;  %v13685_v33 = vcombine.low %v7167_v9, %v7171_v28  ;;  %v7287_v37 = vld [vmem:[#allocation21 + $0x600] sm:$0xff]  ;;  %v13664_v28 = vcombine.high %v7144_v13, %v7148_v15 }
 0x754   :  { %8646 = vmatprep.subr.bf16.mxu0 %v13614_v14  ;;  %8687 = vmatprep.subr.bf16.mxu1 %v13742_v38  ;;  %v7291_v14 = vld [vmem:[#allocation21 + $0x620] sm:$0xff]  ;;  %v13678_v38 = vcombine.high %v7159_v35, %v7163_v32  ;;  %v7268_v35 = vld [vmem:[#allocation21 + $0x568] sm:$0xff] }
 0x755   :  { %v13806_v5 = vcombine.high %v7287_v37, %v7291_v14  ;;  %v13805_v40 = vcombine.low %v7287_v37, %v7291_v14  ;;  %v13784_v37 = vcombine.high %v7264_v36, %v7268_v35  ;;  %v7128_v14 = vld [vmem:[#allocation21 + $0x108] sm:$0xff] }
 0x757   :  { %8647 = vmatpush1.bf16.msra.mxu0 %v13613_v21  ;;  %8688 = vmatpush1.bf16.msra.mxu1 %v13741_v47  ;;  %v16568_v21 = vld [vmem:[#allocation21 + $0x1c8] sm:$0xff] }
 0x758   :  { %8648 = vmatprep.subr.bf16.mxu0 %v13734_v49  ;;  %8689 = vmatprep.subr.bf16.mxu1 %v13862_v51  ;;  %v7156_v47 = vld [vmem:[#allocation21 + $0x1e8] sm:$0xff] }
 0x759   :  { %v16570_v49 = vld [vmem:[#allocation21 + $0x5c8] sm:$0xff]  ;;  %v13672_v51 = vcombine.high %v16568_v21, %v7156_v47  ;;  %v13671_v55 = vcombine.low %v16568_v21, %v7156_v47 }
 0x75a   :  { %v13799_v56 = vcombine.low %v16570_v49, %v7284_v50  ;;  %v13800_v59 = vcombine.high %v16570_v49, %v7284_v50  ;;  %v7120_v49 = vld [vmem:[#allocation21 + $0xc8] sm:$0xff] }
 0x75b   :  { %8649 = vmatpush2.bf16.msra.mxu0 %v13733_v25  ;;  %8690 = vmatpush2.bf16.msra.mxu1 %v13861_v57  ;;  %v13612_v25 = vld.sshfl [vmem:[#allocation19] sm:$0x33 pattern:$0x75316420]  ;;  %v7248_v50 = vld [vmem:[#allocation21 + $0x4c8] sm:$0xff] }
 0x75c   :  { %8650 = vmatprep.subr.bf16.mxu0 %v13726_v60  ;;  %8691 = vmatprep.subr.bf16.mxu1 %v13854_v48  ;;  %v7042_v57 = vcombine.high %v13612_v25, %v13612_v25  ;;  %v7049_v60 = vrot.slane %v13612_v25, %v16395_v26 }
 0x75e   :  { %v7056_v48 = vrot.slane %v7042_v57, %v16395_v26  ;;  %v7057_v53 = vcombine.high %v7049_v60, %v7049_v60  ;;  %v7060_v61 = vpack.i.b16 %v7049_v60, %v7049_v60  ;;  %v7112_v60 = vld [vmem:[#allocation21 + $0x88] sm:$0xff] }
 0x75f   :  { %8651 = vmatpush2.bf16.msra.mxu0 %v13725_v62  ;;  %8692 = vmatpush2.bf16.msra.mxu1 %v13853_v63 }
 0x760   :  { %8652 = vmatprep.subr.bf16.mxu0 %v13718_v0  ;;  %8693 = vmatprep.subr.bf16.mxu1 %v13846_v45  ;;  %v7058_v24 = vcombine.high %v7056_v48, %v7056_v48  ;;  %v7074_v16 = vpack.i.b16 %v7057_v53, %v7057_v53  ;;  %v7067_v62 = vpack.i.b16 %v7056_v48, %v7056_v48  ;;  %v7116_v48 = vld [vmem:[#allocation21 + $0xa8] sm:$0xff] }
 0x761   :  { %v7065_v0 = vrot.slane %v7060_v61, %v16405_v52  ;;  %v7240_v53 = vld [vmem:[#allocation21 + $0x488] sm:$0xff] }
 0x762   :  { %v7081_v63 = vpack.i.b16 %v7058_v24, %v7058_v24  ;;  %v7072_v29 = vrot.slane %v7067_v62, %v16405_v52  ;;  %v7244_v24 = vld [vmem:[#allocation21 + $0x4a8] sm:$0xff]  ;;  %v13632_v62 = vcombine.high %v7112_v60, %v7116_v48 }
 0x763   :  { %8653 = vmatpush2.bf16.msra.mxu0 %v13717_v18  ;;  %8694 = vmatpush2.bf16.msra.mxu1 %v13845_v1  ;;  %v7079_v1 = vrot.slane %v7074_v16, %v16405_v52 }
 0x764   :  { %8654 = vmatprep.subr.bf16.mxu0 %v13710_v6  ;;  %8695 = vmatprep.subr.bf16.mxu1 %v13838_v30  ;;  %v7086_v6 = vrot.slane %v7081_v63, %v16405_v52  ;;  %v13760_v63 = vcombine.high %v7240_v53, %v7244_v24 }
 0x767   :  { %8655 = vmatpush2.bf16.msra.mxu0 %v13709_v8  ;;  %8696 = vmatpush2.bf16.msra.mxu1 %v13837_v3 }
 0x768   :  { %8656 = vmatprep.subr.bf16.mxu0 %v13702_v10  ;;  %8697 = vmatprep.subr.bf16.mxu1 %v13830_v12 }
 0x76b   :  { %8657 = vmatpush2.bf16.msra.mxu0 %v13701_v11  ;;  %8698 = vmatpush2.bf16.msra.mxu1 %v13829_v42 }
 0x76c   :  { %8658 = vmatprep.subr.bf16.mxu0 %v13694_v22  ;;  %8699 = vmatprep.subr.bf16.mxu1 %v13822_v58  ;;  %v7276_v22 = vld [vmem:[#allocation21 + $0x5a8] sm:$0xff] }
 0x76d   :  { %v7140_v58 = vld [vmem:[#allocation21 + $0x168] sm:$0xff] }
 0x76f   :  { %8659 = vmatpush2.bf16.msra.mxu0 %v13693_v20  ;;  %8700 = vmatpush2.bf16.msra.mxu1 %v13821_v23  ;;  %v7272_v20 = vld [vmem:[#allocation21 + $0x588] sm:$0xff] }
 0x770   :  { %8660 = vmatprep.subr.bf16.mxu0 %v13686_v27  ;;  %8701 = vmatprep.subr.bf16.mxu1 %v13814_v46  ;;  %v7136_v23 = vld [vmem:[#allocation21 + $0x148] sm:$0xff]  ;;  %v13792_v43 = vcombine.high %v7272_v20, %v7276_v22  ;;  %v13663_v46 = vcombine.low %v7144_v13, %v7148_v15  ;;  %v13791_v32 = vcombine.low %v7272_v20, %v7276_v22 }
 0x773   :  { %8661 = vmatpush2.bf16.msra.mxu0 %v13685_v33  ;;  %8702 = vmatpush2.bf16.msra.mxu1 %v13813_v39  ;;  %v13656_v33 = vcombine.high %v7136_v23, %v7140_v58  ;;  %v7256_v39 = vld [vmem:[#allocation21 + $0x508] sm:$0xff] }
 0x774   :  { %8662 = vmatprep.subr.bf16.mxu0 %v13678_v38  ;;  %8703 = vmatprep.subr.bf16.mxu1 %v13806_v5  ;;  %v7132_v38 = vld [vmem:[#allocation21 + $0x128] sm:$0xff] }
 0x775   :  { %v7260_v5 = vld [vmem:[#allocation21 + $0x528] sm:$0xff]  ;;  %v13648_v21 = vcombine.high %v7128_v14, %v7132_v38 }
 0x776   :  { %v13776_v47 = vcombine.high %v7256_v39, %v7260_v5 }
 0x777   :  { %8663 = vmatpush2.bf16.msra.mxu0 %v13677_v4  ;;  %8704 = vmatpush2.bf16.msra.mxu1 %v13805_v40  ;;  %v13655_v4 = vcombine.low %v7136_v23, %v7140_v58  ;;  %v13783_v40 = vcombine.low %v7264_v36, %v7268_v35  ;;  %v7212_v23 = vld [vmem:[#allocation21 + $0x3a8] sm:$0xff] }
 0x778   :  { %8714 = vmatprep.subr.bf16.mxu0 %v13672_v51  ;;  %8755 = vmatprep.subr.bf16.mxu1 %v13800_v59  ;;  %v7124_v51 = vld [vmem:[#allocation21 + $0xe8] sm:$0xff]  ;;  %v13775_v59 = vcombine.low %v7256_v39, %v7260_v5 }
 0x779   :  { %v13640_v25 = vcombine.high %v7120_v49, %v7124_v51  ;;  %v13639_v61 = vcombine.low %v7120_v49, %v7124_v51  ;;  %v7336_v58 = vld [vmem:[#allocation21 + $0x788] sm:$0xff] }
 0x77a   :  { %v7320_v49 = vld [vmem:[#allocation21 + $0x708] sm:$0xff] }
 0x77b   :  { %v7324_v51 = vld [vmem:[#allocation21 + $0x728] sm:$0xff] }
 0x7fa   :  { %v6982_v45 = vpop.f32.mrf.mxu0  ;;  %v7023_v18 = vpop.f32.mrf.mxu1 }
 0x7fb   :  { %v7030_v2 = vpack.c.bf16 %v6982_v45, %v6982_v45  ;;  %v7032_v44 = vpack.c.bf16 %v7023_v18, %v7023_v18  ;;  %v7108_v45 = vld [vmem:[#allocation21 + $0x68] sm:$0xff] }
 0x7fc   :  { %v6984_v54 = vpop.f32.mrf.mxu0  ;;  %v7025_v8 = vpop.f32.mrf.mxu1  ;;  %v7232_v18 = vld [vmem:[#allocation21 + $0x448] sm:$0xff] }
 0x7fd   :  { %v7087_v3 = vadd.bf16 %v7065_v0, %v7030_v2  ;;  %v7031_v30 = vpack.c.bf16 %v6984_v54, %v6984_v54  ;;  %v7033_v17 = vpack.c.bf16 %v7025_v8, %v7025_v8  ;;  %v7089_v10 = vadd.bf16 %v7079_v1, %v7032_v44  ;;  %v7104_v0 = vld [vmem:[#allocation21 + $0x48] sm:$0xff] }
 0x7fe   :  { %v6986_v19 = vpop.f32.mrf.mxu0  ;;  %v7027_v7 = vpop.f32.mrf.mxu1  ;;  %v7236_v1 = vld [vmem:[#allocation21 + $0x468] sm:$0xff]  ;;  %v13631_v2 = vcombine.low %v7112_v60, %v7116_v48  ;;  %v13759_v44 = vcombine.low %v7240_v53, %v7244_v24  ;;  %v13839_v24 = vcombine.low %v7320_v49, %v7324_v51 }
 0x7ff   :  { %v7088_v34 = vadd.bf16 %v7072_v29, %v7031_v30  ;;  %v7090_v11 = vadd.bf16 %v7086_v6, %v7033_v17  ;;  %15757 = vtanh.bf16 %v7087_v3  ;;  %v13624_v29 = vcombine.high %v7104_v0, %v7108_v45  ;;  %v7096_v54 = vld [vmem:[#allocation21 + $0x8] sm:$0xff] }
 0x800   :  { %v6987_v42 = vpop.f32.mrf.mxu0  ;;  %v7028_v12 = vpop.f32.mrf.mxu1  ;;  %v13752_v6 = vcombine.high %v7232_v18, %v7236_v1  ;;  %v7100_v8 = vld [vmem:[#allocation21 + $0x28] sm:$0xff]  ;;  %v13623_v17 = vcombine.low %v7104_v0, %v7108_v45  ;;  %v13751_v19 = vcombine.low %v7232_v18, %v7236_v1 }
 0x801   :  { %15759 = vtanh.bf16 %v7088_v34  ;;  %v7224_v3 = vld [vmem:[#allocation21 + $0x408] sm:$0xff]  ;;  %v13616_v7 = vcombine.high %v7096_v54, %v7100_v8  ;;  %v13615_v13 = vcombine.low %v7096_v54, %v7100_v8 }
 0x802   :  { %15761 = vtanh.bf16 %v7090_v11  ;;  %v7228_v30 = vld [vmem:[#allocation21 + $0x428] sm:$0xff] }
 0x803   :  { %15763 = vtanh.bf16 %v7089_v10  ;;  %v13744_v10 = vcombine.high %v7224_v3, %v7228_v30  ;;  %v7216_v34 = vld [vmem:[#allocation21 + $0x3c8] sm:$0xff]  ;;  %v13743_v15 = vcombine.low %v7224_v3, %v7228_v30 }
 0x804   :  { %v7220_v11 = vld [vmem:[#allocation21 + $0x3e8] sm:$0xff] }
 0x805   :  { %v7344_v42 = vld [vmem:[#allocation21 + $0x7c8] sm:$0xff]  ;;  %v13736_v20 = vcombine.high %v7216_v34, %v7220_v11  ;;  %v13735_v36 = vcombine.low %v7216_v34, %v7220_v11 }
 0x806   :  { %v7348_v12 = vld [vmem:[#allocation21 + $0x7e8] sm:$0xff] }
 0x807   :  { %v13864_v22 = vcombine.high %v7344_v42, %v7348_v12  ;;  %v13863_v35 = vcombine.low %v7344_v42, %v7348_v12  ;;  %v7312_v60 = vld [vmem:[#allocation21 + $0x6c8] sm:$0xff] }
 0x808   :  { %v7316_v48 = vld [vmem:[#allocation21 + $0x6e8] sm:$0xff] }
 0x809   :  { %v7304_v0 = vld [vmem:[#allocation21 + $0x688] sm:$0xff]  ;;  %v13831_v1 = vcombine.low %v7312_v60, %v7316_v48 }
 0x80a   :  { %v7308_v45 = vld [vmem:[#allocation21 + $0x6a8] sm:$0xff] }
 0x80b   :  { %v7296_v54 = vld [vmem:[#allocation21 + $0x648] sm:$0xff]  ;;  %v13823_v30 = vcombine.low %v7304_v0, %v7308_v45 }
 0x80c   :  { %v7300_v8 = vld [vmem:[#allocation21 + $0x668] sm:$0xff] }
 0x80d   :  { %v16582_v41 = vpop.eup %15757  ;;  %v7288_v34 = vld [vmem:[#allocation21 + $0x608] sm:$0xff]  ;;  %v13815_v12 = vcombine.low %v7296_v54, %v7300_v8 }
 0x80e   :  { %v7292_v11 = vld [vmem:[#allocation21 + $0x628] sm:$0xff] }
 0x80f   :  { %v16584_v31 = vpop.eup %15759 }
 0x810   :  { %v16586_v9 = vpop.eup %15761  ;;  %8664 = vmatprep.mubr.bf16.mxu0 %v16584_v31 }
 0x811   :  { %v16589_v27 = vpop.eup %15763  ;;  %8705 = vmatprep.mubr.bf16.mxu1 %v16586_v9  ;;  %8665 = vmatmul.mubr.bf16.vlgmr.msra.gmra.mxu0 %v16582_v41 }
 0x812   :  { %8706 = vmatmul.mubr.bf16.vlgmr.msra.gmra.mxu1 %v16589_v27  ;;  %8715 = vmatpush1.bf16.msra.mxu0 %v13671_v55  ;;  %v7252_v55 = vld [vmem:[#allocation21 + $0x4e8] sm:$0xff] }
 0x813   :  { %8756 = vmatpush1.bf16.msra.mxu1 %v13799_v56  ;;  %8746 = vmatprep.mubr.bf16.mxu0 %v16584_v31  ;;  %v13647_v56 = vcombine.low %v7128_v14, %v7132_v38  ;;  %v13768_v57 = vcombine.high %v7248_v50, %v7252_v55  ;;  %v13767_v16 = vcombine.low %v7248_v50, %v7252_v55  ;;  %v7328_v14 = vld [vmem:[#allocation21 + $0x748] sm:$0xff] }
 0x814   :  { %8787 = vmatprep.mubr.bf16.mxu1 %v16586_v9  ;;  %8716 = vmatprep.subr.bf16.mxu0 %v13664_v28  ;;  %v7208_v28 = vld [vmem:[#allocation21 + $0x388] sm:$0xff] }
 0x815   :  { %8757 = vmatprep.subr.bf16.mxu1 %v13792_v43  ;;  %v7340_v43 = vld [vmem:[#allocation21 + $0x7a8] sm:$0xff]  ;;  %v13727_v39 = vcombine.low %v7208_v28, %v7212_v23 }
 0x816   :  { %8717 = vmatpush1.bf16.msra.mxu0 %v13663_v46  ;;  %v13728_v46 = vcombine.high %v7208_v28, %v7212_v23  ;;  %v7332_v38 = vld [vmem:[#allocation21 + $0x768] sm:$0xff]  ;;  %v13855_v5 = vcombine.low %v7336_v58, %v7340_v43  ;;  %v7281_v28 = vld [vmem:[#allocation21 + $0x5d0] sm:$0xff] }
 0x817   :  { %8758 = vmatpush1.bf16.msra.mxu1 %v13791_v32  ;;  %8718 = vmatprep.subr.bf16.mxu0 %v13656_v33  ;;  %v13856_v32 = vcombine.high %v7336_v58, %v7340_v43  ;;  %v7200_v33 = vld [vmem:[#allocation21 + $0x348] sm:$0xff]  ;;  %v13847_v55 = vcombine.low %v7328_v14, %v7332_v38  ;;  %v7285_v23 = vld [vmem:[#allocation21 + $0x5f0] sm:$0xff]  ;;  %v13807_v43 = vcombine.low %v7288_v34, %v7292_v11 }
 0x818   :  { %8759 = vmatprep.subr.bf16.mxu1 %v13784_v37  ;;  %v7204_v37 = vld [vmem:[#allocation21 + $0x368] sm:$0xff] }
 0x819   :  { %v13719_v50 = vcombine.low %v7200_v33, %v7204_v37 }
 0x81a   :  { %8719 = vmatpush1.bf16.msra.mxu0 %v13655_v4  ;;  %v13720_v4 = vcombine.high %v7200_v33, %v7204_v37  ;;  %v7273_v37 = vld [vmem:[#allocation21 + $0x590] sm:$0xff] }
 0x81b   :  { %8760 = vmatpush1.bf16.msra.mxu1 %v13783_v40  ;;  %8720 = vmatprep.subr.bf16.mxu0 %v13648_v21  ;;  %v13848_v40 = vcombine.high %v7328_v14, %v7332_v38  ;;  %v7192_v21 = vld [vmem:[#allocation21 + $0x308] sm:$0xff]  ;;  %v7277_v14 = vld [vmem:[#allocation21 + $0x5b0] sm:$0xff]  ;;  %v13801_v38 = vcombine.low %v7281_v28, %v7285_v23 }
 0x81c   :  { %8761 = vmatprep.subr.bf16.mxu1 %v13776_v47  ;;  %v7196_v47 = vld [vmem:[#allocation21 + $0x328] sm:$0xff] }
 0x81d   :  { %v13711_v53 = vcombine.low %v7192_v21, %v7196_v47 }
 0x81e   :  { %8721 = vmatpush1.bf16.msra.mxu0 %v13647_v56  ;;  %v13712_v56 = vcombine.high %v7192_v21, %v7196_v47  ;;  %v7265_v21 = vld [vmem:[#allocation21 + $0x550] sm:$0xff] }
 0x81f   :  { %8762 = vmatpush1.bf16.msra.mxu1 %v13775_v59  ;;  %8722 = vmatprep.subr.bf16.mxu0 %v13640_v25  ;;  %v13840_v59 = vcombine.high %v7320_v49, %v7324_v51  ;;  %v7184_v25 = vld [vmem:[#allocation21 + $0x2c8] sm:$0xff]  ;;  %v7269_v47 = vld [vmem:[#allocation21 + $0x570] sm:$0xff]  ;;  %v13793_v51 = vcombine.low %v7273_v37, %v7277_v14 }
 0x820   :  { %8763 = vmatprep.subr.bf16.mxu1 %v13768_v57  ;;  %v7188_v57 = vld [vmem:[#allocation21 + $0x2e8] sm:$0xff] }
 0x821   :  { %v13703_v18 = vcombine.low %v7184_v25, %v7188_v57 }
 0x822   :  { %8723 = vmatpush1.bf16.msra.mxu0 %v13639_v61  ;;  %v13704_v61 = vcombine.high %v7184_v25, %v7188_v57  ;;  %v7257_v25 = vld [vmem:[#allocation21 + $0x510] sm:$0xff] }
 0x823   :  { %8764 = vmatpush1.bf16.msra.mxu1 %v13767_v16  ;;  %8724 = vmatprep.subr.bf16.mxu0 %v13632_v62  ;;  %v13832_v16 = vcombine.high %v7312_v60, %v7316_v48  ;;  %v7176_v62 = vld [vmem:[#allocation21 + $0x288] sm:$0xff]  ;;  %v7261_v57 = vld [vmem:[#allocation21 + $0x530] sm:$0xff]  ;;  %v13785_v48 = vcombine.low %v7265_v21, %v7269_v47 }
 0x824   :  { %8765 = vmatprep.subr.bf16.mxu1 %v13760_v63  ;;  %v7180_v63 = vld [vmem:[#allocation21 + $0x2a8] sm:$0xff] }
 0x825   :  { %v13695_v3 = vcombine.low %v7176_v62, %v7180_v63 }
 0x826   :  { %8725 = vmatpush1.bf16.msra.mxu0 %v13631_v2  ;;  %v13696_v2 = vcombine.high %v7176_v62, %v7180_v63  ;;  %v7249_v62 = vld [vmem:[#allocation21 + $0x4d0] sm:$0xff] }
 0x827   :  { %8766 = vmatpush1.bf16.msra.mxu1 %v13759_v44  ;;  %8726 = vmatprep.subr.bf16.mxu0 %v13624_v29  ;;  %v13824_v44 = vcombine.high %v7304_v0, %v7308_v45  ;;  %v7168_v29 = vld [vmem:[#allocation21 + $0x248] sm:$0xff]  ;;  %v7253_v63 = vld [vmem:[#allocation21 + $0x4f0] sm:$0xff]  ;;  %v13777_v45 = vcombine.low %v7257_v25, %v7261_v57 }
 0x828   :  { %8767 = vmatprep.subr.bf16.mxu1 %v13752_v6  ;;  %v7172_v6 = vld [vmem:[#allocation21 + $0x268] sm:$0xff] }
 0x829   :  { %v13687_v42 = vcombine.low %v7168_v29, %v7172_v6 }
 0x82a   :  { %8727 = vmatpush1.bf16.msra.mxu0 %v13623_v17  ;;  %v13688_v17 = vcombine.high %v7168_v29, %v7172_v6  ;;  %v7241_v29 = vld [vmem:[#allocation21 + $0x490] sm:$0xff] }
 0x82b   :  { %8768 = vmatpush1.bf16.msra.mxu1 %v13751_v19  ;;  %8728 = vmatprep.subr.bf16.mxu0 %v13616_v7  ;;  %v13816_v19 = vcombine.high %v7296_v54, %v7300_v8  ;;  %v7160_v7 = vld [vmem:[#allocation21 + $0x208] sm:$0xff]  ;;  %v7245_v6 = vld [vmem:[#allocation21 + $0x4b0] sm:$0xff]  ;;  %v13769_v8 = vcombine.low %v7249_v62, %v7253_v63 }
 0x82c   :  { %8769 = vmatprep.subr.bf16.mxu1 %v13744_v10  ;;  %v7164_v10 = vld [vmem:[#allocation21 + $0x228] sm:$0xff] }
 0x82d   :  { %v13679_v58 = vcombine.low %v7160_v7, %v7164_v10 }
 0x82e   :  { %8729 = vmatpush1.bf16.msra.mxu0 %v13615_v13  ;;  %v13680_v13 = vcombine.high %v7160_v7, %v7164_v10  ;;  %v7233_v7 = vld [vmem:[#allocation21 + $0x450] sm:$0xff] }
 0x82f   :  { %8770 = vmatpush1.bf16.msra.mxu1 %v13743_v15  ;;  %8730 = vmatprep.subr.bf16.mxu0 %v13736_v20  ;;  %v13808_v15 = vcombine.high %v7288_v34, %v7292_v11  ;;  %v7153_v20 = vld [vmem:[#allocation21 + $0x1d0] sm:$0xff]  ;;  %v13761_v11 = vcombine.low %v7241_v29, %v7245_v6 }
 0x830   :  { %8771 = vmatprep.subr.bf16.mxu1 %v13864_v22  ;;  %v7157_v22 = vld [vmem:[#allocation21 + $0x1f0] sm:$0xff] }
 0x831   :  { %v13673_v33 = vcombine.low %v7153_v20, %v7157_v22  ;;  %v7237_v10 = vld [vmem:[#allocation21 + $0x470] sm:$0xff] }
 0x832   :  { %8731 = vmatpush2.bf16.msra.mxu0 %v13735_v36  ;;  %v13674_v36 = vcombine.high %v7153_v20, %v7157_v22  ;;  %v7225_v20 = vld [vmem:[#allocation21 + $0x410] sm:$0xff] }
 0x833   :  { %8772 = vmatpush2.bf16.msra.mxu1 %v13863_v35  ;;  %8732 = vmatprep.subr.bf16.mxu0 %v13728_v46  ;;  %v13802_v35 = vcombine.high %v7281_v28, %v7285_v23  ;;  %v7145_v46 = vld [vmem:[#allocation21 + $0x190] sm:$0xff]  ;;  %v13753_v23 = vcombine.low %v7233_v7, %v7237_v10 }
 0x834   :  { %8773 = vmatprep.subr.bf16.mxu1 %v13856_v32  ;;  %v7149_v32 = vld [vmem:[#allocation21 + $0x1b0] sm:$0xff] }
 0x835   :  { %v13665_v49 = vcombine.low %v7145_v46, %v7149_v32  ;;  %v7229_v22 = vld [vmem:[#allocation21 + $0x430] sm:$0xff] }
 0x836   :  { %8733 = vmatpush2.bf16.msra.mxu0 %v13727_v39  ;;  %v13666_v39 = vcombine.high %v7145_v46, %v7149_v32  ;;  %v7345_v46 = vld [vmem:[#allocation21 + $0x7d0] sm:$0xff] }
 0x837   :  { %8774 = vmatpush2.bf16.msra.mxu1 %v13855_v5  ;;  %8734 = vmatprep.subr.bf16.mxu0 %v13720_v4  ;;  %v7137_v5 = vld [vmem:[#allocation21 + $0x150] sm:$0xff] }
 0x838   :  { %8775 = vmatprep.subr.bf16.mxu1 %v13848_v40  ;;  %v7141_v4 = vld [vmem:[#allocation21 + $0x170] sm:$0xff]  ;;  %v13794_v40 = vcombine.high %v7273_v37, %v7277_v14  ;;  %v13745_v37 = vcombine.low %v7225_v20, %v7229_v22 }
 0x839   :  { %v13657_v60 = vcombine.low %v7137_v5, %v7141_v4  ;;  %v7349_v32 = vld [vmem:[#allocation21 + $0x7f0] sm:$0xff] }
 0x83a   :  { %8735 = vmatpush2.bf16.msra.mxu0 %v13719_v50  ;;  %v13658_v50 = vcombine.high %v7137_v5, %v7141_v4  ;;  %v7213_v5 = vld [vmem:[#allocation21 + $0x3b0] sm:$0xff] }
 0x83b   :  { %8776 = vmatpush2.bf16.msra.mxu1 %v13847_v55  ;;  %8736 = vmatprep.subr.bf16.mxu0 %v13712_v56  ;;  %v13786_v55 = vcombine.high %v7265_v21, %v7269_v47  ;;  %v7129_v56 = vld [vmem:[#allocation21 + $0x110] sm:$0xff]  ;;  %v13865_v47 = vcombine.low %v7345_v46, %v7349_v32 }
 0x83c   :  { %8777 = vmatprep.subr.bf16.mxu1 %v13840_v59  ;;  %v7133_v59 = vld [vmem:[#allocation21 + $0x130] sm:$0xff] }
 0x83d   :  { %v13649_v0 = vcombine.low %v7129_v56, %v7133_v59  ;;  %v7337_v4 = vld [vmem:[#allocation21 + $0x790] sm:$0xff] }
 0x83e   :  { %8737 = vmatpush2.bf16.msra.mxu0 %v13711_v53  ;;  %v13650_v53 = vcombine.high %v7129_v56, %v7133_v59  ;;  %v7329_v56 = vld [vmem:[#allocation21 + $0x750] sm:$0xff] }
 0x83f   :  { %8778 = vmatpush2.bf16.msra.mxu1 %v13839_v24  ;;  %8738 = vmatprep.subr.bf16.mxu0 %v13704_v61  ;;  %v13778_v24 = vcombine.high %v7257_v25, %v7261_v57  ;;  %v7121_v61 = vld [vmem:[#allocation21 + $0xd0] sm:$0xff] }
 0x840   :  { %8779 = vmatprep.subr.bf16.mxu1 %v13832_v16  ;;  %v7125_v16 = vld [vmem:[#allocation21 + $0xf0] sm:$0xff] }
 0x841   :  { %v13641_v54 = vcombine.low %v7121_v61, %v7125_v16  ;;  %v7333_v59 = vld [vmem:[#allocation21 + $0x770] sm:$0xff] }
 0x842   :  { %8739 = vmatpush2.bf16.msra.mxu0 %v13703_v18  ;;  %v13642_v18 = vcombine.high %v7121_v61, %v7125_v16  ;;  %v7321_v61 = vld [vmem:[#allocation21 + $0x710] sm:$0xff] }
 0x843   :  { %8780 = vmatpush2.bf16.msra.mxu1 %v13831_v1  ;;  %8740 = vmatprep.subr.bf16.mxu0 %v13696_v2  ;;  %v13770_v1 = vcombine.high %v7249_v62, %v7253_v63  ;;  %v7113_v2 = vld [vmem:[#allocation21 + $0x90] sm:$0xff]  ;;  %v13849_v63 = vcombine.low %v7329_v56, %v7333_v59 }
 0x844   :  { %8781 = vmatprep.subr.bf16.mxu1 %v13824_v44  ;;  %v7117_v44 = vld [vmem:[#allocation21 + $0xb0] sm:$0xff] }
 0x845   :  { %v13633_v34 = vcombine.low %v7113_v2, %v7117_v44  ;;  %v7325_v16 = vld [vmem:[#allocation21 + $0x730] sm:$0xff] }
 0x846   :  { %8741 = vmatpush2.bf16.msra.mxu0 %v13695_v3  ;;  %v13634_v3 = vcombine.high %v7113_v2, %v7117_v44  ;;  %v7313_v2 = vld [vmem:[#allocation21 + $0x6d0] sm:$0xff] }
 0x847   :  { %8782 = vmatpush2.bf16.msra.mxu1 %v13823_v30  ;;  %8742 = vmatprep.subr.bf16.mxu0 %v13688_v17  ;;  %v13762_v30 = vcombine.high %v7241_v29, %v7245_v6  ;;  %v7105_v17 = vld [vmem:[#allocation21 + $0x50] sm:$0xff]  ;;  %v13841_v6 = vcombine.low %v7321_v61, %v7325_v16 }
 0x848   :  { %8783 = vmatprep.subr.bf16.mxu1 %v13816_v19  ;;  %v7109_v19 = vld [vmem:[#allocation21 + $0x70] sm:$0xff] }
 0x849   :  { %v13625_v28 = vcombine.low %v7105_v17, %v7109_v19  ;;  %v7317_v44 = vld [vmem:[#allocation21 + $0x6f0] sm:$0xff] }
 0x84a   :  { %8743 = vmatpush2.bf16.msra.mxu0 %v13687_v42  ;;  %v13626_v42 = vcombine.high %v7105_v17, %v7109_v19  ;;  %v7305_v17 = vld [vmem:[#allocation21 + $0x690] sm:$0xff] }
 0x84b   :  { %8784 = vmatpush2.bf16.msra.mxu1 %v13815_v12  ;;  %8744 = vmatprep.subr.bf16.mxu0 %v13680_v13  ;;  %v13754_v12 = vcombine.high %v7233_v7, %v7237_v10  ;;  %v7097_v13 = vld [vmem:[#allocation21 + $0x10] sm:$0xff]  ;;  %v13833_v10 = vcombine.low %v7313_v2, %v7317_v44 }
 0x84c   :  { %8785 = vmatprep.subr.bf16.mxu1 %v13808_v15  ;;  %v7101_v15 = vld [vmem:[#allocation21 + $0x30] sm:$0xff] }
 0x84d   :  { %v7309_v19 = vld [vmem:[#allocation21 + $0x6b0] sm:$0xff] }
 0x84e   :  { %8745 = vmatpush2.bf16.msra.mxu0 %v13679_v58  ;;  %v13618_v58 = vcombine.high %v7097_v13, %v7101_v15 }
 0x84f   :  { %8786 = vmatpush2.bf16.msra.mxu1 %v13807_v43  ;;  %8796 = vmatprep.subr.bf16.mxu0 %v13674_v36  ;;  %v13746_v43 = vcombine.high %v7225_v20, %v7229_v22  ;;  %v7217_v36 = vld [vmem:[#allocation21 + $0x3d0] sm:$0xff]  ;;  %v13825_v22 = vcombine.low %v7305_v17, %v7309_v19 }
 0x850   :  { %8837 = vmatprep.subr.bf16.mxu1 %v13802_v35  ;;  %v7221_v35 = vld [vmem:[#allocation21 + $0x3f0] sm:$0xff] }
 0x851   :  { %8747 = vmatmul.mubr.bf16.vlgmr.msra.gmra.mxu0 %v16582_v41  ;;  %v13738_v14 = vcombine.high %v7217_v36, %v7221_v35  ;;  %v13737_v21 = vcombine.low %v7217_v36, %v7221_v35  ;;  %v7289_v36 = vld [vmem:[#allocation21 + $0x610] sm:$0xff] }
 0x852   :  { %8788 = vmatmul.mubr.bf16.vlgmr.msra.gmra.mxu1 %v16589_v27  ;;  %8797 = vmatpush1.bf16.msra.mxu0 %v13673_v33  ;;  %v13617_v33 = vcombine.low %v7097_v13, %v7101_v15  ;;  %v7297_v13 = vld [vmem:[#allocation21 + $0x650] sm:$0xff] }
 0x853   :  { %8828 = vmatprep.mubr.bf16.mxu0 %v16584_v31  ;;  %8838 = vmatpush1.bf16.msra.mxu1 %v13801_v38  ;;  %v13866_v38 = vcombine.high %v7345_v46, %v7349_v32  ;;  %v7301_v15 = vld [vmem:[#allocation21 + $0x670] sm:$0xff] }
 0x854   :  { %8869 = vmatprep.mubr.bf16.mxu1 %v16586_v9  ;;  %8798 = vmatprep.subr.bf16.mxu0 %v13666_v39  ;;  %v7209_v39 = vld [vmem:[#allocation21 + $0x390] sm:$0xff]  ;;  %v13817_v32 = vcombine.low %v7297_v13, %v7301_v15 }
 0x855   :  { %8839 = vmatprep.subr.bf16.mxu1 %v13794_v40  ;;  %v7341_v40 = vld [vmem:[#allocation21 + $0x7b0] sm:$0xff]  ;;  %v13729_v25 = vcombine.low %v7209_v39, %v7213_v5 }
 0x856   :  { %8799 = vmatpush1.bf16.msra.mxu0 %v13665_v49  ;;  %v13730_v49 = vcombine.high %v7209_v39, %v7213_v5  ;;  %v13857_v57 = vcombine.low %v7337_v4, %v7341_v40  ;;  %v7293_v35 = vld [vmem:[#allocation21 + $0x630] sm:$0xff]  ;;  %v7282_v39 = vld [vmem:[#allocation21 + $0x5d8] sm:$0xff] }
 0x857   :  { %8840 = vmatpush1.bf16.msra.mxu1 %v13793_v51  ;;  %8800 = vmatprep.subr.bf16.mxu0 %v13658_v50  ;;  %v13858_v51 = vcombine.high %v7337_v4, %v7341_v40  ;;  %v7201_v50 = vld [vmem:[#allocation21 + $0x350] sm:$0xff]  ;;  %v7286_v5 = vld [vmem:[#allocation21 + $0x5f8] sm:$0xff]  ;;  %v13809_v40 = vcombine.low %v7289_v36, %v7293_v35 }
 0x858   :  { %8841 = vmatprep.subr.bf16.mxu1 %v13786_v55  ;;  %v7205_v55 = vld [vmem:[#allocation21 + $0x370] sm:$0xff] }
 0x859   :  { %v13721_v62 = vcombine.low %v7201_v50, %v7205_v55 }
 0x85a   :  { %8801 = vmatpush1.bf16.msra.mxu0 %v13657_v60  ;;  %v13722_v60 = vcombine.high %v7201_v50, %v7205_v55  ;;  %v7274_v55 = vld [vmem:[#allocation21 + $0x598] sm:$0xff] }
 0x85b   :  { %8842 = vmatpush1.bf16.msra.mxu1 %v13785_v48  ;;  %8802 = vmatprep.subr.bf16.mxu0 %v13650_v53  ;;  %v13850_v48 = vcombine.high %v7329_v56, %v7333_v59  ;;  %v7193_v53 = vld [vmem:[#allocation21 + $0x310] sm:$0xff]  ;;  %v7278_v56 = vld [vmem:[#allocation21 + $0x5b8] sm:$0xff]  ;;  %v13803_v59 = vcombine.low %v7282_v39, %v7286_v5 }
 0x85c   :  { %8843 = vmatprep.subr.bf16.mxu1 %v13778_v24  ;;  %v7197_v24 = vld [vmem:[#allocation21 + $0x330] sm:$0xff] }
 0x85d   :  { %v13713_v29 = vcombine.low %v7193_v53, %v7197_v24 }
 0x85e   :  { %8803 = vmatpush1.bf16.msra.mxu0 %v13649_v0  ;;  %v13714_v0 = vcombine.high %v7193_v53, %v7197_v24  ;;  %v7266_v53 = vld [vmem:[#allocation21 + $0x558] sm:$0xff] }
 0x85f   :  { %8844 = vmatpush1.bf16.msra.mxu1 %v13777_v45  ;;  %8804 = vmatprep.subr.bf16.mxu0 %v13642_v18  ;;  %v13842_v45 = vcombine.high %v7321_v61, %v7325_v16  ;;  %v7185_v18 = vld [vmem:[#allocation21 + $0x2d0] sm:$0xff]  ;;  %v7270_v24 = vld [vmem:[#allocation21 + $0x578] sm:$0xff]  ;;  %v13795_v16 = vcombine.low %v7274_v55, %v7278_v56 }
 0x860   :  { %8845 = vmatprep.subr.bf16.mxu1 %v13770_v1  ;;  %v7189_v1 = vld [vmem:[#allocation21 + $0x2f0] sm:$0xff] }
 0x861   :  { %v13705_v7 = vcombine.low %v7185_v18, %v7189_v1 }
 0x862   :  { %8805 = vmatpush1.bf16.msra.mxu0 %v13641_v54  ;;  %v13706_v54 = vcombine.high %v7185_v18, %v7189_v1  ;;  %v7258_v18 = vld [vmem:[#allocation21 + $0x518] sm:$0xff] }
 0x863   :  { %8846 = vmatpush1.bf16.msra.mxu1 %v13769_v8  ;;  %8806 = vmatprep.subr.bf16.mxu0 %v13634_v3  ;;  %v13834_v8 = vcombine.high %v7313_v2, %v7317_v44  ;;  %v7177_v3 = vld [vmem:[#allocation21 + $0x290] sm:$0xff]  ;;  %v7262_v1 = vld [vmem:[#allocation21 + $0x538] sm:$0xff]  ;;  %v13787_v44 = vcombine.low %v7266_v53, %v7270_v24 }
 0x864   :  { %8847 = vmatprep.subr.bf16.mxu1 %v13762_v30  ;;  %v7181_v30 = vld [vmem:[#allocation21 + $0x2b0] sm:$0xff] }
 0x865   :  { %v13697_v20 = vcombine.low %v7177_v3, %v7181_v30 }
 0x866   :  { %8807 = vmatpush1.bf16.msra.mxu0 %v13633_v34  ;;  %v13698_v34 = vcombine.high %v7177_v3, %v7181_v30  ;;  %v7254_v3 = vld [vmem:[#allocation21 + $0x4f8] sm:$0xff]  ;;  %v13779_v30 = vcombine.low %v7258_v18, %v7262_v1 }
 0x867   :  { %8848 = vmatpush1.bf16.msra.mxu1 %v13761_v11  ;;  %8808 = vmatprep.subr.bf16.mxu0 %v13626_v42  ;;  %v13826_v11 = vcombine.high %v7305_v17, %v7309_v19  ;;  %v7169_v42 = vld [vmem:[#allocation21 + $0x250] sm:$0xff] }
 0x868   :  { %8849 = vmatprep.subr.bf16.mxu1 %v13754_v12  ;;  %v7173_v12 = vld [vmem:[#allocation21 + $0x270] sm:$0xff] }
 0x869   :  { %v13689_v46 = vcombine.low %v7169_v42, %v7173_v12 }
 0x86a   :  { %8809 = vmatpush1.bf16.msra.mxu0 %v13625_v28  ;;  %v13690_v28 = vcombine.high %v7169_v42, %v7173_v12 }
 0x86b   :  { %8850 = vmatpush1.bf16.msra.mxu1 %v13753_v23  ;;  %8810 = vmatprep.subr.bf16.mxu0 %v13618_v58  ;;  %v13818_v23 = vcombine.high %v7297_v13, %v7301_v15  ;;  %v7161_v58 = vld [vmem:[#allocation21 + $0x210] sm:$0xff] }
 0x86c   :  { %8851 = vmatprep.subr.bf16.mxu1 %v13746_v43  ;;  %v7165_v43 = vld [vmem:[#allocation21 + $0x230] sm:$0xff] }
 0x86d   :  { %v13681_v4 = vcombine.low %v7161_v58, %v7165_v43 }
 0x86e   :  { %8811 = vmatpush1.bf16.msra.mxu0 %v13617_v33  ;;  %v13682_v33 = vcombine.high %v7161_v58, %v7165_v43 }
 0x86f   :  { %8852 = vmatpush1.bf16.msra.mxu1 %v13745_v37  ;;  %8812 = vmatprep.subr.bf16.mxu0 %v13738_v14  ;;  %v13810_v37 = vcombine.high %v7289_v36, %v7293_v35  ;;  %v7154_v14 = vld [vmem:[#allocation21 + $0x1d8] sm:$0xff] }
 0x870   :  { %8853 = vmatprep.subr.bf16.mxu1 %v13866_v38  ;;  %v7158_v38 = vld [vmem:[#allocation21 + $0x1f8] sm:$0xff] }
 0x871   :  { %v13675_v50 = vcombine.low %v7154_v14, %v7158_v38 }
 0x872   :  { %8813 = vmatpush2.bf16.msra.mxu0 %v13737_v21  ;;  %v13676_v21 = vcombine.high %v7154_v14, %v7158_v38 }
 0x873   :  { %8854 = vmatpush2.bf16.msra.mxu1 %v13865_v47  ;;  %8814 = vmatprep.subr.bf16.mxu0 %v13730_v49  ;;  %v13804_v47 = vcombine.high %v7282_v39, %v7286_v5  ;;  %v7146_v49 = vld [vmem:[#allocation21 + $0x198] sm:$0xff] }
 0x874   :  { %8855 = vmatprep.subr.bf16.mxu1 %v13858_v51  ;;  %v7150_v51 = vld [vmem:[#allocation21 + $0x1b8] sm:$0xff] }
 0x875   :  { %v13667_v61 = vcombine.low %v7146_v49, %v7150_v51 }
 0x876   :  { %8815 = vmatpush2.bf16.msra.mxu0 %v13729_v25  ;;  %v13668_v25 = vcombine.high %v7146_v49, %v7150_v51 }
 0x877   :  { %8856 = vmatpush2.bf16.msra.mxu1 %v13857_v57  ;;  %8816 = vmatprep.subr.bf16.mxu0 %v13722_v60  ;;  %v7138_v57 = vld [vmem:[#allocation21 + $0x158] sm:$0xff] }
 0x878   :  { %8857 = vmatprep.subr.bf16.mxu1 %v13850_v48  ;;  %v7142_v60 = vld [vmem:[#allocation21 + $0x178] sm:$0xff]  ;;  %v13796_v48 = vcombine.high %v7274_v55, %v7278_v56 }
 0x879   :  { %v13659_v2 = vcombine.low %v7138_v57, %v7142_v60  ;;  %v7210_v56 = vld [vmem:[#allocation21 + $0x398] sm:$0xff] }
 0x87a   :  { %8817 = vmatpush2.bf16.msra.mxu0 %v13721_v62  ;;  %v13660_v62 = vcombine.high %v7138_v57, %v7142_v60  ;;  %v7342_v57 = vld [vmem:[#allocation21 + $0x7b8] sm:$0xff] }
 0x87b   :  { %8858 = vmatpush2.bf16.msra.mxu1 %v13849_v63  ;;  %8818 = vmatprep.subr.bf16.mxu0 %v13714_v0  ;;  %v13788_v63 = vcombine.high %v7266_v53, %v7270_v24  ;;  %v7130_v0 = vld [vmem:[#allocation21 + $0x118] sm:$0xff] }
 0x87c   :  { %8859 = vmatprep.subr.bf16.mxu1 %v13842_v45  ;;  %v7134_v45 = vld [vmem:[#allocation21 + $0x138] sm:$0xff] }
 0x87e   :  { %8819 = vmatpush2.bf16.msra.mxu0 %v13713_v29  ;;  %v13652_v29 = vcombine.high %v7130_v0, %v7134_v45 }
 0x87f   :  { %8860 = vmatpush2.bf16.msra.mxu1 %v13841_v6  ;;  %8820 = vmatprep.subr.bf16.mxu0 %v13706_v54  ;;  %v7122_v6 = vld [vmem:[#allocation21 + $0xd8] sm:$0xff] }
 0x880   :  { %8861 = vmatprep.subr.bf16.mxu1 %v13834_v8  ;;  %v7126_v54 = vld [vmem:[#allocation21 + $0xf8] sm:$0xff] }
 0x881   :  { %v7250_v8 = vld [vmem:[#allocation21 + $0x4d8] sm:$0xff]  ;;  %v13644_v17 = vcombine.high %v7122_v6, %v7126_v54  ;;  %v13643_v42 = vcombine.low %v7122_v6, %v7126_v54 }
 0x882   :  { %8821 = vmatpush2.bf16.msra.mxu0 %v13705_v7  ;;  %v13772_v19 = vcombine.high %v7250_v8, %v7254_v3  ;;  %v7114_v7 = vld [vmem:[#allocation21 + $0x98] sm:$0xff]  ;;  %v13771_v12 = vcombine.low %v7250_v8, %v7254_v3 }
 0x883   :  { %8862 = vmatpush2.bf16.msra.mxu1 %v13833_v10  ;;  %8822 = vmatprep.subr.bf16.mxu0 %v13698_v34  ;;  %v7118_v10 = vld [vmem:[#allocation21 + $0xb8] sm:$0xff] }
 0x884   :  { %8863 = vmatprep.subr.bf16.mxu1 %v13826_v11  ;;  %v7242_v34 = vld [vmem:[#allocation21 + $0x498] sm:$0xff]  ;;  %v13636_v13 = vcombine.high %v7114_v7, %v7118_v10  ;;  %v13635_v58 = vcombine.low %v7114_v7, %v7118_v10 }
 0x885   :  { %v7246_v11 = vld [vmem:[#allocation21 + $0x4b8] sm:$0xff] }
 0x886   :  { %8823 = vmatpush2.bf16.msra.mxu0 %v13697_v20  ;;  %v13764_v15 = vcombine.high %v7242_v34, %v7246_v11  ;;  %v7106_v20 = vld [vmem:[#allocation21 + $0x58] sm:$0xff]  ;;  %v13763_v43 = vcombine.low %v7242_v34, %v7246_v11 }
 0x887   :  { %8864 = vmatpush2.bf16.msra.mxu1 %v13825_v22  ;;  %8824 = vmatprep.subr.bf16.mxu0 %v13690_v28  ;;  %v7110_v22 = vld [vmem:[#allocation21 + $0x78] sm:$0xff] }
 0x888   :  { %8865 = vmatprep.subr.bf16.mxu1 %v13818_v23  ;;  %v7234_v28 = vld [vmem:[#allocation21 + $0x458] sm:$0xff]  ;;  %v13628_v36 = vcombine.high %v7106_v20, %v7110_v22  ;;  %v13627_v14 = vcombine.low %v7106_v20, %v7110_v22 }
 0x889   :  { %v7238_v23 = vld [vmem:[#allocation21 + $0x478] sm:$0xff] }
 0x88a   :  { %8825 = vmatpush2.bf16.msra.mxu0 %v13689_v46  ;;  %v13756_v35 = vcombine.high %v7234_v28, %v7238_v23  ;;  %v7098_v46 = vld [vmem:[#allocation21 + $0x18] sm:$0xff]  ;;  %v13755_v38 = vcombine.low %v7234_v28, %v7238_v23 }
 0x88b   :  { %8866 = vmatpush2.bf16.msra.mxu1 %v13817_v32  ;;  %8826 = vmatprep.subr.bf16.mxu0 %v13682_v33  ;;  %v7102_v32 = vld [vmem:[#allocation21 + $0x38] sm:$0xff] }
 0x88c   :  { %8867 = vmatprep.subr.bf16.mxu1 %v13810_v37  ;;  %v7226_v33 = vld [vmem:[#allocation21 + $0x418] sm:$0xff]  ;;  %v13620_v39 = vcombine.high %v7098_v46, %v7102_v32  ;;  %v13619_v49 = vcombine.low %v7098_v46, %v7102_v32  ;;  %v16604_v32 = vld [vmem:[#allocation22] sm:$0xff] }
 0x88d   :  { %v7230_v37 = vld [vmem:[#allocation21 + $0x438] sm:$0xff] }
 0x88e   :  { %8827 = vmatpush2.bf16.msra.mxu0 %v13681_v4  ;;  %v13748_v5 = vcombine.high %v7226_v33, %v7230_v37  ;;  %v7218_v4 = vld [vmem:[#allocation21 + $0x3d8] sm:$0xff]  ;;  %v13747_v51 = vcombine.low %v7226_v33, %v7230_v37 }
 0x88f   :  { %8868 = vmatpush2.bf16.msra.mxu1 %v13809_v40  ;;  %8878 = vmatprep.subr.bf16.mxu0 %v13676_v21  ;;  %v7222_v40 = vld [vmem:[#allocation21 + $0x3f8] sm:$0xff] }
 0x890   :  { %8919 = vmatprep.subr.bf16.mxu1 %v13804_v47  ;;  %v7346_v21 = vld [vmem:[#allocation21 + $0x7d8] sm:$0xff]  ;;  %v13739_v60 = vcombine.low %v7218_v4, %v7222_v40 }
 0x891   :  { %8829 = vmatmul.mubr.bf16.vlgmr.msra.gmra.mxu0 %v16582_v41  ;;  %v7350_v47 = vld [vmem:[#allocation21 + $0x7f8] sm:$0xff] }
 0x892   :  { %8870 = vmatmul.mubr.bf16.vlgmr.msra.gmra.mxu1 %v16589_v27  ;;  %8879 = vmatpush1.bf16.msra.mxu0 %v13675_v50  ;;  %v13740_v50 = vcombine.high %v7218_v4, %v7222_v40  ;;  %v13868_v55 = vcombine.high %v7346_v21, %v7350_v47  ;;  %v7294_v4 = vld [vmem:[#allocation21 + $0x638] sm:$0xff]  ;;  %v16608_v40 = vrot.slane %v16604_v32, %v16395_v26 }
 0x893   :  { %8910 = vmatprep.mubr.bf16.mxu0 %v16584_v31  ;;  %8920 = vmatpush1.bf16.msra.mxu1 %v13803_v59  ;;  %v13780_v31 = vcombine.high %v7258_v18, %v7262_v1  ;;  %v7214_v59 = vld [vmem:[#allocation21 + $0x3b8] sm:$0xff] }
 0x894   :  { %8951 = vmatprep.mubr.bf16.mxu1 %v16586_v9  ;;  %8880 = vmatprep.subr.bf16.mxu0 %v13668_v25  ;;  %v13651_v9 = vcombine.low %v7130_v0, %v7134_v45  ;;  %v7338_v25 = vld [vmem:[#allocation21 + $0x798] sm:$0xff]  ;;  %v13732_v53 = vcombine.high %v7210_v56, %v7214_v59  ;;  %v13731_v0 = vcombine.low %v7210_v56, %v7214_v59  ;;  %v15085_v59 = vld [vmem:[#allocation24 + $0x18c] ss:$28 sps:$4 sm:$0xff]  }
 0x895   :  { %8921 = vmatprep.subr.bf16.mxu1 %v13796_v48  ;;  %v13867_v48 = vcombine.low %v7346_v21, %v7350_v47  ;;  %v13860_v24 = vcombine.high %v7338_v25, %v7342_v57  ;;  %v13859_v45 = vcombine.low %v7338_v25, %v7342_v57  ;;  %v15106_v25 = vld [vmem:[#allocation24 + $0x50c] ss:$28 sps:$4 sm:$0xff]  }
 0x896   :  { %8881 = vmatpush1.bf16.msra.mxu0 %v13667_v61  ;;  %v7202_v61 = vld [vmem:[#allocation21 + $0x358] sm:$0xff] }
 0x897   :  { %8922 = vmatpush1.bf16.msra.mxu1 %v13795_v16  ;;  %8882 = vmatprep.subr.bf16.mxu0 %v13660_v62  ;;  %v7206_v16 = vld [vmem:[#allocation21 + $0x378] sm:$0xff] }
 0x898   :  { %8923 = vmatprep.subr.bf16.mxu1 %v13788_v63  ;;  %v7330_v62 = vld [vmem:[#allocation21 + $0x758] sm:$0xff]  ;;  %v13724_v18 = vcombine.high %v7202_v61, %v7206_v16  ;;  %v13723_v6 = vcombine.low %v7202_v61, %v7206_v16 }
 0x899   :  { %v7334_v63 = vld [vmem:[#allocation21 + $0x778] sm:$0xff] }
 0x89a   :  { %8883 = vmatpush1.bf16.msra.mxu0 %v13659_v2  ;;  %v13852_v1 = vcombine.high %v7330_v62, %v7334_v63  ;;  %v7194_v2 = vld [vmem:[#allocation21 + $0x318] sm:$0xff]  ;;  %v13851_v54 = vcombine.low %v7330_v62, %v7334_v63 }
 0x89b   :  { %8924 = vmatpush1.bf16.msra.mxu1 %v13787_v44  ;;  %8884 = vmatprep.subr.bf16.mxu0 %v13652_v29  ;;  %v7198_v44 = vld [vmem:[#allocation21 + $0x338] sm:$0xff] }
 0x89c   :  { %8925 = vmatprep.subr.bf16.mxu1 %v13780_v31  ;;  %v7322_v29 = vld [vmem:[#allocation21 + $0x718] sm:$0xff]  ;;  %v13716_v8 = vcombine.high %v7194_v2, %v7198_v44  ;;  %v13715_v7 = vcombine.low %v7194_v2, %v7198_v44  ;;  %v15118_v2 = vld [vmem:[#allocation24 + $0x49c] ss:$28 sps:$4 sm:$0xff]  }
 0x89d   :  { %v7326_v31 = vld [vmem:[#allocation21 + $0x738] sm:$0xff] }
 0x89e   :  { %8885 = vmatpush1.bf16.msra.mxu0 %v13651_v9  ;;  %v13844_v3 = vcombine.high %v7322_v29, %v7326_v31  ;;  %v7186_v9 = vld [vmem:[#allocation21 + $0x2d8] sm:$0xff]  ;;  %v13843_v10 = vcombine.low %v7322_v29, %v7326_v31 }
 0x89f   :  { %8926 = vmatpush1.bf16.msra.mxu1 %v13779_v30  ;;  %8886 = vmatprep.subr.bf16.mxu0 %v13644_v17  ;;  %v7190_v30 = vld [vmem:[#allocation21 + $0x2f8] sm:$0xff] }
 0x8a0   :  { %8927 = vmatprep.subr.bf16.mxu1 %v13772_v19  ;;  %v7314_v17 = vld [vmem:[#allocation21 + $0x6d8] sm:$0xff]  ;;  %v13708_v34 = vcombine.high %v7186_v9, %v7190_v30  ;;  %v13707_v20 = vcombine.low %v7186_v9, %v7190_v30  ;;  %v15124_v30 = vld [vmem:[#allocation24 + $0x464] ss:$28 sps:$4 sm:$0xff]  }
 0x8a1   :  { %v7318_v19 = vld [vmem:[#allocation21 + $0x6f8] sm:$0xff] }
 0x8a2   :  { %8887 = vmatpush1.bf16.msra.mxu0 %v13643_v42  ;;  %v13836_v11 = vcombine.high %v7314_v17, %v7318_v19  ;;  %v7178_v42 = vld [vmem:[#allocation21 + $0x298] sm:$0xff]  ;;  %v13835_v22 = vcombine.low %v7314_v17, %v7318_v19  ;;  %v15092_v19 = vld [vmem:[#allocation24 + $0xe0] ss:$28 sps:$4 sm:$0xff]  }
 0x8a3   :  { %8928 = vmatpush1.bf16.msra.mxu1 %v13771_v12  ;;  %8888 = vmatprep.subr.bf16.mxu0 %v13636_v13  ;;  %v7182_v12 = vld [vmem:[#allocation21 + $0x2b8] sm:$0xff] }
 0x8a4   :  { %8929 = vmatprep.subr.bf16.mxu1 %v13764_v15  ;;  %v7306_v13 = vld [vmem:[#allocation21 + $0x698] sm:$0xff]  ;;  %v13700_v28 = vcombine.high %v7178_v42, %v7182_v12  ;;  %v13699_v46 = vcombine.low %v7178_v42, %v7182_v12  ;;  %v15128_v12 = vld [vmem:[#allocation24 + $0x428] ss:$28 sps:$4 sm:$0xff]  }
 0x8a5   :  { %v7310_v15 = vld [vmem:[#allocation21 + $0x6b8] sm:$0xff] }
 0x8a6   :  { %8889 = vmatpush1.bf16.msra.mxu0 %v13635_v58  ;;  %v13828_v23 = vcombine.high %v7306_v13, %v7310_v15  ;;  %v7170_v58 = vld [vmem:[#allocation21 + $0x258] sm:$0xff]  ;;  %v13827_v33 = vcombine.low %v7306_v13, %v7310_v15 }
 0x8a7   :  { %8930 = vmatpush1.bf16.msra.mxu1 %v13763_v43  ;;  %8890 = vmatprep.subr.bf16.mxu0 %v13628_v36  ;;  %v7174_v43 = vld [vmem:[#allocation21 + $0x278] sm:$0xff] }
 0x8a8   :  { %8931 = vmatprep.subr.bf16.mxu1 %v13756_v35  ;;  %v7298_v36 = vld [vmem:[#allocation21 + $0x658] sm:$0xff]  ;;  %v13692_v37 = vcombine.high %v7170_v58, %v7174_v43  ;;  %v13691_v21 = vcombine.low %v7170_v58, %v7174_v43  ;;  %v15109_v58 = vld [vmem:[#allocation24 + $0x4] ss:$28 sps:$4 sm:$0xff]  }
 0x8a9   :  { %v7302_v35 = vld [vmem:[#allocation21 + $0x678] sm:$0xff] }
 0x8aa   :  { %8891 = vmatpush1.bf16.msra.mxu0 %v13627_v14  ;;  %v13820_v14 = vcombine.high %v7298_v36, %v7302_v35  ;;  %v13819_v47 = vcombine.low %v7298_v36, %v7302_v35  ;;  %v15086_v63 = vld [vmem:[#allocation24 + $0x150] ss:$28 sps:$4 sm:$0xff]   ;;  %v15140_v43 = vld [vmem:[#allocation24 + $0x3b8] ss:$28 sps:$4 sm:$0xff]   ;;  %v15148_v36 = vld [vmem:[#allocation24 + $0x384] ss:$28 sps:$4 sm:$0xff]  }
 0x8ab   :  { %8932 = vmatpush1.bf16.msra.mxu1 %v13755_v38  ;;  %8892 = vmatprep.subr.bf16.mxu0 %v13620_v39  ;;  %v7162_v38 = vld [vmem:[#allocation21 + $0x218] sm:$0xff] }
 0x8ac   :  { %8933 = vmatprep.subr.bf16.mxu1 %v13748_v5  ;;  %v7166_v39 = vld [vmem:[#allocation21 + $0x238] sm:$0xff] }
 0x8ad   :  { %v7290_v5 = vld [vmem:[#allocation21 + $0x618] sm:$0xff] }
 0x8ae   :  { %8893 = vmatpush1.bf16.msra.mxu0 %v13619_v49  ;;  %v13684_v49 = vcombine.high %v7162_v38, %v7166_v39  ;;  %v13811_v56 = vcombine.low %v7290_v5, %v7294_v4  ;;  %v15100_v42 = vld [vmem:[#allocation24 + $0x74] ss:$28 sps:$4 sm:$0xff]  }
 0x8af   :  { %8934 = vmatpush1.bf16.msra.mxu1 %v13747_v51  ;;  %8894 = vmatprep.subr.bf16.mxu0 %v13740_v50  ;;  %v13812_v51 = vcombine.high %v7290_v5, %v7294_v4  ;;  %v8984_v50 = vcombine.high %v16608_v40, %v16608_v40  ;;  %v15136_v13 = vld [vmem:[#allocation24 + $0x3f4] ss:$28 sps:$4 sm:$0xff]   ;;  %v15152_v5 = vld [vmem:[#allocation24 + $0x6c8] ss:$28 sps:$4 sm:$0xff]  }
 0x8b0   :  { %8935 = vmatprep.subr.bf16.mxu1 %v13868_v55  ;;  %v13683_v55 = vcombine.low %v7162_v38, %v7166_v39  ;;  %v15098_v15 = vld [vmem:[#allocation24 + $0x70] ss:$28 sps:$4 sm:$0xff]   ;;  %v15113_v38 = vld [vmem:[#allocation24 + $0x348] ss:$28 sps:$4 sm:$0xff]  }
 0x8b1   :  { %v16613_v57 = vrot.slane %v8984_v50, %v16395_v26  ;;  %v15121_v39 = vld [vmem:[#allocation24 + $0x314] ss:$28 sps:$4 sm:$0xff]   ;;  %v15163_v50 = vld [vmem:[#allocation24 + $0x65c] ss:$28 sps:$4 sm:$0xff]  }
 0x8b2   :  { %8895 = vmatpush2.bf16.msra.mxu0 %v13739_v60  ;;  %v15083_v60 = vld [vmem:[#allocation24 + $0x188] ss:$28 sps:$4 sm:$0xff]   ;;  %v15160_v4 = vld [vmem:[#allocation24 + $0x694] ss:$28 sps:$4 sm:$0xff]  }
 0x8b3   :  { %8936 = vmatpush2.bf16.msra.mxu1 %v13867_v48  ;;  %8896 = vmatprep.subr.bf16.mxu0 %v13732_v53  ;;  %v15088_v48 = vld [vmem:[#allocation24 + $0x154] ss:$28 sps:$4 sm:$0xff]   ;;  %v15104_v53 = vld [vmem:[#allocation24 + $0x508] ss:$28 sps:$4 sm:$0xff]   ;;  %v9026_v16 = vpack.i.b16 %v16613_v57, %v16613_v57 }
 0x8b4   :  { %8937 = vmatprep.subr.bf16.mxu1 %v13860_v24  ;;  %v15112_v24 = vld [vmem:[#allocation24 + $0x4d4] ss:$28 sps:$4 sm:$0xff]  }
 0x8b5   :  { %v9031_v44 = vrot.slane %v9026_v16, %v16405_v52  ;;  %v15139_v16 = vld [vmem:[#allocation24 + $0x26c] ss:$28 sps:$4 sm:$0xff]  }
 0x8b6   :  { %8897 = vmatpush2.bf16.msra.mxu0 %v13731_v0 }
 0x8b7   :  { %8938 = vmatpush2.bf16.msra.mxu1 %v13859_v45  ;;  %8898 = vmatprep.subr.bf16.mxu0 %v13724_v18  ;;  %v15091_v45 = vld [vmem:[#allocation24 + $0x11c] ss:$28 sps:$4 sm:$0xff]   ;;  %v15110_v18 = vld [vmem:[#allocation24 + $0x4d0] ss:$28 sps:$4 sm:$0xff]  }
 0x8b8   :  { %8939 = vmatprep.subr.bf16.mxu1 %v13852_v1 }
 0x8ba   :  { %8899 = vmatpush2.bf16.msra.mxu0 %v13723_v6  ;;  %v15089_v6 = vld [vmem:[#allocation24 + $0x118] ss:$28 sps:$4 sm:$0xff]  }
 0x8bb   :  { %8940 = vmatpush2.bf16.msra.mxu1 %v13851_v54  ;;  %8900 = vmatprep.subr.bf16.mxu0 %v13716_v8  ;;  %v15094_v8 = vld [vmem:[#allocation24 + $0xe4] ss:$28 sps:$4 sm:$0xff]  }
 0x8bc   :  { %8941 = vmatprep.subr.bf16.mxu1 %v13844_v3  ;;  %v15116_v3 = vld [vmem:[#allocation24 + $0x498] ss:$28 sps:$4 sm:$0xff]  }
 0x8be   :  { %8901 = vmatpush2.bf16.msra.mxu0 %v13715_v7  ;;  %v15097_v7 = vld [vmem:[#allocation24 + $0xac] ss:$28 sps:$4 sm:$0xff]  }
 0x8bf   :  { %8942 = vmatpush2.bf16.msra.mxu1 %v13843_v10  ;;  %8902 = vmatprep.subr.bf16.mxu0 %v13708_v34  ;;  %v15122_v10 = vld [vmem:[#allocation24 + $0x460] ss:$28 sps:$4 sm:$0xff]   ;;  %v15130_v34 = vld [vmem:[#allocation24 + $0x42c] ss:$28 sps:$4 sm:$0xff]  }
 0x8c0   :  { %8943 = vmatprep.subr.bf16.mxu1 %v13836_v11  ;;  %v15095_v11 = vld [vmem:[#allocation24 + $0xa8] ss:$28 sps:$4 sm:$0xff]  }
 0x8c2   :  { %8903 = vmatpush2.bf16.msra.mxu0 %v13707_v20  ;;  %v15103_v20 = vld [vmem:[#allocation24 + $0x3c] ss:$28 sps:$4 sm:$0xff]  }
 0x8c3   :  { %8944 = vmatpush2.bf16.msra.mxu1 %v13835_v22  ;;  %8904 = vmatprep.subr.bf16.mxu0 %v13700_v28  ;;  %v15134_v22 = vld [vmem:[#allocation24 + $0x3f0] ss:$28 sps:$4 sm:$0xff]   ;;  %v15142_v28 = vld [vmem:[#allocation24 + $0x3bc] ss:$28 sps:$4 sm:$0xff]  }
 0x8c4   :  { %8945 = vmatprep.subr.bf16.mxu1 %v13828_v23  ;;  %v15101_v23 = vld [vmem:[#allocation24 + $0x38] ss:$28 sps:$4 sm:$0xff]  }
 0x8c6   :  { %8905 = vmatpush2.bf16.msra.mxu0 %v13699_v46  ;;  %v15107_v46 = vld [vmem:[#allocation24] ss:$28 sps:$4 sm:$0xff]  }
 0x8c7   :  { %8946 = vmatpush2.bf16.msra.mxu1 %v13827_v33  ;;  %8906 = vmatprep.subr.bf16.mxu0 %v13692_v37  ;;  %v15115_v33 = vld [vmem:[#allocation24 + $0x34c] ss:$28 sps:$4 sm:$0xff]   ;;  %v15146_v37 = vld [vmem:[#allocation24 + $0x380] ss:$28 sps:$4 sm:$0xff]  }
 0x8c8   :  { %8947 = vmatprep.subr.bf16.mxu1 %v13820_v14  ;;  %v15154_v14 = vld [vmem:[#allocation24 + $0x6cc] ss:$28 sps:$4 sm:$0xff]  }
 0x8ca   :  { %8907 = vmatpush2.bf16.msra.mxu0 %v13691_v21  ;;  %v8992_v21 = vrot.slane %v16608_v40, %v16395_v26  ;;  %v15166_v40 = vld [vmem:[#allocation24 + $0x624] ss:$28 sps:$4 sm:$0xff]  }
 0x8cb   :  { %8948 = vmatpush2.bf16.msra.mxu1 %v13819_v47  ;;  %8908 = vmatprep.subr.bf16.mxu0 %v13684_v49  ;;  %v15119_v47 = vld [vmem:[#allocation24 + $0x310] ss:$28 sps:$4 sm:$0xff]   ;;  %v15127_v49 = vld [vmem:[#allocation24 + $0x2dc] ss:$28 sps:$4 sm:$0xff]  }
 0x8cc   :  { %8949 = vmatprep.subr.bf16.mxu1 %v13812_v51  ;;  %v15158_v51 = vld [vmem:[#allocation24 + $0x690] ss:$28 sps:$4 sm:$0xff]  }
 0x8ce   :  { %8909 = vmatpush2.bf16.msra.mxu0 %v13683_v55 }
 0x8cf   :  { %8950 = vmatpush2.bf16.msra.mxu1 %v13811_v56  ;;  %11907 = vmatprep.subr.bf16.mxu0 %v15085_v59  ;;  %v9019_v56 = vpack.i.b16 %v8992_v21, %v8992_v21  ;;  %v15125_v59 = vld [vmem:[#allocation24 + $0x2d8] ss:$28 sps:$4 sm:$0xff]  }
 0x8d0   :  { %11948 = vmatprep.subr.bf16.mxu1 %v15106_v25  ;;  %v15133_v25 = vld [vmem:[#allocation24 + $0x2a4] ss:$28 sps:$4 sm:$0xff]  }
 0x8d1   :  { %8911 = vmatmul.mubr.bf16.vlgmr.msra.gmra.mxu0 %v16582_v41  ;;  %v16616_v61 = vpop.f32.mrf.mxu0 }
 0x8d2   :  { %8952 = vmatmul.mubr.bf16.vlgmr.msra.gmra.mxu1 %v16589_v27  ;;  %v16621_v62 = vpop.f32.mrf.mxu1  ;;  %11908 = vmatpush1.bf16.msra.mxu0 %v15083_v60  ;;  %v15161_v60 = vld [vmem:[#allocation24 + $0x658] ss:$28 sps:$4 sm:$0xff]  }
 0x8d3   :  { %v8668_v0 = vpop.f32.mrf.mxu0  ;;  %11909 = vmatprep.subr.bf16.mxu0 %v15088_v48  ;;  %11949 = vmatpush1.bf16.msra.mxu1 %v15104_v53  ;;  %v8708_v55 = vadd.f32 %v16621_v62, %v16616_v61  ;;  %v9024_v53 = vrot.slane %v9019_v56, %v16405_v52  ;;  %v15169_v61 = vld [vmem:[#allocation24 + $0x5ec] ss:$28 sps:$4 sm:$0xff]   ;;  %v15199_v56 = vld [vmem:[#allocation24 + $0x73c] ss:$28 sps:$4 sm:$0xff]  }
 0x8d4   :  { %v8709_v1 = vpop.f32.mrf.mxu1  ;;  %11950 = vmatprep.subr.bf16.mxu1 %v15112_v24  ;;  %v15131_v24 = vld [vmem:[#allocation24 + $0x2a0] ss:$28 sps:$4 sm:$0xff]  }
 0x8d5   :  { %v8710_v41 = vadd.f32 %v8709_v1, %v8668_v0  ;;  %v8670_v29 = vpop.f32.mrf.mxu0  ;;  %v8960_v48 = vpack.c.bf16 %v8708_v55, %v8708_v55  ;;  %v15137_v0 = vld [vmem:[#allocation24 + $0x268] ss:$28 sps:$4 sm:$0xff]   ;;  %v15172_v1 = vld [vmem:[#allocation24 + $0x5b4] ss:$28 sps:$4 sm:$0xff]  }
 0x8d6   :  { %v8711_v31 = vpop.f32.mrf.mxu1  ;;  %11910 = vmatpush1.bf16.msra.mxu0 %v15086_v63  ;;  %v15164_v63 = vld [vmem:[#allocation24 + $0x620] ss:$28 sps:$4 sm:$0xff]   ;;  %v15194_v55 = vld [vmem:[#allocation24 + $0x770] ss:$28 sps:$4 sm:$0xff]  }
 0x8d7   :  { %v8961_v27 = vpack.c.bf16 %v8710_v41, %v8710_v41  ;;  %v8671_v54 = vpop.f32.mrf.mxu0  ;;  %11911 = vmatprep.subr.bf16.mxu0 %v15091_v45  ;;  %11951 = vmatpush1.bf16.msra.mxu1 %v15110_v18  ;;  %v9074_v62 = vadd.bf16 %v9024_v53, %v8960_v48  ;;  %v15145_v45 = vld [vmem:[#allocation24 + $0x234] ss:$28 sps:$4 sm:$0xff]   ;;  %v15167_v18 = vld [vmem:[#allocation24 + $0x5e8] ss:$28 sps:$4 sm:$0xff]   ;;  %v15151_v41 = vld [vmem:[#allocation24 + $0x1fc] ss:$28 sps:$4 sm:$0xff]  }
 0x8d8   :  { %v8712_v9 = vpop.f32.mrf.mxu1  ;;  %11952 = vmatprep.subr.bf16.mxu1 %v15118_v2  ;;  %v15143_v2 = vld [vmem:[#allocation24 + $0x230] ss:$28 sps:$4 sm:$0xff]   ;;  %v15175_v29 = vld [vmem:[#allocation24 + $0x57c] ss:$28 sps:$4 sm:$0xff]   ;;  %v15178_v54 = vld [vmem:[#allocation24 + $0x544] ss:$28 sps:$4 sm:$0xff]  }
 0x8d9   :  { %v9075_v17 = vadd.bf16 %v9031_v44, %v8961_v27  ;;  %v15170_v44 = vld [vmem:[#allocation24 + $0x5b0] ss:$28 sps:$4 sm:$0xff]   ;;  %v15149_v31 = vld [vmem:[#allocation24 + $0x1f8] ss:$28 sps:$4 sm:$0xff]  }
 0x8da   :  { %11912 = vmatpush1.bf16.msra.mxu0 %v15089_v6  ;;  %v15157_v6 = vld [vmem:[#allocation24 + $0x1c4] ss:$28 sps:$4 sm:$0xff]   ;;  %v15173_v27 = vld [vmem:[#allocation24 + $0x578] ss:$28 sps:$4 sm:$0xff]   ;;  %v15181_v9 = vld [vmem:[#allocation24 + $0x88c] ss:$28 sps:$4 sm:$0xff]  }
 0x8db   :  { %15765 = vtanh.bf16 %v9075_v17  ;;  %11913 = vmatprep.subr.bf16.mxu0 %v15094_v8  ;;  %11953 = vmatpush1.bf16.msra.mxu1 %v15116_v3  ;;  %v15155_v8 = vld [vmem:[#allocation24 + $0x1c0] ss:$28 sps:$4 sm:$0xff]   ;;  %v15230_v17 = vld [vmem:[#allocation24 + $0xc0c] ss:$28 sps:$4 sm:$0xff]   ;;  %v15236_v48 = vld [vmem:[#allocation24 + $0xbd4] ss:$28 sps:$4 sm:$0xff]  }
 0x8dc   :  { %11954 = vmatprep.subr.bf16.mxu1 %v15124_v30  ;;  %15767 = vtanh.bf16 %v9074_v62  ;;  %v15176_v3 = vld [vmem:[#allocation24 + $0x540] ss:$28 sps:$4 sm:$0xff]   ;;  %v9014_v30 = vcombine.high %v8992_v21, %v8992_v21  ;;  %v15203_v62 = vld [vmem:[#allocation24 + $0xa48] ss:$28 sps:$4 sm:$0xff]  }
 0x8de   :  { %11914 = vmatpush1.bf16.msra.mxu0 %v15092_v19  ;;  %v9016_v19 = vcombine.high %v16613_v57, %v16613_v57  ;;  %v15187_v57 = vld [vmem:[#allocation24 + $0x81c] ss:$28 sps:$4 sm:$0xff]  }
 0x8df   :  { %11915 = vmatprep.subr.bf16.mxu0 %v15097_v7  ;;  %11955 = vmatpush1.bf16.msra.mxu1 %v15122_v10  ;;  %v15179_v7 = vld [vmem:[#allocation24 + $0x888] ss:$28 sps:$4 sm:$0xff]   ;;  %v15184_v10 = vld [vmem:[#allocation24 + $0x854] ss:$28 sps:$4 sm:$0xff]  }
 0x8e0   :  { %11956 = vmatprep.subr.bf16.mxu1 %v15130_v34 }
 0x8e2   :  { %11916 = vmatpush1.bf16.msra.mxu0 %v15095_v11  ;;  %v9033_v11 = vpack.i.b16 %v9014_v30, %v9014_v30  ;;  %v15216_v30 = vld [vmem:[#allocation24 + $0x968] ss:$28 sps:$4 sm:$0xff]  }
 0x8e3   :  { %11917 = vmatprep.subr.bf16.mxu0 %v15100_v42  ;;  %11957 = vmatpush1.bf16.msra.mxu1 %v15128_v12  ;;  %v9040_v12 = vpack.i.b16 %v9016_v19, %v9016_v19  ;;  %v15264_v19 = vld [vmem:[#allocation24 + $0xab8] ss:$28 sps:$4 sm:$0xff]  }
 0x8e4   :  { %11958 = vmatprep.subr.bf16.mxu1 %v15136_v13 }
 0x8e6   :  { %11918 = vmatpush1.bf16.msra.mxu0 %v15098_v15  ;;  %v15182_v15 = vld [vmem:[#allocation24 + $0x850] ss:$28 sps:$4 sm:$0xff]  }
 0x8e7   :  { %11919 = vmatprep.subr.bf16.mxu0 %v15103_v20  ;;  %11959 = vmatpush1.bf16.msra.mxu1 %v15134_v22 }
 0x8e8   :  { %11960 = vmatprep.subr.bf16.mxu1 %v15142_v28  ;;  %v9038_v28 = vrot.slane %v9033_v11, %v16405_v52  ;;  %v15219_v11 = vld [vmem:[#allocation24 + $0x930] ss:$28 sps:$4 sm:$0xff]  }
 0x8e9   :  { %v16624_v35 = vpop.eup %15765 }
 0x8ea   :  { %11920 = vmatpush1.bf16.msra.mxu0 %v15101_v23  ;;  %11939 = vmatprep.mubr.bf16.mxu0 %v16624_v35  ;;  %v16634_v34 = vpop.eup %15767 }
 0x8eb   :  { %11921 = vmatprep.subr.bf16.mxu0 %v15109_v58  ;;  %11961 = vmatpush1.bf16.msra.mxu1 %v15140_v43 }
 0x8ec   :  { %11962 = vmatprep.subr.bf16.mxu1 %v15148_v36  ;;  %v9045_v36 = vrot.slane %v9040_v12, %v16405_v52  ;;  %v15270_v12 = vld [vmem:[#allocation24 + $0xa80] ss:$28 sps:$4 sm:$0xff]  }
 0x8ee   :  { %11922 = vmatpush1.bf16.msra.mxu0 %v15107_v46 }
 0x8ef   :  { %11923 = vmatprep.subr.bf16.mxu0 %v15115_v33  ;;  %11963 = vmatpush1.bf16.msra.mxu1 %v15146_v37  ;;  %v15185_v37 = vld [vmem:[#allocation24 + $0x818] ss:$28 sps:$4 sm:$0xff]  }
 0x8f0   :  { %11964 = vmatprep.subr.bf16.mxu1 %v15154_v14 }
 0x8f2   :  { %11924 = vmatpush2.bf16.msra.mxu0 %v15113_v38 }
 0x8f3   :  { %11925 = vmatprep.subr.bf16.mxu0 %v15121_v39  ;;  %11965 = vmatpush2.bf16.msra.mxu1 %v15152_v5  ;;  %v15190_v39 = vld [vmem:[#allocation24 + $0x7e4] ss:$28 sps:$4 sm:$0xff]  }
 0x8f4   :  { %11966 = vmatprep.subr.bf16.mxu1 %v15160_v4 }
 0x8f6   :  { %11926 = vmatpush2.bf16.msra.mxu0 %v15119_v47  ;;  %v15188_v47 = vld [vmem:[#allocation24 + $0x7e0] ss:$28 sps:$4 sm:$0xff]  }
 0x8f7   :  { %11927 = vmatprep.subr.bf16.mxu0 %v15127_v49  ;;  %11967 = vmatpush2.bf16.msra.mxu1 %v15158_v51  ;;  %v15193_v49 = vld [vmem:[#allocation24 + $0x7ac] ss:$28 sps:$4 sm:$0xff]  }
 0x8f8   :  { %11968 = vmatprep.subr.bf16.mxu1 %v15163_v50  ;;  %v15191_v51 = vld [vmem:[#allocation24 + $0x7a8] ss:$28 sps:$4 sm:$0xff]   ;;  %v15196_v50 = vld [vmem:[#allocation24 + $0x774] ss:$28 sps:$4 sm:$0xff]  }
 0x8fa   :  { %11928 = vmatpush2.bf16.msra.mxu0 %v15125_v59  ;;  %v15197_v59 = vld [vmem:[#allocation24 + $0x738] ss:$28 sps:$4 sm:$0xff]  }
 0x8fb   :  { %11929 = vmatprep.subr.bf16.mxu0 %v15133_v25  ;;  %11969 = vmatpush2.bf16.msra.mxu1 %v15161_v60  ;;  %v15202_v25 = vld [vmem:[#allocation24 + $0x704] ss:$28 sps:$4 sm:$0xff]  }
 0x8fc   :  { %11970 = vmatprep.subr.bf16.mxu1 %v15166_v40  ;;  %v15228_v60 = vld [vmem:[#allocation24 + $0xc08] ss:$28 sps:$4 sm:$0xff]  }
 0x8fe   :  { %11930 = vmatpush2.bf16.msra.mxu0 %v15131_v24  ;;  %v15200_v24 = vld [vmem:[#allocation24 + $0x700] ss:$28 sps:$4 sm:$0xff]  }
 0x8ff   :  { %11931 = vmatprep.subr.bf16.mxu0 %v15139_v16  ;;  %11971 = vmatpush2.bf16.msra.mxu1 %v15164_v63  ;;  %v15205_v16 = vld [vmem:[#allocation24 + $0xa4c] ss:$28 sps:$4 sm:$0xff]  }
 0x900   :  { %11972 = vmatprep.subr.bf16.mxu1 %v15169_v61  ;;  %v15234_v63 = vld [vmem:[#allocation24 + $0xbd0] ss:$28 sps:$4 sm:$0xff]   ;;  %v15242_v61 = vld [vmem:[#allocation24 + $0xb9c] ss:$28 sps:$4 sm:$0xff]  }
 0x902   :  { %11932 = vmatpush2.bf16.msra.mxu0 %v15137_v0  ;;  %v15208_v0 = vld [vmem:[#allocation24 + $0xa14] ss:$28 sps:$4 sm:$0xff]  }
 0x903   :  { %11933 = vmatprep.subr.bf16.mxu0 %v15145_v45  ;;  %11973 = vmatpush2.bf16.msra.mxu1 %v15167_v18  ;;  %v15240_v45 = vld [vmem:[#allocation24 + $0xb98] ss:$28 sps:$4 sm:$0xff]   ;;  %v15248_v18 = vld [vmem:[#allocation24 + $0xb64] ss:$28 sps:$4 sm:$0xff]  }
 0x904   :  { %11974 = vmatprep.subr.bf16.mxu1 %v15172_v1  ;;  %v15206_v1 = vld [vmem:[#allocation24 + $0xa10] ss:$28 sps:$4 sm:$0xff]  }
 0x906   :  { %11934 = vmatpush2.bf16.msra.mxu0 %v15143_v2  ;;  %v15212_v2 = vld [vmem:[#allocation24 + $0x9dc] ss:$28 sps:$4 sm:$0xff]  }
 0x907   :  { %11935 = vmatprep.subr.bf16.mxu0 %v15151_v41  ;;  %11975 = vmatpush2.bf16.msra.mxu1 %v15170_v44  ;;  %v15246_v41 = vld [vmem:[#allocation24 + $0xb60] ss:$28 sps:$4 sm:$0xff]   ;;  %v15254_v44 = vld [vmem:[#allocation24 + $0xb2c] ss:$28 sps:$4 sm:$0xff]  }
 0x908   :  { %11976 = vmatprep.subr.bf16.mxu1 %v15175_v29  ;;  %v15210_v29 = vld [vmem:[#allocation24 + $0x9d8] ss:$28 sps:$4 sm:$0xff]  }
 0x90a   :  { %11936 = vmatpush2.bf16.msra.mxu0 %v15149_v31  ;;  %v15215_v31 = vld [vmem:[#allocation24 + $0x9a4] ss:$28 sps:$4 sm:$0xff]  }
 0x90b   :  { %11937 = vmatprep.subr.bf16.mxu0 %v15157_v6  ;;  %11977 = vmatpush2.bf16.msra.mxu1 %v15173_v27  ;;  %v15252_v6 = vld [vmem:[#allocation24 + $0xb28] ss:$28 sps:$4 sm:$0xff]   ;;  %v15260_v27 = vld [vmem:[#allocation24 + $0xaf4] ss:$28 sps:$4 sm:$0xff]  }
 0x90c   :  { %11978 = vmatprep.subr.bf16.mxu1 %v15178_v54  ;;  %v15213_v54 = vld [vmem:[#allocation24 + $0x9a0] ss:$28 sps:$4 sm:$0xff]  }
 0x90e   :  { %11938 = vmatpush2.bf16.msra.mxu0 %v15155_v8  ;;  %v15218_v8 = vld [vmem:[#allocation24 + $0x96c] ss:$28 sps:$4 sm:$0xff]  }
 0x90f   :  { %11979 = vmatpush2.bf16.msra.mxu1 %v15176_v3  ;;  %11989 = vmatprep.subr.bf16.mxu0 %v15181_v9  ;;  %v15258_v3 = vld [vmem:[#allocation24 + $0xaf0] ss:$28 sps:$4 sm:$0xff]   ;;  %v15266_v9 = vld [vmem:[#allocation24 + $0xabc] ss:$28 sps:$4 sm:$0xff]  }
 0x910   :  { %12030 = vmatprep.subr.bf16.mxu1 %v15230_v17  ;;  %v15221_v17 = vld [vmem:[#allocation24 + $0x934] ss:$28 sps:$4 sm:$0xff]  }
 0x911   :  { %v8748_v42 = vpop.f32.mrf.mxu0  ;;  %11940 = vmatmul.mubr.bf16.vlgmr.msra.gmra.mxu0 %v16634_v34 }
 0x912   :  { %v8789_v13 = vpop.f32.mrf.mxu1  ;;  %11990 = vmatpush1.bf16.msra.mxu0 %v15179_v7  ;;  %v8969_v7 = vcombine.high %v16604_v32, %v16604_v32  ;;  %v15284_v32 = vld [vmem:[#allocation24 + $0xd94] ss:$28 sps:$4 sm:$0xff]  }
 0x913   :  { %v8790_v20 = vadd.f32 %v8789_v13, %v8748_v42  ;;  %v8750_v22 = vpop.f32.mrf.mxu0  ;;  %11991 = vmatprep.subr.bf16.mxu0 %v15184_v10  ;;  %v15272_v10 = vld [vmem:[#allocation24 + $0xa84] ss:$28 sps:$4 sm:$0xff]   ;;  %v15224_v42 = vld [vmem:[#allocation24 + $0x8fc] ss:$28 sps:$4 sm:$0xff]  }
 0x914   :  { %v8791_v23 = vpop.f32.mrf.mxu1  ;;  %v8983_v13 = vrot.slane %v8969_v7, %v16395_v26  ;;  %v15255_v7 = vld [vmem:[#allocation24 + $0xb0] ss:$28 sps:$4 sm:$0xff]  }
 0x915   :  { %v8962_v58 = vpack.c.bf16 %v8790_v20, %v8790_v20  ;;  %v8792_v43 = vadd.f32 %v8791_v23, %v8750_v22  ;;  %v8752_v46 = vpop.f32.mrf.mxu0  ;;  %v15222_v20 = vld [vmem:[#allocation24 + $0x8f8] ss:$28 sps:$4 sm:$0xff]   ;;  %v15227_v22 = vld [vmem:[#allocation24 + $0x8c4] ss:$28 sps:$4 sm:$0xff]  }
 0x916   :  { %v8793_v33 = vpop.f32.mrf.mxu1  ;;  %11992 = vmatpush1.bf16.msra.mxu0 %v15182_v15  ;;  %v15278_v15 = vld [vmem:[#allocation24 + $0xdcc] ss:$28 sps:$4 sm:$0xff]   ;;  %v15225_v23 = vld [vmem:[#allocation24 + $0x8c0] ss:$28 sps:$4 sm:$0xff]  }
 0x917   :  { %v8963_v14 = vpack.c.bf16 %v8792_v43, %v8792_v43  ;;  %v8753_v38 = vpop.f32.mrf.mxu0  ;;  %11993 = vmatprep.subr.bf16.mxu0 %v15187_v57  ;;  %v9076_v5 = vadd.bf16 %v9038_v28, %v8962_v58  ;;  %v15276_v57 = vld [vmem:[#allocation24 + $0xdc8] ss:$28 sps:$4 sm:$0xff]   ;;  %v8985_v28 = vcombine.high %v8983_v13, %v8983_v13  ;;  %v15233_v58 = vld [vmem:[#allocation24 + $0x194] ss:$28 sps:$4 sm:$0xff]   ;;  %v16649_v43 = vrot.slane %v8983_v13, %v16395_v26  ;;  %v15290_v33 = vld [vmem:[#allocation24 + $0xd5c] ss:$28 sps:$4 sm:$0xff]  }
 0x918   :  { %v8794_v4 = vpop.f32.mrf.mxu1  ;;  %v15275_v13 = vld [vmem:[#allocation24 + $0xc] ss:$28 sps:$4 sm:$0xff]  }
 0x919   :  { %v9077_v21 = vadd.bf16 %v9045_v36, %v8963_v14  ;;  %v15282_v36 = vld [vmem:[#allocation24 + $0xd90] ss:$28 sps:$4 sm:$0xff]   ;;  %v16652_v46 = vrot.slane %v8985_v28, %v16395_v26  ;;  %v15288_v14 = vld [vmem:[#allocation24 + $0xd58] ss:$28 sps:$4 sm:$0xff]  }
 0x91a   :  { %11994 = vmatpush1.bf16.msra.mxu0 %v15185_v37  ;;  %v9047_v37 = vpack.i.b16 %v16649_v43, %v16649_v43  ;;  %v15285_v28 = vld [vmem:[#allocation24 + $0x318] ss:$28 sps:$4 sm:$0xff]  }
 0x91b   :  { %15769 = vtanh.bf16 %v9077_v21  ;;  %11995 = vmatprep.subr.bf16.mxu0 %v15190_v39  ;;  %v9054_v39 = vpack.i.b16 %v16652_v46, %v16652_v46 }
 0x91c   :  { %15771 = vtanh.bf16 %v9076_v5  ;;  %v15296_v5 = vld [vmem:[#allocation24 + $0xd24] ss:$28 sps:$4 sm:$0xff]  }
 0x91e   :  { %11996 = vmatpush1.bf16.msra.mxu0 %v15188_v47 }
 0x91f   :  { %11997 = vmatprep.subr.bf16.mxu0 %v15193_v49  ;;  %v9052_v49 = vrot.slane %v9047_v37, %v16405_v52 }
 0x922   :  { %11998 = vmatpush1.bf16.msra.mxu0 %v15191_v51 }
 0x923   :  { %11999 = vmatprep.subr.bf16.mxu0 %v15196_v50  ;;  %v15294_v50 = vld [vmem:[#allocation24 + $0xd20] ss:$28 sps:$4 sm:$0xff]  }
 0x926   :  { %12000 = vmatpush1.bf16.msra.mxu0 %v15194_v55 }
 0x927   :  { %12001 = vmatprep.subr.bf16.mxu0 %v15199_v56 }
 0x929   :  { %v16639_v40 = vpop.eup %15769 }
 0x92a   :  { %v16641_v53 = vpop.eup %15771  ;;  %11980 = vmatprep.mubr.bf16.mxu1 %v16639_v40  ;;  %12002 = vmatpush1.bf16.msra.mxu0 %v15197_v59  ;;  %v9059_v59 = vrot.slane %v9054_v39, %v16405_v52 }
 0x92b   :  { %11981 = vmatmul.mubr.bf16.vlgmr.msra.gmra.mxu1 %v16641_v53  ;;  %12003 = vmatprep.subr.bf16.mxu0 %v15202_v25 }
 0x92c   :  { %12031 = vmatpush1.bf16.msra.mxu1 %v15228_v60  ;;  %v15302_v60 = vld [vmem:[#allocation24 + $0xcec] ss:$28 sps:$4 sm:$0xff]  }
 0x92d   :  { %12032 = vmatprep.subr.bf16.mxu1 %v15236_v48 }
 0x92e   :  { %12004 = vmatpush1.bf16.msra.mxu0 %v15200_v24 }
 0x92f   :  { %12005 = vmatprep.subr.bf16.mxu0 %v15205_v16 }
 0x930   :  { %12033 = vmatpush1.bf16.msra.mxu1 %v15234_v63 }
 0x931   :  { %12034 = vmatprep.subr.bf16.mxu1 %v15242_v61 }
 0x932   :  { %12006 = vmatpush2.bf16.msra.mxu0 %v15203_v62  ;;  %v15300_v62 = vld [vmem:[#allocation24 + $0xce8] ss:$28 sps:$4 sm:$0xff]  }
 0x933   :  { %12007 = vmatprep.subr.bf16.mxu0 %v15208_v0 }
 0x934   :  { %12035 = vmatpush1.bf16.msra.mxu1 %v15240_v45  ;;  %v15308_v45 = vld [vmem:[#allocation24 + $0xcb4] ss:$28 sps:$4 sm:$0xff]  }
 0x935   :  { %12036 = vmatprep.subr.bf16.mxu1 %v15248_v18  ;;  %v15306_v18 = vld [vmem:[#allocation24 + $0xcb0] ss:$28 sps:$4 sm:$0xff]  }
 0x936   :  { %12008 = vmatpush2.bf16.msra.mxu0 %v15206_v1  ;;  %v15314_v1 = vld [vmem:[#allocation24 + $0xc7c] ss:$28 sps:$4 sm:$0xff]  }
 0x937   :  { %12009 = vmatprep.subr.bf16.mxu0 %v15212_v2  ;;  %v15312_v2 = vld [vmem:[#allocation24 + $0xc78] ss:$28 sps:$4 sm:$0xff]  }
 0x938   :  { %12037 = vmatpush1.bf16.msra.mxu1 %v15246_v41  ;;  %v15320_v41 = vld [vmem:[#allocation24 + $0xc44] ss:$28 sps:$4 sm:$0xff]  }
 0x939   :  { %12038 = vmatprep.subr.bf16.mxu1 %v15254_v44  ;;  %v15318_v44 = vld [vmem:[#allocation24 + $0xc40] ss:$28 sps:$4 sm:$0xff]  }
 0x93a   :  { %12010 = vmatpush2.bf16.msra.mxu0 %v15210_v29  ;;  %v15326_v29 = vld [vmem:[#allocation24 + $0x514] ss:$28 sps:$4 sm:$0xff]  }
 0x93b   :  { %12011 = vmatprep.subr.bf16.mxu0 %v15215_v31  ;;  %v15231_v31 = vld [vmem:[#allocation24 + $0x190] ss:$28 sps:$4 sm:$0xff]  }
 0x93c   :  { %12039 = vmatpush1.bf16.msra.mxu1 %v15252_v6 }
 0x93d   :  { %12040 = vmatprep.subr.bf16.mxu1 %v15260_v27  ;;  %v15239_v27 = vld [vmem:[#allocation24 + $0x15c] ss:$28 sps:$4 sm:$0xff]  }
 0x93e   :  { %12012 = vmatpush2.bf16.msra.mxu0 %v15213_v54 }
 0x93f   :  { %12013 = vmatprep.subr.bf16.mxu0 %v15218_v8  ;;  %v15237_v8 = vld [vmem:[#allocation24 + $0x158] ss:$28 sps:$4 sm:$0xff]  }
 0x940   :  { %12041 = vmatpush1.bf16.msra.mxu1 %v15258_v3  ;;  %v15245_v3 = vld [vmem:[#allocation24 + $0x124] ss:$28 sps:$4 sm:$0xff]  }
 0x941   :  { %12042 = vmatprep.subr.bf16.mxu1 %v15266_v9  ;;  %v15243_v9 = vld [vmem:[#allocation24 + $0x120] ss:$28 sps:$4 sm:$0xff]  }
 0x942   :  { %12014 = vmatpush2.bf16.msra.mxu0 %v15216_v30  ;;  %v15251_v30 = vld [vmem:[#allocation24 + $0xec] ss:$28 sps:$4 sm:$0xff]  }
 0x943   :  { %12015 = vmatprep.subr.bf16.mxu0 %v15221_v17  ;;  %v15249_v17 = vld [vmem:[#allocation24 + $0xe8] ss:$28 sps:$4 sm:$0xff]  }
 0x944   :  { %12043 = vmatpush1.bf16.msra.mxu1 %v15264_v19  ;;  %v15257_v19 = vld [vmem:[#allocation24 + $0xb4] ss:$28 sps:$4 sm:$0xff]  }
 0x945   :  { %12044 = vmatprep.subr.bf16.mxu1 %v15272_v10  ;;  %v15263_v10 = vld [vmem:[#allocation24 + $0x7c] ss:$28 sps:$4 sm:$0xff]  }
 0x946   :  { %12016 = vmatpush2.bf16.msra.mxu0 %v15219_v11  ;;  %v15261_v11 = vld [vmem:[#allocation24 + $0x78] ss:$28 sps:$4 sm:$0xff]  }
 0x947   :  { %12017 = vmatprep.subr.bf16.mxu0 %v15224_v42  ;;  %v15269_v42 = vld [vmem:[#allocation24 + $0x44] ss:$28 sps:$4 sm:$0xff]  }
 0x948   :  { %12045 = vmatpush1.bf16.msra.mxu1 %v15270_v12  ;;  %v15267_v12 = vld [vmem:[#allocation24 + $0x40] ss:$28 sps:$4 sm:$0xff]  }
 0x949   :  { %12046 = vmatprep.subr.bf16.mxu1 %v15278_v15  ;;  %v15273_v15 = vld [vmem:[#allocation24 + $0x8] ss:$28 sps:$4 sm:$0xff]  }
 0x94a   :  { %12018 = vmatpush2.bf16.msra.mxu0 %v15222_v20  ;;  %v15281_v20 = vld [vmem:[#allocation24 + $0x354] ss:$28 sps:$4 sm:$0xff]  }
 0x94b   :  { %12019 = vmatprep.subr.bf16.mxu0 %v15227_v22  ;;  %v15279_v22 = vld [vmem:[#allocation24 + $0x350] ss:$28 sps:$4 sm:$0xff]  }
 0x94c   :  { %12047 = vmatpush2.bf16.msra.mxu1 %v15276_v57  ;;  %v15287_v57 = vld [vmem:[#allocation24 + $0x31c] ss:$28 sps:$4 sm:$0xff]  }
 0x94d   :  { %12048 = vmatprep.subr.bf16.mxu1 %v15284_v32  ;;  %v9015_v32 = vcombine.high %v16649_v43, %v16649_v43  ;;  %v15297_v43 = vld [vmem:[#allocation24 + $0x2a8] ss:$28 sps:$4 sm:$0xff]  }
 0x94e   :  { %12020 = vmatpush2.bf16.msra.mxu0 %v15225_v23  ;;  %v15293_v23 = vld [vmem:[#allocation24 + $0x2e4] ss:$28 sps:$4 sm:$0xff]  }
 0x94f   :  { %12071 = vmatprep.subr.bf16.mxu0 %v15233_v58  ;;  %v9017_v58 = vcombine.high %v16652_v46, %v16652_v46 }
 0x950   :  { %12049 = vmatpush2.bf16.msra.mxu1 %v15282_v36  ;;  %v9061_v36 = vpack.i.b16 %v9015_v32, %v9015_v32  ;;  %v15357_v32 = vld [vmem:[#allocation24 + $0x778] ss:$28 sps:$4 sm:$0xff]  }
 0x951   :  { %v8830_v38 = vpop.f32.mrf.mxu0  ;;  %12050 = vmatprep.subr.bf16.mxu1 %v15290_v33  ;;  %v15291_v33 = vld [vmem:[#allocation24 + $0x2e0] ss:$28 sps:$4 sm:$0xff]  }
 0x952   :  { %v8871_v4 = vpop.f32.mrf.mxu1 }
 0x953   :  { %v8872_v21 = vadd.f32 %v8871_v4, %v8830_v38  ;;  %v8832_v47 = vpop.f32.mrf.mxu0  ;;  %v15299_v38 = vld [vmem:[#allocation24 + $0x2ac] ss:$28 sps:$4 sm:$0xff]  }
 0x954   :  { %v8873_v51 = vpop.f32.mrf.mxu1  ;;  %12051 = vmatpush2.bf16.msra.mxu1 %v15288_v14  ;;  %v9068_v14 = vpack.i.b16 %v9017_v58, %v9017_v58  ;;  %v15365_v58 = vld [vmem:[#allocation24 + $0x744] ss:$28 sps:$4 sm:$0xff]  }
 0x955   :  { %v8964_v55 = vpack.c.bf16 %v8872_v21, %v8872_v21  ;;  %v8874_v56 = vadd.f32 %v8873_v51, %v8832_v47  ;;  %v8834_v25 = vpop.f32.mrf.mxu0  ;;  %12052 = vmatprep.subr.bf16.mxu1 %v15296_v5  ;;  %v9066_v21 = vrot.slane %v9061_v36, %v16405_v52  ;;  %v15360_v36 = vld [vmem:[#allocation24 + $0x3c0] ss:$28 sps:$4 sm:$0xff]  }
 0x956   :  { %v8875_v48 = vpop.f32.mrf.mxu1 }
 0x957   :  { %v8965_v24 = vpack.c.bf16 %v8874_v56, %v8874_v56  ;;  %v8835_v16 = vpop.f32.mrf.mxu0  ;;  %v9078_v63 = vadd.bf16 %v9052_v49, %v8964_v55  ;;  %v15305_v55 = vld [vmem:[#allocation24 + $0x274] ss:$28 sps:$4 sm:$0xff]  }
 0x958   :  { %v8876_v61 = vpop.f32.mrf.mxu1  ;;  %12053 = vmatpush2.bf16.msra.mxu1 %v15294_v50  ;;  %v9073_v50 = vrot.slane %v9068_v14, %v16405_v52  ;;  %v15371_v14 = vld [vmem:[#allocation24 + $0x70c] ss:$28 sps:$4 sm:$0xff]  }
 0x959   :  { %v9079_v0 = vadd.bf16 %v9059_v59, %v8965_v24  ;;  %12054 = vmatprep.subr.bf16.mxu1 %v15302_v60  ;;  %v15303_v24 = vld [vmem:[#allocation24 + $0x270] ss:$28 sps:$4 sm:$0xff]   ;;  %v15309_v61 = vld [vmem:[#allocation24 + $0x238] ss:$28 sps:$4 sm:$0xff]  }
 0x95b   :  { %15773 = vtanh.bf16 %v9079_v0  ;;  %v15315_v0 = vld [vmem:[#allocation24 + $0x200] ss:$28 sps:$4 sm:$0xff]  }
 0x95c   :  { %15775 = vtanh.bf16 %v9078_v63  ;;  %12055 = vmatpush2.bf16.msra.mxu1 %v15300_v62  ;;  %v15311_v63 = vld [vmem:[#allocation24 + $0x23c] ss:$28 sps:$4 sm:$0xff]   ;;  %v15317_v62 = vld [vmem:[#allocation24 + $0x204] ss:$28 sps:$4 sm:$0xff]  }
 0x95d   :  { %12056 = vmatprep.subr.bf16.mxu1 %v15308_v45  ;;  %v15323_v45 = vld [vmem:[#allocation24 + $0x1cc] ss:$28 sps:$4 sm:$0xff]  }
 0x960   :  { %12057 = vmatpush2.bf16.msra.mxu1 %v15306_v18  ;;  %v15321_v18 = vld [vmem:[#allocation24 + $0x1c8] ss:$28 sps:$4 sm:$0xff]  }
 0x961   :  { %12058 = vmatprep.subr.bf16.mxu1 %v15314_v1  ;;  %v15329_v1 = vld [vmem:[#allocation24 + $0x894] ss:$28 sps:$4 sm:$0xff]  }
 0x964   :  { %12059 = vmatpush2.bf16.msra.mxu1 %v15312_v2  ;;  %v15324_v2 = vld [vmem:[#allocation24 + $0x510] ss:$28 sps:$4 sm:$0xff]  }
 0x965   :  { %12060 = vmatprep.subr.bf16.mxu1 %v15320_v41  ;;  %v15327_v41 = vld [vmem:[#allocation24 + $0x890] ss:$28 sps:$4 sm:$0xff]  }
 0x968   :  { %12061 = vmatpush2.bf16.msra.mxu1 %v15318_v44 }
 0x969   :  { %v16660_v6 = vpop.eup %15773  ;;  %12112 = vmatprep.subr.bf16.mxu1 %v15326_v29 }
 0x96a   :  { %v16662_v54 = vpop.eup %15775  ;;  %12021 = vmatprep.mubr.bf16.mxu0 %v16660_v6 }
 0x96b   :  { %12022 = vmatmul.mubr.bf16.vlgmr.msra.gmra.mxu0 %v16662_v54 }
 0x96c   :  { %12072 = vmatpush1.bf16.msra.mxu0 %v15231_v31  ;;  %12103 = vmatprep.mubr.bf16.mxu0 %v16624_v35  ;;  %v15332_v31 = vld [vmem:[#allocation24 + $0x4dc] ss:$28 sps:$4 sm:$0xff]  }
 0x96d   :  { %12073 = vmatprep.subr.bf16.mxu0 %v15239_v27  ;;  %v15335_v27 = vld [vmem:[#allocation24 + $0x85c] ss:$28 sps:$4 sm:$0xff]  }
 0x970   :  { %12074 = vmatpush1.bf16.msra.mxu0 %v15237_v8  ;;  %v15330_v8 = vld [vmem:[#allocation24 + $0x4d8] ss:$28 sps:$4 sm:$0xff]  }
 0x971   :  { %12075 = vmatprep.subr.bf16.mxu0 %v15245_v3  ;;  %v15333_v3 = vld [vmem:[#allocation24 + $0x858] ss:$28 sps:$4 sm:$0xff]  }
 0x974   :  { %12076 = vmatpush1.bf16.msra.mxu0 %v15243_v9  ;;  %v15338_v9 = vld [vmem:[#allocation24 + $0x4a4] ss:$28 sps:$4 sm:$0xff]  }
 0x975   :  { %12077 = vmatprep.subr.bf16.mxu0 %v15251_v30  ;;  %v15341_v30 = vld [vmem:[#allocation24 + $0x824] ss:$28 sps:$4 sm:$0xff]  }
 0x978   :  { %12078 = vmatpush1.bf16.msra.mxu0 %v15249_v17  ;;  %v15336_v17 = vld [vmem:[#allocation24 + $0x4a0] ss:$28 sps:$4 sm:$0xff]  }
 0x979   :  { %12079 = vmatprep.subr.bf16.mxu0 %v15257_v19  ;;  %v15339_v19 = vld [vmem:[#allocation24 + $0x820] ss:$28 sps:$4 sm:$0xff]  }
 0x97c   :  { %12080 = vmatpush1.bf16.msra.mxu0 %v15255_v7  ;;  %v15344_v7 = vld [vmem:[#allocation24 + $0x46c] ss:$28 sps:$4 sm:$0xff]  }
 0x97d   :  { %12081 = vmatprep.subr.bf16.mxu0 %v15263_v10  ;;  %v15347_v10 = vld [vmem:[#allocation24 + $0x7ec] ss:$28 sps:$4 sm:$0xff]  }
 0x980   :  { %12082 = vmatpush1.bf16.msra.mxu0 %v15261_v11  ;;  %v15342_v11 = vld [vmem:[#allocation24 + $0x468] ss:$28 sps:$4 sm:$0xff]  }
 0x981   :  { %12083 = vmatprep.subr.bf16.mxu0 %v15269_v42  ;;  %v15345_v42 = vld [vmem:[#allocation24 + $0x7e8] ss:$28 sps:$4 sm:$0xff]  }
 0x984   :  { %12084 = vmatpush1.bf16.msra.mxu0 %v15267_v12  ;;  %v15350_v12 = vld [vmem:[#allocation24 + $0x434] ss:$28 sps:$4 sm:$0xff]  }
 0x985   :  { %12085 = vmatprep.subr.bf16.mxu0 %v15275_v13  ;;  %v15353_v13 = vld [vmem:[#allocation24 + $0x7b4] ss:$28 sps:$4 sm:$0xff]  }
 0x988   :  { %12086 = vmatpush1.bf16.msra.mxu0 %v15273_v15  ;;  %v15348_v15 = vld [vmem:[#allocation24 + $0x430] ss:$28 sps:$4 sm:$0xff]  }
 0x989   :  { %12087 = vmatprep.subr.bf16.mxu0 %v15281_v20  ;;  %v15351_v20 = vld [vmem:[#allocation24 + $0x7b0] ss:$28 sps:$4 sm:$0xff]  }
 0x98c   :  { %12088 = vmatpush2.bf16.msra.mxu0 %v15279_v22  ;;  %v15356_v22 = vld [vmem:[#allocation24 + $0x3fc] ss:$28 sps:$4 sm:$0xff]  }
 0x98d   :  { %12089 = vmatprep.subr.bf16.mxu0 %v15287_v57  ;;  %v15359_v57 = vld [vmem:[#allocation24 + $0x77c] ss:$28 sps:$4 sm:$0xff]  }
 0x990   :  { %12090 = vmatpush2.bf16.msra.mxu0 %v15285_v28  ;;  %v15354_v28 = vld [vmem:[#allocation24 + $0x3f8] ss:$28 sps:$4 sm:$0xff]  }
 0x991   :  { %v8912_v37 = vpop.f32.mrf.mxu0  ;;  %12091 = vmatprep.subr.bf16.mxu0 %v15293_v23  ;;  %v15362_v23 = vld [vmem:[#allocation24 + $0x3c4] ss:$28 sps:$4 sm:$0xff]  }
 0x992   :  { %v8953_v39 = vpop.f32.mrf.mxu1 }
 0x993   :  { %v8954_v5 = vadd.f32 %v8953_v39, %v8912_v37  ;;  %v8914_v4 = vpop.f32.mrf.mxu0  ;;  %v15368_v37 = vld [vmem:[#allocation24 + $0x38c] ss:$28 sps:$4 sm:$0xff]  }
 0x994   :  { %12092 = vmatpush2.bf16.msra.mxu0 %v15291_v33  ;;  %v8955_v47 = vpop.f32.mrf.mxu1  ;;  %v15363_v33 = vld [vmem:[#allocation24 + $0x740] ss:$28 sps:$4 sm:$0xff]   ;;  %v15369_v39 = vld [vmem:[#allocation24 + $0x708] ss:$28 sps:$4 sm:$0xff]  }
 0x995   :  { %v8966_v49 = vpack.c.bf16 %v8954_v5, %v8954_v5  ;;  %v8956_v51 = vadd.f32 %v8955_v47, %v8914_v4  ;;  %v8916_v46 = vpop.f32.mrf.mxu0  ;;  %12093 = vmatprep.subr.bf16.mxu0 %v15299_v38  ;;  %v15366_v38 = vld [vmem:[#allocation24 + $0x388] ss:$28 sps:$4 sm:$0xff]   ;;  %v15374_v5 = vld [vmem:[#allocation24 + $0x6d4] ss:$28 sps:$4 sm:$0xff]  }
 0x996   :  { %v8957_v56 = vpop.f32.mrf.mxu1  ;;  %v15377_v4 = vld [vmem:[#allocation24 + $0xa54] ss:$28 sps:$4 sm:$0xff]   ;;  %v15386_v46 = vld [vmem:[#allocation24 + $0x664] ss:$28 sps:$4 sm:$0xff]  }
 0x997   :  { %v8967_v59 = vpack.c.bf16 %v8956_v51, %v8956_v51  ;;  %v8917_v25 = vpop.f32.mrf.mxu0  ;;  %v9080_v60 = vadd.bf16 %v9066_v21, %v8966_v49  ;;  %v15372_v21 = vld [vmem:[#allocation24 + $0x6d0] ss:$28 sps:$4 sm:$0xff]   ;;  %v15383_v49 = vld [vmem:[#allocation24 + $0xa1c] ss:$28 sps:$4 sm:$0xff]  }
 0x998   :  { %12094 = vmatpush2.bf16.msra.mxu0 %v15297_v43  ;;  %v8958_v48 = vpop.f32.mrf.mxu1  ;;  %v15375_v47 = vld [vmem:[#allocation24 + $0xa50] ss:$28 sps:$4 sm:$0xff]   ;;  %v15380_v43 = vld [vmem:[#allocation24 + $0x69c] ss:$28 sps:$4 sm:$0xff]  }
 0x999   :  { %v9081_v16 = vadd.bf16 %v9073_v50, %v8967_v59  ;;  %12095 = vmatprep.subr.bf16.mxu0 %v15305_v55  ;;  %v15378_v51 = vld [vmem:[#allocation24 + $0x698] ss:$28 sps:$4 sm:$0xff]   ;;  %v15389_v55 = vld [vmem:[#allocation24 + $0x9e4] ss:$28 sps:$4 sm:$0xff]   ;;  %v15395_v48 = vld [vmem:[#allocation24 + $0x9ac] ss:$28 sps:$4 sm:$0xff]  }
 0x99a   :  { %v15381_v50 = vld [vmem:[#allocation24 + $0xa18] ss:$28 sps:$4 sm:$0xff]   ;;  %v15384_v56 = vld [vmem:[#allocation24 + $0x660] ss:$28 sps:$4 sm:$0xff]  }
 0x99b   :  { %15777 = vtanh.bf16 %v9081_v16  ;;  %v15387_v59 = vld [vmem:[#allocation24 + $0x9e0] ss:$28 sps:$4 sm:$0xff]   ;;  %v15390_v16 = vld [vmem:[#allocation24 + $0x628] ss:$28 sps:$4 sm:$0xff]  }
 0x99c   :  { %15779 = vtanh.bf16 %v9080_v60  ;;  %12096 = vmatpush2.bf16.msra.mxu0 %v15303_v24  ;;  %v15392_v60 = vld [vmem:[#allocation24 + $0x62c] ss:$28 sps:$4 sm:$0xff]  }
 0x99d   :  { %12097 = vmatprep.subr.bf16.mxu0 %v15311_v63  ;;  %v15393_v63 = vld [vmem:[#allocation24 + $0x9a8] ss:$28 sps:$4 sm:$0xff]  }
 0x9a0   :  { %12098 = vmatpush2.bf16.msra.mxu0 %v15309_v61 }
 0x9a1   :  { %12099 = vmatprep.subr.bf16.mxu0 %v15317_v62  ;;  %v15398_v62 = vld [vmem:[#allocation24 + $0x5f4] ss:$28 sps:$4 sm:$0xff]  }
 0x9a4   :  { %12100 = vmatpush2.bf16.msra.mxu0 %v15315_v0  ;;  %v15401_v0 = vld [vmem:[#allocation24 + $0x974] ss:$28 sps:$4 sm:$0xff]  }
 0x9a5   :  { %12101 = vmatprep.subr.bf16.mxu0 %v15323_v45 }
 0x9a8   :  { %12102 = vmatpush2.bf16.msra.mxu0 %v15321_v18  ;;  %v15396_v18 = vld [vmem:[#allocation24 + $0x5f0] ss:$28 sps:$4 sm:$0xff]  }
 0x9a9   :  { %v16673_v44 = vpop.eup %15777  ;;  %12153 = vmatprep.subr.bf16.mxu0 %v15329_v1  ;;  %v15399_v1 = vld [vmem:[#allocation24 + $0x970] ss:$28 sps:$4 sm:$0xff]  }
 0x9aa   :  { %v16675_v29 = vpop.eup %15779  ;;  %12062 = vmatprep.mubr.bf16.mxu1 %v16673_v44 }
 0x9ab   :  { %12104 = vmatmul.mubr.bf16.vlgmr.msra.gmra.mxu0 %v16634_v34  ;;  %12063 = vmatmul.mubr.bf16.vlgmr.msra.gmra.mxu1 %v16675_v29 }
 0x9ac   :  { %12113 = vmatpush1.bf16.msra.mxu1 %v15324_v2  ;;  %12154 = vmatpush1.bf16.msra.mxu0 %v15327_v41  ;;  %v15404_v2 = vld [vmem:[#allocation24 + $0x5bc] ss:$28 sps:$4 sm:$0xff]  }
 0x9ad   :  { %12185 = vmatprep.mubr.bf16.mxu0 %v16660_v6  ;;  %12144 = vmatprep.mubr.bf16.mxu1 %v16639_v40  ;;  %v15407_v41 = vld [vmem:[#allocation24 + $0x93c] ss:$28 sps:$4 sm:$0xff]  }
 0x9ae   :  { %12114 = vmatprep.subr.bf16.mxu1 %v15332_v31  ;;  %12155 = vmatprep.subr.bf16.mxu0 %v15335_v27  ;;  %v15402_v31 = vld [vmem:[#allocation24 + $0x5b8] ss:$28 sps:$4 sm:$0xff]  }
 0x9af   :  { %v15405_v27 = vld [vmem:[#allocation24 + $0x938] ss:$28 sps:$4 sm:$0xff]  }
 0x9b0   :  { %12115 = vmatpush1.bf16.msra.mxu1 %v15330_v8  ;;  %12156 = vmatpush1.bf16.msra.mxu0 %v15333_v3  ;;  %v15410_v8 = vld [vmem:[#allocation24 + $0x584] ss:$28 sps:$4 sm:$0xff]  }
 0x9b1   :  { %12116 = vmatprep.subr.bf16.mxu1 %v15338_v9  ;;  %12157 = vmatprep.subr.bf16.mxu0 %v15341_v30  ;;  %v15413_v3 = vld [vmem:[#allocation24 + $0x904] ss:$28 sps:$4 sm:$0xff]  }
 0x9b2   :  { %v15408_v9 = vld [vmem:[#allocation24 + $0x580] ss:$28 sps:$4 sm:$0xff]  }
 0x9b3   :  { %v15411_v30 = vld [vmem:[#allocation24 + $0x900] ss:$28 sps:$4 sm:$0xff]  }
 0x9b4   :  { %12117 = vmatpush1.bf16.msra.mxu1 %v15336_v17  ;;  %12158 = vmatpush1.bf16.msra.mxu0 %v15339_v19  ;;  %v15416_v17 = vld [vmem:[#allocation24 + $0x54c] ss:$28 sps:$4 sm:$0xff]  }
 0x9b5   :  { %12118 = vmatprep.subr.bf16.mxu1 %v15344_v7  ;;  %12159 = vmatprep.subr.bf16.mxu0 %v15347_v10  ;;  %v15419_v19 = vld [vmem:[#allocation24 + $0x8cc] ss:$28 sps:$4 sm:$0xff]  }
 0x9b6   :  { %v15414_v7 = vld [vmem:[#allocation24 + $0x548] ss:$28 sps:$4 sm:$0xff]  }
 0x9b7   :  { %v15417_v10 = vld [vmem:[#allocation24 + $0x8c8] ss:$28 sps:$4 sm:$0xff]  }
 0x9b8   :  { %12119 = vmatpush1.bf16.msra.mxu1 %v15342_v11  ;;  %12160 = vmatpush1.bf16.msra.mxu0 %v15345_v42  ;;  %v15422_v11 = vld [vmem:[#allocation24 + $0xc14] ss:$28 sps:$4 sm:$0xff]   ;;  %v15425_v42 = vld [vmem:[#allocation24 + $0x19c] ss:$28 sps:$4 sm:$0xff]  }
 0x9b9   :  { %12120 = vmatprep.subr.bf16.mxu1 %v15350_v12  ;;  %12161 = vmatprep.subr.bf16.mxu0 %v15353_v13  ;;  %v15420_v12 = vld [vmem:[#allocation24 + $0xc10] ss:$28 sps:$4 sm:$0xff]   ;;  %v15423_v13 = vld [vmem:[#allocation24 + $0x198] ss:$28 sps:$4 sm:$0xff]  }
 0x9bc   :  { %12121 = vmatpush1.bf16.msra.mxu1 %v15348_v15  ;;  %12162 = vmatpush1.bf16.msra.mxu0 %v15351_v20  ;;  %v15428_v15 = vld [vmem:[#allocation24 + $0xbdc] ss:$28 sps:$4 sm:$0xff]   ;;  %v15431_v20 = vld [vmem:[#allocation24 + $0x164] ss:$28 sps:$4 sm:$0xff]  }
 0x9bd   :  { %12122 = vmatprep.subr.bf16.mxu1 %v15356_v22  ;;  %12163 = vmatprep.subr.bf16.mxu0 %v15359_v57 }
 0x9c0   :  { %12123 = vmatpush1.bf16.msra.mxu1 %v15354_v28  ;;  %12164 = vmatpush1.bf16.msra.mxu0 %v15357_v32  ;;  %v15426_v28 = vld [vmem:[#allocation24 + $0xbd8] ss:$28 sps:$4 sm:$0xff]  }
 0x9c1   :  { %12124 = vmatprep.subr.bf16.mxu1 %v15362_v23  ;;  %12165 = vmatprep.subr.bf16.mxu0 %v15365_v58  ;;  %v15429_v23 = vld [vmem:[#allocation24 + $0x160] ss:$28 sps:$4 sm:$0xff]  }
 0x9c2   :  { %v15434_v58 = vld [vmem:[#allocation24 + $0xba4] ss:$28 sps:$4 sm:$0xff]  }
 0x9c4   :  { %12125 = vmatpush1.bf16.msra.mxu1 %v15360_v36  ;;  %12166 = vmatpush1.bf16.msra.mxu0 %v15363_v33  ;;  %v15437_v33 = vld [vmem:[#allocation24 + $0x12c] ss:$28 sps:$4 sm:$0xff]  }
 0x9c5   :  { %12126 = vmatprep.subr.bf16.mxu1 %v15368_v37  ;;  %12167 = vmatprep.subr.bf16.mxu0 %v15371_v14  ;;  %v15432_v14 = vld [vmem:[#allocation24 + $0xba0] ss:$28 sps:$4 sm:$0xff]  }
 0x9c8   :  { %12127 = vmatpush1.bf16.msra.mxu1 %v15366_v38  ;;  %12168 = vmatpush1.bf16.msra.mxu0 %v15369_v39  ;;  %v15435_v39 = vld [vmem:[#allocation24 + $0x128] ss:$28 sps:$4 sm:$0xff]  }
 0x9c9   :  { %12128 = vmatprep.subr.bf16.mxu1 %v15374_v5  ;;  %12169 = vmatprep.subr.bf16.mxu0 %v15377_v4  ;;  %v15440_v5 = vld [vmem:[#allocation24 + $0xb6c] ss:$28 sps:$4 sm:$0xff]   ;;  %v15443_v4 = vld [vmem:[#allocation24 + $0xf4] ss:$28 sps:$4 sm:$0xff]  }
 0x9cc   :  { %12129 = vmatpush2.bf16.msra.mxu1 %v15372_v21  ;;  %12170 = vmatpush2.bf16.msra.mxu0 %v15375_v47  ;;  %v15438_v21 = vld [vmem:[#allocation24 + $0xb68] ss:$28 sps:$4 sm:$0xff]   ;;  %v15441_v47 = vld [vmem:[#allocation24 + $0xf0] ss:$28 sps:$4 sm:$0xff]  }
 0x9cd   :  { %12130 = vmatprep.subr.bf16.mxu1 %v15380_v43  ;;  %12171 = vmatprep.subr.bf16.mxu0 %v15383_v49  ;;  %v15446_v43 = vld [vmem:[#allocation24 + $0xb34] ss:$28 sps:$4 sm:$0xff]   ;;  %v15449_v49 = vld [vmem:[#allocation24 + $0xbc] ss:$28 sps:$4 sm:$0xff]  }
 0x9d0   :  { %12131 = vmatpush2.bf16.msra.mxu1 %v15378_v51  ;;  %12172 = vmatpush2.bf16.msra.mxu0 %v15381_v50  ;;  %v15444_v51 = vld [vmem:[#allocation24 + $0xb30] ss:$28 sps:$4 sm:$0xff]   ;;  %v15447_v50 = vld [vmem:[#allocation24 + $0xb8] ss:$28 sps:$4 sm:$0xff]  }
 0x9d1   :  { %v11941_v25 = vpop.f32.mrf.mxu0  ;;  %12132 = vmatprep.subr.bf16.mxu1 %v15386_v46  ;;  %12173 = vmatprep.subr.bf16.mxu0 %v15389_v55  ;;  %v15452_v46 = vld [vmem:[#allocation24 + $0xafc] ss:$28 sps:$4 sm:$0xff]   ;;  %v15455_v55 = vld [vmem:[#allocation24 + $0x84] ss:$28 sps:$4 sm:$0xff]  }
 0x9d3   :  { %v16682_v24 = vpop.f32.mrf.mxu0 }
 0x9d4   :  { %12133 = vmatpush2.bf16.msra.mxu1 %v15384_v56  ;;  %12174 = vmatpush2.bf16.msra.mxu0 %v15387_v59  ;;  %v15450_v56 = vld [vmem:[#allocation24 + $0xaf8] ss:$28 sps:$4 sm:$0xff]   ;;  %v15453_v59 = vld [vmem:[#allocation24 + $0x80] ss:$28 sps:$4 sm:$0xff]  }
 0x9d5   :  { %v11945_v61 = vpop.f32.mrf.mxu0  ;;  %12134 = vmatprep.subr.bf16.mxu1 %v15392_v60  ;;  %12175 = vmatprep.subr.bf16.mxu0 %v15395_v48  ;;  %v15461_v60 = vld [vmem:[#allocation24 + $0x4c] ss:$28 sps:$4 sm:$0xff]   ;;  %v15456_v48 = vld [vmem:[#allocation24 + $0xac0] ss:$28 sps:$4 sm:$0xff]  }
 0x9d6   :  { %v15462_v61 = vld [vmem:[#allocation24 + $0xa88] ss:$28 sps:$4 sm:$0xff]  }
 0x9d7   :  { %v11946_v45 = vpop.f32.mrf.mxu0 }
 0x9d8   :  { %12135 = vmatpush2.bf16.msra.mxu1 %v15390_v16  ;;  %12176 = vmatpush2.bf16.msra.mxu0 %v15393_v63  ;;  %v15464_v16 = vld [vmem:[#allocation24 + $0xa8c] ss:$28 sps:$4 sm:$0xff]   ;;  %v15467_v63 = vld [vmem:[#allocation24 + $0x14] ss:$28 sps:$4 sm:$0xff]   ;;  %v15473_v45 = vld [vmem:[#allocation24 + $0x35c] ss:$28 sps:$4 sm:$0xff]  }
 0x9d9   :  { %12136 = vmatprep.subr.bf16.mxu1 %v15398_v62  ;;  %12177 = vmatprep.subr.bf16.mxu0 %v15401_v0  ;;  %v15465_v62 = vld [vmem:[#allocation24 + $0x10] ss:$28 sps:$4 sm:$0xff]  }
 0x9da   :  { %v15470_v0 = vld [vmem:[#allocation24 + $0xdd4] ss:$28 sps:$4 sm:$0xff]  }
 0x9dc   :  { %12137 = vmatpush2.bf16.msra.mxu1 %v15396_v18  ;;  %12178 = vmatpush2.bf16.msra.mxu0 %v15399_v1  ;;  %v15468_v18 = vld [vmem:[#allocation24 + $0xdd0] ss:$28 sps:$4 sm:$0xff]   ;;  %v15471_v1 = vld [vmem:[#allocation24 + $0x358] ss:$28 sps:$4 sm:$0xff]  }
 0x9dd   :  { %12138 = vmatprep.subr.bf16.mxu1 %v15404_v2  ;;  %12179 = vmatprep.subr.bf16.mxu0 %v15407_v41  ;;  %v15476_v2 = vld [vmem:[#allocation24 + $0xd9c] ss:$28 sps:$4 sm:$0xff]   ;;  %v15479_v41 = vld [vmem:[#allocation24 + $0x324] ss:$28 sps:$4 sm:$0xff]  }
 0x9e0   :  { %12139 = vmatpush2.bf16.msra.mxu1 %v15402_v31  ;;  %12180 = vmatpush2.bf16.msra.mxu0 %v15405_v27  ;;  %v15474_v31 = vld [vmem:[#allocation24 + $0xd98] ss:$28 sps:$4 sm:$0xff]   ;;  %v15477_v27 = vld [vmem:[#allocation24 + $0x320] ss:$28 sps:$4 sm:$0xff]  }
 0x9e1   :  { %12140 = vmatprep.subr.bf16.mxu1 %v15410_v8  ;;  %12181 = vmatprep.subr.bf16.mxu0 %v15413_v3  ;;  %v15482_v8 = vld [vmem:[#allocation24 + $0xd64] ss:$28 sps:$4 sm:$0xff]   ;;  %v15485_v3 = vld [vmem:[#allocation24 + $0x2ec] ss:$28 sps:$4 sm:$0xff]  }
 0x9e4   :  { %12141 = vmatpush2.bf16.msra.mxu1 %v15408_v9  ;;  %12182 = vmatpush2.bf16.msra.mxu0 %v15411_v30  ;;  %v15480_v9 = vld [vmem:[#allocation24 + $0xd60] ss:$28 sps:$4 sm:$0xff]   ;;  %v15483_v30 = vld [vmem:[#allocation24 + $0x2e8] ss:$28 sps:$4 sm:$0xff]  }
 0x9e5   :  { %12142 = vmatprep.subr.bf16.mxu1 %v15416_v17  ;;  %12183 = vmatprep.subr.bf16.mxu0 %v15419_v19  ;;  %v15488_v17 = vld [vmem:[#allocation24 + $0xd2c] ss:$28 sps:$4 sm:$0xff]   ;;  %v15491_v19 = vld [vmem:[#allocation24 + $0x2b4] ss:$28 sps:$4 sm:$0xff]  }
 0x9e8   :  { %12143 = vmatpush2.bf16.msra.mxu1 %v15414_v7  ;;  %12184 = vmatpush2.bf16.msra.mxu0 %v15417_v10  ;;  %v15486_v7 = vld [vmem:[#allocation24 + $0xd28] ss:$28 sps:$4 sm:$0xff]   ;;  %v15489_v10 = vld [vmem:[#allocation24 + $0x2b0] ss:$28 sps:$4 sm:$0xff]  }
 0x9e9   :  { %12194 = vmatprep.subr.bf16.mxu1 %v15422_v11  ;;  %12235 = vmatprep.subr.bf16.mxu0 %v15425_v42  ;;  %v15494_v11 = vld [vmem:[#allocation24 + $0xcf4] ss:$28 sps:$4 sm:$0xff]   ;;  %v15497_v42 = vld [vmem:[#allocation24 + $0x27c] ss:$28 sps:$4 sm:$0xff]  }
 0x9eb   :  { %12145 = vmatmul.mubr.bf16.vlgmr.msra.gmra.mxu1 %v16641_v53  ;;  %12186 = vmatmul.mubr.bf16.vlgmr.msra.gmra.mxu0 %v16662_v54  ;;  %v11982_v22 = vpop.f32.mrf.mxu1 }
 0x9ec   :  { %v16686_v57 = vadd.f32 %v11982_v22, %v11941_v25  ;;  %12195 = vmatpush1.bf16.msra.mxu1 %v15420_v12  ;;  %12226 = vmatprep.mubr.bf16.mxu1 %v16673_v44  ;;  %v15458_v25 = vld [vmem:[#allocation24 + $0xac4] ss:$28 sps:$4 sm:$0xff]   ;;  %v15492_v12 = vld [vmem:[#allocation24 + $0xcf0] ss:$28 sps:$4 sm:$0xff]   ;;  %v15498_v22 = vld [vmem:[#allocation24 + $0xcb8] ss:$28 sps:$4 sm:$0xff]  }
 0x9ed   :  { %12236 = vmatpush1.bf16.msra.mxu0 %v15423_v13  ;;  %12267 = vmatprep.mubr.bf16.mxu0 %v16624_v35  ;;  %v11984_v32 = vpop.f32.mrf.mxu1  ;;  %v15495_v13 = vld [vmem:[#allocation24 + $0x278] ss:$28 sps:$4 sm:$0xff]  }
 0x9ee   :  { %v16691_v36 = vadd.f32 %v11984_v32, %v16682_v24  ;;  %12196 = vmatprep.subr.bf16.mxu1 %v15428_v15  ;;  %12237 = vmatprep.subr.bf16.mxu0 %v15431_v20  ;;  %v15459_v24 = vld [vmem:[#allocation24 + $0x48] ss:$28 sps:$4 sm:$0xff]   ;;  %v15500_v15 = vld [vmem:[#allocation24 + $0xcbc] ss:$28 sps:$4 sm:$0xff]  }
 0x9ef   :  { %v11986_v37 = vpop.f32.mrf.mxu1  ;;  %v15503_v20 = vld [vmem:[#allocation24 + $0x244] ss:$28 sps:$4 sm:$0xff]  }
 0x9f0   :  { %12197 = vmatpush1.bf16.msra.mxu1 %v15426_v28  ;;  %v15501_v28 = vld [vmem:[#allocation24 + $0x240] ss:$28 sps:$4 sm:$0xff]   ;;  %v15512_v37 = vld [vmem:[#allocation24 + $0xc4c] ss:$28 sps:$4 sm:$0xff]  }
 0x9f1   :  { %12238 = vmatpush1.bf16.msra.mxu0 %v15429_v23  ;;  %v11987_v38 = vpop.f32.mrf.mxu1  ;;  %12198 = vmatprep.subr.bf16.mxu1 %v15434_v58  ;;  %v15506_v32 = vld [vmem:[#allocation24 + $0xc84] ss:$28 sps:$4 sm:$0xff]   ;;  %v15509_v23 = vld [vmem:[#allocation24 + $0x20c] ss:$28 sps:$4 sm:$0xff]  }
 0x9f2   :  { %12239 = vmatprep.subr.bf16.mxu0 %v15437_v33  ;;  %v15504_v58 = vld [vmem:[#allocation24 + $0xc80] ss:$28 sps:$4 sm:$0xff]   ;;  %v15507_v33 = vld [vmem:[#allocation24 + $0x208] ss:$28 sps:$4 sm:$0xff]  }
 0x9f3   :  { %v15510_v38 = vld [vmem:[#allocation24 + $0xc48] ss:$28 sps:$4 sm:$0xff]  }
 0x9f4   :  { %12199 = vmatpush1.bf16.msra.mxu1 %v15432_v14  ;;  %v15515_v14 = vld [vmem:[#allocation24 + $0x1d4] ss:$28 sps:$4 sm:$0xff]  }
 0x9f5   :  { %12240 = vmatpush1.bf16.msra.mxu0 %v15435_v39  ;;  %12200 = vmatprep.subr.bf16.mxu1 %v15440_v5  ;;  %v15513_v39 = vld [vmem:[#allocation24 + $0x1d0] ss:$28 sps:$4 sm:$0xff]   ;;  %v15518_v5 = vld [vmem:[#allocation24 + $0x51c] ss:$28 sps:$4 sm:$0xff]  }
 0x9f6   :  { %12241 = vmatprep.subr.bf16.mxu0 %v15443_v4  ;;  %v15521_v4 = vld [vmem:[#allocation24 + $0x89c] ss:$28 sps:$4 sm:$0xff]  }
 0x9f8   :  { %12201 = vmatpush1.bf16.msra.mxu1 %v15438_v21  ;;  %v15516_v21 = vld [vmem:[#allocation24 + $0x518] ss:$28 sps:$4 sm:$0xff]  }
 0x9f9   :  { %12242 = vmatpush1.bf16.msra.mxu0 %v15441_v47  ;;  %12202 = vmatprep.subr.bf16.mxu1 %v15446_v43  ;;  %v15519_v47 = vld [vmem:[#allocation24 + $0x898] ss:$28 sps:$4 sm:$0xff]   ;;  %v15524_v43 = vld [vmem:[#allocation24 + $0x4e4] ss:$28 sps:$4 sm:$0xff]  }
 0x9fa   :  { %12243 = vmatprep.subr.bf16.mxu0 %v15449_v49 }
 0x9fc   :  { %12203 = vmatpush1.bf16.msra.mxu1 %v15444_v51  ;;  %v15527_v51 = vld [vmem:[#allocation24 + $0x864] ss:$28 sps:$4 sm:$0xff]  }
 0x9fd   :  { %12244 = vmatpush1.bf16.msra.mxu0 %v15447_v50  ;;  %12204 = vmatprep.subr.bf16.mxu1 %v15452_v46  ;;  %v15522_v46 = vld [vmem:[#allocation24 + $0x4e0] ss:$28 sps:$4 sm:$0xff]  }
 0x9fe   :  { %12245 = vmatprep.subr.bf16.mxu0 %v15455_v55 }
 0xa00   :  { %12205 = vmatpush1.bf16.msra.mxu1 %v15450_v56  ;;  %v15525_v56 = vld [vmem:[#allocation24 + $0x860] ss:$28 sps:$4 sm:$0xff]  }
 0xa01   :  { %12246 = vmatpush1.bf16.msra.mxu0 %v15453_v59  ;;  %12206 = vmatprep.subr.bf16.mxu1 %v15458_v25  ;;  %v15530_v59 = vld [vmem:[#allocation24 + $0x4ac] ss:$28 sps:$4 sm:$0xff]  }
 0xa02   :  { %12247 = vmatprep.subr.bf16.mxu0 %v15461_v60  ;;  %v15533_v25 = vld [vmem:[#allocation24 + $0x82c] ss:$28 sps:$4 sm:$0xff]  }
 0xa04   :  { %12207 = vmatpush1.bf16.msra.mxu1 %v15456_v48  ;;  %v15528_v48 = vld [vmem:[#allocation24 + $0x4a8] ss:$28 sps:$4 sm:$0xff]  }
 0xa05   :  { %12248 = vmatpush1.bf16.msra.mxu0 %v15459_v24  ;;  %12208 = vmatprep.subr.bf16.mxu1 %v15464_v16  ;;  %v15531_v24 = vld [vmem:[#allocation24 + $0x828] ss:$28 sps:$4 sm:$0xff]   ;;  %v15536_v16 = vld [vmem:[#allocation24 + $0x474] ss:$28 sps:$4 sm:$0xff]  }
 0xa06   :  { %12249 = vmatprep.subr.bf16.mxu0 %v15467_v63  ;;  %v15539_v63 = vld [vmem:[#allocation24 + $0x7f4] ss:$28 sps:$4 sm:$0xff]  }
 0xa08   :  { %12209 = vmatpush1.bf16.msra.mxu1 %v15462_v61  ;;  %v15534_v61 = vld [vmem:[#allocation24 + $0x470] ss:$28 sps:$4 sm:$0xff]  }
 0xa09   :  { %12250 = vmatpush1.bf16.msra.mxu0 %v15465_v62  ;;  %12210 = vmatprep.subr.bf16.mxu1 %v15470_v0  ;;  %v15537_v62 = vld [vmem:[#allocation24 + $0x7f0] ss:$28 sps:$4 sm:$0xff]   ;;  %v15542_v0 = vld [vmem:[#allocation24 + $0x43c] ss:$28 sps:$4 sm:$0xff]  }
 0xa0a   :  { %12251 = vmatprep.subr.bf16.mxu0 %v15473_v45  ;;  %v15545_v45 = vld [vmem:[#allocation24 + $0x7bc] ss:$28 sps:$4 sm:$0xff]  }
 0xa0c   :  { %12211 = vmatpush2.bf16.msra.mxu1 %v15468_v18  ;;  %v15540_v18 = vld [vmem:[#allocation24 + $0x438] ss:$28 sps:$4 sm:$0xff]  }
 0xa0d   :  { %12252 = vmatpush2.bf16.msra.mxu0 %v15471_v1  ;;  %12212 = vmatprep.subr.bf16.mxu1 %v15476_v2  ;;  %v15543_v1 = vld [vmem:[#allocation24 + $0x7b8] ss:$28 sps:$4 sm:$0xff]   ;;  %v15548_v2 = vld [vmem:[#allocation24 + $0x404] ss:$28 sps:$4 sm:$0xff]  }
 0xa0e   :  { %12253 = vmatprep.subr.bf16.mxu0 %v15479_v41  ;;  %v15551_v41 = vld [vmem:[#allocation24 + $0x784] ss:$28 sps:$4 sm:$0xff]  }
 0xa10   :  { %12213 = vmatpush2.bf16.msra.mxu1 %v15474_v31  ;;  %v15546_v31 = vld [vmem:[#allocation24 + $0x400] ss:$28 sps:$4 sm:$0xff]  }
 0xa11   :  { %12254 = vmatpush2.bf16.msra.mxu0 %v15477_v27  ;;  %12214 = vmatprep.subr.bf16.mxu1 %v15482_v8  ;;  %v15549_v27 = vld [vmem:[#allocation24 + $0x780] ss:$28 sps:$4 sm:$0xff]   ;;  %v15554_v8 = vld [vmem:[#allocation24 + $0x3cc] ss:$28 sps:$4 sm:$0xff]  }
 0xa12   :  { %12255 = vmatprep.subr.bf16.mxu0 %v15485_v3  ;;  %v15557_v3 = vld [vmem:[#allocation24 + $0x74c] ss:$28 sps:$4 sm:$0xff]  }
 0xa14   :  { %12215 = vmatpush2.bf16.msra.mxu1 %v15480_v9  ;;  %v15552_v9 = vld [vmem:[#allocation24 + $0x3c8] ss:$28 sps:$4 sm:$0xff]  }
 0xa15   :  { %12256 = vmatpush2.bf16.msra.mxu0 %v15483_v30  ;;  %12216 = vmatprep.subr.bf16.mxu1 %v15488_v17  ;;  %v15555_v30 = vld [vmem:[#allocation24 + $0x748] ss:$28 sps:$4 sm:$0xff]   ;;  %v15560_v17 = vld [vmem:[#allocation24 + $0x394] ss:$28 sps:$4 sm:$0xff]  }
 0xa16   :  { %12257 = vmatprep.subr.bf16.mxu0 %v15491_v19  ;;  %v15563_v19 = vld [vmem:[#allocation24 + $0x714] ss:$28 sps:$4 sm:$0xff]  }
 0xa18   :  { %12217 = vmatpush2.bf16.msra.mxu1 %v15486_v7  ;;  %v15558_v7 = vld [vmem:[#allocation24 + $0x390] ss:$28 sps:$4 sm:$0xff]  }
 0xa19   :  { %12258 = vmatpush2.bf16.msra.mxu0 %v15489_v10  ;;  %12218 = vmatprep.subr.bf16.mxu1 %v15494_v11  ;;  %v15561_v10 = vld [vmem:[#allocation24 + $0x710] ss:$28 sps:$4 sm:$0xff]   ;;  %v15566_v11 = vld [vmem:[#allocation24 + $0x6dc] ss:$28 sps:$4 sm:$0xff]  }
 0xa1a   :  { %12259 = vmatprep.subr.bf16.mxu0 %v15497_v42  ;;  %v15569_v42 = vld [vmem:[#allocation24 + $0xa5c] ss:$28 sps:$4 sm:$0xff]  }
 0xa1c   :  { %12219 = vmatpush2.bf16.msra.mxu1 %v15492_v12  ;;  %v15564_v12 = vld [vmem:[#allocation24 + $0x6d8] ss:$28 sps:$4 sm:$0xff]  }
 0xa1d   :  { %12260 = vmatpush2.bf16.msra.mxu0 %v15495_v13  ;;  %12220 = vmatprep.subr.bf16.mxu1 %v15500_v15  ;;  %v15567_v13 = vld [vmem:[#allocation24 + $0xa58] ss:$28 sps:$4 sm:$0xff]   ;;  %v15572_v15 = vld [vmem:[#allocation24 + $0x6a4] ss:$28 sps:$4 sm:$0xff]  }
 0xa1e   :  { %12261 = vmatprep.subr.bf16.mxu0 %v15503_v20  ;;  %v15575_v20 = vld [vmem:[#allocation24 + $0xa24] ss:$28 sps:$4 sm:$0xff]  }
 0xa20   :  { %12221 = vmatpush2.bf16.msra.mxu1 %v15498_v22  ;;  %v15570_v22 = vld [vmem:[#allocation24 + $0x6a0] ss:$28 sps:$4 sm:$0xff]  }
 0xa21   :  { %12262 = vmatpush2.bf16.msra.mxu0 %v15501_v28  ;;  %12222 = vmatprep.subr.bf16.mxu1 %v15506_v32  ;;  %v15573_v28 = vld [vmem:[#allocation24 + $0xa20] ss:$28 sps:$4 sm:$0xff]   ;;  %v15578_v32 = vld [vmem:[#allocation24 + $0x66c] ss:$28 sps:$4 sm:$0xff]  }
 0xa22   :  { %12263 = vmatprep.subr.bf16.mxu0 %v15509_v23  ;;  %v15581_v23 = vld [vmem:[#allocation24 + $0x9ec] ss:$28 sps:$4 sm:$0xff]  }
 0xa24   :  { %12223 = vmatpush2.bf16.msra.mxu1 %v15504_v58  ;;  %v15576_v58 = vld [vmem:[#allocation24 + $0x668] ss:$28 sps:$4 sm:$0xff]  }
 0xa25   :  { %12264 = vmatpush2.bf16.msra.mxu0 %v15507_v33  ;;  %12224 = vmatprep.subr.bf16.mxu1 %v15512_v37  ;;  %v15579_v33 = vld [vmem:[#allocation24 + $0x9e8] ss:$28 sps:$4 sm:$0xff]   ;;  %v15584_v37 = vld [vmem:[#allocation24 + $0x634] ss:$28 sps:$4 sm:$0xff]  }
 0xa26   :  { %12265 = vmatprep.subr.bf16.mxu0 %v15515_v14  ;;  %v15587_v14 = vld [vmem:[#allocation24 + $0x9b4] ss:$28 sps:$4 sm:$0xff]  }
 0xa28   :  { %12225 = vmatpush2.bf16.msra.mxu1 %v15510_v38  ;;  %v15582_v38 = vld [vmem:[#allocation24 + $0x630] ss:$28 sps:$4 sm:$0xff]  }
 0xa29   :  { %12266 = vmatpush2.bf16.msra.mxu0 %v15513_v39  ;;  %12276 = vmatprep.subr.bf16.mxu1 %v15518_v5  ;;  %v15585_v39 = vld [vmem:[#allocation24 + $0x9b0] ss:$28 sps:$4 sm:$0xff]   ;;  %v15590_v5 = vld [vmem:[#allocation24 + $0x5fc] ss:$28 sps:$4 sm:$0xff]  }
 0xa2a   :  { %12317 = vmatprep.subr.bf16.mxu0 %v15521_v4  ;;  %v15593_v4 = vld [vmem:[#allocation24 + $0x97c] ss:$28 sps:$4 sm:$0xff]  }
 0xa2b   :  { %12227 = vmatmul.mubr.bf16.vlgmr.msra.gmra.mxu1 %v16675_v29  ;;  %v12023_v49 = vpop.f32.mrf.mxu0 }
 0xa2c   :  { %12268 = vmatmul.mubr.bf16.vlgmr.msra.gmra.mxu0 %v16634_v34  ;;  %v16696_v50 = vadd.f32 %v12023_v49, %v16686_v57  ;;  %12277 = vmatpush1.bf16.msra.mxu1 %v15516_v21  ;;  %v15588_v21 = vld [vmem:[#allocation24 + $0x5f8] ss:$28 sps:$4 sm:$0xff]   ;;  %v15599_v49 = vld [vmem:[#allocation24 + $0x944] ss:$28 sps:$4 sm:$0xff]  }
 0xa2d   :  { %12308 = vmatprep.mubr.bf16.mxu1 %v16639_v40  ;;  %12318 = vmatpush1.bf16.msra.mxu0 %v15519_v47  ;;  %v16699_v55 = vpop.f32.mrf.mxu0  ;;  %v15591_v47 = vld [vmem:[#allocation24 + $0x978] ss:$28 sps:$4 sm:$0xff]  }
 0xa2e   :  { %12349 = vmatprep.mubr.bf16.mxu0 %v16660_v6  ;;  %12278 = vmatprep.subr.bf16.mxu1 %v15524_v43  ;;  %v15596_v43 = vld [vmem:[#allocation24 + $0x5c4] ss:$28 sps:$4 sm:$0xff]  }
 0xa2f   :  { %12319 = vmatprep.subr.bf16.mxu0 %v15527_v51  ;;  %v12027_v60 = vpop.f32.mrf.mxu0  ;;  %v16702_v51 = vld [vmem:[#allocation25] sm:$0x7f] }
 0xa30   :  { %12279 = vmatpush1.bf16.msra.mxu1 %v15522_v46  ;;  %v15594_v46 = vld [vmem:[#allocation24 + $0x5c0] ss:$28 sps:$4 sm:$0xff]   ;;  %v12574_v60 = vrot.slane %v16702_v51, %v16395_v26 }
 0xa31   :  { %12320 = vmatpush1.bf16.msra.mxu0 %v15525_v56  ;;  %v12028_v57 = vpop.f32.mrf.mxu0  ;;  %12280 = vmatprep.subr.bf16.mxu1 %v15530_v59  ;;  %v15597_v56 = vld [vmem:[#allocation24 + $0x940] ss:$28 sps:$4 sm:$0xff]   ;;  %v15602_v59 = vld [vmem:[#allocation24 + $0x58c] ss:$28 sps:$4 sm:$0xff]  }
 0xa32   :  { %12321 = vmatprep.subr.bf16.mxu0 %v15533_v25  ;;  %v15605_v25 = vld [vmem:[#allocation24 + $0x90c] ss:$28 sps:$4 sm:$0xff]  }
 0xa33   :  { %v15603_v57 = vld [vmem:[#allocation24 + $0x908] ss:$28 sps:$4 sm:$0xff]  }
 0xa34   :  { %12281 = vmatpush1.bf16.msra.mxu1 %v15528_v48  ;;  %v15600_v48 = vld [vmem:[#allocation24 + $0x588] ss:$28 sps:$4 sm:$0xff]  }
 0xa35   :  { %12322 = vmatpush1.bf16.msra.mxu0 %v15531_v24  ;;  %12282 = vmatprep.subr.bf16.mxu1 %v15536_v16  ;;  %v15608_v24 = vld [vmem:[#allocation24 + $0x554] ss:$28 sps:$4 sm:$0xff]  }
 0xa36   :  { %12323 = vmatprep.subr.bf16.mxu0 %v15539_v63  ;;  %v15611_v16 = vld [vmem:[#allocation24 + $0x8d4] ss:$28 sps:$4 sm:$0xff]   ;;  %v12582_v63 = vcombine.high %v12574_v60, %v12574_v60 }
 0xa38   :  { %12283 = vmatpush1.bf16.msra.mxu1 %v15534_v61  ;;  %v15606_v61 = vld [vmem:[#allocation24 + $0x550] ss:$28 sps:$4 sm:$0xff]  }
 0xa39   :  { %12324 = vmatpush1.bf16.msra.mxu0 %v15537_v62  ;;  %12284 = vmatprep.subr.bf16.mxu1 %v15542_v0  ;;  %v16707_v62 = vrot.slane %v12574_v60, %v16395_v26  ;;  %v15609_v0 = vld [vmem:[#allocation24 + $0x8d0] ss:$28 sps:$4 sm:$0xff]   ;;  %v15641_v60 = vld [vmem:[#allocation24 + $0x88] ss:$28 sps:$4 sm:$0xff]  }
 0xa3a   :  { %12325 = vmatprep.subr.bf16.mxu0 %v15545_v45  ;;  %v15614_v45 = vld [vmem:[#allocation24 + $0xc1c] ss:$28 sps:$4 sm:$0xff]  }
 0xa3c   :  { %12285 = vmatpush1.bf16.msra.mxu1 %v15540_v18  ;;  %v15615_v18 = vld [vmem:[#allocation24 + $0x360] ss:$28 sps:$4 sm:$0xff]  }
 0xa3d   :  { %12326 = vmatpush1.bf16.msra.mxu0 %v15543_v1  ;;  %12286 = vmatprep.subr.bf16.mxu1 %v15548_v2  ;;  %v16710_v1 = vrot.slane %v12582_v63, %v16395_v26  ;;  %v15612_v2 = vld [vmem:[#allocation24 + $0xc18] ss:$28 sps:$4 sm:$0xff]  }
 0xa3e   :  { %12327 = vmatprep.subr.bf16.mxu0 %v15551_v41  ;;  %v12616_v41 = vpack.i.b16 %v16707_v62, %v16707_v62  ;;  %v15649_v63 = vld [vmem:[#allocation24 + $0xa94] ss:$28 sps:$4 sm:$0xff]  }
 0xa40   :  { %12287 = vmatpush1.bf16.msra.mxu1 %v15546_v31  ;;  %v15616_v31 = vld [vmem:[#allocation24 + $0x1a0] ss:$28 sps:$4 sm:$0xff]  }
 0xa41   :  { %12328 = vmatpush1.bf16.msra.mxu0 %v15549_v27  ;;  %12288 = vmatprep.subr.bf16.mxu1 %v15554_v8  ;;  %v12623_v27 = vpack.i.b16 %v16710_v1, %v16710_v1  ;;  %v15619_v8 = vld [vmem:[#allocation24 + $0xbe4] ss:$28 sps:$4 sm:$0xff]  }
 0xa42   :  { %12329 = vmatprep.subr.bf16.mxu0 %v15557_v3 }
 0xa44   :  { %12289 = vmatpush1.bf16.msra.mxu1 %v15552_v9 }
 0xa45   :  { %12330 = vmatpush1.bf16.msra.mxu0 %v15555_v30  ;;  %12290 = vmatprep.subr.bf16.mxu1 %v15560_v17  ;;  %v15620_v30 = vld [vmem:[#allocation24 + $0x328] ss:$28 sps:$4 sm:$0xff]   ;;  %v12026_v17 = vadd.f32 %v16699_v55, %v16691_v36  ;;  %v12628_v55 = vrot.slane %v12623_v27, %v16405_v52  ;;  %v15654_v27 = vld [vmem:[#allocation24 + $0xddc] ss:$28 sps:$4 sm:$0xff]  }
 0xa46   :  { %12331 = vmatprep.subr.bf16.mxu0 %v15563_v19 }
 0xa48   :  { %12291 = vmatpush1.bf16.msra.mxu1 %v15558_v7  ;;  %v12621_v7 = vrot.slane %v12616_v41, %v16405_v52 }
 0xa49   :  { %12332 = vmatpush1.bf16.msra.mxu0 %v15561_v10  ;;  %12292 = vmatprep.subr.bf16.mxu1 %v15566_v11  ;;  %v15617_v10 = vld [vmem:[#allocation24 + $0xbe0] ss:$28 sps:$4 sm:$0xff]  }
 0xa4a   :  { %12333 = vmatprep.subr.bf16.mxu0 %v15569_v42 }
 0xa4c   :  { %12293 = vmatpush2.bf16.msra.mxu1 %v15564_v12  ;;  %v15621_v12 = vld [vmem:[#allocation24 + $0x168] ss:$28 sps:$4 sm:$0xff]  }
 0xa4d   :  { %12334 = vmatpush2.bf16.msra.mxu0 %v15567_v13  ;;  %12294 = vmatprep.subr.bf16.mxu1 %v15572_v15  ;;  %v15624_v13 = vld [vmem:[#allocation24 + $0xbac] ss:$28 sps:$4 sm:$0xff]  }
 0xa4e   :  { %12335 = vmatprep.subr.bf16.mxu0 %v15575_v20 }
 0xa50   :  { %12295 = vmatpush2.bf16.msra.mxu1 %v15570_v22 }
 0xa51   :  { %12336 = vmatpush2.bf16.msra.mxu0 %v15573_v28  ;;  %12296 = vmatprep.subr.bf16.mxu1 %v15578_v32 }
 0xa52   :  { %12337 = vmatprep.subr.bf16.mxu0 %v15581_v23  ;;  %v15622_v23 = vld [vmem:[#allocation24 + $0xba8] ss:$28 sps:$4 sm:$0xff]  }
 0xa54   :  { %12297 = vmatpush2.bf16.msra.mxu1 %v15576_v58 }
 0xa55   :  { %12338 = vmatpush2.bf16.msra.mxu0 %v15579_v33  ;;  %12298 = vmatprep.subr.bf16.mxu1 %v15584_v37  ;;  %v15626_v37 = vld [vmem:[#allocation24 + $0x130] ss:$28 sps:$4 sm:$0xff]  }
 0xa56   :  { %12339 = vmatprep.subr.bf16.mxu0 %v15587_v14  ;;  %v15629_v14 = vld [vmem:[#allocation24 + $0xb74] ss:$28 sps:$4 sm:$0xff]  }
 0xa58   :  { %12299 = vmatpush2.bf16.msra.mxu1 %v15582_v38 }
 0xa59   :  { %12340 = vmatpush2.bf16.msra.mxu0 %v15585_v39  ;;  %12300 = vmatprep.subr.bf16.mxu1 %v15590_v5  ;;  %v15630_v39 = vld [vmem:[#allocation24 + $0x2b8] ss:$28 sps:$4 sm:$0xff]  }
 0xa5a   :  { %12341 = vmatprep.subr.bf16.mxu0 %v15593_v4  ;;  %v15627_v4 = vld [vmem:[#allocation24 + $0xb70] ss:$28 sps:$4 sm:$0xff]  }
 0xa5c   :  { %12301 = vmatpush2.bf16.msra.mxu1 %v15588_v21  ;;  %v15631_v21 = vld [vmem:[#allocation24 + $0xf8] ss:$28 sps:$4 sm:$0xff]  }
 0xa5d   :  { %12342 = vmatpush2.bf16.msra.mxu0 %v15591_v47  ;;  %12302 = vmatprep.subr.bf16.mxu1 %v15596_v43  ;;  %v15634_v47 = vld [vmem:[#allocation24 + $0xb3c] ss:$28 sps:$4 sm:$0xff]  }
 0xa5e   :  { %12343 = vmatprep.subr.bf16.mxu0 %v15599_v49  ;;  %v15635_v43 = vld [vmem:[#allocation24 + $0x280] ss:$28 sps:$4 sm:$0xff]   ;;  %v15632_v49 = vld [vmem:[#allocation24 + $0xb38] ss:$28 sps:$4 sm:$0xff]  }
 0xa60   :  { %12303 = vmatpush2.bf16.msra.mxu1 %v15594_v46  ;;  %v15636_v46 = vld [vmem:[#allocation24 + $0xc0] ss:$28 sps:$4 sm:$0xff]  }
 0xa61   :  { %12344 = vmatpush2.bf16.msra.mxu0 %v15597_v56  ;;  %12304 = vmatprep.subr.bf16.mxu1 %v15602_v59  ;;  %v15639_v56 = vld [vmem:[#allocation24 + $0xb04] ss:$28 sps:$4 sm:$0xff]  }
 0xa62   :  { %12345 = vmatprep.subr.bf16.mxu0 %v15605_v25  ;;  %v15640_v59 = vld [vmem:[#allocation24 + $0x248] ss:$28 sps:$4 sm:$0xff]   ;;  %v15637_v25 = vld [vmem:[#allocation24 + $0xb00] ss:$28 sps:$4 sm:$0xff]  }
 0xa64   :  { %12305 = vmatpush2.bf16.msra.mxu1 %v15600_v48  ;;  %v15644_v48 = vld [vmem:[#allocation24 + $0xacc] ss:$28 sps:$4 sm:$0xff]  }
 0xa65   :  { %12346 = vmatpush2.bf16.msra.mxu0 %v15603_v57  ;;  %12306 = vmatprep.subr.bf16.mxu1 %v15608_v24  ;;  %v15645_v57 = vld [vmem:[#allocation24 + $0x210] ss:$28 sps:$4 sm:$0xff]   ;;  %v15642_v24 = vld [vmem:[#allocation24 + $0xac8] ss:$28 sps:$4 sm:$0xff]  }
 0xa66   :  { %12347 = vmatprep.subr.bf16.mxu0 %v15611_v16  ;;  %v15646_v16 = vld [vmem:[#allocation24 + $0x50] ss:$28 sps:$4 sm:$0xff]  }
 0xa68   :  { %12307 = vmatpush2.bf16.msra.mxu1 %v15606_v61 }
 0xa69   :  { %12348 = vmatpush2.bf16.msra.mxu0 %v15609_v0  ;;  %12358 = vmatprep.subr.bf16.mxu1 %v15614_v45  ;;  %v15650_v0 = vld [vmem:[#allocation24 + $0x1d8] ss:$28 sps:$4 sm:$0xff]  }
 0xa6a   :  { %14343 = vmatprep.subr.bf16.mxu0 %v15615_v18 }
 0xa6b   :  { %v16716_v3 = vpop.f32.mrf.mxu0  ;;  %12309 = vmatmul.mubr.bf16.vlgmr.msra.gmra.mxu1 %v16641_v53  ;;  %v12064_v9 = vpop.f32.mrf.mxu1 }
 0xa6c   :  { %12350 = vmatmul.mubr.bf16.vlgmr.msra.gmra.mxu0 %v16662_v54  ;;  %v12065_v19 = vadd.f32 %v12064_v9, %v16696_v50  ;;  %12359 = vmatpush1.bf16.msra.mxu1 %v15612_v2  ;;  %v15625_v50 = vld [vmem:[#allocation24 + $0x2f0] ss:$28 sps:$4 sm:$0xff]  }
 0xa6d   :  { %12390 = vmatprep.mubr.bf16.mxu1 %v16673_v44  ;;  %14344 = vmatpush3.bf16.msra.mxu0 %v15616_v31  ;;  %v16725_v11 = vpop.f32.mrf.mxu0  ;;  %v12066_v42 = vpop.f32.mrf.mxu1  ;;  %v15647_v2 = vld [vmem:[#allocation24 + $0xa90] ss:$28 sps:$4 sm:$0xff]   ;;  %v15651_v31 = vld [vmem:[#allocation24 + $0x18] ss:$28 sps:$4 sm:$0xff]  }
 0xa6e   :  { %v12559_v15 = vpack.c.bf16 %v12065_v19, %v12065_v19  ;;  %12431 = vmatprep.mubr.bf16.mxu0 %v16624_v35  ;;  %v12067_v36 = vadd.f32 %v12066_v42, %v12026_v17  ;;  %12360 = vmatprep.subr.bf16.mxu1 %v15619_v8  ;;  %v15655_v8 = vld [vmem:[#allocation24 + $0xa60] ss:$28 sps:$4 sm:$0xff]   ;;  %v15652_v17 = vld [vmem:[#allocation24 + $0xdd8] ss:$28 sps:$4 sm:$0xff]   ;;  %v15660_v42 = vld [vmem:[#allocation24 + $0xa28] ss:$28 sps:$4 sm:$0xff]  }
 0xa6f   :  { %v12109_v20 = vpop.f32.mrf.mxu0  ;;  %14345 = vmatprep.subr.bf16.mxu0 %v15620_v30  ;;  %v12068_v22 = vpop.f32.mrf.mxu1 }
 0xa70   :  { %v12664_v28 = vadd.bf16 %v12621_v7, %v12559_v15  ;;  %v12560_v32 = vpack.c.bf16 %v12067_v36, %v12067_v36  ;;  %12361 = vmatpush1.bf16.msra.mxu1 %v15617_v10  ;;  %v15656_v7 = vld [vmem:[#allocation24 + $0x8a0] ss:$28 sps:$4 sm:$0xff]   ;;  %v15664_v15 = vld [vmem:[#allocation24 + $0xd6c] ss:$28 sps:$4 sm:$0xff]   ;;  %v15669_v20 = vld [vmem:[#allocation24 + $0xd34] ss:$28 sps:$4 sm:$0xff]  }
 0xa71   :  { %14346 = vmatpush3.bf16.msra.mxu0 %v15621_v12  ;;  %v12110_v58 = vpop.f32.mrf.mxu0  ;;  %v12069_v33 = vpop.f32.mrf.mxu1  ;;  %12362 = vmatprep.subr.bf16.mxu1 %v15624_v13  ;;  %v15659_v10 = vld [vmem:[#allocation24 + $0xda4] ss:$28 sps:$4 sm:$0xff]   ;;  %v15665_v36 = vld [vmem:[#allocation24 + $0x9f0] ss:$28 sps:$4 sm:$0xff]   ;;  %v15670_v22 = vld [vmem:[#allocation24 + $0x9b8] ss:$28 sps:$4 sm:$0xff]  }
 0xa72   :  { %v12671_v38 = vmul.bf16 1056980736, %v12664_v28  ;;  %v12665_v35 = vadd.bf16 %v12628_v55, %v12560_v32  ;;  %14347 = vmatprep.subr.bf16.mxu0 %v15625_v50  ;;  %v15657_v12 = vld [vmem:[#allocation24 + $0xda0] ss:$28 sps:$4 sm:$0xff]   ;;  %v15661_v13 = vld [vmem:[#allocation24 + $0x868] ss:$28 sps:$4 sm:$0xff]  }
 0xa73   :  { %v15662_v55 = vld [vmem:[#allocation24 + $0xd68] ss:$28 sps:$4 sm:$0xff]   ;;  %v15666_v50 = vld [vmem:[#allocation24 + $0x830] ss:$28 sps:$4 sm:$0xff]   ;;  %v15671_v28 = vld [vmem:[#allocation24 + $0x7f8] ss:$28 sps:$4 sm:$0xff]  }
 0xa74   :  { %15781 = vtanh.bf16 %v12671_v38  ;;  %v12672_v5 = vmul.bf16 1056980736, %v12665_v35  ;;  %12363 = vmatpush1.bf16.msra.mxu1 %v15622_v23  ;;  %v15674_v32 = vld [vmem:[#allocation24 + $0xcfc] ss:$28 sps:$4 sm:$0xff]   ;;  %v15679_v33 = vld [vmem:[#allocation24 + $0xcc4] ss:$28 sps:$4 sm:$0xff]  }
 0xa75   :  { %14348 = vmatpush3.bf16.msra.mxu0 %v15626_v37  ;;  %12364 = vmatprep.subr.bf16.mxu1 %v15629_v14  ;;  %v15672_v23 = vld [vmem:[#allocation24 + $0xcf8] ss:$28 sps:$4 sm:$0xff]   ;;  %v15676_v58 = vld [vmem:[#allocation24 + $0x7c0] ss:$28 sps:$4 sm:$0xff]   ;;  %v15680_v37 = vld [vmem:[#allocation24 + $0x948] ss:$28 sps:$4 sm:$0xff]  }
 0xa76   :  { %15783 = vtanh.bf16 %v12672_v5  ;;  %14349 = vmatprep.subr.bf16.mxu0 %v15630_v39  ;;  %v15677_v14 = vld [vmem:[#allocation24 + $0xcc0] ss:$28 sps:$4 sm:$0xff]   ;;  %v15681_v38 = vld [vmem:[#allocation24 + $0x788] ss:$28 sps:$4 sm:$0xff]   ;;  %v15685_v39 = vld [vmem:[#allocation24 + $0x910] ss:$28 sps:$4 sm:$0xff]  }
 0xa77   :  { %v15684_v35 = vld [vmem:[#allocation24 + $0xc8c] ss:$28 sps:$4 sm:$0xff]  }
 0xa78   :  { %12365 = vmatpush1.bf16.msra.mxu1 %v15627_v4  ;;  %v15682_v5 = vld [vmem:[#allocation24 + $0xc88] ss:$28 sps:$4 sm:$0xff]   ;;  %v15686_v4 = vld [vmem:[#allocation24 + $0x750] ss:$28 sps:$4 sm:$0xff]  }
 0xa79   :  { %14350 = vmatpush3.bf16.msra.mxu0 %v15631_v21  ;;  %12366 = vmatprep.subr.bf16.mxu1 %v15634_v47  ;;  %v15689_v21 = vld [vmem:[#allocation24 + $0xc54] ss:$28 sps:$4 sm:$0xff]  }
 0xa7a   :  { %14351 = vmatprep.subr.bf16.mxu0 %v15635_v43  ;;  %v15690_v47 = vld [vmem:[#allocation24 + $0x8d8] ss:$28 sps:$4 sm:$0xff]   ;;  %v15687_v43 = vld [vmem:[#allocation24 + $0xc50] ss:$28 sps:$4 sm:$0xff]  }
 0xa7c   :  { %12367 = vmatpush1.bf16.msra.mxu1 %v15632_v49  ;;  %v15691_v49 = vld [vmem:[#allocation24 + $0x718] ss:$28 sps:$4 sm:$0xff]  }
 0xa7d   :  { %14352 = vmatpush3.bf16.msra.mxu0 %v15636_v46  ;;  %12368 = vmatprep.subr.bf16.mxu1 %v15639_v56  ;;  %v15692_v46 = vld [vmem:[#allocation24 + $0x6e0] ss:$28 sps:$4 sm:$0xff]  }
 0xa7e   :  { %14353 = vmatprep.subr.bf16.mxu0 %v15640_v59  ;;  %v15693_v56 = vld [vmem:[#allocation24 + $0x520] ss:$28 sps:$4 sm:$0xff]   ;;  %v15694_v59 = vld [vmem:[#allocation24 + $0x6a8] ss:$28 sps:$4 sm:$0xff]  }
 0xa80   :  { %12369 = vmatpush1.bf16.msra.mxu1 %v15637_v25 }
 0xa81   :  { %14354 = vmatpush3.bf16.msra.mxu0 %v15641_v60  ;;  %12370 = vmatprep.subr.bf16.mxu1 %v15644_v48 }
 0xa82   :  { %v15782_v61 = vpop.eup %15781  ;;  %14355 = vmatprep.subr.bf16.mxu0 %v15645_v57  ;;  %v15695_v57 = vld [vmem:[#allocation24 + $0x4e8] ss:$28 sps:$4 sm:$0xff]  }
 0xa83   :  { %v12685_v45 = vadd.bf16 1065369472, %v15782_v61 }
 0xa84   :  { %v15784_v18 = vpop.eup %15783  ;;  %12371 = vmatpush1.bf16.msra.mxu1 %v15642_v24 }
 0xa85   :  { %v12686_v41 = vadd.bf16 1065369472, %v15784_v18  ;;  %14356 = vmatpush3.bf16.msra.mxu0 %v15646_v16  ;;  %12372 = vmatprep.subr.bf16.mxu1 %v15649_v63  ;;  %v12692_v9 = vmul.bf16 1056980736, %v12685_v45  ;;  %v15696_v63 = vld [vmem:[#allocation24 + $0x670] ss:$28 sps:$4 sm:$0xff]  }
 0xa86   :  { %14357 = vmatprep.subr.bf16.mxu0 %v15650_v0  ;;  %v15697_v18 = vld [vmem:[#allocation24 + $0x4b0] ss:$28 sps:$4 sm:$0xff]  }
 0xa87   :  { %v12693_v30 = vmul.bf16 1056980736, %v12686_v41  ;;  %v15699_v41 = vld [vmem:[#allocation24 + $0x478] ss:$28 sps:$4 sm:$0xff]  }
 0xa88   :  { %12373 = vmatpush1.bf16.msra.mxu1 %v15647_v2 }
 0xa89   :  { %v14317_v19 = vcombine.low %v12692_v9, %v12693_v30  ;;  %14358 = vmatpush3.bf16.msra.mxu0 %v15651_v31  ;;  %12374 = vmatprep.subr.bf16.mxu1 %v15654_v27  ;;  %v15701_v31 = vld [vmem:[#allocation24 + $0x440] ss:$28 sps:$4 sm:$0xff]   ;;  %v15702_v27 = vld [vmem:[#allocation24 + $0x5c8] ss:$28 sps:$4 sm:$0xff]   ;;  %v15704_v9 = vld [vmem:[#allocation24 + $0x590] ss:$28 sps:$4 sm:$0xff]  }
 0xa8a   :  { %14387 = vmatprep.subr.bf16.mxu0 %v15655_v8  ;;  %v15703_v8 = vld [vmem:[#allocation24 + $0x408] ss:$28 sps:$4 sm:$0xff]   ;;  %v15705_v30 = vld [vmem:[#allocation24 + $0x3d0] ss:$28 sps:$4 sm:$0xff]  }
 0xa8b   :  { %12721 = vst [vmem:[%s16791_s17] sm:$0xff] %v14317_v19  ;;  %v15707_v19 = vld [vmem:[#allocation24 + $0x398] ss:$28 sps:$4 sm:$0xff]  }
 0xa8c   :  { %12432 = vmatmul.mubr.bf16.vlgmr.msra.gmra.mxu0 %v16634_v34  ;;  %12375 = vmatpush2.bf16.msra.mxu1 %v15652_v17  ;;  %v15667_v34 = vld [vmem:[#allocation24 + $0xd30] ss:$28 sps:$4 sm:$0xff]   ;;  %v15706_v17 = vld [vmem:[#allocation24 + $0x558] ss:$28 sps:$4 sm:$0xff]  }
 0xa8d   :  { %14388 = vmatpush3.bf16.msra.mxu0 %v15656_v7  ;;  %12511 = vmatprep.mubr.bf16.mxu0 %v16660_v6  ;;  %v15675_v6 = vld [vmem:[#allocation24 + $0x980] ss:$28 sps:$4 sm:$0xff]  }
 0xa8e   :  { %12376 = vmatprep.subr.bf16.mxu1 %v15659_v10  ;;  %14389 = vmatprep.subr.bf16.mxu0 %v15660_v42  ;;  %v15708_v7 = vld [vmem:[#allocation24 + $0xde0] ss:$28 sps:$4 sm:$0xff]   ;;  %v15710_v42 = vld [vmem:[#allocation24 + $0xda8] ss:$28 sps:$4 sm:$0xff]  }
 0xa8f   :  { %v15709_v10 = vld [vmem:[#allocation24 + $0xc20] ss:$28 sps:$4 sm:$0xff]  }
 0xa90   :  { %12377 = vmatpush2.bf16.msra.mxu1 %v15657_v12  ;;  %v15711_v12 = vld [vmem:[#allocation24 + $0xbe8] ss:$28 sps:$4 sm:$0xff]  }
 0xa91   :  { %14390 = vmatpush3.bf16.msra.mxu0 %v15661_v13  ;;  %12378 = vmatprep.subr.bf16.mxu1 %v15664_v15  ;;  %v15712_v13 = vld [vmem:[#allocation24 + $0xd70] ss:$28 sps:$4 sm:$0xff]  }
 0xa92   :  { %14391 = vmatprep.subr.bf16.mxu0 %v15665_v36  ;;  %v15713_v15 = vld [vmem:[#allocation24 + $0xbb0] ss:$28 sps:$4 sm:$0xff]   ;;  %v15714_v36 = vld [vmem:[#allocation24 + $0xd38] ss:$28 sps:$4 sm:$0xff]  }
 0xa94   :  { %12379 = vmatpush2.bf16.msra.mxu1 %v15662_v55  ;;  %v15715_v55 = vld [vmem:[#allocation24 + $0xb78] ss:$28 sps:$4 sm:$0xff]  }
 0xa95   :  { %14392 = vmatpush3.bf16.msra.mxu0 %v15666_v50  ;;  %12380 = vmatprep.subr.bf16.mxu1 %v15669_v20  ;;  %v15716_v50 = vld [vmem:[#allocation24 + $0xd00] ss:$28 sps:$4 sm:$0xff]  }
 0xa96   :  { %14393 = vmatprep.subr.bf16.mxu0 %v15670_v22  ;;  %v15717_v20 = vld [vmem:[#allocation24 + $0xb40] ss:$28 sps:$4 sm:$0xff]   ;;  %v15718_v22 = vld [vmem:[#allocation24 + $0xcc8] ss:$28 sps:$4 sm:$0xff]  }
 0xa98   :  { %12381 = vmatpush2.bf16.msra.mxu1 %v15667_v34  ;;  %v15720_v34 = vld [vmem:[#allocation24 + $0xc90] ss:$28 sps:$4 sm:$0xff]  }
 0xa99   :  { %14394 = vmatpush3.bf16.msra.mxu0 %v15671_v28  ;;  %12382 = vmatprep.subr.bf16.mxu1 %v15674_v32  ;;  %v15722_v28 = vld [vmem:[#allocation24 + $0xc58] ss:$28 sps:$4 sm:$0xff]  }
 0xa9a   :  { %14395 = vmatprep.subr.bf16.mxu0 %v15675_v6  ;;  %v15723_v32 = vld [vmem:[#allocation24 + $0xa98] ss:$28 sps:$4 sm:$0xff]   ;;  %v12612_v6 = vcombine.high %v16707_v62, %v16707_v62 }
 0xa9c   :  { %12383 = vmatpush2.bf16.msra.mxu1 %v15672_v23  ;;  %v12614_v23 = vcombine.high %v16710_v1, %v16710_v1 }
 0xa9d   :  { %14396 = vmatpush3.bf16.msra.mxu0 %v15676_v58  ;;  %12384 = vmatprep.subr.bf16.mxu1 %v15679_v33  ;;  %v12630_v33 = vpack.i.b16 %v12612_v6, %v12612_v6 }
 0xa9e   :  { %14397 = vmatprep.subr.bf16.mxu0 %v15680_v37  ;;  %v12637_v37 = vpack.i.b16 %v12614_v23, %v12614_v23 }
 0xaa0   :  { %12385 = vmatpush2.bf16.msra.mxu1 %v15677_v14  ;;  %v12642_v1 = vrot.slane %v12637_v37, %v16405_v52 }
 0xaa1   :  { %14398 = vmatpush3.bf16.msra.mxu0 %v15681_v38  ;;  %12386 = vmatprep.subr.bf16.mxu1 %v15684_v35 }
 0xaa2   :  { %14399 = vmatprep.subr.bf16.mxu0 %v15685_v39  ;;  %v12635_v39 = vrot.slane %v12630_v33, %v16405_v52 }
 0xaa4   :  { %12387 = vmatpush2.bf16.msra.mxu1 %v15682_v5 }
 0xaa5   :  { %14400 = vmatpush3.bf16.msra.mxu0 %v15686_v4  ;;  %12388 = vmatprep.subr.bf16.mxu1 %v15689_v21 }
 0xaa6   :  { %14401 = vmatprep.subr.bf16.mxu0 %v15690_v47 }
 0xaa8   :  { %12389 = vmatpush2.bf16.msra.mxu1 %v15687_v43 }
 0xaa9   :  { %14402 = vmatpush3.bf16.msra.mxu0 %v15691_v49  ;;  %14365 = vmatprep.subr.bf16.mxu1 %v15692_v46 }
 0xaab   :  { %v12146_v25 = vpop.f32.mrf.mxu1  ;;  %v12187_v60 = vpop.f32.mrf.mxu0  ;;  %12391 = vmatmul.mubr.bf16.vlgmr.msra.gmra.mxu1 %v16675_v29 }
 0xaac   :  { %v12147_v48 = vadd.f32 %v12146_v25, %v16716_v3  ;;  %12512 = vmatmul.mubr.bf16.vlgmr.msra.gmra.mxu0 %v16662_v54  ;;  %14366 = vmatpush3.bf16.msra.mxu1 %v15693_v56  ;;  %v15698_v54 = vld [vmem:[#allocation24 + $0x638] ss:$28 sps:$4 sm:$0xff]  }
 0xaad   :  { %12471 = vmatprep.mubr.bf16.mxu1 %v16639_v40  ;;  %v16738_v24 = vpop.f32.mrf.mxu1  ;;  %v16740_v16 = vpop.f32.mrf.mxu0  ;;  %14367 = vmatprep.subr.bf16.mxu1 %v15694_v59  ;;  %v15700_v40 = vld [vmem:[#allocation24 + $0x600] ss:$28 sps:$4 sm:$0xff]  }
 0xaae   :  { %v16742_v61 = vadd.f32 %v12187_v60, %v12147_v48  ;;  %v12149_v58 = vadd.f32 %v16738_v24, %v16725_v11 }
 0xaaf   :  { %v12150_v0 = vpop.f32.mrf.mxu1  ;;  %v12191_v45 = vpop.f32.mrf.mxu0 }
 0xab0   :  { %14368 = vmatpush3.bf16.msra.mxu1 %v15695_v57  ;;  %v12190_v38 = vadd.f32 %v16740_v16, %v12149_v58 }
 0xab1   :  { %v12151_v2 = vpop.f32.mrf.mxu1  ;;  %v12192_v3 = vpop.f32.mrf.mxu0  ;;  %14369 = vmatprep.subr.bf16.mxu1 %v15696_v63 }
 0xab4   :  { %14370 = vmatpush3.bf16.msra.mxu1 %v15697_v18 }
 0xab5   :  { %14371 = vmatprep.subr.bf16.mxu1 %v15698_v54 }
 0xab8   :  { %14372 = vmatpush3.bf16.msra.mxu1 %v15699_v41 }
 0xab9   :  { %14373 = vmatprep.subr.bf16.mxu1 %v15700_v40 }
 0xabc   :  { %14374 = vmatpush3.bf16.msra.mxu1 %v15701_v31 }
 0xabd   :  { %14375 = vmatprep.subr.bf16.mxu1 %v15702_v27 }
 0xac0   :  { %14376 = vmatpush3.bf16.msra.mxu1 %v15703_v8 }
 0xac1   :  { %14377 = vmatprep.subr.bf16.mxu1 %v15704_v9 }
 0xac4   :  { %14378 = vmatpush3.bf16.msra.mxu1 %v15705_v30 }
 0xac5   :  { %14379 = vmatprep.subr.bf16.mxu1 %v15706_v17 }
 0xac8   :  { %14380 = vmatpush3.bf16.msra.mxu1 %v15707_v19  ;;  %v12567_v19 = vcombine.high %v16702_v51, %v16702_v51 }
 0xac9   :  { %14409 = vmatprep.subr.bf16.mxu1 %v15708_v7 }
 0xaca   :  { %v12581_v7 = vrot.slane %v12567_v19, %v16395_v26 }
 0xacb   :  { %12472 = vmatmul.mubr.bf16.vlgmr.msra.gmra.mxu1 %v16641_v53  ;;  %v15719_v53 = vld [vmem:[#allocation24 + $0xb08] ss:$28 sps:$4 sm:$0xff]  }
 0xacc   :  { %14410 = vmatpush3.bf16.msra.mxu1 %v15709_v10  ;;  %12551 = vmatprep.mubr.bf16.mxu1 %v16673_v44  ;;  %v15721_v44 = vld [vmem:[#allocation24 + $0xad0] ss:$28 sps:$4 sm:$0xff]   ;;  %v12583_v10 = vcombine.high %v12581_v7, %v12581_v7 }
 0xacd   :  { %14411 = vmatprep.subr.bf16.mxu1 %v15710_v42  ;;  %v12597_v42 = vrot.slane %v12581_v7, %v16395_v26 }
 0xad0   :  { %14412 = vmatpush3.bf16.msra.mxu1 %v15711_v12 }
 0xad1   :  { %14413 = vmatprep.subr.bf16.mxu1 %v15712_v13  ;;  %v12611_v13 = vrot.slane %v12583_v10, %v16395_v26 }
 0xad4   :  { %14414 = vmatpush3.bf16.msra.mxu1 %v15713_v15 }
 0xad5   :  { %14415 = vmatprep.subr.bf16.mxu1 %v15714_v36  ;;  %v12644_v36 = vpack.i.b16 %v12597_v42, %v12597_v42 }
 0xad8   :  { %14416 = vmatpush3.bf16.msra.mxu1 %v15715_v55 }
 0xad9   :  { %14417 = vmatprep.subr.bf16.mxu1 %v15716_v50  ;;  %v12651_v50 = vpack.i.b16 %v12611_v13, %v12611_v13 }
 0xadb   :  { %v12656_v6 = vrot.slane %v12651_v50, %v16405_v52 }
 0xadc   :  { %14418 = vmatpush3.bf16.msra.mxu1 %v15717_v20 }
 0xadd   :  { %14419 = vmatprep.subr.bf16.mxu1 %v15718_v22 }
 0xae0   :  { %14420 = vmatpush3.bf16.msra.mxu1 %v15719_v53 }
 0xae1   :  { %14421 = vmatprep.subr.bf16.mxu1 %v15720_v34  ;;  %v12649_v34 = vrot.slane %v12644_v36, %v16405_v52 }
 0xae4   :  { %14422 = vmatpush3.bf16.msra.mxu1 %v15721_v44 }
 0xae5   :  { %14423 = vmatprep.subr.bf16.mxu1 %v15722_v28 }
 0xae8   :  { %14424 = vmatpush3.bf16.msra.mxu1 %v15723_v32 }
 0xaeb   :  { %v12228_v14 = vpop.f32.mrf.mxu1  ;;  %12552 = vmatmul.mubr.bf16.vlgmr.msra.gmra.mxu1 %v16675_v29 }
 0xaec   :  { %v12229_v35 = vadd.f32 %v12228_v14, %v16742_v61  ;;  %v12269_v62 = vpop.f32.mrf.mxu0 }
 0xaed   :  { %v12230_v5 = vpop.f32.mrf.mxu1 }
 0xaee   :  { %v12561_v4 = vpack.c.bf16 %v12229_v35, %v12229_v35  ;;  %v12231_v21 = vadd.f32 %v12230_v5, %v12190_v38  ;;  %v12271_v47 = vpop.f32.mrf.mxu0 }
 0xaef   :  { %v12232_v11 = vpop.f32.mrf.mxu1 }
 0xaf0   :  { %v12666_v43 = vadd.bf16 %v12635_v39, %v12561_v4  ;;  %v12562_v49 = vpack.c.bf16 %v12231_v21, %v12231_v21  ;;  %v12273_v46 = vpop.f32.mrf.mxu0 }
 0xaf1   :  { %v12233_v56 = vpop.f32.mrf.mxu1 }
 0xaf2   :  { %v12673_v59 = vmul.bf16 1056980736, %v12666_v43  ;;  %v12667_v29 = vadd.bf16 %v12642_v1, %v12562_v49  ;;  %v12274_v25 = vpop.f32.mrf.mxu0 }
 0xaf3   :  { %v12613_v25 = vcombine.high %v12597_v42, %v12597_v42 }
 0xaf4   :  { %15785 = vtanh.bf16 %v12673_v59  ;;  %v12674_v60 = vmul.bf16 1056980736, %v12667_v29 }
 0xaf6   :  { %15787 = vtanh.bf16 %v12674_v60 }
 0xb02   :  { %v15786_v48 = vpop.eup %15785 }
 0xb03   :  { %v12687_v57 = vadd.bf16 1065369472, %v15786_v48 }
 0xb04   :  { %v15788_v24 = vpop.eup %15787 }
 0xb05   :  { %v12688_v16 = vadd.bf16 1065369472, %v15788_v24  ;;  %v12694_v63 = vmul.bf16 1056980736, %v12687_v57  ;;  %v12658_v24 = vpack.i.b16 %v12613_v25, %v12613_v25 }
 0xb07   :  { %v12695_v61 = vmul.bf16 1056980736, %v12688_v16 }
 0xb09   :  { %v14318_v0 = vcombine.low %v12694_v63, %v12695_v61 }
 0xb0b   :  { %12722 = vst [vmem:[%s16791_s17 + $0x8] sm:$0xff] %v14318_v0 }
 0xb2b   :  { %v12310_v45 = vpop.f32.mrf.mxu1 }
 0xb2c   :  { %v12351_v18 = vpop.f32.mrf.mxu0  ;;  %v12311_v12 = vadd.f32 %v12310_v45, %v12269_v62 }
 0xb2d   :  { %v12312_v2 = vpop.f32.mrf.mxu1 }
 0xb2e   :  { %v12353_v3 = vpop.f32.mrf.mxu0  ;;  %v12313_v15 = vadd.f32 %v12312_v2, %v12271_v47  ;;  %v12352_v55 = vadd.f32 %v12351_v18, %v12311_v12  ;;  %v12663_v18 = vrot.slane %v12658_v24, %v16405_v52 }
 0xb2f   :  { %v12314_v54 = vpop.f32.mrf.mxu1 }
 0xb30   :  { %v12355_v41 = vpop.f32.mrf.mxu0  ;;  %v12354_v22 = vadd.f32 %v12353_v3, %v12313_v15 }
 0xb31   :  { %v12315_v40 = vpop.f32.mrf.mxu1 }
 0xb32   :  { %v12356_v31 = vpop.f32.mrf.mxu0 }
 0xb4c   :  { %v14359_v27 = vpop.f32.mrf.mxu0 }
 0xb4e   :  { %v14360_v8 = vpop.f32.mrf.mxu0 }
 0xb4f   :  { %v14361_v9 = vadd.f32 %v14360_v8, %v14359_v27 }
 0xb50   :  { %v14362_v30 = vpop.f32.mrf.mxu0 }
 0xb52   :  { %v14363_v17 = vpop.f32.mrf.mxu0 }
 0xb6b   :  { %v12392_v20 = vpop.f32.mrf.mxu1 }
 0xb6c   :  { %v12393_v53 = vadd.f32 %v12392_v20, %v12352_v55  ;;  %v14403_v44 = vpop.f32.mrf.mxu0 }
 0xb6d   :  { %v12394_v28 = vpop.f32.mrf.mxu1 }
 0xb6e   :  { %v12563_v51 = vpack.c.bf16 %v12393_v53, %v12393_v53  ;;  %v12395_v32 = vadd.f32 %v12394_v28, %v12354_v22  ;;  %v14404_v23 = vpop.f32.mrf.mxu0 }
 0xb6f   :  { %v12396_v58 = vpop.f32.mrf.mxu1  ;;  %v14405_v57 = vadd.f32 %v14404_v23, %v14403_v44 }
 0xb70   :  { %v12668_v33 = vadd.bf16 %v12649_v34, %v12563_v51  ;;  %v12564_v37 = vpack.c.bf16 %v12395_v32, %v12395_v32  ;;  %v14406_v26 = vpop.f32.mrf.mxu0 }
 0xb71   :  { %v12397_v14 = vpop.f32.mrf.mxu1 }
 0xb72   :  { %v12675_v38 = vmul.bf16 1056980736, %v12668_v33  ;;  %v12669_v35 = vadd.bf16 %v12656_v6, %v12564_v37  ;;  %v14407_v39 = vpop.f32.mrf.mxu0 }
 0xb74   :  { %15789 = vtanh.bf16 %v12675_v38  ;;  %v12676_v62 = vmul.bf16 1056980736, %v12669_v35 }
 0xb76   :  { %15791 = vtanh.bf16 %v12676_v62 }
 0xb82   :  { %v15790_v5 = vpop.eup %15789 }
 0xb83   :  { %v12689_v4 = vadd.bf16 1065369472, %v15790_v5 }
 0xb84   :  { %v15792_v21 = vpop.eup %15791 }
 0xb85   :  { %v12690_v1 = vadd.bf16 1065369472, %v15792_v21  ;;  %v12696_v47 = vmul.bf16 1056980736, %v12689_v4 }
 0xb87   :  { %v12697_v11 = vmul.bf16 1056980736, %v12690_v1 }
 0xb89   :  { %v14319_v43 = vcombine.low %v12696_v47, %v12697_v11 }
 0xb8b   :  { %12723 = vst [vmem:[%s16791_s17 + $0x10] sm:$0xff] %v14319_v43  ;;  %v14381_v49 = vpop.f32.mrf.mxu1 }
 0xb8d   :  { %v14382_v46 = vpop.f32.mrf.mxu1 }
 0xb8e   :  { %v14383_v29 = vadd.f32 %v14382_v46, %v14381_v49 }
 0xb8f   :  { %v14384_v56 = vpop.f32.mrf.mxu1 }
 0xb90   :  { %v12474_v60 = vadd.f32 %v14383_v29, %v14361_v9 }
 0xb91   :  { %v14385_v59 = vpop.f32.mrf.mxu1 }
 0xb92   :  { %v12514_v63 = vadd.f32 %v14405_v57, %v12474_v60 }
 0xbab   :  { %v14425_v48 = vpop.f32.mrf.mxu1 }
 0xbad   :  { %v14426_v16 = vpop.f32.mrf.mxu1 }
 0xbae   :  { %v14427_v61 = vadd.f32 %v14426_v16, %v14425_v48 }
 0xbaf   :  { %v14428_v0 = vpop.f32.mrf.mxu1 }
 0xbb0   :  { %v12554_v45 = vadd.f32 %v14427_v61, %v12514_v63 }
 0xbb1   :  { %v14429_v2 = vpop.f32.mrf.mxu1 }
 0xbb2   :  { %v12565_v3 = vpack.c.bf16 %v12554_v45, %v12554_v45 }
 0xbb4   :  { %v12670_v54 = vadd.bf16 %v12663_v18, %v12565_v3 }
 0xbb6   :  { %v12677_v41 = vmul.bf16 1056980736, %v12670_v54 }
 0xbb8   :  { %15793 = vtanh.bf16 %v12677_v41 }
 0xbc6   :  { %v15794_v40 = vpop.eup %15793 }
 0xbc7   :  { %v12691_v31 = vadd.bf16 1065369472, %v15794_v40 }
 0xbc9   :  { %v12698_v27 = vmul.bf16 1056980736, %v12691_v31 }
 0xbcb   :  { %v14320_v8 = vcombine.low %v12698_v27, %v12698_v27 }
 0xbcd   :  { %12724 = vst [vmem:[%s16791_s17 + $0x18] sm:$0xf] %v14320_v8 }
 0xbce   :  { %12729 = vsyncpa [#allocation3], 1 }
 0xbcf   :  { %12730 = vsyncpa [#allocation5], 1 }
 0xbd0   :  { %12731 = vsyncpa [#allocation8], 1 }
 0xbd1   :  { %12732 = vsyncpa [#allocation11], 1 }
 0xbd2   :  { %12733 = vsyncpa [#allocation14], 1 }
 0xbd3   :  { %12734 = vsyncpa [#allocation17], 1 }
 0xbd4   :  { %12735 = vsyncpa [#allocation20], 1 }
 0xbd5   :  { %12736 = vsyncpa [#allocation23], 1 }
 0xbd6   :  { %12737 = vsyncpa [#allocation26], 1 }

</bundles_post_ra>
